<compile_context>
chip_gen: v5e
topology: v5e:2x2
jax: 0.10.0
libtpu: 0.0.40
codegen_flags: <defaults>
</compile_context>

<pallas_src>
import functools

import jax
import jax.numpy as jnp
from jax import lax
from jax.experimental import pallas as pl
from jax.experimental.pallas import tpu as pltpu

_NEG = -1e30   # bias for padded class lanes -> exp() == 0 -> no effect on the LSE
_LANE = 128


def _round_up(x, m):
    return (x + m - 1) // m * m


# ------------------------------ Pallas kernel ------------------------------- #

def _fused_convnet_kernel(x_ref, m_ref, cb_ref, w1_ref, b1_ref, w2_ref, b2_ref,
                          out_ref, *, n_off, cpad):
    # x_ref : (Bt, Kpad)           flattened images, zero-padded K dim (bf16/f32)
    # m_ref : (Kpad, n_off*cpad)   structured conv matrix (offsets x filters x positions)
    # cb_ref: (1, cpad)            conv bias broadcast over pooled positions (f32)
    # w1_ref: (cpad, Hpad)         fc1 weight, zero-padded
    # b1_ref: (1, Hpad)            fc1 bias, zero-padded (f32)
    # w2_ref: (Hpad, Opad)         fc2 weight, zero-padded
    # b2_ref: (1, Opad)            fc2 bias, padded classes = -1e30 (f32)
    # out_ref: (Bt, Opad)          log-probs; lanes [0, 10) are the real classes

    # Conv for all pooling offsets / filters / positions in ONE MXU call (f32 acc).
    acc = jnp.dot(x_ref[...], m_ref[...], preferred_element_type=jnp.float32)

    # 2x2 max-pool == max over the n_off lane-aligned offset blocks (VPU only).
    pooled = acc[:, 0:cpad]
    for o in range(1, n_off):
        pooled = jnp.maximum(pooled, acc[:, o * cpad:(o + 1) * cpad])
    # Conv bias is offset-invariant so it commutes with the max; ReLU after.
    pooled = jnp.maximum(pooled + cb_ref[...], 0.0)

    # fc1 + ReLU (hidden padded to 128 lanes).
    h = jnp.dot(pooled.astype(w1_ref.dtype), w1_ref[...],
                preferred_element_type=jnp.float32) + b1_ref[...]
    h = jnp.maximum(h, 0.0)

    # fc2 + numerically stable log-softmax over the padded class axis.
    logits = jnp.dot(h.astype(w2_ref.dtype), w2_ref[...],
                     preferred_element_type=jnp.float32) + b2_ref[...]
    z = logits - jnp.max(logits, axis=-1, keepdims=True)
    lse = jnp.log(jnp.sum(jnp.exp(z), axis=-1, keepdims=True))
    out_ref[...] = (z - lse).astype(out_ref.dtype)


# ---------------- one-time parameter preprocessing (hoisted) ----------------- #

def _build_conv_matrix(conv_w, img_w, pool_w, cpad, kpad, dtype):
    """Fold conv + the 4 pooling-offset subsamplings into one (kpad, 4*cpad) matrix.

    Column o*cpad + f*P*P + p*P + q holds w[f, i, j] at row (2p+a+i)*img_w + (2q+c+j)
    (o = 2a + c).  Column ordering inside each block equals PyTorch's Flatten of
    (F, P, P), so fc1's weight needs no permutation, only transpose + zero pad.
    Rows are zero-padded img_w^2 -> kpad to lane-align the matmul K dimension.
    """
    F = conv_w.shape[0]
    K = conv_w.shape[-1]
    P = pool_w
    w = conv_w[:, 0].astype(jnp.float32)                     # (F, K, K)
    r = jnp.arange(img_w)[:, None, None]
    p = jnp.arange(P)[None, :, None]
    t = jnp.arange(K)[None, None, :]
    blocks = []
    for a in (0, 1):
        for c in (0, 1):
            R = (r == 2 * p + a + t).astype(jnp.float32)     # (img_w, P, K) row selector
            C = (r == 2 * p + c + t).astype(jnp.float32)     # (img_w, P, K) col selector
            Mo = jnp.einsum('rpi,cqj,fij->rcfpq', R, C, w)   # (img_w, img_w, F, P, P)
            Mo = Mo.reshape(img_w * img_w, F * P * P)
            blocks.append(jnp.pad(Mo, ((0, 0), (0, cpad - F * P * P))))
    m = jnp.concatenate(blocks, axis=1)                      # (img_w^2, 4*cpad)
    m = jnp.pad(m, ((0, kpad - img_w * img_w), (0, 0)))      # K-dim lane alignment
    return m.astype(dtype)


def prepare_params(params, *, num_filters, kernel_size, linear_width, img_w=28,
                   compute_dtype=jnp.bfloat16):
    """Batch-independent preprocessing. Call ONCE; pass the result to the forward.

    bf16 operands (default) are the intended fast path on v5e/v6e/v7x; f32 is a
    debug/parity mode. Biases stay f32 either way.
    """
    conv_w, conv_b, fc1_w, fc1_b, fc2_w, fc2_b = params
    K, F, H = kernel_size, num_filters, linear_width
    CO = img_w - (K - 1)
    P = CO // 2                        # floor, matches nn.MaxPool2d(2)
    feat = F * P * P

    cpad = _round_up(feat, _LANE)      # pooled-feature lanes (676 -> 768)
    hpad = _round_up(H, _LANE)         # hidden lanes (32 -> 128)
    opad = _round_up(10, _LANE)        # class lanes (10 -> 128)
    kpad = _round_up(img_w * img_w, _LANE)   # contraction dim (784 -> 896)

    m_big = _build_conv_matrix(conv_w, img_w, P, cpad, kpad, compute_dtype)
    cb = jnp.pad(jnp.repeat(conv_b.astype(jnp.float32), P * P),
                 (0, cpad - feat)).reshape(1, cpad)
    w1p = jnp.pad(fc1_w.T.astype(jnp.float32),
                  ((0, cpad - feat), (0, hpad - H))).astype(compute_dtype)
    b1p = jnp.pad(fc1_b.astype(jnp.float32), (0, hpad - H)).reshape(1, hpad)
    w2p = jnp.pad(fc2_w.T.astype(jnp.float32),
                  ((0, hpad - H), (0, opad - 10))).astype(compute_dtype)
    b2p = jnp.pad(fc2_b.astype(jnp.float32), (0, opad - 10),
                  constant_values=_NEG).reshape(1, opad)
    return (m_big, cb, w1p, b1p, w2p, b2p)


# --------------------------------- forward ----------------------------------- #

def _resident_spec(block_shape, index_map):
    # Constant index_map -> fetched once; single VMEM buffer (no double-buffering).
    try:
        return pl.BlockSpec(block_shape, index_map, pipeline_mode=pl.Buffered(1))
    except (TypeError, AttributeError):   # older jax without pipeline_mode
        return pl.BlockSpec(block_shape, index_map)


def mnist_convnet_forward(x, prepared, *, batch_tile=256):
    m_big, cb, w1p, b1p, w2p, b2p = prepared
    compute_dtype = m_big.dtype
    itemsize = jnp.dtype(compute_dtype).itemsize

    B = x.shape[0]
    img_w = x.shape[-1]
    kdim = img_w * img_w
    kpad, ncol = m_big.shape
    cpad = cb.shape[1]
    hpad = b1p.shape[1]
    opad = b2p.shape[1]
    n_off = ncol // cpad

    # Sublane pack of the operand dtype: 8 for f32, 16 for bf16.
    sub = 8 * (4 // itemsize)
    bpad_min = _round_up(B, sub)
    bt = _round_up(min(batch_tile, bpad_min), sub)
    # v7x megacore: keep >= 2 grid steps when the batch allows it so the
    # "parallel" axis actually shards across both TensorCores.
    if bpad_min // bt < 2 and bpad_min >= 2 * sub:
        bt = _round_up((bpad_min + 1) // 2, sub)
    bpad = _round_up(B, bt)

    # Batch side: raw flattened image, K dim zero-padded to the lane-aligned kpad.
    xf = x.reshape(B, kdim).astype(compute_dtype)
    xf = jnp.pad(xf, ((0, bpad - B), (0, kpad - kdim)))

    kernel = functools.partial(_fused_convnet_kernel, n_off=n_off, cpad=cpad)

    flops = 2 * bpad * (kpad * ncol + cpad * hpad + hpad * opad)
    bytes_accessed = (xf.size * itemsize
                      + (m_big.size + w1p.size + w2p.size) * itemsize
                      + (cb.size + b1p.size + b2p.size) * 4
                      + bpad * opad * 4)

    # VMEM budget derived from the actual residents/tiles/intermediates with a 2x
    # margin, clamped to [16, 32] MiB (v7x per-TC VMEM is only 64 MiB).
    param_bytes = ((m_big.size + w1p.size + w2p.size) * itemsize
                   + (cb.size + b1p.size + b2p.size) * 4)
    tile_bytes = 2 * bt * kpad * itemsize + 2 * bt * opad * 4   # double-buffered x / out
    interm_bytes = bt * (ncol + cpad + hpad + opad) * 4         # f32 intermediates
    vmem_budget = 2 * (param_bytes + tile_bytes + interm_bytes)
    vmem_budget = min(max(vmem_budget, 16 * 1024 * 1024), 32 * 1024 * 1024)

    out = pl.pallas_call(
        kernel,
        out_shape=jax.ShapeDtypeStruct((bpad, opad), jnp.float32),
        grid=(bpad // bt,),
        in_specs=[
            pl.BlockSpec((bt, kpad), lambda b: (b, 0)),         # x tile (pipelined)
            _resident_spec((kpad, ncol), lambda b: (0, 0)),     # conv matrix (resident)
            _resident_spec((1, cpad), lambda b: (0, 0)),        # conv bias row
            _resident_spec((cpad, hpad), lambda b: (0, 0)),     # fc1 weight
            _resident_spec((1, hpad), lambda b: (0, 0)),        # fc1 bias
            _resident_spec((hpad, opad), lambda b: (0, 0)),     # fc2 weight
            _resident_spec((1, opad), lambda b: (0, 0)),        # fc2 bias
        ],
        out_specs=pl.BlockSpec((bt, opad), lambda b: (b, 0)),
        compiler_params=pltpu.CompilerParams(
            dimension_semantics=("parallel",),
            vmem_limit_bytes=vmem_budget),
        cost_estimate=pl.CostEstimate(flops=flops, transcendentals=bpad * opad,
                                      bytes_accessed=bytes_accessed),
    )(xf, m_big, cb, w1p, b1p, w2p, b2p)

    return out[:B, :10]


# ------------------------- params & pure-JAX reference ----------------------- #

def init_params(key, num_filters, kernel_size, linear_width):
    K, F = kernel_size, num_filters
    P = (28 - (K - 1)) // 2
    fc1_indim = F * P * P
    ks = jax.random.split(key, 6)

    def u(k, shape, fan_in):
        bound = 1.0 / jnp.sqrt(jnp.float32(fan_in))
        return jax.random.uniform(k, shape, jnp.float32, -bound, bound)

    conv_w = u(ks[0], (F, 1, K, K), K * K)
    conv_b = u(ks[1], (F,), K * K)
    fc1_w = u(ks[2], (linear_width, fc1_indim), fc1_indim)
    fc1_b = u(ks[3], (linear_width,), fc1_indim)
    fc2_w = u(ks[4], (10, linear_width), linear_width)
    fc2_b = u(ks[5], (10,), linear_width)
    return conv_w, conv_b, fc1_w, fc1_b, fc2_w, fc2_b


def reference_forward(x, params):
    conv_w, conv_b, fc1_w, fc1_b, fc2_w, fc2_b = params
    conv = lax.conv_general_dilated(x, conv_w, (1, 1), 'VALID',
                                    dimension_numbers=('NCHW', 'OIHW', 'NCHW'))
    conv = jnp.maximum(conv + conv_b[None, :, None, None], 0.0)
    pooled = lax.reduce_window(conv, -jnp.inf, lax.max,
                               (1, 1, 2, 2), (1, 1, 2, 2), 'VALID')
    flat = pooled.reshape(x.shape[0], -1)
    h = jnp.maximum(flat @ fc1_w.T + fc1_b, 0.0)
    logits = h @ fc2_w.T + fc2_b
    return jax.nn.log_softmax(logits, axis=1)


# ----------------------------------- main ----------------------------------- #

if __name__ == "__main__":
    num_filters, kernel_size, linear_width = 4, 3, 32
    B = 2  # MNIST spatial size (28x28) is baked into the module

    key = jax.random.PRNGKey(0)
    kx, kp = jax.random.split(key)
    x = jax.random.normal(kx, (B, 1, 28, 28), jnp.float32)
    params = init_params(kp, num_filters, kernel_size, linear_width)

    ref = reference_forward(x, params)
    fwd = jax.jit(mnist_convnet_forward)

    # Default fast path: bf16 MXU operands / f32 accumulation (prepared ONCE).
    prep_bf16 = prepare_params(params, num_filters=num_filters,
                               kernel_size=kernel_size, linear_width=linear_width,
                               compute_dtype=jnp.bfloat16)
    out = fwd(x, prep_bf16)
    jax.block_until_ready(out)
    assert out.shape == (B, 10)
    assert bool(jnp.allclose(out, ref, atol=5e-2, rtol=5e-2)), "bf16 mismatch vs reference"

    # f32 debug/parity path: strict 1e-4 parity with the PyTorch-semantics reference.
    prep_f32 = prepare_params(params, num_filters=num_filters,
                              kernel_size=kernel_size, linear_width=linear_width,
                              compute_dtype=jnp.float32)
    out_f32 = fwd(x, prep_f32)
    jax.block_until_ready(out_f32)
    assert out_f32.shape == (B, 10)
    assert bool(jnp.allclose(out_f32, ref, atol=1e-4, rtol=1e-4)), "f32 mismatch vs reference"

    print("KERNEL_OK")
</pallas_src>

<mosaic_0001>
module attributes {stable_mosaic.version = 11 : i64} {
  func.func @_fused_convnet_kernel(%arg0: i32, %arg1: memref<16x896xbf16, #tpu.memory_space<vmem>>, %arg2: memref<896x3072xbf16, #tpu.memory_space<vmem>>, %arg3: memref<1x768xf32, #tpu.memory_space<vmem>>, %arg4: memref<768x128xbf16, #tpu.memory_space<vmem>>, %arg5: memref<1x128xf32, #tpu.memory_space<vmem>>, %arg6: memref<128x128xbf16, #tpu.memory_space<vmem>>, %arg7: memref<1x128xf32, #tpu.memory_space<vmem>>, %arg8: memref<16x128xf32, #tpu.memory_space<vmem>>) attributes {dimension_semantics = [#tpu.dimension_semantics<parallel>], iteration_bounds = array<i64: 1>, scalar_prefetch = 0 : i64, scratch_operands = 0 : i64, tpu.core_type = #tpu.core_type<tc>, window_params = [{transform_indices = @transform_0, window_bounds = array<i64: 16, 896>}, {pipeline_mode = #tpu.pipeline_mode<synchronous>, transform_indices = @transform_1, window_bounds = array<i64: 896, 3072>}, {pipeline_mode = #tpu.pipeline_mode<synchronous>, transform_indices = @transform_2, window_bounds = array<i64: 1, 768>}, {pipeline_mode = #tpu.pipeline_mode<synchronous>, transform_indices = @transform_3, window_bounds = array<i64: 768, 128>}, {pipeline_mode = #tpu.pipeline_mode<synchronous>, transform_indices = @transform_4, window_bounds = array<i64: 1, 128>}, {pipeline_mode = #tpu.pipeline_mode<synchronous>, transform_indices = @transform_5, window_bounds = array<i64: 128, 128>}, {pipeline_mode = #tpu.pipeline_mode<synchronous>, transform_indices = @transform_6, window_bounds = array<i64: 1, 128>}, {transform_indices = @transform_7, window_bounds = array<i64: 16, 128>}]} {
    %c0 = arith.constant 0 : index
    %c0_0 = arith.constant 0 : index
    %0 = vector.load %arg1[%c0, %c0_0] : memref<16x896xbf16, #tpu.memory_space<vmem>>, vector<16x896xbf16>
    %c0_1 = arith.constant 0 : index
    %c0_2 = arith.constant 0 : index
    %1 = vector.load %arg2[%c0_1, %c0_2] : memref<896x3072xbf16, #tpu.memory_space<vmem>>, vector<896x3072xbf16>
    %cst = arith.constant dense<0.000000e+00> : vector<16x3072xf32>
    %2 = tpu.matmul %0, %1, %cst {dimension_numbers = #tpu.dot_dimension_numbers<[1], [0], [0], [1], [0, 0, 1, 1], [], []>} : vector<16x896xbf16>, vector<896x3072xbf16>, vector<16x3072xf32> -> vector<16x3072xf32>
    %3 = vector.extract_strided_slice %2 {offsets = [0, 0], sizes = [16, 768], strides = [1, 1]} : vector<16x3072xf32> to vector<16x768xf32>
    %4 = vector.extract_strided_slice %2 {offsets = [0, 768], sizes = [16, 768], strides = [1, 1]} : vector<16x3072xf32> to vector<16x768xf32>
    %5 = arith.maximumf %3, %4 : vector<16x768xf32>
    %6 = vector.extract_strided_slice %2 {offsets = [0, 1536], sizes = [16, 768], strides = [1, 1]} : vector<16x3072xf32> to vector<16x768xf32>
    %7 = arith.maximumf %5, %6 : vector<16x768xf32>
    %8 = vector.extract_strided_slice %2 {offsets = [0, 2304], sizes = [16, 768], strides = [1, 1]} : vector<16x3072xf32> to vector<16x768xf32>
    %9 = arith.maximumf %7, %8 : vector<16x768xf32>
    %c0_3 = arith.constant 0 : index
    %c0_4 = arith.constant 0 : index
    %10 = vector.load %arg3[%c0_3, %c0_4] : memref<1x768xf32, #tpu.memory_space<vmem>>, vector<1x768xf32>
    %11 = vector.broadcast %10 : vector<1x768xf32> to vector<16x768xf32>
    %12 = arith.addf %9, %11 : vector<16x768xf32>
    %cst_5 = arith.constant 0.000000e+00 : f32
    %13 = vector.broadcast %cst_5 : f32 to vector<16x768xf32>
    %14 = arith.maximumf %12, %13 : vector<16x768xf32>
    %15 = arith.truncf %14 : vector<16x768xf32> to vector<16x768xbf16>
    %c0_6 = arith.constant 0 : index
    %c0_7 = arith.constant 0 : index
    %16 = vector.load %arg4[%c0_6, %c0_7] : memref<768x128xbf16, #tpu.memory_space<vmem>>, vector<768x128xbf16>
    %cst_8 = arith.constant dense<0.000000e+00> : vector<16x128xf32>
    %17 = tpu.matmul %15, %16, %cst_8 {dimension_numbers = #tpu.dot_dimension_numbers<[1], [0], [0], [1], [0, 0, 1, 1], [], []>} : vector<16x768xbf16>, vector<768x128xbf16>, vector<16x128xf32> -> vector<16x128xf32>
    %c0_9 = arith.constant 0 : index
    %c0_10 = arith.constant 0 : index
    %18 = vector.load %arg5[%c0_9, %c0_10] : memref<1x128xf32, #tpu.memory_space<vmem>>, vector<1x128xf32>
    %19 = vector.broadcast %18 : vector<1x128xf32> to vector<16x128xf32>
    %20 = arith.addf %17, %19 : vector<16x128xf32>
    %cst_11 = arith.constant 0.000000e+00 : f32
    %21 = vector.broadcast %cst_11 : f32 to vector<16x128xf32>
    %22 = arith.maximumf %20, %21 : vector<16x128xf32>
    %23 = arith.truncf %22 : vector<16x128xf32> to vector<16x128xbf16>
    %c0_12 = arith.constant 0 : index
    %c0_13 = arith.constant 0 : index
    %24 = vector.load %arg6[%c0_12, %c0_13] : memref<128x128xbf16, #tpu.memory_space<vmem>>, vector<128x128xbf16>
    %cst_14 = arith.constant dense<0.000000e+00> : vector<16x128xf32>
    %25 = tpu.matmul %23, %24, %cst_14 {dimension_numbers = #tpu.dot_dimension_numbers<[1], [0], [0], [1], [0, 0, 1, 1], [], []>} : vector<16x128xbf16>, vector<128x128xbf16>, vector<16x128xf32> -> vector<16x128xf32>
    %c0_15 = arith.constant 0 : index
    %c0_16 = arith.constant 0 : index
    %26 = vector.load %arg7[%c0_15, %c0_16] : memref<1x128xf32, #tpu.memory_space<vmem>>, vector<1x128xf32>
    %27 = vector.broadcast %26 : vector<1x128xf32> to vector<16x128xf32>
    %28 = arith.addf %25, %27 : vector<16x128xf32>
    %cst_17 = arith.constant dense<0xFF800000> : vector<16xf32>
    %29 = vector.multi_reduction <maximumf>, %28, %cst_17 [1] : vector<16x128xf32> to vector<16xf32>
    %30 = vector.shape_cast %29 : vector<16xf32> to vector<16x1xf32>
    %31 = vector.broadcast %30 : vector<16x1xf32> to vector<16x128xf32>
    %32 = arith.subf %28, %31 : vector<16x128xf32>
    %33 = math.exp %32 : vector<16x128xf32>
    %cst_18 = arith.constant dense<0.000000e+00> : vector<16xf32>
    %34 = vector.multi_reduction <add>, %33, %cst_18 [1] : vector<16x128xf32> to vector<16xf32>
    %35 = vector.shape_cast %34 : vector<16xf32> to vector<16x1xf32>
    %36 = math.log %35 : vector<16x1xf32>
    %37 = vector.broadcast %36 : vector<16x1xf32> to vector<16x128xf32>
    %38 = arith.subf %32, %37 : vector<16x128xf32>
    %c0_19 = arith.constant 0 : index
    %c0_20 = arith.constant 0 : index
    %39 = vector.load %arg8[%c0_19, %c0_20] : memref<16x128xf32, #tpu.memory_space<vmem>>, vector<16x128xf32>
    tpu.vector_store %arg8[%c0_19, %c0_20], %38 {strides = array<i32>} : memref<16x128xf32, #tpu.memory_space<vmem>>, vector<16x128xf32>,
    return
  }
  func.func @transform_0(%arg0: i32) -> (i32, i32) {
    %c0_i32 = arith.constant 0 : i32
    %c0_i32_0 = arith.constant 0 : i32
    return %arg0, %c0_i32 : i32, i32
  }
  func.func @transform_1(%arg0: i32) -> (i32, i32) {
    %c0_i32 = arith.constant 0 : i32
    %c0_i32_0 = arith.constant 0 : i32
    %c0_i32_1 = arith.constant 0 : i32
    return %c0_i32, %c0_i32_0 : i32, i32
  }
  func.func @transform_2(%arg0: i32) -> (i32, i32) {
    %c0_i32 = arith.constant 0 : i32
    %c0_i32_0 = arith.constant 0 : i32
    %c0_i32_1 = arith.constant 0 : i32
    return %c0_i32, %c0_i32_0 : i32, i32
  }
  func.func @transform_3(%arg0: i32) -> (i32, i32) {
    %c0_i32 = arith.constant 0 : i32
    %c0_i32_0 = arith.constant 0 : i32
    %c0_i32_1 = arith.constant 0 : i32
    return %c0_i32, %c0_i32_0 : i32, i32
  }
  func.func @transform_4(%arg0: i32) -> (i32, i32) {
    %c0_i32 = arith.constant 0 : i32
    %c0_i32_0 = arith.constant 0 : i32
    %c0_i32_1 = arith.constant 0 : i32
    return %c0_i32, %c0_i32_0 : i32, i32
  }
  func.func @transform_5(%arg0: i32) -> (i32, i32) {
    %c0_i32 = arith.constant 0 : i32
    %c0_i32_0 = arith.constant 0 : i32
    %c0_i32_1 = arith.constant 0 : i32
    return %c0_i32, %c0_i32_0 : i32, i32
  }
  func.func @transform_6(%arg0: i32) -> (i32, i32) {
    %c0_i32 = arith.constant 0 : i32
    %c0_i32_0 = arith.constant 0 : i32
    %c0_i32_1 = arith.constant 0 : i32
    return %c0_i32, %c0_i32_0 : i32, i32
  }
  func.func @transform_7(%arg0: i32) -> (i32, i32) {
    %c0_i32 = arith.constant 0 : i32
    %c0_i32_0 = arith.constant 0 : i32
    return %arg0, %c0_i32 : i32, i32
  }
}

</mosaic_0001>

<bundles_post_ra>
// kernel: mnist_convnet_forward.1
= control target key start
LH: loop header
LB: loop body
LE: loop exit
PB: predicated region body
PF: predicated region fallthrough
CT: control target
= control target key end

     0   :  { %12 = vsyncpa [#allocation3], 0  ;;  %s19378_s0 = inlined_call_operand.vmem [shape: bf16[16,896], index: 0, kind: input, shape index: {}]   ;;  %s19379_s1 = inlined_call_operand.hbm [shape: bf16[896,3072], index: 1, kind: input, shape index: {}]   ;;  %s19380_s2 = inlined_call_operand.hbm [shape: f32[1,768], index: 2, kind: input, shape index: {}]   ;;  %s19381_s3 = inlined_call_operand.hbm [shape: bf16[768,128], index: 3, kind: input, shape index: {}]   ;;  %s19382_s4 = inlined_call_operand.hbm [shape: f32[1,128], index: 4, kind: input, shape index: {}]   ;;  %s19383_s5 = inlined_call_operand.hbm [shape: bf16[128,128], index: 5, kind: input, shape index: {}]   ;;  %s19384_s6 = inlined_call_operand.hbm [shape: f32[1,128], index: 6, kind: input, shape index: {}]   ;;  %s19385_s7 = inlined_call_operand.vmem [shape: f32[16,128], index: 7, kind: output, shape index: {}]  }
   0x1   :  { %13 = vsyncpa [#allocation5], 0 }
   0x2   :  { %14 = vsyncpa [#allocation8], 0  ;;  %s36_s26 = sshll.u32 %s19380_s2, 4  ;;  %s37_s26 = int_to_ptr.hbm [resolvable:$true] %s36_s26 }
   0x3   :  { %15 = vsyncpa [#allocation11], 0  ;;  %s18448_s27 = smov [#allocation4]   ;;  %s60_s8 = sshll.u32 %s19382_s4, 4  ;;  %s61_s8 = int_to_ptr.hbm [resolvable:$true] %s60_s8 }
   0x4   :  { %s38_s28 = sshll.u32 %s18448_s27, 4  ;;  %s18449_s9 = smov [#allocation7]   ;;  %s39_s28 = int_to_ptr.vmem [resolvable:$true] %s38_s28 }
   0x5   :  { %41 = dma.hbm_to_vmem [thread:$0]  %s37_s26, 96, %s39_s28, [#allocation5]  }
   0x6   :  { %s62_s10 = sshll.u32 %s18449_s9, 4  ;;  %s22_s13 = sshll.u32 %s19379_s1, 4  ;;  %s63_s10 = int_to_ptr.vmem [resolvable:$true] %s62_s10  ;;  %s23_s13 = int_to_ptr.hbm [resolvable:$true] %s22_s13 }
   0x7   :  { %65 = dma.hbm_to_vmem [thread:$0]  %s61_s8, 16, %s63_s10, [#allocation8]  }
   0x8   :  { %s18450_s2 = smov [#allocation2]   ;;  %s46_s17 = sshll.u32 %s19381_s3, 4  ;;  %s47_s17 = int_to_ptr.hbm [resolvable:$true] %s46_s17 }
   0x9   :  { %s24_s14 = sshll.u32 %s18450_s2, 4  ;;  %s18451_s18 = smov 1536   ;;  %s25_s14 = int_to_ptr.vmem [resolvable:$true] %s24_s14 }
   0xa   :  { %s18452_s4 = smov 96   ;;  %s18453_s19 = smov [#allocation6]  }
   0xb   :  { %30 = dma.hbm_to_vmem [thread:$0]  %s23_s13, 172032, %s25_s14, [#allocation3], %s18451_s18, %s18451_s18, %s18452_s4  }
   0xc   :  { %s48_s20 = sshll.u32 %s18453_s19, 4  ;;  %s18454_s21 = smov 64   ;;  %s49_s20 = int_to_ptr.vmem [resolvable:$true] %s48_s20 }
   0xd   :  { %s18455_s22 = smov 4   ;;  %s70_s24 = sshll.u32 %s19383_s5, 4  ;;  %s71_s24 = int_to_ptr.hbm [resolvable:$true] %s70_s24 }
   0xe   :  { %54 = dma.hbm_to_vmem [thread:$0]  %s47_s17, 6144, %s49_s20, [#allocation5], %s18454_s21, %s18454_s21, %s18455_s22  }
   0xf   :  { %s18456_s25 = smov [#allocation9]   ;;  %s84_s28 = sshll.u32 %s19384_s6, 4  ;;  %s85_s28 = int_to_ptr.hbm [resolvable:$true] %s84_s28 }
  0x10   :  { %s72_s26 = sshll.u32 %s18456_s25, 4  ;;  %s18457_s29 = smov [#allocation10]   ;;  %s73_s26 = int_to_ptr.vmem [resolvable:$true] %s72_s26 }
  0x11   :  { %78 = dma.hbm_to_vmem [thread:$0]  %s71_s24, 1024, %s73_s26, [#allocation8], %s18454_s21, %s18454_s21, %s18455_s22  }
  0x12   :  { %s86_s30 = sshll.u32 %s18457_s29, 4  ;;  %s87_s30 = int_to_ptr.vmem [resolvable:$true] %s86_s30 }
  0x13   :  { %89 = dma.hbm_to_vmem [thread:$0]  %s85_s28, 16, %s87_s30, [#allocation11]  }
  0x14   :  { %18440 = dma.done.wait [#allocation3], 172032  }
  0x15   :  { %18441 = vsyncadd [#allocation3], 4294795264 }
  0x16   :  { %18442 = dma.done.wait [#allocation5], 6240  }
  0x17   :  { %18443 = vsyncadd [#allocation5], 4294961056 }
  0x18   :  { %18444 = dma.done.wait [#allocation8], 1040  }
  0x19   :  { %18445 = vsyncadd [#allocation8], 4294966256 }
  0x1a   :  { %18446 = dma.done.wait [#allocation11], 16  }
  0x1b   :  { %18447 = vsyncadd [#allocation11], 4294967280  ;;  %v11943_v0 = vld [vmem:[#allocation2 + $0x540] sm:$0xf] }
  0x1c   :  { %v17056_v1 = vld [vmem:[#allocation2 + $0x59c] sm:$0xf0] }
  0x1d   :  { %v12711_v2 = vld [vmem:[#allocation2 + $0xb40] sm:$0xf]  ;;  %v11944_v3 = vor.u32 %v17056_v1, %v11943_v0 }
  0x1e   :  { %v17248_v4 = vld [vmem:[#allocation2 + $0xb9c] sm:$0xf0] }
  0x1f   :  { %v13479_v5 = vld [vmem:[#allocation2 + $0x1140] sm:$0xf]  ;;  %v12712_v7 = vor.u32 %v17248_v4, %v12711_v2  ;;  %8222 = vmatpush.bf16.msra.mxu0 %v11944_v3 }
  0x20   :  { %v17440_v6 = vld [vmem:[#allocation2 + $0x119c] sm:$0xf0] }
  0x21   :  { %v13480_v8 = vor.u32 %v17440_v6, %v13479_v5  ;;  %v14247_v9 = vld [vmem:[#allocation2 + $0x1740] sm:$0xf]  ;;  %8236 = vmatpush.bf16.msra.mxu1 %v12712_v7 }
  0x22   :  { %v17632_v10 = vld [vmem:[#allocation2 + $0x179c] sm:$0xf0] }
  0x23   :  { %v11847_v11 = vld [vmem:[#allocation2 + $0x480] sm:$0xf]  ;;  %v14248_v12 = vor.u32 %v17632_v10, %v14247_v9  ;;  %8250 = vmatpush.bf16.msra.mxu2 %v13480_v8 }
  0x24   :  { %v17032_v13 = vld [vmem:[#allocation2 + $0x4dc] sm:$0xf0] }
  0x25   :  { %v12615_v14 = vld [vmem:[#allocation2 + $0xa80] sm:$0xf]  ;;  %v11848_v16 = vor.u32 %v17032_v13, %v11847_v11  ;;  %8264 = vmatpush.bf16.msra.mxu3 %v14248_v12 }
  0x26   :  { %v17224_v15 = vld [vmem:[#allocation2 + $0xadc] sm:$0xf0] }
  0x27   :  { %v12616_v17 = vor.u32 %v17224_v15, %v12615_v14  ;;  %v13383_v18 = vld [vmem:[#allocation2 + $0x1080] sm:$0xf]  ;;  %8223 = vmatpush.bf16.msra.mxu0 %v11848_v16 }
  0x28   :  { %v17416_v19 = vld [vmem:[#allocation2 + $0x10dc] sm:$0xf0] }
  0x29   :  { %v14151_v20 = vld [vmem:[#allocation2 + $0x1680] sm:$0xf]  ;;  %v13384_v21 = vor.u32 %v17416_v19, %v13383_v18  ;;  %8237 = vmatpush.bf16.msra.mxu1 %v12616_v17 }
  0x2a   :  { %v17608_v22 = vld [vmem:[#allocation2 + $0x16dc] sm:$0xf0] }
  0x2b   :  { %v11751_v23 = vld [vmem:[#allocation2 + $0x3c0] sm:$0xf]  ;;  %v14152_v25 = vor.u32 %v17608_v22, %v14151_v20  ;;  %8251 = vmatpush.bf16.msra.mxu2 %v13384_v21 }
  0x2c   :  { %v17008_v24 = vld [vmem:[#allocation2 + $0x41c] sm:$0xf0] }
  0x2d   :  { %v12519_v26 = vld [vmem:[#allocation2 + $0x9c0] sm:$0xf]  ;;  %v11752_v29 = vor.u32 %v17008_v24, %v11751_v23  ;;  %8265 = vmatpush.bf16.msra.mxu3 %v14152_v25 }
  0x2e   :  { %v17200_v27 = vld [vmem:[#allocation2 + $0xa1c] sm:$0xf0] }
  0x2f   :  { %v13287_v28 = vld [vmem:[#allocation2 + $0xfc0] sm:$0xf]  ;;  %v12520_v33 = vor.u32 %v17200_v27, %v12519_v26  ;;  %8224 = vmatpush.bf16.msra.mxu0 %v11752_v29 }
  0x30   :  { %v17392_v30 = vld [vmem:[#allocation2 + $0x101c] sm:$0xf0] }
  0x31   :  { %v14055_v31 = vld [vmem:[#allocation2 + $0x15c0] sm:$0xf]  ;;  %v13288_v34 = vor.u32 %v17392_v30, %v13287_v28  ;;  %8238 = vmatpush.bf16.msra.mxu1 %v12520_v33 }
  0x32   :  { %v17584_v32 = vld [vmem:[#allocation2 + $0x161c] sm:$0xf0] }
  0x33   :  { %v11655_v35 = vld [vmem:[#allocation2 + $0x300] sm:$0xf]  ;;  %v14056_v38 = vor.u32 %v17584_v32, %v14055_v31  ;;  %8252 = vmatpush.bf16.msra.mxu2 %v13288_v34 }
  0x34   :  { %v16984_v36 = vld [vmem:[#allocation2 + $0x35c] sm:$0xf0] }
  0x35   :  { %v12423_v37 = vld [vmem:[#allocation2 + $0x900] sm:$0xf]  ;;  %v11656_v44 = vor.u32 %v16984_v36, %v11655_v35  ;;  %8266 = vmatpush.bf16.msra.mxu3 %v14056_v38  ;;  %v11945_v38 = vld [vmem:[#allocation2 + $0x5a0] sm:$0xf0] }
  0x36   :  { %v17176_v39 = vld [vmem:[#allocation2 + $0x95c] sm:$0xf0] }
  0x37   :  { %v13191_v40 = vld [vmem:[#allocation2 + $0xf00] sm:$0xf]  ;;  %v12424_v45 = vor.u32 %v17176_v39, %v12423_v37  ;;  %8225 = vmatpush.bf16.msra.mxu0 %v11656_v44  ;;  %v17044_v37 = vld [vmem:[#allocation2 + $0x544] sm:$0xf] }
  0x38   :  { %v17368_v41 = vld [vmem:[#allocation2 + $0xf5c] sm:$0xf0] }
  0x39   :  { %v13959_v42 = vld [vmem:[#allocation2 + $0x1500] sm:$0xf]  ;;  %v13192_v46 = vor.u32 %v17368_v41, %v13191_v40  ;;  %8239 = vmatpush.bf16.msra.mxu1 %v12424_v45 }
  0x3a   :  { %v17560_v43 = vld [vmem:[#allocation2 + $0x155c] sm:$0xf0] }
  0x3b   :  { %v11559_v47 = vld [vmem:[#allocation2 + $0x240] sm:$0xf]  ;;  %v13960_v50 = vor.u32 %v17560_v43, %v13959_v42  ;;  %8253 = vmatpush.bf16.msra.mxu2 %v13192_v46 }
  0x3c   :  { %v16960_v48 = vld [vmem:[#allocation2 + $0x29c] sm:$0xf0] }
  0x3d   :  { %v12327_v49 = vld [vmem:[#allocation2 + $0x840] sm:$0xf]  ;;  %v11560_v56 = vor.u32 %v16960_v48, %v11559_v47  ;;  %8267 = vmatpush.bf16.msra.mxu3 %v13960_v50  ;;  %v11948_v48 = vor.u32 %v17044_v37, %v11945_v38  ;;  %v17020_v50 = vld [vmem:[#allocation2 + $0x484] sm:$0xf] }
  0x3e   :  { %v17152_v51 = vld [vmem:[#allocation2 + $0x89c] sm:$0xf0] }
  0x3f   :  { %v13095_v52 = vld [vmem:[#allocation2 + $0xe40] sm:$0xf]  ;;  %v12328_v57 = vor.u32 %v17152_v51, %v12327_v49  ;;  %8226 = vmatpush.bf16.msra.mxu0 %v11560_v56  ;;  %v11849_v51 = vld [vmem:[#allocation2 + $0x4e0] sm:$0xf0] }
  0x40   :  { %v17344_v53 = vld [vmem:[#allocation2 + $0xe9c] sm:$0xf0] }
  0x41   :  { %v13863_v54 = vld [vmem:[#allocation2 + $0x1440] sm:$0xf]  ;;  %v13096_v58 = vor.u32 %v17344_v53, %v13095_v52  ;;  %8240 = vmatpush.bf16.msra.mxu1 %v12328_v57  ;;  %v16872_v53 = vld [vmem:[%s19378_s0 + $0x18] sm:$0xf0] }
  0x42   :  { %v17536_v55 = vld [vmem:[#allocation2 + $0x149c] sm:$0xf0] }
  0x43   :  { %v11463_v59 = vld [vmem:[#allocation2 + $0x180] sm:$0xf]  ;;  %v13864_v62 = vor.u32 %v17536_v55, %v13863_v54  ;;  %8254 = vmatpush.bf16.msra.mxu2 %v13096_v58  ;;  %v11251_v54 = vld [vmem:[%s19378_s0 + $0x8] sm:$0xf]  ;;  %v16873_v58 = vld [vmem:[%s19378_s0 + $0x20] sm:$0xf0] }
  0x44   :  { %v16936_v60 = vld [vmem:[#allocation2 + $0x1dc] sm:$0xf0] }
  0x45   :  { %v12231_v61 = vld [vmem:[#allocation2 + $0x780] sm:$0xf]  ;;  %v11464_v4 = vor.u32 %v16936_v60, %v11463_v59  ;;  %8268 = vmatpush.bf16.msra.mxu3 %v13864_v62 }
  0x46   :  { %v17128_v63 = vld [vmem:[#allocation2 + $0x7dc] sm:$0xf0] }
  0x47   :  { %v12999_v0 = vld [vmem:[#allocation2 + $0xd80] sm:$0xf]  ;;  %v12232_v5 = vor.u32 %v17128_v63, %v12231_v61  ;;  %8227 = vmatpush.bf16.msra.mxu0 %v11464_v4  ;;  %v16996_v4 = vld [vmem:[#allocation2 + $0x3c4] sm:$0xf] }
  0x48   :  { %v17320_v1 = vld [vmem:[#allocation2 + $0xddc] sm:$0xf0] }
  0x49   :  { %v13767_v2 = vld [vmem:[#allocation2 + $0x1380] sm:$0xf]  ;;  %v13000_v6 = vor.u32 %v17320_v1, %v12999_v0  ;;  %8241 = vmatpush.bf16.msra.mxu1 %v12232_v5  ;;  %v18530_v0 = vor.u32 %v16873_v58, %v11251_v54  ;;  %v11852_v1 = vor.u32 %v17020_v50, %v11849_v51  ;;  %v11753_v5 = vld [vmem:[#allocation2 + $0x420] sm:$0xf0] }
  0x4a   :  { %v17512_v3 = vld [vmem:[#allocation2 + $0x13dc] sm:$0xf0] }
  0x4b   :  { %v11367_v7 = vld [vmem:[#allocation2 + $0xc0] sm:$0xf]  ;;  %v13768_v10 = vor.u32 %v17512_v3, %v13767_v2  ;;  %8255 = vmatpush.bf16.msra.mxu2 %v13000_v6  ;;  %v16869_v6 = vld [vmem:[%s19378_s0 + $0x4] sm:$0xf] }
  0x4c   :  { %v16912_v8 = vld [vmem:[#allocation2 + $0x11c] sm:$0xf0] }
  0x4d   :  { %v12135_v9 = vld [vmem:[#allocation2 + $0x6c0] sm:$0xf]  ;;  %v11368_v16 = vor.u32 %v16912_v8, %v11367_v7  ;;  %8269 = vmatpush.bf16.msra.mxu3 %v13768_v10 }
  0x4e   :  { %v17104_v11 = vld [vmem:[#allocation2 + $0x71c] sm:$0xf0] }
  0x4f   :  { %v12903_v12 = vld [vmem:[#allocation2 + $0xcc0] sm:$0xf]  ;;  %v12136_v19 = vor.u32 %v17104_v11, %v12135_v9  ;;  %8228 = vmatpush.bf16.msra.mxu0 %v11368_v16 }
  0x50   :  { %v17296_v13 = vld [vmem:[#allocation2 + $0xd1c] sm:$0xf0] }
  0x51   :  { %v13671_v14 = vld [vmem:[#allocation2 + $0x12c0] sm:$0xf]  ;;  %v12904_v20 = vor.u32 %v17296_v13, %v12903_v12  ;;  %8242 = vmatpush.bf16.msra.mxu1 %v12136_v19  ;;  %v16870_v19 = vld [vmem:[%s19378_s0 + $0xc] sm:$0xf] }
  0x52   :  { %v17488_v15 = vld [vmem:[#allocation2 + $0x131c] sm:$0xf0] }
  0x53   :  { %v11271_v17 = vld [vmem:[#allocation2] sm:$0xf]  ;;  %v13672_v24 = vor.u32 %v17488_v15, %v13671_v14  ;;  %8256 = vmatpush.bf16.msra.mxu2 %v12904_v20  ;;  %v11253_v20 = vld [vmem:[%s19378_s0 + $0x24] sm:$0xf0] }
  0x54   :  { %v16888_v18 = vld [vmem:[#allocation2 + $0x5c] sm:$0xf0] }
  0x55   :  { %v12039_v21 = vld [vmem:[#allocation2 + $0x600] sm:$0xf]  ;;  %v11272_v31 = vor.u32 %v16888_v18, %v11271_v17  ;;  %8270 = vmatpush.bf16.msra.mxu3 %v13672_v24  ;;  %v11756_v17 = vor.u32 %v16996_v4, %v11753_v5 }
  0x56   :  { %v17080_v22 = vld [vmem:[#allocation2 + $0x65c] sm:$0xf0] }
  0x57   :  { %v12807_v23 = vld [vmem:[#allocation2 + $0xc00] sm:$0xf]  ;;  %v12040_v35 = vor.u32 %v17080_v22, %v12039_v21  ;;  %8229 = vmatpush.bf16.msra.mxu0 %v11272_v31  ;;  %v16972_v21 = vld [vmem:[#allocation2 + $0x304] sm:$0xf] }
  0x58   :  { %v17272_v25 = vld [vmem:[#allocation2 + $0xc5c] sm:$0xf0]  ;;  %v11657_v22 = vld [vmem:[#allocation2 + $0x360] sm:$0xf0] }
  0x59   :  { %v13575_v26 = vld [vmem:[#allocation2 + $0x1200] sm:$0xf]  ;;  %v12808_v36 = vor.u32 %v17272_v25, %v12807_v23  ;;  %8243 = vmatpush.bf16.msra.mxu1 %v12040_v35  ;;  %v18549_v23 = vor.u32 %v16870_v19, %v11253_v20  ;;  %v11561_v35 = vld [vmem:[#allocation2 + $0x2a0] sm:$0xf0] }
  0x5a   :  { %v17464_v27 = vld [vmem:[#allocation2 + $0x125c] sm:$0xf0]  ;;  %v15017_v19 = vld [vmem:[#allocation2 + $0x1da0] sm:$0xf0] }
  0x5b   :  { %v15015_v28 = vld [vmem:[#allocation2 + $0x1d40] sm:$0xf]  ;;  %v13576_v39 = vor.u32 %v17464_v27, %v13575_v26  ;;  %8257 = vmatpush.bf16.msra.mxu2 %v12808_v36 }
  0x5c   :  { %v17824_v29 = vld [vmem:[#allocation2 + $0x1d9c] sm:$0xf0] }
  0x5d   :  { %v15783_v30 = vld [vmem:[#allocation2 + $0x2340] sm:$0xf]  ;;  %v15016_v40 = vor.u32 %v17824_v29, %v15015_v28  ;;  %8271 = vmatpush.bf16.msra.mxu3 %v13576_v39 }
  0x5e   :  { %v18016_v32 = vld [vmem:[#allocation2 + $0x239c] sm:$0xf0]  ;;  %8258 = vmatmul.bf16.vlgmr.msra.gmra.mxu2 %v18530_v0 }
  0x5f   :  { %v16551_v33 = vld [vmem:[#allocation2 + $0x2940] sm:$0xf]  ;;  %v15784_v43 = vor.u32 %v18016_v32, %v15783_v30  ;;  %8278 = vmatpush.bf16.msrb.mxu0 %v15016_v40  ;;  %v11660_v30 = vor.u32 %v16972_v21, %v11657_v22  ;;  %v11259_v22 = vld [vmem:[%s19378_s0 + $0x10] sm:$0xf] }
  0x60   :  { %v18208_v34 = vld [vmem:[#allocation2 + $0x299c] sm:$0xf0]  ;;  %8272 = vmatmul.bf16.vlgmr.msra.gmra.mxu3 %v18549_v23 }
  0x61   :  { %v14919_v41 = vld [vmem:[#allocation2 + $0x1c80] sm:$0xf]  ;;  %v16552_v44 = vor.u32 %v18208_v34, %v16551_v33  ;;  %8292 = vmatpush.bf16.msrb.mxu1 %v15784_v43  ;;  %8320 = vmatpush.bf16.msrb.mxu3 %v11948_v48  ;;  %v16948_v34 = vld [vmem:[#allocation2 + $0x244] sm:$0xf] }
  0x62   :  { %v17800_v42 = vld [vmem:[#allocation2 + $0x1cdc] sm:$0xf0] }
  0x63   :  { %v15687_v45 = vld [vmem:[#allocation2 + $0x2280] sm:$0xf]  ;;  %v14920_v55 = vor.u32 %v17800_v42, %v14919_v41  ;;  %8306 = vmatpush.bf16.msrb.mxu2 %v16552_v44  ;;  %v11564_v42 = vor.u32 %v16948_v34, %v11561_v35  ;;  %v12617_v34 = vld [vmem:[#allocation2 + $0xae0] sm:$0xf0] }
  0x64   :  { %v17992_v46 = vld [vmem:[#allocation2 + $0x22dc] sm:$0xf0]  ;;  %v17404_v35 = vld [vmem:[#allocation2 + $0x1084] sm:$0xf] }
  0x65   :  { %v16455_v47 = vld [vmem:[#allocation2 + $0x2880] sm:$0xf]  ;;  %v15688_v59 = vor.u32 %v17992_v46, %v15687_v45  ;;  %8279 = vmatpush.bf16.msrb.mxu0 %v14920_v55  ;;  %8321 = vmatpush.bf16.msrb.mxu3 %v11852_v1  ;;  %v16924_v46 = vld [vmem:[#allocation2 + $0x184] sm:$0xf] }
  0x66   :  { %v18184_v49 = vld [vmem:[#allocation2 + $0x28dc] sm:$0xf0] }
  0x67   :  { %v11243_v52 = vld [vmem:[%s19378_s0] sm:$0xf]  ;;  %v16456_v60 = vor.u32 %v18184_v49, %v16455_v47  ;;  %8293 = vmatpush.bf16.msrb.mxu1 %v15688_v59  ;;  %v11465_v47 = vld [vmem:[#allocation2 + $0x1e0] sm:$0xf0] }
  0x68   :  { %v14823_v56 = vld [vmem:[#allocation2 + $0x1bc0] sm:$0xf]  ;;  %v18525_v57 = vor.u32 %v16872_v53, %v11243_v52  ;;  %v11468_v54 = vor.u32 %v16924_v46, %v11465_v47  ;;  %v16900_v59 = vld [vmem:[#allocation2 + $0xc4] sm:$0xf] }
  0x69   :  { %v17776_v61 = vld [vmem:[#allocation2 + $0x1c1c] sm:$0xf0]  ;;  %8307 = vmatpush.bf16.msrb.mxu2 %v16456_v60  ;;  %8322 = vmatpush.bf16.msrb.mxu3 %v11756_v17  ;;  %v11369_v60 = vld [vmem:[#allocation2 + $0x120] sm:$0xf0] }
  0x6a   :  { %v15591_v62 = vld [vmem:[#allocation2 + $0x21c0] sm:$0xf]  ;;  %8230 = vmatmul.bf16.vlgmr.msra.gmra.mxu0 %v18525_v57  ;;  %v14824_v8 = vor.u32 %v17776_v61, %v14823_v56  ;;  %v14249_v17 = vld [vmem:[#allocation2 + $0x17a0] sm:$0xf0] }
  0x6b   :  { %v17968_v63 = vld [vmem:[#allocation2 + $0x221c] sm:$0xf0] }
  0x6c   :  { %v16359_v2 = vld [vmem:[#allocation2 + $0x27c0] sm:$0xf]  ;;  %v15592_v12 = vor.u32 %v17968_v63, %v15591_v62  ;;  %8280 = vmatpush.bf16.msrb.mxu0 %v14824_v8  ;;  %v11372_v8 = vor.u32 %v16900_v59, %v11369_v60 }
  0x6d   :  { %v18160_v3 = vld [vmem:[#allocation2 + $0x281c] sm:$0xf0]  ;;  %8323 = vmatpush.bf16.msrb.mxu3 %v11660_v30  ;;  %v11261_v30 = vld [vmem:[%s19378_s0 + $0x2c] sm:$0xf0] }
  0x6e   :  { %v11245_v7 = vld [vmem:[%s19378_s0 + $0x1c] sm:$0xf0]  ;;  %v16360_v13 = vor.u32 %v18160_v3, %v16359_v2  ;;  %8294 = vmatpush.bf16.msrb.mxu1 %v15592_v12  ;;  %v12713_v12 = vld [vmem:[#allocation2 + $0xba0] sm:$0xf0] }
  0x6f   :  { %v14727_v9 = vld [vmem:[#allocation2 + $0x1b00] sm:$0xf]  ;;  %v18540_v11 = vor.u32 %v16869_v6, %v11245_v7  ;;  %v16876_v7 = vld [vmem:[#allocation2 + $0x4] sm:$0xf] }
  0x70   :  { %v17752_v10 = vld [vmem:[#allocation2 + $0x1b5c] sm:$0xf0]  ;;  %8308 = vmatpush.bf16.msrb.mxu2 %v16360_v13  ;;  %v17428_v13 = vld [vmem:[#allocation2 + $0x1144] sm:$0xf] }
  0x71   :  { %v15495_v14 = vld [vmem:[#allocation2 + $0x2100] sm:$0xf]  ;;  %8244 = vmatmul.bf16.vlgmr.msra.gmra.mxu1 %v18540_v11  ;;  %v14728_v24 = vor.u32 %v17752_v10, %v14727_v9  ;;  %8324 = vmatpush.bf16.msrb.mxu3 %v11564_v42  ;;  %v11273_v9 = vld [vmem:[#allocation2 + $0x60] sm:$0xf0] }
  0x72   :  { %v17944_v15 = vld [vmem:[#allocation2 + $0x215c] sm:$0xf0]  ;;  %v17236_v10 = vld [vmem:[#allocation2 + $0xb44] sm:$0xf] }
  0x73   :  { %v16263_v16 = vld [vmem:[#allocation2 + $0x2700] sm:$0xf]  ;;  %v15496_v25 = vor.u32 %v17944_v15, %v15495_v14  ;;  %8281 = vmatpush.bf16.msrb.mxu0 %v14728_v24  ;;  %v13481_v14 = vld [vmem:[#allocation2 + $0x11a0] sm:$0xf0]  ;;  %v16874_v24 = vld [vmem:[%s19378_s0 + $0x28] sm:$0xf0] }
  0x74   :  { %v18136_v18 = vld [vmem:[#allocation2 + $0x275c] sm:$0xf0]  ;;  %v17620_v15 = vld [vmem:[#allocation2 + $0x1744] sm:$0xf] }
  0x75   :  { %v16264_v26 = vor.u32 %v18136_v18, %v16263_v16  ;;  %v14631_v27 = vld [vmem:[#allocation2 + $0x1a40] sm:$0xf]  ;;  %8295 = vmatpush.bf16.msrb.mxu1 %v15496_v25  ;;  %8325 = vmatpush.bf16.msrb.mxu3 %v11468_v54  ;;  %v17812_v18 = vld [vmem:[#allocation2 + $0x1d44] sm:$0xf]  ;;  %v11267_v25 = vld [vmem:[%s19378_s0 + $0x18] sm:$0xf] }
  0x76   :  { %v17728_v28 = vld [vmem:[#allocation2 + $0x1a9c] sm:$0xf0]  ;;  %v14057_v54 = vld [vmem:[#allocation2 + $0x1620] sm:$0xf0] }
  0x77   :  { %v15399_v29 = vld [vmem:[#allocation2 + $0x2040] sm:$0xf]  ;;  %v14632_v36 = vor.u32 %v17728_v28, %v14631_v27  ;;  %8309 = vmatpush.bf16.msrb.mxu2 %v16264_v26  ;;  %v11276_v26 = vor.u32 %v16876_v7, %v11273_v9  ;;  %v12716_v27 = vor.u32 %v17236_v10, %v12713_v12  ;;  %v16875_v28 = vld [vmem:[%s19378_s0 + $0x30] sm:$0xf0]  ;;  %v17140_v10 = vld [vmem:[#allocation2 + $0x844] sm:$0xf] }
  0x78   :  { %v17920_v31 = vld [vmem:[#allocation2 + $0x209c] sm:$0xf0]  ;;  %v12329_v12 = vld [vmem:[#allocation2 + $0x8a0] sm:$0xf0] }
  0x79   :  { %v16167_v32 = vld [vmem:[#allocation2 + $0x2640] sm:$0xf]  ;;  %v15400_v37 = vor.u32 %v17920_v31, %v15399_v29  ;;  %8282 = vmatpush.bf16.msrb.mxu0 %v14632_v36  ;;  %8326 = vmatpush.bf16.msrb.mxu3 %v11372_v8  ;;  %v16871_v29 = vld [vmem:[%s19378_s0 + $0x14] sm:$0xf]  ;;  %v13484_v31 = vor.u32 %v17428_v13, %v13481_v14  ;;  %v15020_v36 = vor.u32 %v17812_v18, %v15017_v19  ;;  %v17332_v13 = vld [vmem:[#allocation2 + $0xe44] sm:$0xf] }
  0x7a   :  { %v18112_v33 = vld [vmem:[#allocation2 + $0x269c] sm:$0xf0]  ;;  %v18574_v42 = vor.u32 %v16871_v29, %v11261_v30  ;;  %v17716_v18 = vld [vmem:[#allocation2 + $0x1a44] sm:$0xf] }
  0x7b   :  { %v16168_v38 = vor.u32 %v18112_v33, %v16167_v32  ;;  %v14535_v39 = vld [vmem:[#allocation2 + $0x1980] sm:$0xf]  ;;  %8296 = vmatpush.bf16.msrb.mxu1 %v15400_v37  ;;  %v14252_v32 = vor.u32 %v17620_v15, %v14249_v17  ;;  %v17212_v33 = vld [vmem:[#allocation2 + $0xa84] sm:$0xf]  ;;  %v18570_v37 = vor.u32 %v16874_v24, %v11259_v22 }
  0x7c   :  { %v17704_v40 = vld [vmem:[#allocation2 + $0x19dc] sm:$0xf0]  ;;  %19389 = vst [vmem:[#allocation16_spill] sm:$0xff] %v18574_v42  ;;  %v13097_v15 = vld [vmem:[#allocation2 + $0xea0] sm:$0xf0] }
  0x7d   :  { %v15303_v41 = vld [vmem:[#allocation2 + $0x1f80] sm:$0xf]  ;;  %v14536_v48 = vor.u32 %v17704_v40, %v14535_v39  ;;  %8310 = vmatpush.bf16.msrb.mxu2 %v16168_v38  ;;  %v13385_v38 = vld [vmem:[#allocation2 + $0x10e0] sm:$0xf0]  ;;  %8327 = vmatpush.bf16.msrb.mxu3 %v11276_v26 }
  0x7e   :  { %v17896_v43 = vld [vmem:[#allocation2 + $0x1fdc] sm:$0xf0]  ;;  %v17596_v39 = vld [vmem:[#allocation2 + $0x1684] sm:$0xf]  ;;  %v13388_v46 = vor.u32 %v17404_v35, %v13385_v38 }
  0x7f   :  { %v16071_v44 = vld [vmem:[#allocation2 + $0x2580] sm:$0xf]  ;;  %v15304_v49 = vor.u32 %v17896_v43, %v15303_v41  ;;  %8283 = vmatpush.bf16.msrb.mxu0 %v14536_v48  ;;  %v14153_v40 = vld [vmem:[#allocation2 + $0x16e0] sm:$0xf0]  ;;  %v18572_v41 = vor.u32 %v16875_v28, %v11267_v25 }
  0x80   :  { %v18088_v45 = vld [vmem:[#allocation2 + $0x25dc] sm:$0xf0]  ;;  %v17788_v43 = vld [vmem:[#allocation2 + $0x1c84] sm:$0xf]  ;;  %v14156_v47 = vor.u32 %v17596_v39, %v14153_v40  ;;  %8328 = vmatmul.bf16.vlgmr.msrb.gmra.mxu3 %v18525_v57 }
  0x81   :  { %v16072_v50 = vor.u32 %v18088_v45, %v16071_v44  ;;  %v14439_v51 = vld [vmem:[#allocation2 + $0x18c0] sm:$0xf]  ;;  %8297 = vmatpush.bf16.msrb.mxu1 %v15304_v49  ;;  %v14921_v44 = vld [vmem:[#allocation2 + $0x1ce0] sm:$0xf0]  ;;  %v12620_v45 = vor.u32 %v17212_v33, %v12617_v34  ;;  %8376 = vmatpush.bf16.msra.mxu3 %v15020_v36 }
  0x82   :  { %v17680_v52 = vld [vmem:[#allocation2 + $0x191c] sm:$0xf0]  ;;  %v17188_v48 = vld [vmem:[#allocation2 + $0x9c4] sm:$0xf] }
  0x83   :  { %v15207_v53 = vld [vmem:[#allocation2 + $0x1ec0] sm:$0xf]  ;;  %v14440_v62 = vor.u32 %v17680_v52, %v14439_v51  ;;  %8311 = vmatpush.bf16.msrb.mxu2 %v16072_v50  ;;  %v12521_v49 = vld [vmem:[#allocation2 + $0xa20] sm:$0xf0]  ;;  %v14924_v51 = vor.u32 %v17788_v43, %v14921_v44 }
  0x84   :  { %v17872_v55 = vld [vmem:[#allocation2 + $0x1f1c] sm:$0xf0]  ;;  %v17380_v50 = vld [vmem:[#allocation2 + $0xfc4] sm:$0xf] }
  0x85   :  { %v15975_v56 = vld [vmem:[#allocation2 + $0x24c0] sm:$0xf]  ;;  %v15208_v3 = vor.u32 %v17872_v55, %v15207_v53  ;;  %8284 = vmatpush.bf16.msrb.mxu0 %v14440_v62  ;;  %v13289_v52 = vld [vmem:[#allocation2 + $0x1020] sm:$0xf0]  ;;  %8377 = vmatpush.bf16.msra.mxu3 %v14924_v51 }
  0x86   :  { %v18064_v58 = vld [vmem:[#allocation2 + $0x251c] sm:$0xf0]  ;;  %v17572_v53 = vld [vmem:[#allocation2 + $0x15c4] sm:$0xf]  ;;  %v13292_v59 = vor.u32 %v17380_v50, %v13289_v52 }
  0x87   :  { %v14343_v61 = vld [vmem:[#allocation2 + $0x1800] sm:$0xf]  ;;  %v15976_v4 = vor.u32 %v18064_v58, %v15975_v56  ;;  %8298 = vmatpush.bf16.msrb.mxu1 %v15208_v3  ;;  %v17764_v55 = vld [vmem:[#allocation2 + $0x1bc4] sm:$0xf]  ;;  %v12524_v58 = vor.u32 %v17188_v48, %v12521_v49  ;;  %v14060_v60 = vor.u32 %v17572_v53, %v14057_v54 }
  0x88   :  { %v17656_v63 = vld [vmem:[#allocation2 + $0x185c] sm:$0xf0]  ;;  %v14825_v56 = vld [vmem:[#allocation2 + $0x1c20] sm:$0xf0] }
  0x89   :  { %v15111_v1 = vld [vmem:[#allocation2 + $0x1e00] sm:$0xf]  ;;  %v14344_v16 = vor.u32 %v17656_v63, %v14343_v61  ;;  %8312 = vmatpush.bf16.msrb.mxu2 %v15976_v4  ;;  %v17164_v61 = vld [vmem:[#allocation2 + $0x904] sm:$0xf] }
  0x8a   :  { %v17848_v2 = vld [vmem:[#allocation2 + $0x1e5c] sm:$0xf0]  ;;  %v12425_v62 = vld [vmem:[#allocation2 + $0x960] sm:$0xf0] }
  0x8b   :  { %v15879_v5 = vld [vmem:[#allocation2 + $0x2400] sm:$0xf]  ;;  %v15112_v20 = vor.u32 %v17848_v2, %v15111_v1  ;;  %8285 = vmatpush.bf16.msrb.mxu0 %v14344_v16  ;;  %v17356_v63 = vld [vmem:[#allocation2 + $0xf04] sm:$0xf]  ;;  %v14828_v1 = vor.u32 %v17764_v55, %v14825_v56  ;;  %v12428_v7 = vor.u32 %v17164_v61, %v12425_v62 }
  0x8c   :  { %v18040_v6 = vld [vmem:[#allocation2 + $0x245c] sm:$0xf0]  ;;  %v13193_v2 = vld [vmem:[#allocation2 + $0xf60] sm:$0xf0] }
  0x8d   :  { %v15880_v21 = vor.u32 %v18040_v6, %v15879_v5  ;;  %8299 = vmatpush.bf16.msrb.mxu1 %v15112_v20  ;;  %v17548_v3 = vld [vmem:[#allocation2 + $0x1504] sm:$0xf]  ;;  %v13196_v8 = vor.u32 %v17356_v63, %v13193_v2  ;;  %8378 = vmatpush.bf16.msra.mxu3 %v14828_v1  ;;  %v12332_v20 = vor.u32 %v17140_v10, %v12329_v12 }
  0x8e   :  { %8286 = vmatmul.bf16.vlgmr.msrb.gmra.mxu0 %v18570_v37  ;;  %v13961_v4 = vld [vmem:[#allocation2 + $0x1560] sm:$0xf0] }
  0x8f   :  { %8313 = vmatpush.bf16.msrb.mxu2 %v15880_v21  ;;  %8334 = vmatpush.bf16.msra.mxu0 %v12716_v27  ;;  %v17740_v5 = vld [vmem:[#allocation2 + $0x1b04] sm:$0xf]  ;;  %v13964_v9 = vor.u32 %v17548_v3, %v13961_v4  ;;  %v13100_v21 = vor.u32 %v17332_v13, %v13097_v15  ;;  %v11951_v3 = vld [vmem:[#allocation2 + $0x548] sm:$0xf] }
  0x90   :  { %8300 = vmatmul.bf16.vlgmr.msrb.gmra.mxu1 %v18574_v42  ;;  %v14729_v6 = vld [vmem:[#allocation2 + $0x1b60] sm:$0xf0]  ;;  %v17057_v4 = vld [vmem:[#allocation2 + $0x5a4] sm:$0xf0] }
  0x91   :  { %8348 = vmatpush.bf16.msra.mxu1 %v13484_v31  ;;  %v14732_v14 = vor.u32 %v17740_v5, %v14729_v6  ;;  %v17524_v16 = vld [vmem:[#allocation2 + $0x1444] sm:$0xf]  ;;  %v11952_v13 = vor.u32 %v17057_v4, %v11951_v3 }
  0x92   :  { %8314 = vmatmul.bf16.vlgmr.msrb.gmra.mxu2 %v18572_v41  ;;  %v13865_v17 = vld [vmem:[#allocation2 + $0x14a0] sm:$0xf0] }
  0x93   :  { %8362 = vmatpush.bf16.msra.mxu2 %v14252_v32  ;;  %8335 = vmatpush.bf16.msra.mxu0 %v12620_v45  ;;  %v14633_v19 = vld [vmem:[#allocation2 + $0x1aa0] sm:$0xf0]  ;;  %v13868_v22 = vor.u32 %v17524_v16, %v13865_v17 }
  0x94   :  { %v17116_v24 = vld [vmem:[#allocation2 + $0x784] sm:$0xf]  ;;  %8379 = vmatpush.bf16.msra.mxu3 %v14732_v14  ;;  %v14636_v27 = vor.u32 %v17716_v18, %v14633_v19  ;;  %v11855_v19 = vld [vmem:[#allocation2 + $0x488] sm:$0xf] }
  0x95   :  { %8349 = vmatpush.bf16.msra.mxu1 %v13388_v46  ;;  %v12233_v25 = vld [vmem:[#allocation2 + $0x7e0] sm:$0xf0] }
  0x96   :  { %v17308_v26 = vld [vmem:[#allocation2 + $0xd84] sm:$0xf]  ;;  %v12236_v33 = vor.u32 %v17116_v24, %v12233_v25 }
  0x97   :  { %8363 = vmatpush.bf16.msra.mxu2 %v14156_v47  ;;  %8336 = vmatpush.bf16.msra.mxu0 %v12524_v58  ;;  %v13001_v28 = vld [vmem:[#allocation2 + $0xde0] sm:$0xf0] }
  0x98   :  { %v17500_v29 = vld [vmem:[#allocation2 + $0x1384] sm:$0xf]  ;;  %v13004_v34 = vor.u32 %v17308_v26, %v13001_v28  ;;  %8380 = vmatpush.bf16.msra.mxu3 %v14636_v27 }
  0x99   :  { %8350 = vmatpush.bf16.msra.mxu1 %v13292_v59  ;;  %v13769_v30 = vld [vmem:[#allocation2 + $0x13e0] sm:$0xf0] }
  0x9a   :  { %v17692_v31 = vld [vmem:[#allocation2 + $0x1984] sm:$0xf]  ;;  %v13772_v35 = vor.u32 %v17500_v29, %v13769_v30 }
  0x9b   :  { %8364 = vmatpush.bf16.msra.mxu2 %v14060_v60  ;;  %8337 = vmatpush.bf16.msra.mxu0 %v12428_v7  ;;  %v14537_v32 = vld [vmem:[#allocation2 + $0x19e0] sm:$0xf0]  ;;  %v12719_v7 = vld [vmem:[#allocation2 + $0xb48] sm:$0xf] }
  0x9c   :  { %v17092_v36 = vld [vmem:[#allocation2 + $0x6c4] sm:$0xf]  ;;  %v14540_v40 = vor.u32 %v17692_v31, %v14537_v32  ;;  %v11759_v32 = vld [vmem:[#allocation2 + $0x3c8] sm:$0xf] }
  0x9d   :  { %8351 = vmatpush.bf16.msra.mxu1 %v13196_v8  ;;  %v12137_v38 = vld [vmem:[#allocation2 + $0x720] sm:$0xf0]  ;;  %v17249_v8 = vld [vmem:[#allocation2 + $0xba4] sm:$0xf0] }
  0x9e   :  { %v17284_v39 = vld [vmem:[#allocation2 + $0xcc4] sm:$0xf]  ;;  %v12140_v48 = vor.u32 %v17092_v36, %v12137_v38  ;;  %8381 = vmatpush.bf16.msra.mxu3 %v14540_v40  ;;  %v12720_v17 = vor.u32 %v17249_v8, %v12719_v7 }
  0x9f   :  { %8365 = vmatpush.bf16.msra.mxu2 %v13964_v9  ;;  %8338 = vmatpush.bf16.msra.mxu0 %v12332_v20  ;;  %v12905_v43 = vld [vmem:[#allocation2 + $0xd20] sm:$0xf0]  ;;  %v17033_v20 = vld [vmem:[#allocation2 + $0x4e4] sm:$0xf0] }
  0xa0   :  { %v17476_v44 = vld [vmem:[#allocation2 + $0x12c4] sm:$0xf]  ;;  %v12908_v51 = vor.u32 %v17284_v39, %v12905_v43  ;;  %v11856_v26 = vor.u32 %v17033_v20, %v11855_v19 }
  0xa1   :  { %8352 = vmatpush.bf16.msra.mxu1 %v13100_v21  ;;  %v13673_v45 = vld [vmem:[#allocation2 + $0x1320] sm:$0xf0]  ;;  %v12623_v21 = vld [vmem:[#allocation2 + $0xa88] sm:$0xf] }
  0xa2   :  { %v17668_v46 = vld [vmem:[#allocation2 + $0x18c4] sm:$0xf]  ;;  %v13676_v52 = vor.u32 %v17476_v44, %v13673_v45 }
  0xa3   :  { %8366 = vmatpush.bf16.msra.mxu2 %v13868_v22  ;;  %v14441_v47 = vld [vmem:[#allocation2 + $0x1920] sm:$0xf0]  ;;  %8339 = vmatpush.bf16.msra.mxu0 %v12236_v33  ;;  %v17225_v22 = vld [vmem:[#allocation2 + $0xae4] sm:$0xf0] }
  0xa4   :  { %v17068_v49 = vld [vmem:[#allocation2 + $0x604] sm:$0xf]  ;;  %v14444_v56 = vor.u32 %v17668_v46, %v14441_v47  ;;  %v12624_v30 = vor.u32 %v17225_v22, %v12623_v21  ;;  %v17009_v33 = vld [vmem:[#allocation2 + $0x424] sm:$0xf0] }
  0xa5   :  { %v12041_v50 = vld [vmem:[#allocation2 + $0x660] sm:$0xf0]  ;;  %8353 = vmatpush.bf16.msra.mxu1 %v13004_v34  ;;  %v12527_v34 = vld [vmem:[#allocation2 + $0x9c8] sm:$0xf]  ;;  %v11760_v39 = vor.u32 %v17009_v33, %v11759_v32 }
  0xa6   :  { %v17260_v53 = vld [vmem:[#allocation2 + $0xc04] sm:$0xf]  ;;  %v12044_v1 = vor.u32 %v17068_v49, %v12041_v50  ;;  %8382 = vmatpush.bf16.msra.mxu3 %v14444_v56  ;;  %v11663_v47 = vld [vmem:[#allocation2 + $0x308] sm:$0xf] }
  0xa7   :  { %8367 = vmatpush.bf16.msra.mxu2 %v13772_v35  ;;  %v12809_v54 = vld [vmem:[#allocation2 + $0xc60] sm:$0xf0]  ;;  %8340 = vmatpush.bf16.msra.mxu0 %v12140_v48  ;;  %v17201_v35 = vld [vmem:[#allocation2 + $0xa24] sm:$0xf0] }
  0xa8   :  { %v17452_v55 = vld [vmem:[#allocation2 + $0x1204] sm:$0xf]  ;;  %v12812_v5 = vor.u32 %v17260_v53, %v12809_v54  ;;  %v12528_v45 = vor.u32 %v17201_v35, %v12527_v34  ;;  %v16985_v48 = vld [vmem:[#allocation2 + $0x364] sm:$0xf0] }
  0xa9   :  { %v13577_v58 = vld [vmem:[#allocation2 + $0x1260] sm:$0xf0]  ;;  %8354 = vmatpush.bf16.msra.mxu1 %v12908_v51  ;;  %v12431_v49 = vld [vmem:[#allocation2 + $0x908] sm:$0xf]  ;;  %v11664_v53 = vor.u32 %v16985_v48, %v11663_v47 }
  0xaa   :  { %v17644_v59 = vld [vmem:[#allocation2 + $0x1804] sm:$0xf]  ;;  %v13580_v6 = vor.u32 %v17452_v55, %v13577_v58  ;;  %v17177_v50 = vld [vmem:[#allocation2 + $0x964] sm:$0xf0] }
  0xab   :  { %v14345_v60 = vld [vmem:[#allocation2 + $0x1860] sm:$0xf0]  ;;  %8368 = vmatpush.bf16.msra.mxu2 %v13676_v52  ;;  %8341 = vmatpush.bf16.msra.mxu0 %v12044_v1  ;;  %v12432_v58 = vor.u32 %v17177_v50, %v12431_v49  ;;  %v11375_v22 = vld [vmem:[#allocation2 + $0xc8] sm:$0xf] }
  0xac   :  { %v18004_v61 = vld [vmem:[#allocation2 + $0x2344] sm:$0xf]  ;;  %v14348_v9 = vor.u32 %v17644_v59, %v14345_v60  ;;  %v11567_v60 = vld [vmem:[#allocation2 + $0x248] sm:$0xf] }
  0xad   :  { %v15785_v62 = vld [vmem:[#allocation2 + $0x23a0] sm:$0xf0]  ;;  %8355 = vmatpush.bf16.msra.mxu1 %v12812_v5  ;;  %v11279_v34 = vld [vmem:[#allocation2 + $0x8] sm:$0xf] }
  0xae   :  { %v18196_v63 = vld [vmem:[#allocation2 + $0x2944] sm:$0xf]  ;;  %v15788_v10 = vor.u32 %v18004_v61, %v15785_v62  ;;  %8383 = vmatpush.bf16.msra.mxu3 %v14348_v9  ;;  %8342 = vmatmul.bf16.vlgmr.msra.gmra.mxu0 %v18540_v11  ;;  %v16961_v61 = vld [vmem:[#allocation2 + $0x2a4] sm:$0xf0] }
  0xaf   :  { %v16553_v2 = vld [vmem:[#allocation2 + $0x29a0] sm:$0xf0]  ;;  %8369 = vmatpush.bf16.msra.mxu2 %v13580_v6  ;;  %v12335_v62 = vld [vmem:[#allocation2 + $0x848] sm:$0xf]  ;;  %v11568_v3 = vor.u32 %v16961_v61, %v11567_v60 }
  0xb0   :  { %v16556_v12 = vor.u32 %v18196_v63, %v16553_v2  ;;  %v17980_v14 = vld [vmem:[#allocation2 + $0x2284] sm:$0xf]  ;;  %8390 = vmatpush.bf16.msrb.mxu0 %v15788_v10  ;;  %8356 = vmatmul.bf16.vlgmr.msra.gmra.mxu1 %v18530_v0  ;;  %v17153_v63 = vld [vmem:[#allocation2 + $0x8a4] sm:$0xf0] }
  0xb1   :  { %v15689_v15 = vld [vmem:[#allocation2 + $0x22e0] sm:$0xf0]  ;;  %8384 = vmatmul.bf16.vlgmr.msra.gmra.mxu3 %v18570_v37  ;;  %v12336_v7 = vor.u32 %v17153_v63, %v12335_v62  ;;  %v11471_v9 = vld [vmem:[#allocation2 + $0x188] sm:$0xf] }
  0xb2   :  { %v18172_v16 = vld [vmem:[#allocation2 + $0x2884] sm:$0xf]  ;;  %v15692_v24 = vor.u32 %v17980_v14, %v15689_v15  ;;  %8404 = vmatpush.bf16.msrb.mxu1 %v16556_v12  ;;  %8432 = vmatpush.bf16.msrb.mxu3 %v12720_v17  ;;  %v16937_v10 = vld [vmem:[#allocation2 + $0x1e4] sm:$0xf0] }
  0xb3   :  { %v16457_v18 = vld [vmem:[#allocation2 + $0x28e0] sm:$0xf0]  ;;  %8418 = vmatpush.bf16.msrb.mxu2 %v11952_v13  ;;  %v12239_v12 = vld [vmem:[#allocation2 + $0x788] sm:$0xf] }
  0xb4   :  { %v16460_v25 = vor.u32 %v18172_v16, %v16457_v18  ;;  %v17956_v27 = vld [vmem:[#allocation2 + $0x21c4] sm:$0xf]  ;;  %8370 = vmatmul.bf16.vlgmr.msra.gmra.mxu2 %v18549_v23  ;;  %8391 = vmatpush.bf16.msrb.mxu0 %v15692_v24  ;;  %v17129_v13 = vld [vmem:[#allocation2 + $0x7e4] sm:$0xf0]  ;;  %v11472_v16 = vor.u32 %v16937_v10, %v11471_v9 }
  0xb5   :  { %v15593_v28 = vld [vmem:[#allocation2 + $0x2220] sm:$0xf0]  ;;  %v12240_v20 = vor.u32 %v17129_v13, %v12239_v12  ;;  %v16913_v24 = vld [vmem:[#allocation2 + $0x124] sm:$0xf0] }
  0xb6   :  { %v18148_v29 = vld [vmem:[#allocation2 + $0x27c4] sm:$0xf]  ;;  %v15596_v36 = vor.u32 %v17956_v27, %v15593_v28  ;;  %8405 = vmatpush.bf16.msrb.mxu1 %v16460_v25  ;;  %8433 = vmatpush.bf16.msrb.mxu3 %v12624_v30  ;;  %v12143_v25 = vld [vmem:[#allocation2 + $0x6c8] sm:$0xf] }
  0xb7   :  { %v16361_v31 = vld [vmem:[#allocation2 + $0x2820] sm:$0xf0]  ;;  %8419 = vmatpush.bf16.msrb.mxu2 %v11856_v26  ;;  %v17105_v26 = vld [vmem:[#allocation2 + $0x724] sm:$0xf0] }
  0xb8   :  { %v16364_v38 = vor.u32 %v18148_v29, %v16361_v31  ;;  %v17932_v40 = vld [vmem:[#allocation2 + $0x2104] sm:$0xf]  ;;  %8392 = vmatpush.bf16.msrb.mxu0 %v15596_v36  ;;  %v11376_v31 = vor.u32 %v16913_v24, %v11375_v22  ;;  %v12144_v35 = vor.u32 %v17105_v26, %v12143_v25  ;;  %v16889_v36 = vld [vmem:[#allocation2 + $0x64] sm:$0xf0] }
  0xb9   :  { %v15497_v43 = vld [vmem:[#allocation2 + $0x2160] sm:$0xf0]  ;;  %v15023_v47 = vld [vmem:[#allocation2 + $0x1d48] sm:$0xf]  ;;  %v11280_v50 = vor.u32 %v16889_v36, %v11279_v34 }
  0xba   :  { %v18124_v44 = vld [vmem:[#allocation2 + $0x2704] sm:$0xf]  ;;  %v15500_v51 = vor.u32 %v17932_v40, %v15497_v43  ;;  %8406 = vmatpush.bf16.msrb.mxu1 %v16364_v38  ;;  %8434 = vmatpush.bf16.msrb.mxu3 %v12528_v45  ;;  %v12047_v38 = vld [vmem:[#allocation2 + $0x608] sm:$0xf] }
  0xbb   :  { %v16265_v46 = vld [vmem:[#allocation2 + $0x2760] sm:$0xf0]  ;;  %8420 = vmatpush.bf16.msrb.mxu2 %v11760_v39  ;;  %v17081_v39 = vld [vmem:[#allocation2 + $0x664] sm:$0xf0] }
  0xbc   :  { %v16268_v52 = vor.u32 %v18124_v44, %v16265_v46  ;;  %v17908_v54 = vld [vmem:[#allocation2 + $0x2044] sm:$0xf]  ;;  %8393 = vmatpush.bf16.msrb.mxu0 %v15500_v51  ;;  %v13487_v40 = vld [vmem:[#allocation2 + $0x1148] sm:$0xf] }
  0xbd   :  { %v15401_v55 = vld [vmem:[#allocation2 + $0x20a0] sm:$0xf0]  ;;  %v17441_v43 = vld [vmem:[#allocation2 + $0x11a4] sm:$0xf0] }
  0xbe   :  { %v18100_v56 = vld [vmem:[#allocation2 + $0x2644] sm:$0xf]  ;;  %v15404_v1 = vor.u32 %v17908_v54, %v15401_v55  ;;  %8407 = vmatpush.bf16.msrb.mxu1 %v16268_v52  ;;  %8435 = vmatpush.bf16.msrb.mxu3 %v12432_v58  ;;  %v14255_v44 = vld [vmem:[#allocation2 + $0x1748] sm:$0xf]  ;;  %v13488_v54 = vor.u32 %v17441_v43, %v13487_v40 }
  0xbf   :  { %v16169_v59 = vld [vmem:[#allocation2 + $0x26a0] sm:$0xf0]  ;;  %8421 = vmatpush.bf16.msrb.mxu2 %v11664_v53  ;;  %v17633_v46 = vld [vmem:[#allocation2 + $0x17a4] sm:$0xf0]  ;;  %v12048_v53 = vor.u32 %v17081_v39, %v12047_v38 }
  0xc0   :  { %v16172_v2 = vor.u32 %v18100_v56, %v16169_v59  ;;  %v17884_v4 = vld [vmem:[#allocation2 + $0x1f84] sm:$0xf]  ;;  %8394 = vmatpush.bf16.msrb.mxu0 %v15404_v1  ;;  %v17825_v48 = vld [vmem:[#allocation2 + $0x1da4] sm:$0xf0]  ;;  %v14256_v55 = vor.u32 %v17633_v46, %v14255_v44 }
  0xc1   :  { %v15305_v5 = vld [vmem:[#allocation2 + $0x1fe0] sm:$0xf0]  ;;  %v15791_v51 = vld [vmem:[#allocation2 + $0x2348] sm:$0xf]  ;;  %v15024_v56 = vor.u32 %v17825_v48, %v15023_v47 }
  0xc2   :  { %v18076_v6 = vld [vmem:[#allocation2 + $0x2584] sm:$0xf]  ;;  %v15308_v14 = vor.u32 %v17884_v4, %v15305_v5  ;;  %8408 = vmatpush.bf16.msrb.mxu1 %v16172_v2  ;;  %8436 = vmatpush.bf16.msrb.mxu3 %v12336_v7  ;;  %v18017_v52 = vld [vmem:[#allocation2 + $0x23a4] sm:$0xf0] }
  0xc3   :  { %v16073_v8 = vld [vmem:[#allocation2 + $0x25e0] sm:$0xf0]  ;;  %8422 = vmatpush.bf16.msrb.mxu2 %v11568_v3  ;;  %v13391_v58 = vld [vmem:[#allocation2 + $0x1088] sm:$0xf]  ;;  %v15792_v61 = vor.u32 %v18017_v52, %v15791_v51 }
  0xc4   :  { %v16076_v15 = vor.u32 %v18076_v6, %v16073_v8  ;;  %v17860_v17 = vld [vmem:[#allocation2 + $0x1ec4] sm:$0xf]  ;;  %8395 = vmatpush.bf16.msrb.mxu0 %v15308_v14  ;;  %v17417_v59 = vld [vmem:[#allocation2 + $0x10e4] sm:$0xf0] }
  0xc5   :  { %v15209_v18 = vld [vmem:[#allocation2 + $0x1f20] sm:$0xf0]  ;;  %v14159_v60 = vld [vmem:[#allocation2 + $0x1688] sm:$0xf]  ;;  %v13392_v4 = vor.u32 %v17417_v59, %v13391_v58 }
  0xc6   :  { %v18052_v19 = vld [vmem:[#allocation2 + $0x24c4] sm:$0xf]  ;;  %v15212_v27 = vor.u32 %v17860_v17, %v15209_v18  ;;  %8409 = vmatpush.bf16.msrb.mxu1 %v16076_v15  ;;  %8437 = vmatpush.bf16.msrb.mxu3 %v12240_v20  ;;  %v17609_v62 = vld [vmem:[#allocation2 + $0x16e4] sm:$0xf0] }
  0xc7   :  { %v15977_v21 = vld [vmem:[#allocation2 + $0x2520] sm:$0xf0]  ;;  %8423 = vmatpush.bf16.msrb.mxu2 %v11472_v16  ;;  %v14927_v63 = vld [vmem:[#allocation2 + $0x1c88] sm:$0xf]  ;;  %v14160_v5 = vor.u32 %v17609_v62, %v14159_v60 }
  0xc8   :  { %v17836_v28 = vld [vmem:[#allocation2 + $0x1e04] sm:$0xf]  ;;  %v15980_v30 = vor.u32 %v18052_v19, %v15977_v21  ;;  %8396 = vmatpush.bf16.msrb.mxu0 %v15212_v27  ;;  %v17801_v1 = vld [vmem:[#allocation2 + $0x1ce4] sm:$0xf0] }
  0xc9   :  { %v15113_v29 = vld [vmem:[#allocation2 + $0x1e60] sm:$0xf0]  ;;  %v15695_v2 = vld [vmem:[#allocation2 + $0x2288] sm:$0xf]  ;;  %v14928_v6 = vor.u32 %v17801_v1, %v14927_v63 }
  0xca   :  { %v18028_v32 = vld [vmem:[#allocation2 + $0x2404] sm:$0xf]  ;;  %v15116_v45 = vor.u32 %v17836_v28, %v15113_v29  ;;  %8410 = vmatpush.bf16.msrb.mxu1 %v15980_v30  ;;  %8438 = vmatpush.bf16.msrb.mxu3 %v12144_v35  ;;  %v17993_v3 = vld [vmem:[#allocation2 + $0x22e4] sm:$0xf0] }
  0xcb   :  { %v15881_v33 = vld [vmem:[#allocation2 + $0x2460] sm:$0xf0]  ;;  %8424 = vmatpush.bf16.msrb.mxu2 %v11376_v31  ;;  %v13295_v7 = vld [vmem:[#allocation2 + $0xfc8] sm:$0xf]  ;;  %v15696_v10 = vor.u32 %v17993_v3, %v15695_v2 }
  0xcc   :  { %v15884_v49 = vor.u32 %v18028_v32, %v15881_v33  ;;  %8397 = vmatpush.bf16.msrb.mxu0 %v15116_v45  ;;  %v17393_v8 = vld [vmem:[#allocation2 + $0x1024] sm:$0xf0] }
  0xcd   :  { %v14063_v9 = vld [vmem:[#allocation2 + $0x15c8] sm:$0xf]  ;;  %v13296_v17 = vor.u32 %v17393_v8, %v13295_v7 }
  0xce   :  { %8411 = vmatpush.bf16.msrb.mxu1 %v15884_v49  ;;  %8439 = vmatpush.bf16.msrb.mxu3 %v12048_v53  ;;  %v17585_v12 = vld [vmem:[#allocation2 + $0x1624] sm:$0xf0] }
  0xcf   :  { %8425 = vmatpush.bf16.msrb.mxu2 %v11280_v50  ;;  %8398 = vmatmul.bf16.vlgmr.msrb.gmra.mxu0 %v18574_v42  ;;  %v14831_v13 = vld [vmem:[#allocation2 + $0x1bc8] sm:$0xf]  ;;  %v14064_v18 = vor.u32 %v17585_v12, %v14063_v9 }
  0xd0   :  { %8446 = vmatpush.bf16.msra.mxu0 %v13488_v54  ;;  %v17777_v14 = vld [vmem:[#allocation2 + $0x1c24] sm:$0xf0] }
  0xd1   :  { %8412 = vmatmul.bf16.vlgmr.msrb.gmra.mxu1 %v18572_v41  ;;  %v15599_v15 = vld [vmem:[#allocation2 + $0x21c8] sm:$0xf]  ;;  %8440 = vmatmul.bf16.vlgmr.msrb.gmra.mxu3 %v18540_v11  ;;  %v14832_v19 = vor.u32 %v17777_v14, %v14831_v13 }
  0xd2   :  { %8460 = vmatpush.bf16.msra.mxu1 %v14256_v55  ;;  %8488 = vmatpush.bf16.msra.mxu3 %v15792_v61  ;;  %v17969_v16 = vld [vmem:[#allocation2 + $0x2224] sm:$0xf0] }
  0xd3   :  { %8474 = vmatpush.bf16.msra.mxu2 %v15024_v56  ;;  %v13199_v20 = vld [vmem:[#allocation2 + $0xf08] sm:$0xf]  ;;  %v15600_v24 = vor.u32 %v17969_v16, %v15599_v15 }
  0xd4   :  { %8426 = vmatmul.bf16.vlgmr.msrb.gmra.mxu2 %v18525_v57  ;;  %8447 = vmatpush.bf16.msra.mxu0 %v13392_v4  ;;  %v17369_v21 = vld [vmem:[#allocation2 + $0xf64] sm:$0xf0] }
  0xd5   :  { %v13967_v22 = vld [vmem:[#allocation2 + $0x1508] sm:$0xf]  ;;  %v13200_v30 = vor.u32 %v17369_v21, %v13199_v20 }
  0xd6   :  { %8461 = vmatpush.bf16.msra.mxu1 %v14160_v5  ;;  %8489 = vmatpush.bf16.msra.mxu3 %v15696_v10  ;;  %v17561_v25 = vld [vmem:[#allocation2 + $0x1564] sm:$0xf0] }
  0xd7   :  { %8475 = vmatpush.bf16.msra.mxu2 %v14928_v6  ;;  %v14735_v26 = vld [vmem:[#allocation2 + $0x1b08] sm:$0xf]  ;;  %v13968_v31 = vor.u32 %v17561_v25, %v13967_v22  ;;  %v17045_v22 = vld [vmem:[#allocation2 + $0x54c] sm:$0xf] }
  0xd8   :  { %v17753_v27 = vld [vmem:[#allocation2 + $0x1b64] sm:$0xf0]  ;;  %8448 = vmatpush.bf16.msra.mxu0 %v13296_v17  ;;  %v11953_v25 = vld [vmem:[#allocation2 + $0x5a8] sm:$0xf0] }
  0xd9   :  { %v15503_v28 = vld [vmem:[#allocation2 + $0x2108] sm:$0xf]  ;;  %v14736_v32 = vor.u32 %v17753_v27, %v14735_v26  ;;  %v17237_v26 = vld [vmem:[#allocation2 + $0xb4c] sm:$0xf] }
  0xda   :  { %v17945_v29 = vld [vmem:[#allocation2 + $0x2164] sm:$0xf0]  ;;  %8462 = vmatpush.bf16.msra.mxu1 %v14064_v18  ;;  %8490 = vmatpush.bf16.msra.mxu3 %v15600_v24  ;;  %v12721_v27 = vld [vmem:[#allocation2 + $0xba8] sm:$0xf0] }
  0xdb   :  { %8476 = vmatpush.bf16.msra.mxu2 %v14832_v19  ;;  %v13103_v33 = vld [vmem:[#allocation2 + $0xe48] sm:$0xf]  ;;  %v15504_v36 = vor.u32 %v17945_v29, %v15503_v28 }
  0xdc   :  { %v17345_v34 = vld [vmem:[#allocation2 + $0xea4] sm:$0xf0]  ;;  %8449 = vmatpush.bf16.msra.mxu0 %v13200_v30  ;;  %v17429_v30 = vld [vmem:[#allocation2 + $0x114c] sm:$0xf] }
  0xdd   :  { %v13871_v35 = vld [vmem:[#allocation2 + $0x1448] sm:$0xf]  ;;  %v13104_v45 = vor.u32 %v17345_v34, %v13103_v33  ;;  %v11956_v34 = vor.u32 %v17045_v22, %v11953_v25  ;;  %v13105_v22 = vld [vmem:[#allocation2 + $0xea8] sm:$0xf0] }
  0xde   :  { %v17537_v38 = vld [vmem:[#allocation2 + $0x14a4] sm:$0xf0]  ;;  %8463 = vmatpush.bf16.msra.mxu1 %v13968_v31  ;;  %8491 = vmatpush.bf16.msra.mxu3 %v15504_v36  ;;  %v13489_v31 = vld [vmem:[#allocation2 + $0x11a8] sm:$0xf0] }
  0xdf   :  { %v14639_v39 = vld [vmem:[#allocation2 + $0x1a48] sm:$0xf]  ;;  %8477 = vmatpush.bf16.msra.mxu2 %v14736_v32  ;;  %v13872_v46 = vor.u32 %v17537_v38, %v13871_v35  ;;  %v12724_v35 = vor.u32 %v17237_v26, %v12721_v27 }
  0xe0   :  { %v17729_v40 = vld [vmem:[#allocation2 + $0x1aa4] sm:$0xf0]  ;;  %8450 = vmatpush.bf16.msra.mxu0 %v13104_v45  ;;  %v12625_v45 = vld [vmem:[#allocation2 + $0xae8] sm:$0xf0] }
  0xe1   :  { %v15407_v43 = vld [vmem:[#allocation2 + $0x2048] sm:$0xf]  ;;  %v14640_v47 = vor.u32 %v17729_v40, %v14639_v39  ;;  %v17021_v39 = vld [vmem:[#allocation2 + $0x48c] sm:$0xf]  ;;  %v13492_v40 = vor.u32 %v17429_v30, %v13489_v31 }
  0xe2   :  { %v17921_v44 = vld [vmem:[#allocation2 + $0x20a4] sm:$0xf0]  ;;  %8464 = vmatpush.bf16.msra.mxu1 %v13872_v46  ;;  %v17405_v46 = vld [vmem:[#allocation2 + $0x108c] sm:$0xf] }
  0xe3   :  { %v13007_v48 = vld [vmem:[#allocation2 + $0xd88] sm:$0xf]  ;;  %v15408_v51 = vor.u32 %v17921_v44, %v15407_v43  ;;  %8478 = vmatpush.bf16.msra.mxu2 %v14640_v47  ;;  %v11857_v43 = vld [vmem:[#allocation2 + $0x4e8] sm:$0xf0] }
  0xe4   :  { %v17321_v49 = vld [vmem:[#allocation2 + $0xde4] sm:$0xf0]  ;;  %v17213_v44 = vld [vmem:[#allocation2 + $0xa8c] sm:$0xf] }
  0xe5   :  { %v13775_v50 = vld [vmem:[#allocation2 + $0x1388] sm:$0xf]  ;;  %v13008_v58 = vor.u32 %v17321_v49, %v13007_v48  ;;  %8492 = vmatpush.bf16.msra.mxu3 %v15408_v51  ;;  %v13393_v47 = vld [vmem:[#allocation2 + $0x10e8] sm:$0xf0]  ;;  %v11860_v49 = vor.u32 %v17021_v39, %v11857_v43 }
  0xe6   :  { %v17513_v52 = vld [vmem:[#allocation2 + $0x13e4] sm:$0xf0]  ;;  %v17309_v39 = vld [vmem:[#allocation2 + $0xd8c] sm:$0xf] }
  0xe7   :  { %v14543_v53 = vld [vmem:[#allocation2 + $0x1988] sm:$0xf]  ;;  %v13776_v59 = vor.u32 %v17513_v52, %v13775_v50  ;;  %8451 = vmatpush.bf16.msra.mxu0 %v13008_v58  ;;  %v12628_v50 = vor.u32 %v17213_v44, %v12625_v45  ;;  %v12529_v58 = vld [vmem:[#allocation2 + $0xa28] sm:$0xf0] }
  0xe8   :  { %v17705_v54 = vld [vmem:[#allocation2 + $0x19e4] sm:$0xf0] }
  0xe9   :  { %v15311_v55 = vld [vmem:[#allocation2 + $0x1f88] sm:$0xf]  ;;  %v14544_v60 = vor.u32 %v17705_v54, %v14543_v53  ;;  %8465 = vmatpush.bf16.msra.mxu1 %v13776_v59  ;;  %v16997_v53 = vld [vmem:[#allocation2 + $0x3cc] sm:$0xf]  ;;  %v13396_v54 = vor.u32 %v17405_v46, %v13393_v47 }
  0xea   :  { %v17897_v56 = vld [vmem:[#allocation2 + $0x1fe4] sm:$0xf0]  ;;  %v17381_v59 = vld [vmem:[#allocation2 + $0xfcc] sm:$0xf] }
  0xeb   :  { %v12911_v61 = vld [vmem:[#allocation2 + $0xcc8] sm:$0xf]  ;;  %v15312_v1 = vor.u32 %v17897_v56, %v15311_v55  ;;  %8479 = vmatpush.bf16.msra.mxu2 %v14544_v60  ;;  %v11761_v55 = vld [vmem:[#allocation2 + $0x428] sm:$0xf0] }
  0xec   :  { %v17297_v62 = vld [vmem:[#allocation2 + $0xd24] sm:$0xf0]  ;;  %v17189_v56 = vld [vmem:[#allocation2 + $0x9cc] sm:$0xf] }
  0xed   :  { %v13679_v63 = vld [vmem:[#allocation2 + $0x12c8] sm:$0xf]  ;;  %v12912_v7 = vor.u32 %v17297_v62, %v12911_v61  ;;  %8493 = vmatpush.bf16.msra.mxu3 %v15312_v1  ;;  %v13297_v60 = vld [vmem:[#allocation2 + $0x1028] sm:$0xf0]  ;;  %v11764_v62 = vor.u32 %v16997_v53, %v11761_v55 }
  0xee   :  { %v17489_v2 = vld [vmem:[#allocation2 + $0x1324] sm:$0xf0]  ;;  %v8245_v25 = vpop.f32.mrf.mxu1  ;;  %v12145_v53 = vld [vmem:[#allocation2 + $0x728] sm:$0xf0] }
  0xef   :  { %v14447_v3 = vld [vmem:[#allocation2 + $0x18c8] sm:$0xf]  ;;  %v13680_v10 = vor.u32 %v17489_v2, %v13679_v63  ;;  %8452 = vmatpush.bf16.msra.mxu0 %v12912_v7  ;;  %v12532_v63 = vor.u32 %v17189_v56, %v12529_v58  ;;  %v12433_v7 = vld [vmem:[#allocation2 + $0x968] sm:$0xf0] }
  0xf0   :  { %v17681_v4 = vld [vmem:[#allocation2 + $0x1924] sm:$0xf0]  ;;  %v12913_v55 = vld [vmem:[#allocation2 + $0xd28] sm:$0xf0] }
  0xf1   :  { %v15215_v5 = vld [vmem:[#allocation2 + $0x1ec8] sm:$0xf]  ;;  %v14448_v12 = vor.u32 %v17681_v4, %v14447_v3  ;;  %8466 = vmatpush.bf16.msra.mxu1 %v13680_v10  ;;  %v16973_v3 = vld [vmem:[#allocation2 + $0x30c] sm:$0xf]  ;;  %v13300_v4 = vor.u32 %v17381_v59, %v13297_v60 }
  0xf2   :  { %v17873_v6 = vld [vmem:[#allocation2 + $0x1f24] sm:$0xf0] }
  0xf3   :  { %v12815_v8 = vld [vmem:[#allocation2 + $0xc08] sm:$0xf]  ;;  %v15216_v16 = vor.u32 %v17873_v6, %v15215_v5  ;;  %8480 = vmatpush.bf16.msra.mxu2 %v14448_v12  ;;  %v11665_v5 = vld [vmem:[#allocation2 + $0x368] sm:$0xf0] }
  0xf4   :  { %v17273_v9 = vld [vmem:[#allocation2 + $0xc64] sm:$0xf0]  ;;  %v17165_v6 = vld [vmem:[#allocation2 + $0x90c] sm:$0xf]  ;;  %v11668_v12 = vor.u32 %v16973_v3, %v11665_v5 }
  0xf5   :  { %v13583_v13 = vld [vmem:[#allocation2 + $0x1208] sm:$0xf]  ;;  %v12816_v24 = vor.u32 %v17273_v9, %v12815_v8  ;;  %8494 = vmatpush.bf16.msra.mxu3 %v15216_v16  ;;  %v17357_v8 = vld [vmem:[#allocation2 + $0xf0c] sm:$0xf] }
  0xf6   :  { %v17465_v14 = vld [vmem:[#allocation2 + $0x1264] sm:$0xf0]  ;;  %v13201_v9 = vld [vmem:[#allocation2 + $0xf68] sm:$0xf0] }
  0xf7   :  { %v14351_v15 = vld [vmem:[#allocation2 + $0x1808] sm:$0xf]  ;;  %v13584_v28 = vor.u32 %v17465_v14, %v13583_v13  ;;  %8453 = vmatpush.bf16.msra.mxu0 %v12816_v24  ;;  %v12436_v13 = vor.u32 %v17165_v6, %v12433_v7  ;;  %v16949_v16 = vld [vmem:[#allocation2 + $0x24c] sm:$0xf]  ;;  %v8231_v24 = vpop.f32.mrf.mxu0  ;;  %v8273_v6 = vpop.f32.mrf.mxu3 }
  0xf8   :  { %v17657_v17 = vld [vmem:[#allocation2 + $0x1864] sm:$0xf0]  ;;  %v8246_v27 = vadd.f32 %v8245_v25, %v8231_v24  ;;  %v12049_v3 = vld [vmem:[#allocation2 + $0x668] sm:$0xf0] }
  0xf9   :  { %v15119_v18 = vld [vmem:[#allocation2 + $0x1e08] sm:$0xf]  ;;  %v14352_v29 = vor.u32 %v17657_v17, %v14351_v15  ;;  %8467 = vmatpush.bf16.msra.mxu1 %v13584_v28  ;;  %v13204_v17 = vor.u32 %v17357_v8, %v13201_v9  ;;  %v12817_v5 = vld [vmem:[#allocation2 + $0xc68] sm:$0xf0] }
  0xfa   :  { %v17849_v19 = vld [vmem:[#allocation2 + $0x1e64] sm:$0xf0]  ;;  %8454 = vmatmul.bf16.vlgmr.msra.gmra.mxu0 %v18530_v0  ;;  %v17621_v7 = vld [vmem:[#allocation2 + $0x174c] sm:$0xf] }
  0xfb   :  { %v16559_v20 = vld [vmem:[#allocation2 + $0x2948] sm:$0xf]  ;;  %v15120_v32 = vor.u32 %v17849_v19, %v15119_v18  ;;  %8481 = vmatpush.bf16.msra.mxu2 %v14352_v29  ;;  %v11569_v18 = vld [vmem:[#allocation2 + $0x2a8] sm:$0xf0] }
  0xfc   :  { %v18209_v21 = vld [vmem:[#allocation2 + $0x29a4] sm:$0xf0]  ;;  %8468 = vmatmul.bf16.vlgmr.msra.gmra.mxu1 %v18549_v23  ;;  %v17141_v19 = vld [vmem:[#allocation2 + $0x84c] sm:$0xf]  ;;  %v11572_v28 = vor.u32 %v16949_v16, %v11569_v18 }
  0xfd   :  { %v16560_v33 = vor.u32 %v18209_v21, %v16559_v20  ;;  %v16463_v36 = vld [vmem:[#allocation2 + $0x2888] sm:$0xf]  ;;  %8495 = vmatpush.bf16.msra.mxu3 %v15120_v32  ;;  %8516 = vmatpush.bf16.msrb.mxu1 %v11956_v34  ;;  %v12337_v20 = vld [vmem:[#allocation2 + $0x8a8] sm:$0xf0] }
  0xfe   :  { %v18185_v38 = vld [vmem:[#allocation2 + $0x28e4] sm:$0xf0]  ;;  %8482 = vmatmul.bf16.vlgmr.msra.gmra.mxu2 %v18570_v37  ;;  %v17333_v21 = vld [vmem:[#allocation2 + $0xe4c] sm:$0xf]  ;;  %v12340_v29 = vor.u32 %v17141_v19, %v12337_v20 }
  0xff   :  { %8502 = vmatpush.bf16.msrb.mxu0 %v16560_v33  ;;  %v16464_v48 = vor.u32 %v18185_v38, %v16463_v36  ;;  %8530 = vmatpush.bf16.msrb.mxu2 %v12724_v35  ;;  %v16367_v51 = vld [vmem:[#allocation2 + $0x27c8] sm:$0xf]  ;;  %v16925_v32 = vld [vmem:[#allocation2 + $0x18c] sm:$0xf]  ;;  %v13108_v33 = vor.u32 %v17333_v21, %v13105_v22  ;;  %v8259_v38 = vpop.f32.mrf.mxu2  ;;  %v18594_v25 = vpop.f32.mrf.mxu0 }
 0x100   :  { %v18161_v52 = vld [vmem:[#allocation2 + $0x2824] sm:$0xf0]  ;;  %8496 = vmatmul.bf16.vlgmr.msra.gmra.mxu3 %v18574_v42  ;;  %v11473_v34 = vld [vmem:[#allocation2 + $0x1e8] sm:$0xf0]  ;;  %v8260_v43 = vadd.f32 %v8259_v38, %v8246_v27 }
 0x101   :  { %8544 = vmatpush.bf16.msrb.mxu3 %v13492_v40  ;;  %v16368_v61 = vor.u32 %v18161_v52, %v16367_v51  ;;  %8517 = vmatpush.bf16.msrb.mxu1 %v11860_v49  ;;  %v16271_v1 = vld [vmem:[#allocation2 + $0x2708] sm:$0xf]  ;;  %v17117_v35 = vld [vmem:[#allocation2 + $0x78c] sm:$0xf]  ;;  %v11476_v45 = vor.u32 %v16925_v32, %v11473_v34 }
 0x102   :  { %v18137_v2 = vld [vmem:[#allocation2 + $0x2764] sm:$0xf0]  ;;  %v12241_v36 = vld [vmem:[#allocation2 + $0x7e8] sm:$0xf0] }
 0x103   :  { %8503 = vmatpush.bf16.msrb.mxu0 %v16464_v48  ;;  %8531 = vmatpush.bf16.msrb.mxu2 %v12628_v50  ;;  %v16272_v10 = vor.u32 %v18137_v2, %v16271_v1  ;;  %v16175_v14 = vld [vmem:[#allocation2 + $0x2648] sm:$0xf]  ;;  %v13009_v40 = vld [vmem:[#allocation2 + $0xde8] sm:$0xf0]  ;;  %v12244_v46 = vor.u32 %v17117_v35, %v12241_v36  ;;  %v18596_v35 = vpop.f32.mrf.mxu1 }
 0x104   :  { %v18113_v15 = vld [vmem:[#allocation2 + $0x26a4] sm:$0xf0]  ;;  %v16901_v49 = vld [vmem:[#allocation2 + $0xcc] sm:$0xf]  ;;  %v13012_v50 = vor.u32 %v17309_v39, %v13009_v40 }
 0x105   :  { %8545 = vmatpush.bf16.msrb.mxu3 %v13396_v54  ;;  %8518 = vmatpush.bf16.msrb.mxu1 %v11764_v62  ;;  %v16176_v26 = vor.u32 %v18113_v15, %v16175_v14  ;;  %v16079_v30 = vld [vmem:[#allocation2 + $0x2588] sm:$0xf]  ;;  %v11377_v51 = vld [vmem:[#allocation2 + $0x128] sm:$0xf0] }
 0x106   :  { %v18089_v31 = vld [vmem:[#allocation2 + $0x25e4] sm:$0xf0]  ;;  %v17093_v52 = vld [vmem:[#allocation2 + $0x6cc] sm:$0xf]  ;;  %v11380_v60 = vor.u32 %v16901_v49, %v11377_v51 }
 0x107   :  { %8504 = vmatpush.bf16.msrb.mxu0 %v16368_v61  ;;  %8532 = vmatpush.bf16.msrb.mxu2 %v12532_v63  ;;  %v16080_v44 = vor.u32 %v18089_v31, %v16079_v30  ;;  %v15983_v47 = vld [vmem:[#allocation2 + $0x24c8] sm:$0xf]  ;;  %v17285_v54 = vld [vmem:[#allocation2 + $0xccc] sm:$0xf]  ;;  %v12148_v61 = vor.u32 %v17093_v52, %v12145_v53  ;;  %v18601_v52 = vpop.f32.mrf.mxu2 }
 0x108   :  { %v18065_v48 = vld [vmem:[#allocation2 + $0x2524] sm:$0xf0]  ;;  %v16877_v62 = vld [vmem:[#allocation2 + $0xc] sm:$0xf]  ;;  %v12916_v2 = vor.u32 %v17285_v54, %v12913_v55 }
 0x109   :  { %8546 = vmatpush.bf16.msrb.mxu3 %v13300_v4  ;;  %8519 = vmatpush.bf16.msrb.mxu1 %v11668_v12  ;;  %v15984_v56 = vor.u32 %v18065_v48, %v15983_v47  ;;  %v15887_v58 = vld [vmem:[#allocation2 + $0x2408] sm:$0xf]  ;;  %v11281_v63 = vld [vmem:[#allocation2 + $0x68] sm:$0xf0] }
 0x10a   :  { %v18041_v59 = vld [vmem:[#allocation2 + $0x2464] sm:$0xf0]  ;;  %v17069_v1 = vld [vmem:[#allocation2 + $0x60c] sm:$0xf]  ;;  %v11284_v16 = vor.u32 %v16877_v62, %v11281_v63 }
 0x10b   :  { %8505 = vmatpush.bf16.msrb.mxu0 %v16272_v10  ;;  %8533 = vmatpush.bf16.msrb.mxu2 %v12436_v13  ;;  %v17261_v4 = vld [vmem:[#allocation2 + $0xc0c] sm:$0xf]  ;;  %v18592_v10 = vadd.f32 %v8273_v6, %v8260_v43  ;;  %v15888_v12 = vor.u32 %v18041_v59, %v15887_v58  ;;  %v8287_v63 = vpop.f32.mrf.mxu0 }
 0x10c   :  { %v14257_v8 = vld [vmem:[#allocation2 + $0x17a8] sm:$0xf0]  ;;  %v12820_v20 = vor.u32 %v17261_v4, %v12817_v5 }
 0x10d   :  { %8547 = vmatpush.bf16.msrb.mxu3 %v13204_v17  ;;  %8520 = vmatpush.bf16.msrb.mxu1 %v11572_v28  ;;  %v17813_v9 = vld [vmem:[#allocation2 + $0x1d4c] sm:$0xf]  ;;  %v12052_v17 = vor.u32 %v17069_v1, %v12049_v3  ;;  %v14260_v21 = vor.u32 %v17621_v7, %v14257_v8  ;;  %v8288_v3 = vadd.f32 %v8287_v63, %v18592_v10  ;;  %v8301_v7 = vpop.f32.mrf.mxu1 }
 0x10e   :  { %v15025_v13 = vld [vmem:[#allocation2 + $0x1da8] sm:$0xf0] }
 0x10f   :  { %8506 = vmatpush.bf16.msrb.mxu0 %v16176_v26  ;;  %8534 = vmatpush.bf16.msrb.mxu2 %v12340_v29  ;;  %v18005_v14 = vld [vmem:[#allocation2 + $0x234c] sm:$0xf]  ;;  %v15028_v22 = vor.u32 %v17813_v9, %v15025_v13 }
 0x110   :  { %v15793_v15 = vld [vmem:[#allocation2 + $0x23a8] sm:$0xf0] }
 0x111   :  { %8548 = vmatpush.bf16.msrb.mxu3 %v13108_v33  ;;  %8521 = vmatpush.bf16.msrb.mxu1 %v11476_v45  ;;  %v18197_v18 = vld [vmem:[#allocation2 + $0x294c] sm:$0xf]  ;;  %v15796_v24 = vor.u32 %v18005_v14, %v15793_v15  ;;  %v8302_v14 = vadd.f32 %v8301_v7, %v8288_v3  ;;  %v11959_v3 = vld [vmem:[#allocation2 + $0x550] sm:$0xf] }
 0x112   :  { %v16561_v19 = vld [vmem:[#allocation2 + $0x29a8] sm:$0xf0]  ;;  %v17250_v7 = vld [vmem:[#allocation2 + $0xbac] sm:$0xf0] }
 0x113   :  { %8507 = vmatpush.bf16.msrb.mxu0 %v16080_v44  ;;  %8535 = vmatpush.bf16.msrb.mxu2 %v12244_v46  ;;  %v17597_v26 = vld [vmem:[#allocation2 + $0x168c] sm:$0xf]  ;;  %v16564_v29 = vor.u32 %v18197_v18, %v16561_v19 }
 0x114   :  { %v14161_v27 = vld [vmem:[#allocation2 + $0x16e8] sm:$0xf0] }
 0x115   :  { %8549 = vmatpush.bf16.msrb.mxu3 %v13012_v50  ;;  %8522 = vmatpush.bf16.msrb.mxu1 %v11380_v60  ;;  %v17789_v28 = vld [vmem:[#allocation2 + $0x1c8c] sm:$0xf]  ;;  %v14164_v36 = vor.u32 %v17597_v26, %v14161_v27 }
 0x116   :  { %v14929_v30 = vld [vmem:[#allocation2 + $0x1ce8] sm:$0xf0] }
 0x117   :  { %8508 = vmatpush.bf16.msrb.mxu0 %v15984_v56  ;;  %8536 = vmatpush.bf16.msrb.mxu2 %v12148_v61  ;;  %v17981_v31 = vld [vmem:[#allocation2 + $0x228c] sm:$0xf]  ;;  %v14932_v38 = vor.u32 %v17789_v28, %v14929_v30  ;;  %v8315_v28 = vpop.f32.mrf.mxu2 }
 0x118   :  { %v15697_v32 = vld [vmem:[#allocation2 + $0x22e8] sm:$0xf0] }
 0x119   :  { %8550 = vmatpush.bf16.msrb.mxu3 %v12916_v2  ;;  %8523 = vmatpush.bf16.msrb.mxu1 %v11284_v16  ;;  %v18173_v33 = vld [vmem:[#allocation2 + $0x288c] sm:$0xf]  ;;  %v15700_v39 = vor.u32 %v17981_v31, %v15697_v32  ;;  %v18605_v32 = vadd.f32 %v8315_v28, %v8302_v14  ;;  %v14263_v14 = vld [vmem:[#allocation2 + $0x1750] sm:$0xf] }
 0x11a   :  { %v16465_v34 = vld [vmem:[#allocation2 + $0x28e8] sm:$0xf0]  ;;  %v17418_v28 = vld [vmem:[#allocation2 + $0x10ec] sm:$0xf0] }
 0x11b   :  { %8509 = vmatpush.bf16.msrb.mxu0 %v15888_v12  ;;  %8537 = vmatpush.bf16.msrb.mxu2 %v12052_v17  ;;  %v17573_v40 = vld [vmem:[#allocation2 + $0x15cc] sm:$0xf]  ;;  %v16468_v45 = vor.u32 %v18173_v33, %v16465_v34 }
 0x11c   :  { %v14065_v43 = vld [vmem:[#allocation2 + $0x1628] sm:$0xf0]  ;;  %8524 = vmatmul.bf16.vlgmr.msrb.gmra.mxu1 %v18525_v57 }
 0x11d   :  { %8551 = vmatpush.bf16.msrb.mxu3 %v12820_v20  ;;  %8572 = vmatpush.bf16.msra.mxu1 %v15028_v22  ;;  %v17765_v44 = vld [vmem:[#allocation2 + $0x1bcc] sm:$0xf]  ;;  %v14068_v51 = vor.u32 %v17573_v40, %v14065_v43 }
 0x11e   :  { %8510 = vmatmul.bf16.vlgmr.msrb.gmra.mxu0 %v18572_v41  ;;  %v14833_v46 = vld [vmem:[#allocation2 + $0x1c28] sm:$0xf0]  ;;  %8538 = vmatmul.bf16.vlgmr.msrb.gmra.mxu2 %v18540_v11 }
 0x11f   :  { %8558 = vmatpush.bf16.msra.mxu0 %v14260_v21  ;;  %8586 = vmatpush.bf16.msra.mxu2 %v15796_v24  ;;  %v17957_v47 = vld [vmem:[#allocation2 + $0x21cc] sm:$0xf]  ;;  %v14836_v53 = vor.u32 %v17765_v44, %v14833_v46 }
 0x120   :  { %v15601_v48 = vld [vmem:[#allocation2 + $0x2228] sm:$0xf0]  ;;  %8552 = vmatmul.bf16.vlgmr.msrb.gmra.mxu3 %v18530_v0 }
 0x121   :  { %8600 = vmatpush.bf16.msra.mxu3 %v16564_v29  ;;  %v18149_v49 = vld [vmem:[#allocation2 + $0x27cc] sm:$0xf]  ;;  %8573 = vmatpush.bf16.msra.mxu1 %v14932_v38  ;;  %v15604_v54 = vor.u32 %v17957_v47, %v15601_v48 }
 0x122   :  { %v16369_v50 = vld [vmem:[#allocation2 + $0x2828] sm:$0xf0] }
 0x123   :  { %8559 = vmatpush.bf16.msra.mxu0 %v14164_v36  ;;  %8587 = vmatpush.bf16.msra.mxu2 %v15700_v39  ;;  %v17549_v55 = vld [vmem:[#allocation2 + $0x150c] sm:$0xf]  ;;  %v16372_v59 = vor.u32 %v18149_v49, %v16369_v50 }
 0x124   :  { %v13969_v56 = vld [vmem:[#allocation2 + $0x1568] sm:$0xf0] }
 0x125   :  { %v17741_v58 = vld [vmem:[#allocation2 + $0x1b0c] sm:$0xf]  ;;  %8601 = vmatpush.bf16.msra.mxu3 %v16468_v45  ;;  %v13972_v4 = vor.u32 %v17549_v55, %v13969_v56  ;;  %8574 = vmatpush.bf16.msra.mxu1 %v14836_v53  ;;  %v18607_v45 = vpop.f32.mrf.mxu3 }
 0x126   :  { %v14737_v60 = vld [vmem:[#allocation2 + $0x1b68] sm:$0xf0] }
 0x127   :  { %v17933_v61 = vld [vmem:[#allocation2 + $0x210c] sm:$0xf]  ;;  %8560 = vmatpush.bf16.msra.mxu0 %v14068_v51  ;;  %8588 = vmatpush.bf16.msra.mxu2 %v15604_v54  ;;  %v14740_v5 = vor.u32 %v17741_v58, %v14737_v60 }
 0x128   :  { %v15505_v62 = vld [vmem:[#allocation2 + $0x2168] sm:$0xf0] }
 0x129   :  { %v18125_v1 = vld [vmem:[#allocation2 + $0x270c] sm:$0xf]  ;;  %v15508_v6 = vor.u32 %v17933_v61, %v15505_v62  ;;  %8602 = vmatpush.bf16.msra.mxu3 %v16372_v59  ;;  %8575 = vmatpush.bf16.msra.mxu1 %v14740_v5  ;;  %v12727_v5 = vld [vmem:[#allocation2 + $0xb50] sm:$0xf] }
 0x12a   :  { %v16273_v2 = vld [vmem:[#allocation2 + $0x2768] sm:$0xf0] }
 0x12b   :  { %v17525_v8 = vld [vmem:[#allocation2 + $0x144c] sm:$0xf]  ;;  %v16276_v13 = vor.u32 %v18125_v1, %v16273_v2  ;;  %8561 = vmatpush.bf16.msra.mxu0 %v13972_v4  ;;  %8589 = vmatpush.bf16.msra.mxu2 %v15508_v6  ;;  %v17058_v4 = vld [vmem:[#allocation2 + $0x5ac] sm:$0xf0] }
 0x12c   :  { %v13873_v9 = vld [vmem:[#allocation2 + $0x14a8] sm:$0xf0] }
 0x12d   :  { %v17717_v12 = vld [vmem:[#allocation2 + $0x1a4c] sm:$0xf]  ;;  %v13876_v20 = vor.u32 %v17525_v8, %v13873_v9  ;;  %8603 = vmatpush.bf16.msra.mxu3 %v16276_v13  ;;  %v13495_v8 = vld [vmem:[#allocation2 + $0x1150] sm:$0xf] }
 0x12e   :  { %v14641_v15 = vld [vmem:[#allocation2 + $0x1aa8] sm:$0xf0]  ;;  %v17442_v9 = vld [vmem:[#allocation2 + $0x11ac] sm:$0xf0] }
 0x12f   :  { %v17909_v16 = vld [vmem:[#allocation2 + $0x204c] sm:$0xf]  ;;  %v14644_v10 = vor.u32 %v17717_v12, %v14641_v15  ;;  %8562 = vmatpush.bf16.msra.mxu0 %v13876_v20  ;;  %v17634_v15 = vld [vmem:[#allocation2 + $0x17ac] sm:$0xf0]  ;;  %v13496_v20 = vor.u32 %v17442_v9, %v13495_v8 }
 0x130   :  { %v15409_v17 = vld [vmem:[#allocation2 + $0x20a8] sm:$0xf0] }
 0x131   :  { %v18101_v18 = vld [vmem:[#allocation2 + $0x264c] sm:$0xf]  ;;  %v15412_v21 = vor.u32 %v17909_v16, %v15409_v17  ;;  %8576 = vmatpush.bf16.msra.mxu1 %v14644_v10  ;;  %v11960_v17 = vor.u32 %v17058_v4, %v11959_v3  ;;  %v11863_v10 = vld [vmem:[#allocation2 + $0x490] sm:$0xf] }
 0x132   :  { %v16177_v19 = vld [vmem:[#allocation2 + $0x26a8] sm:$0xf0]  ;;  %v13975_v3 = vld [vmem:[#allocation2 + $0x1510] sm:$0xf] }
 0x133   :  { %v17501_v22 = vld [vmem:[#allocation2 + $0x138c] sm:$0xf]  ;;  %v16180_v27 = vor.u32 %v18101_v18, %v16177_v19  ;;  %8590 = vmatpush.bf16.msra.mxu2 %v15412_v21  ;;  %v8329_v18 = vpop.f32.mrf.mxu3  ;;  %v12728_v19 = vor.u32 %v17250_v7, %v12727_v5  ;;  %v17034_v21 = vld [vmem:[#allocation2 + $0x4ec] sm:$0xf0] }
 0x134   :  { %v13777_v24 = vld [vmem:[#allocation2 + $0x13e8] sm:$0xf0]  ;;  %v17562_v4 = vld [vmem:[#allocation2 + $0x156c] sm:$0xf0] }
 0x135   :  { %v17693_v26 = vld [vmem:[#allocation2 + $0x198c] sm:$0xf]  ;;  %v13780_v36 = vor.u32 %v17501_v22, %v13777_v24  ;;  %8604 = vmatpush.bf16.msra.mxu3 %v16180_v27  ;;  %v12631_v22 = vld [vmem:[#allocation2 + $0xa90] sm:$0xf]  ;;  %v14264_v24 = vor.u32 %v17634_v15, %v14263_v14  ;;  %v13976_v15 = vor.u32 %v17562_v4, %v13975_v3 }
 0x136   :  { %v14545_v29 = vld [vmem:[#allocation2 + $0x19e8] sm:$0xf0]  ;;  %v13399_v27 = vld [vmem:[#allocation2 + $0x1090] sm:$0xf] }
 0x137   :  { %v17885_v30 = vld [vmem:[#allocation2 + $0x1f8c] sm:$0xf]  ;;  %v14548_v38 = vor.u32 %v17693_v26, %v14545_v29  ;;  %8563 = vmatpush.bf16.msra.mxu0 %v13780_v36  ;;  %v17226_v26 = vld [vmem:[#allocation2 + $0xaec] sm:$0xf0]  ;;  %v18609_v29 = vpop.f32.mrf.mxu0 }
 0x138   :  { %v15313_v31 = vld [vmem:[#allocation2 + $0x1fe8] sm:$0xf0]  ;;  %v12632_v36 = vor.u32 %v17226_v26, %v12631_v22  ;;  %v12343_v14 = vld [vmem:[#allocation2 + $0x850] sm:$0xf] }
 0x139   :  { %v18077_v33 = vld [vmem:[#allocation2 + $0x258c] sm:$0xf]  ;;  %v15316_v39 = vor.u32 %v17885_v30, %v15313_v31  ;;  %8577 = vmatpush.bf16.msra.mxu1 %v14548_v38  ;;  %v14167_v30 = vld [vmem:[#allocation2 + $0x1690] sm:$0xf]  ;;  %v13400_v38 = vor.u32 %v17418_v28, %v13399_v27 }
 0x13a   :  { %v16081_v34 = vld [vmem:[#allocation2 + $0x25e8] sm:$0xf0]  ;;  %v17610_v31 = vld [vmem:[#allocation2 + $0x16ec] sm:$0xf0] }
 0x13b   :  { %v17477_v40 = vld [vmem:[#allocation2 + $0x12cc] sm:$0xf]  ;;  %v16084_v46 = vor.u32 %v18077_v33, %v16081_v34  ;;  %8591 = vmatpush.bf16.msra.mxu2 %v15316_v39  ;;  %v11864_v33 = vor.u32 %v17034_v21, %v11863_v10  ;;  %v18611_v34 = vpop.f32.mrf.mxu1  ;;  %v11767_v39 = vld [vmem:[#allocation2 + $0x3d0] sm:$0xf] }
 0x13c   :  { %v13681_v43 = vld [vmem:[#allocation2 + $0x1328] sm:$0xf0]  ;;  %19390 = vst [vmem:[#allocation17_spill] sm:$0xff] %v18611_v34  ;;  %v13879_v10 = vld [vmem:[#allocation2 + $0x1450] sm:$0xf] }
 0x13d   :  { %v17669_v44 = vld [vmem:[#allocation2 + $0x18cc] sm:$0xf]  ;;  %v13684_v53 = vor.u32 %v17477_v40, %v13681_v43  ;;  %8605 = vmatpush.bf16.msra.mxu3 %v16084_v46  ;;  %v17010_v40 = vld [vmem:[#allocation2 + $0x42c] sm:$0xf0] }
 0x13e   :  { %v14449_v47 = vld [vmem:[#allocation2 + $0x1928] sm:$0xf0]  ;;  %v12535_v43 = vld [vmem:[#allocation2 + $0x9d0] sm:$0xf] }
 0x13f   :  { %v17861_v48 = vld [vmem:[#allocation2 + $0x1ecc] sm:$0xf]  ;;  %v14452_v56 = vor.u32 %v17669_v44, %v14449_v47  ;;  %8564 = vmatpush.bf16.msra.mxu0 %v13684_v53  ;;  %v14168_v44 = vor.u32 %v17610_v31, %v14167_v30  ;;  %v17202_v46 = vld [vmem:[#allocation2 + $0xa2c] sm:$0xf0] }
 0x140   :  { %v15217_v49 = vld [vmem:[#allocation2 + $0x1f28] sm:$0xf0]  ;;  %v13303_v47 = vld [vmem:[#allocation2 + $0xfd0] sm:$0xf]  ;;  %v12536_v53 = vor.u32 %v17202_v46, %v12535_v43 }
 0x141   :  { %v18053_v50 = vld [vmem:[#allocation2 + $0x24cc] sm:$0xf]  ;;  %v15220_v58 = vor.u32 %v17861_v48, %v15217_v49  ;;  %8578 = vmatpush.bf16.msra.mxu1 %v14452_v56  ;;  %v17394_v48 = vld [vmem:[#allocation2 + $0x102c] sm:$0xf0] }
 0x142   :  { %v15985_v51 = vld [vmem:[#allocation2 + $0x2528] sm:$0xf0]  ;;  %v14071_v49 = vld [vmem:[#allocation2 + $0x15d0] sm:$0xf] }
 0x143   :  { %v17453_v54 = vld [vmem:[#allocation2 + $0x120c] sm:$0xf]  ;;  %v15988_v62 = vor.u32 %v18053_v50, %v15985_v51  ;;  %8592 = vmatpush.bf16.msra.mxu2 %v15220_v58  ;;  %v17586_v50 = vld [vmem:[#allocation2 + $0x162c] sm:$0xf0]  ;;  %v11768_v51 = vor.u32 %v17010_v40, %v11767_v39  ;;  %v8357_v9 = vpop.f32.mrf.mxu1 }
 0x144   :  { %v13585_v55 = vld [vmem:[#allocation2 + $0x1268] sm:$0xf0]  ;;  %v16986_v56 = vld [vmem:[#allocation2 + $0x36c] sm:$0xf0] }
 0x145   :  { %v17645_v59 = vld [vmem:[#allocation2 + $0x180c] sm:$0xf]  ;;  %v13588_v6 = vor.u32 %v17453_v54, %v13585_v55  ;;  %8606 = vmatpush.bf16.msra.mxu3 %v15988_v62  ;;  %v13304_v54 = vor.u32 %v17394_v48, %v13303_v47  ;;  %v11671_v55 = vld [vmem:[#allocation2 + $0x310] sm:$0xf] }
 0x146   :  { %v14353_v60 = vld [vmem:[#allocation2 + $0x1868] sm:$0xf0]  ;;  %v12439_v58 = vld [vmem:[#allocation2 + $0x910] sm:$0xf] }
 0x147   :  { %v17837_v61 = vld [vmem:[#allocation2 + $0x1e0c] sm:$0xf]  ;;  %v14356_v12 = vor.u32 %v17645_v59, %v14353_v60  ;;  %8565 = vmatpush.bf16.msra.mxu0 %v13588_v6  ;;  %v18617_v59 = vpop.f32.mrf.mxu2  ;;  %v14072_v60 = vor.u32 %v17586_v50, %v14071_v49  ;;  %v17178_v62 = vld [vmem:[#allocation2 + $0x96c] sm:$0xf0]  ;;  %v11672_v6 = vor.u32 %v16986_v56, %v11671_v55 }
 0x148   :  { %v15121_v63 = vld [vmem:[#allocation2 + $0x1e68] sm:$0xf0]  ;;  %19391 = vst [vmem:[#allocation18_spill] sm:$0xff] %v18617_v59  ;;  %v12440_v7 = vor.u32 %v17178_v62, %v12439_v58  ;;  %v17538_v21 = vld [vmem:[#allocation2 + $0x14ac] sm:$0xf0] }
 0x149   :  { %v18029_v1 = vld [vmem:[#allocation2 + $0x240c] sm:$0xf]  ;;  %v15124_v13 = vor.u32 %v17837_v61, %v15121_v63  ;;  %8579 = vmatpush.bf16.msra.mxu1 %v14356_v12  ;;  %v18619_v61 = vpop.f32.mrf.mxu3  ;;  %v13207_v63 = vld [vmem:[#allocation2 + $0xf10] sm:$0xf]  ;;  %v13880_v30 = vor.u32 %v17538_v21, %v13879_v10 }
 0x14a   :  { %v15889_v2 = vld [vmem:[#allocation2 + $0x2468] sm:$0xf0]  ;;  %8566 = vmatmul.bf16.vlgmr.msra.gmra.mxu0 %v18549_v23  ;;  %v11575_v12 = vld [vmem:[#allocation2 + $0x250] sm:$0xf] }
 0x14b   :  { %v15892_v16 = vor.u32 %v18029_v1, %v15889_v2  ;;  %8593 = vmatpush.bf16.msra.mxu2 %v15124_v13  ;;  %8614 = vmatpush.bf16.msrb.mxu0 %v11960_v17  ;;  %v17370_v1 = vld [vmem:[#allocation2 + $0xf6c] sm:$0xf0]  ;;  %v8343_v2 = vpop.f32.mrf.mxu0  ;;  %v17025_v59 = vld [vmem:[#allocation2 + $0x4ac] sm:$0xf] }
 0x14c   :  { %8580 = vmatmul.bf16.vlgmr.msra.gmra.mxu1 %v18570_v37  ;;  %v8344_v5 = vadd.f32 %v8343_v2, %v8329_v18  ;;  %v13208_v8 = vor.u32 %v17370_v1, %v13207_v63  ;;  %v16962_v13 = vld [vmem:[#allocation2 + $0x2ac] sm:$0xf0] }
 0x14d   :  { %8607 = vmatpush.bf16.msra.mxu3 %v15892_v16  ;;  %8628 = vmatpush.bf16.msrb.mxu1 %v12728_v19  ;;  %v17154_v17 = vld [vmem:[#allocation2 + $0x8ac] sm:$0xf0]  ;;  %v11576_v22 = vor.u32 %v16962_v13, %v11575_v12 }
 0x14e   :  { %8594 = vmatmul.bf16.vlgmr.msra.gmra.mxu2 %v18574_v42  ;;  %v8358_v16 = vadd.f32 %v8357_v9, %v8344_v5  ;;  %v13111_v19 = vld [vmem:[#allocation2 + $0xe50] sm:$0xf]  ;;  %v12344_v18 = vor.u32 %v17154_v17, %v12343_v14 }
 0x14f   :  { %8642 = vmatpush.bf16.msrb.mxu2 %v13496_v20  ;;  %8615 = vmatpush.bf16.msrb.mxu0 %v11864_v33  ;;  %v17346_v20 = vld [vmem:[#allocation2 + $0xeac] sm:$0xf0]  ;;  %v8371_v31 = vpop.f32.mrf.mxu2 }
 0x150   :  { %8608 = vmatmul.bf16.vlgmr.msra.gmra.mxu3 %v18572_v41  ;;  %v11479_v26 = vld [vmem:[#allocation2 + $0x190] sm:$0xf]  ;;  %v8372_v39 = vadd.f32 %v8371_v31, %v8358_v16 }
 0x151   :  { %8656 = vmatpush.bf16.msrb.mxu3 %v14264_v24  ;;  %8629 = vmatpush.bf16.msrb.mxu1 %v12632_v36  ;;  %v13112_v24 = vor.u32 %v17346_v20, %v13111_v19  ;;  %v16938_v27 = vld [vmem:[#allocation2 + $0x1ec] sm:$0xf0] }
 0x152   :  { %v12247_v28 = vld [vmem:[#allocation2 + $0x790] sm:$0xf]  ;;  %v11480_v46 = vor.u32 %v16938_v27, %v11479_v26 }
 0x153   :  { %8643 = vmatpush.bf16.msrb.mxu2 %v13400_v38  ;;  %8616 = vmatpush.bf16.msrb.mxu0 %v11768_v51  ;;  %v17130_v33 = vld [vmem:[#allocation2 + $0x7ec] sm:$0xf0] }
 0x154   :  { %v13015_v36 = vld [vmem:[#allocation2 + $0xd90] sm:$0xf]  ;;  %v12248_v48 = vor.u32 %v17130_v33, %v12247_v28 }
 0x155   :  { %8657 = vmatpush.bf16.msrb.mxu3 %v14168_v44  ;;  %8630 = vmatpush.bf16.msrb.mxu1 %v12536_v53  ;;  %v17322_v38 = vld [vmem:[#allocation2 + $0xdec] sm:$0xf0]  ;;  %v8385_v44 = vpop.f32.mrf.mxu3 }
 0x156   :  { %v13783_v40 = vld [vmem:[#allocation2 + $0x1390] sm:$0xf]  ;;  %v18621_v47 = vadd.f32 %v8385_v44, %v8372_v39  ;;  %v13016_v49 = vor.u32 %v17322_v38, %v13015_v36  ;;  %v18623_v44 = vpop.f32.mrf.mxu0 }
 0x157   :  { %8644 = vmatpush.bf16.msrb.mxu2 %v13304_v54  ;;  %8617 = vmatpush.bf16.msrb.mxu0 %v11672_v6  ;;  %v17514_v43 = vld [vmem:[#allocation2 + $0x13ec] sm:$0xf0] }
 0x158   :  { %v11383_v50 = vld [vmem:[#allocation2 + $0xd0] sm:$0xf]  ;;  %v13784_v54 = vor.u32 %v17514_v43, %v13783_v40 }
 0x159   :  { %8658 = vmatpush.bf16.msrb.mxu3 %v14072_v60  ;;  %8631 = vmatpush.bf16.msrb.mxu1 %v12440_v7  ;;  %v16914_v51 = vld [vmem:[#allocation2 + $0x12c] sm:$0xf0] }
 0x15a   :  { %v12151_v53 = vld [vmem:[#allocation2 + $0x6d0] sm:$0xf]  ;;  %v11384_v63 = vor.u32 %v16914_v51, %v11383_v50 }
 0x15b   :  { %8645 = vmatpush.bf16.msrb.mxu2 %v13208_v8  ;;  %8618 = vmatpush.bf16.msrb.mxu0 %v11576_v22  ;;  %v17106_v55 = vld [vmem:[#allocation2 + $0x72c] sm:$0xf0] }
 0x15c   :  { %v12919_v56 = vld [vmem:[#allocation2 + $0xcd0] sm:$0xf]  ;;  %v12152_v3 = vor.u32 %v17106_v55, %v12151_v53 }
 0x15d   :  { %8659 = vmatpush.bf16.msrb.mxu3 %v13976_v15  ;;  %8632 = vmatpush.bf16.msrb.mxu1 %v12344_v18  ;;  %v17298_v58 = vld [vmem:[#allocation2 + $0xd2c] sm:$0xf0]  ;;  %v17046_v18 = vld [vmem:[#allocation2 + $0x554] sm:$0xf] }
 0x15e   :  { %v13687_v60 = vld [vmem:[#allocation2 + $0x12d0] sm:$0xf]  ;;  %v12920_v4 = vor.u32 %v17298_v58, %v12919_v56 }
 0x15f   :  { %8646 = vmatpush.bf16.msrb.mxu2 %v13112_v24  ;;  %v17490_v62 = vld [vmem:[#allocation2 + $0x132c] sm:$0xf0]  ;;  %8619 = vmatpush.bf16.msrb.mxu0 %v11480_v46  ;;  %v11961_v24 = vld [vmem:[#allocation2 + $0x5b0] sm:$0xf0] }
 0x160   :  { %v11287_v1 = vld [vmem:[#allocation2 + $0x10] sm:$0xf]  ;;  %v13688_v8 = vor.u32 %v17490_v62, %v13687_v60  ;;  %v11964_v38 = vor.u32 %v17046_v18, %v11961_v24  ;;  %v17022_v46 = vld [vmem:[#allocation2 + $0x494] sm:$0xf] }
 0x161   :  { %8660 = vmatpush.bf16.msrb.mxu3 %v13880_v30  ;;  %v16890_v2 = vld [vmem:[#allocation2 + $0x6c] sm:$0xf0]  ;;  %8633 = vmatpush.bf16.msrb.mxu1 %v12248_v48  ;;  %v11865_v48 = vld [vmem:[#allocation2 + $0x4f0] sm:$0xf0] }
 0x162   :  { %v12055_v5 = vld [vmem:[#allocation2 + $0x610] sm:$0xf]  ;;  %v11288_v17 = vor.u32 %v16890_v2, %v11287_v1  ;;  %v11868_v58 = vor.u32 %v17022_v46, %v11865_v48  ;;  %v16998_v1 = vld [vmem:[#allocation2 + $0x3d4] sm:$0xf] }
 0x163   :  { %8647 = vmatpush.bf16.msrb.mxu2 %v13016_v49  ;;  %v17082_v6 = vld [vmem:[#allocation2 + $0x66c] sm:$0xf0]  ;;  %8620 = vmatpush.bf16.msrb.mxu0 %v11384_v63  ;;  %v18625_v49 = vpop.f32.mrf.mxu1  ;;  %v11769_v2 = vld [vmem:[#allocation2 + $0x430] sm:$0xf0] }
 0x164   :  { %v12823_v7 = vld [vmem:[#allocation2 + $0xc10] sm:$0xf]  ;;  %v12056_v21 = vor.u32 %v17082_v6, %v12055_v5  ;;  %19392 = vst [vmem:[#allocation19_spill] sm:$0xff] %v18625_v49 }
 0x165   :  { %8661 = vmatpush.bf16.msrb.mxu3 %v13784_v54  ;;  %v17274_v9 = vld [vmem:[#allocation2 + $0xc6c] sm:$0xf0]  ;;  %8634 = vmatpush.bf16.msrb.mxu1 %v12152_v3 }
 0x166   :  { %v13591_v12 = vld [vmem:[#allocation2 + $0x1210] sm:$0xf]  ;;  %v12824_v22 = vor.u32 %v17274_v9, %v12823_v7  ;;  %v18631_v9 = vpop.f32.mrf.mxu2 }
 0x167   :  { %v17466_v13 = vld [vmem:[#allocation2 + $0x126c] sm:$0xf0]  ;;  %8648 = vmatpush.bf16.msrb.mxu2 %v12920_v4  ;;  %8621 = vmatpush.bf16.msrb.mxu0 %v11288_v17  ;;  %19393 = vst [vmem:[#allocation20_spill] sm:$0xff] %v18631_v9  ;;  %v8399_v17 = vpop.f32.mrf.mxu0  ;;  %v12657_v9 = vld [vmem:[#allocation2 + $0xb08] sm:$0xf0] }
 0x168   :  { %v15031_v14 = vld [vmem:[#allocation2 + $0x1d50] sm:$0xf]  ;;  %v13592_v26 = vor.u32 %v17466_v13, %v13591_v12  ;;  %v11772_v12 = vor.u32 %v16998_v1, %v11769_v2 }
 0x169   :  { %v17826_v15 = vld [vmem:[#allocation2 + $0x1dac] sm:$0xf0]  ;;  %8662 = vmatpush.bf16.msrb.mxu3 %v13688_v8  ;;  %8635 = vmatpush.bf16.msrb.mxu1 %v12056_v21 }
 0x16a   :  { %v15799_v16 = vld [vmem:[#allocation2 + $0x2350] sm:$0xf]  ;;  %v15032_v27 = vor.u32 %v17826_v15, %v15031_v14  ;;  %8622 = vmatmul.bf16.vlgmr.msrb.gmra.mxu0 %v18525_v57 }
 0x16b   :  { %v18018_v19 = vld [vmem:[#allocation2 + $0x23ac] sm:$0xf0]  ;;  %8649 = vmatpush.bf16.msrb.mxu2 %v12824_v22  ;;  %v8413_v22 = vpop.f32.mrf.mxu1 }
 0x16c   :  { %v16567_v20 = vld [vmem:[#allocation2 + $0x2950] sm:$0xf]  ;;  %v15800_v28 = vor.u32 %v18018_v19, %v15799_v16  ;;  %8670 = vmatpush.bf16.msra.mxu0 %v15032_v27  ;;  %8636 = vmatmul.bf16.vlgmr.msrb.gmra.mxu1 %v18540_v11  ;;  %v18633_v16 = vpop.f32.mrf.mxu3  ;;  %v16974_v19 = vld [vmem:[#allocation2 + $0x314] sm:$0xf] }
 0x16d   :  { %v18210_v10 = vld [vmem:[#allocation2 + $0x29ac] sm:$0xf0]  ;;  %8663 = vmatpush.bf16.msrb.mxu3 %v13592_v26  ;;  %19394 = vst [vmem:[#allocation21_spill] sm:$0xff] %v18633_v16  ;;  %v14191_v16 = vld [vmem:[#allocation2 + $0x16a8] sm:$0xf] }
 0x16e   :  { %v16568_v30 = vor.u32 %v18210_v10, %v16567_v20  ;;  %v14935_v31 = vld [vmem:[#allocation2 + $0x1c90] sm:$0xf]  ;;  %8684 = vmatpush.bf16.msra.mxu1 %v15800_v28  ;;  %8650 = vmatmul.bf16.vlgmr.msrb.gmra.mxu2 %v18530_v0  ;;  %v11673_v20 = vld [vmem:[#allocation2 + $0x370] sm:$0xf0]  ;;  %v8400_v10 = vadd.f32 %v8399_v17, %v18621_v47 }
 0x16f   :  { %v17802_v33 = vld [vmem:[#allocation2 + $0x1cec] sm:$0xf0]  ;;  %v11385_v17 = vld [vmem:[#allocation2 + $0x130] sm:$0xf0] }
 0x170   :  { %v15703_v36 = vld [vmem:[#allocation2 + $0x2290] sm:$0xf]  ;;  %v14936_v50 = vor.u32 %v17802_v33, %v14935_v31  ;;  %8698 = vmatpush.bf16.msra.mxu2 %v16568_v30  ;;  %8664 = vmatmul.bf16.vlgmr.msrb.gmra.mxu3 %v18549_v23  ;;  %v11676_v30 = vor.u32 %v16974_v19, %v11673_v20  ;;  %v18636_v31 = vadd.f32 %v8413_v22, %v8400_v10 }
 0x171   :  { %v17994_v39 = vld [vmem:[#allocation2 + $0x22ec] sm:$0xf0]  ;;  %8712 = vmatpush.bf16.msra.mxu3 %v11964_v38 }
 0x172   :  { %v16471_v40 = vld [vmem:[#allocation2 + $0x2890] sm:$0xf]  ;;  %v15704_v51 = vor.u32 %v17994_v39, %v15703_v36  ;;  %8671 = vmatpush.bf16.msra.mxu0 %v14936_v50  ;;  %v16950_v39 = vld [vmem:[#allocation2 + $0x254] sm:$0xf] }
 0x173   :  { %v18186_v43 = vld [vmem:[#allocation2 + $0x28ec] sm:$0xf0] }
 0x174   :  { %v16472_v53 = vor.u32 %v18186_v43, %v16471_v40  ;;  %v14839_v54 = vld [vmem:[#allocation2 + $0x1bd0] sm:$0xf]  ;;  %8685 = vmatpush.bf16.msra.mxu1 %v15704_v51  ;;  %v11577_v40 = vld [vmem:[#allocation2 + $0x2b0] sm:$0xf0] }
 0x175   :  { %v17778_v55 = vld [vmem:[#allocation2 + $0x1c2c] sm:$0xf0]  ;;  %8713 = vmatpush.bf16.msra.mxu3 %v11868_v58  ;;  %v16926_v58 = vld [vmem:[#allocation2 + $0x194] sm:$0xf] }
 0x176   :  { %v15607_v56 = vld [vmem:[#allocation2 + $0x21d0] sm:$0xf]  ;;  %v14840_v3 = vor.u32 %v17778_v55, %v14839_v54  ;;  %8699 = vmatpush.bf16.msra.mxu2 %v16472_v53  ;;  %v11580_v53 = vor.u32 %v16950_v39, %v11577_v40  ;;  %v17430_v39 = vld [vmem:[#allocation2 + $0x1154] sm:$0xf] }
 0x177   :  { %v17970_v60 = vld [vmem:[#allocation2 + $0x222c] sm:$0xf0] }
 0x178   :  { %v16375_v62 = vld [vmem:[#allocation2 + $0x27d0] sm:$0xf]  ;;  %v15608_v4 = vor.u32 %v17970_v60, %v15607_v56  ;;  %8672 = vmatpush.bf16.msra.mxu0 %v14840_v3  ;;  %v11481_v60 = vld [vmem:[#allocation2 + $0x1f0] sm:$0xf0] }
 0x179   :  { %v18162_v63 = vld [vmem:[#allocation2 + $0x282c] sm:$0xf0]  ;;  %8714 = vmatpush.bf16.msra.mxu3 %v11772_v12 }
 0x17a   :  { %v16376_v5 = vor.u32 %v18162_v63, %v16375_v62  ;;  %v14743_v6 = vld [vmem:[#allocation2 + $0x1b10] sm:$0xf]  ;;  %8686 = vmatpush.bf16.msra.mxu1 %v15608_v4  ;;  %v8427_v62 = vpop.f32.mrf.mxu2  ;;  %v8441_v63 = vpop.f32.mrf.mxu3 }
 0x17b   :  { %v17754_v7 = vld [vmem:[#allocation2 + $0x1b6c] sm:$0xf0]  ;;  %v18638_v2 = vadd.f32 %v8441_v63, %v8427_v62  ;;  %v12633_v62 = vld [vmem:[#allocation2 + $0xaf0] sm:$0xf0] }
 0x17c   :  { %v15511_v8 = vld [vmem:[#allocation2 + $0x2110] sm:$0xf]  ;;  %v14744_v21 = vor.u32 %v17754_v7, %v14743_v6  ;;  %8700 = vmatpush.bf16.msra.mxu2 %v16376_v5  ;;  %v17406_v63 = vld [vmem:[#allocation2 + $0x1094] sm:$0xf] }
 0x17d   :  { %v17946_v13 = vld [vmem:[#allocation2 + $0x216c] sm:$0xf0]  ;;  %8715 = vmatpush.bf16.msra.mxu3 %v11676_v30  ;;  %v16878_v30 = vld [vmem:[#allocation2 + $0x14] sm:$0xf] }
 0x17e   :  { %v16279_v14 = vld [vmem:[#allocation2 + $0x2710] sm:$0xf]  ;;  %v15512_v18 = vor.u32 %v17946_v13, %v15511_v8  ;;  %8673 = vmatpush.bf16.msra.mxu0 %v14744_v21  ;;  %v11484_v8 = vor.u32 %v16926_v58, %v11481_v60  ;;  %v17214_v60 = vld [vmem:[#allocation2 + $0xa94] sm:$0xf] }
 0x17f   :  { %v18138_v15 = vld [vmem:[#allocation2 + $0x276c] sm:$0xf0] }
 0x180   :  { %v16280_v24 = vor.u32 %v18138_v15, %v16279_v14  ;;  %v14647_v26 = vld [vmem:[#allocation2 + $0x1a50] sm:$0xf]  ;;  %8687 = vmatpush.bf16.msra.mxu1 %v15512_v18  ;;  %v16902_v15 = vld [vmem:[#allocation2 + $0xd4] sm:$0xf] }
 0x181   :  { %v17730_v27 = vld [vmem:[#allocation2 + $0x1aac] sm:$0xf0]  ;;  %8716 = vmatpush.bf16.msra.mxu3 %v11580_v53  ;;  %v15033_v53 = vld [vmem:[#allocation2 + $0x1db0] sm:$0xf0] }
 0x182   :  { %v15415_v28 = vld [vmem:[#allocation2 + $0x2050] sm:$0xf]  ;;  %v14648_v47 = vor.u32 %v17730_v27, %v14647_v26  ;;  %8701 = vmatpush.bf16.msra.mxu2 %v16280_v24  ;;  %v11388_v27 = vor.u32 %v16902_v15, %v11385_v17  ;;  %v17190_v17 = vld [vmem:[#allocation2 + $0x9d4] sm:$0xf] }
 0x183   :  { %v17922_v33 = vld [vmem:[#allocation2 + $0x20ac] sm:$0xf0] }
 0x184   :  { %v16183_v36 = vld [vmem:[#allocation2 + $0x2650] sm:$0xf]  ;;  %v15416_v43 = vor.u32 %v17922_v33, %v15415_v28  ;;  %8674 = vmatpush.bf16.msra.mxu0 %v14648_v47  ;;  %v11289_v33 = vld [vmem:[#allocation2 + $0x70] sm:$0xf0] }
 0x185   :  { %v18114_v38 = vld [vmem:[#allocation2 + $0x26ac] sm:$0xf0]  ;;  %8717 = vmatpush.bf16.msra.mxu3 %v11484_v8  ;;  %v13497_v47 = vld [vmem:[#allocation2 + $0x11b0] sm:$0xf0] }
 0x186   :  { %v16184_v46 = vor.u32 %v18114_v38, %v16183_v36  ;;  %v14551_v48 = vld [vmem:[#allocation2 + $0x1990] sm:$0xf]  ;;  %8688 = vmatpush.bf16.msra.mxu1 %v15416_v43  ;;  %v17238_v36 = vld [vmem:[#allocation2 + $0xb54] sm:$0xf] }
 0x187   :  { %v17706_v50 = vld [vmem:[#allocation2 + $0x19ec] sm:$0xf0]  ;;  %v12729_v38 = vld [vmem:[#allocation2 + $0xbb0] sm:$0xf0] }
 0x188   :  { %v15319_v51 = vld [vmem:[#allocation2 + $0x1f90] sm:$0xf]  ;;  %v14552_v1 = vor.u32 %v17706_v50, %v14551_v48  ;;  %8702 = vmatpush.bf16.msra.mxu2 %v16184_v46  ;;  %v17622_v43 = vld [vmem:[#allocation2 + $0x1754] sm:$0xf] }
 0x189   :  { %v17898_v54 = vld [vmem:[#allocation2 + $0x1fec] sm:$0xf0]  ;;  %v14265_v46 = vld [vmem:[#allocation2 + $0x17b0] sm:$0xf0]  ;;  %8718 = vmatpush.bf16.msra.mxu3 %v11388_v27 }
 0x18a   :  { %v16087_v55 = vld [vmem:[#allocation2 + $0x2590] sm:$0xf]  ;;  %v15320_v3 = vor.u32 %v17898_v54, %v15319_v51  ;;  %8675 = vmatpush.bf16.msra.mxu0 %v14552_v1  ;;  %v17814_v51 = vld [vmem:[#allocation2 + $0x1d54] sm:$0xf]  ;;  %v11292_v54 = vor.u32 %v16878_v30, %v11289_v33  ;;  %v14268_v58 = vor.u32 %v17622_v43, %v14265_v46 }
 0x18b   :  { %v18090_v56 = vld [vmem:[#allocation2 + $0x25ec] sm:$0xf0]  ;;  %v15036_v1 = vor.u32 %v17814_v51, %v15033_v53  ;;  %v14937_v8 = vld [vmem:[#allocation2 + $0x1cf0] sm:$0xf0] }
 0x18c   :  { %v16088_v4 = vor.u32 %v18090_v56, %v16087_v55  ;;  %v14455_v5 = vld [vmem:[#allocation2 + $0x18d0] sm:$0xf]  ;;  %8689 = vmatpush.bf16.msra.mxu1 %v15320_v3  ;;  %v12732_v55 = vor.u32 %v17238_v36, %v12729_v38  ;;  %v13500_v56 = vor.u32 %v17430_v39, %v13497_v47  ;;  %v13401_v3 = vld [vmem:[#allocation2 + $0x10f0] sm:$0xf0]  ;;  %v18650_v47 = vpop.f32.mrf.mxu3 }
 0x18d   :  { %v17682_v6 = vld [vmem:[#allocation2 + $0x192c] sm:$0xf0]  ;;  %8719 = vmatpush.bf16.msra.mxu3 %v11292_v54  ;;  %v17166_v36 = vld [vmem:[#allocation2 + $0x914] sm:$0xf] }
 0x18e   :  { %v15223_v7 = vld [vmem:[#allocation2 + $0x1ed0] sm:$0xf]  ;;  %v14456_v19 = vor.u32 %v17682_v6, %v14455_v5  ;;  %8703 = vmatpush.bf16.msra.mxu2 %v16088_v4  ;;  %v17598_v4 = vld [vmem:[#allocation2 + $0x1694] sm:$0xf]  ;;  %v18640_v6 = vpop.f32.mrf.mxu0 }
 0x18f   :  { %v17874_v12 = vld [vmem:[#allocation2 + $0x1f2c] sm:$0xf0]  ;;  %v14169_v5 = vld [vmem:[#allocation2 + $0x16f0] sm:$0xf0]  ;;  %19395 = vst [vmem:[#allocation22_spill] sm:$0xff] %v18640_v6 }
 0x190   :  { %v15991_v13 = vld [vmem:[#allocation2 + $0x24d0] sm:$0xf]  ;;  %v15224_v21 = vor.u32 %v17874_v12, %v15223_v7  ;;  %8676 = vmatpush.bf16.msra.mxu0 %v14456_v19  ;;  %v17790_v7 = vld [vmem:[#allocation2 + $0x1c94] sm:$0xf]  ;;  %v12636_v12 = vor.u32 %v17214_v60, %v12633_v62  ;;  %v14172_v15 = vor.u32 %v17598_v4, %v14169_v5  ;;  %8720 = vmatmul.bf16.vlgmr.msra.gmra.mxu3 %v18525_v57  ;;  %v17037_v6 = vld [vmem:[#allocation2 + $0x504] sm:$0xf0] }
 0x191   :  { %v18066_v14 = vld [vmem:[#allocation2 + $0x252c] sm:$0xf0]  ;;  %v12537_v19 = vld [vmem:[#allocation2 + $0xa30] sm:$0xf0]  ;;  %8768 = vmatpush.bf16.msrb.mxu3 %v15036_v1 }
 0x192   :  { %v14359_v20 = vld [vmem:[#allocation2 + $0x1810] sm:$0xf]  ;;  %v15992_v22 = vor.u32 %v18066_v14, %v15991_v13  ;;  %8690 = vmatpush.bf16.msra.mxu1 %v15224_v21  ;;  %v18642_v13 = vpop.f32.mrf.mxu1  ;;  %v13404_v14 = vor.u32 %v17406_v63, %v13401_v3  ;;  %v13305_v21 = vld [vmem:[#allocation2 + $0x1030] sm:$0xf0]  ;;  %v12540_v27 = vor.u32 %v17190_v17, %v12537_v19 }
 0x193   :  { %v17658_v10 = vld [vmem:[#allocation2 + $0x186c] sm:$0xf0]  ;;  %19396 = vst [vmem:[#allocation23_spill] sm:$0xff] %v18642_v13  ;;  %v12441_v38 = vld [vmem:[#allocation2 + $0x970] sm:$0xf0] }
 0x194   :  { %v15127_v18 = vld [vmem:[#allocation2 + $0x1e10] sm:$0xf]  ;;  %v14360_v40 = vor.u32 %v17658_v10, %v14359_v20  ;;  %8704 = vmatpush.bf16.msra.mxu2 %v15992_v22  ;;  %v17382_v20 = vld [vmem:[#allocation2 + $0xfd4] sm:$0xf]  ;;  %v14940_v10 = vor.u32 %v17790_v7, %v14937_v8 }
 0x195   :  { %v17850_v24 = vld [vmem:[#allocation2 + $0x1e6c] sm:$0xf0]  ;;  %v17574_v22 = vld [vmem:[#allocation2 + $0x15d4] sm:$0xf]  ;;  %v13308_v30 = vor.u32 %v17382_v20, %v13305_v21 }
 0x196   :  { %v15895_v26 = vld [vmem:[#allocation2 + $0x2410] sm:$0xf]  ;;  %v15128_v48 = vor.u32 %v17850_v24, %v15127_v18  ;;  %8677 = vmatpush.bf16.msra.mxu0 %v14360_v40  ;;  %v14073_v18 = vld [vmem:[#allocation2 + $0x1630] sm:$0xf0]  ;;  %8769 = vmatpush.bf16.msrb.mxu3 %v14940_v10 }
 0x197   :  { %v18042_v28 = vld [vmem:[#allocation2 + $0x246c] sm:$0xf0]  ;;  %v17766_v24 = vld [vmem:[#allocation2 + $0x1bd4] sm:$0xf]  ;;  %v14076_v33 = vor.u32 %v17574_v22, %v14073_v18 }
 0x198   :  { %v15896_v50 = vor.u32 %v18042_v28, %v15895_v26  ;;  %8691 = vmatpush.bf16.msra.mxu1 %v15128_v48  ;;  %v14841_v26 = vld [vmem:[#allocation2 + $0x1c30] sm:$0xf0]  ;;  %v18647_v28 = vpop.f32.mrf.mxu2 }
 0x199   :  { %8678 = vmatmul.bf16.vlgmr.msra.gmra.mxu0 %v18570_v37  ;;  %v17358_v39 = vld [vmem:[#allocation2 + $0xf14] sm:$0xf]  ;;  %v14844_v40 = vor.u32 %v17766_v24, %v14841_v26 }
 0x19a   :  { %8705 = vmatpush.bf16.msra.mxu2 %v15896_v50  ;;  %8726 = vmatpush.bf16.msrb.mxu0 %v12732_v55  ;;  %v13209_v43 = vld [vmem:[#allocation2 + $0xf70] sm:$0xf0]  ;;  %v8455_v50 = vpop.f32.mrf.mxu0  ;;  %v12444_v55 = vor.u32 %v17166_v36, %v12441_v38  ;;  %v8469_v60 = vpop.f32.mrf.mxu1 }
 0x19b   :  { %8692 = vmatmul.bf16.vlgmr.msra.gmra.mxu1 %v18574_v42  ;;  %v17550_v46 = vld [vmem:[#allocation2 + $0x1514] sm:$0xf]  ;;  %v8456_v54 = vadd.f32 %v8455_v50, %v18638_v2  ;;  %8770 = vmatpush.bf16.msrb.mxu3 %v14844_v40  ;;  %v8497_v36 = vpop.f32.mrf.mxu3 }
 0x19c   :  { %8740 = vmatpush.bf16.msrb.mxu1 %v13500_v56  ;;  %v13977_v48 = vld [vmem:[#allocation2 + $0x1570] sm:$0xf0]  ;;  %v13212_v56 = vor.u32 %v17358_v39, %v13209_v43 }
 0x19d   :  { %8706 = vmatmul.bf16.vlgmr.msra.gmra.mxu2 %v18572_v41  ;;  %v17742_v51 = vld [vmem:[#allocation2 + $0x1b14] sm:$0xf]  ;;  %v8470_v4 = vadd.f32 %v8469_v60, %v8456_v54 }
 0x19e   :  { %8754 = vmatpush.bf16.msrb.mxu2 %v14268_v58  ;;  %8727 = vmatpush.bf16.msrb.mxu0 %v12636_v12  ;;  %v14745_v53 = vld [vmem:[#allocation2 + $0x1b70] sm:$0xf0]  ;;  %v13980_v58 = vor.u32 %v17550_v46, %v13977_v48 }
 0x19f   :  { %v17142_v62 = vld [vmem:[#allocation2 + $0x854] sm:$0xf]  ;;  %v14748_v3 = vor.u32 %v17742_v51, %v14745_v53 }
 0x1a0   :  { %8741 = vmatpush.bf16.msrb.mxu1 %v13404_v14  ;;  %v12345_v63 = vld [vmem:[#allocation2 + $0x8b0] sm:$0xf0]  ;;  %v8483_v22 = vpop.f32.mrf.mxu2 }
 0x1a1   :  { %v17334_v1 = vld [vmem:[#allocation2 + $0xe54] sm:$0xf]  ;;  %8771 = vmatpush.bf16.msrb.mxu3 %v14748_v3 }
 0x1a2   :  { %8755 = vmatpush.bf16.msrb.mxu2 %v14172_v15  ;;  %8728 = vmatpush.bf16.msrb.mxu0 %v12540_v27  ;;  %v13113_v5 = vld [vmem:[#allocation2 + $0xeb0] sm:$0xf0]  ;;  %v12348_v15 = vor.u32 %v17142_v62, %v12345_v63  ;;  %v8484_v27 = vadd.f32 %v8483_v22, %v8470_v4  ;;  %v17059_v22 = vld [vmem:[#allocation2 + $0x5b4] sm:$0xf0] }
 0x1a3   :  { %v17526_v7 = vld [vmem:[#allocation2 + $0x1454] sm:$0xf]  ;;  %v13116_v2 = vor.u32 %v17334_v1, %v13113_v5 }
 0x1a4   :  { %8742 = vmatpush.bf16.msrb.mxu1 %v13308_v30  ;;  %v13881_v8 = vld [vmem:[#allocation2 + $0x14b0] sm:$0xf0]  ;;  %v18653_v39 = vadd.f32 %v8497_v36, %v8484_v27  ;;  %v17251_v27 = vld [vmem:[#allocation2 + $0xbb4] sm:$0xf0] }
 0x1a5   :  { %v17718_v12 = vld [vmem:[#allocation2 + $0x1a54] sm:$0xf]  ;;  %v13884_v17 = vor.u32 %v17526_v7, %v13881_v8 }
 0x1a6   :  { %8756 = vmatpush.bf16.msrb.mxu2 %v14076_v33  ;;  %v14649_v14 = vld [vmem:[#allocation2 + $0x1ab0] sm:$0xf0]  ;;  %8729 = vmatpush.bf16.msrb.mxu0 %v12444_v55 }
 0x1a7   :  { %v17118_v19 = vld [vmem:[#allocation2 + $0x794] sm:$0xf]  ;;  %v14652_v21 = vor.u32 %v17718_v12, %v14649_v14 }
 0x1a8   :  { %8743 = vmatpush.bf16.msrb.mxu1 %v13212_v56  ;;  %v12249_v20 = vld [vmem:[#allocation2 + $0x7f0] sm:$0xf0] }
 0x1a9   :  { %v17310_v10 = vld [vmem:[#allocation2 + $0xd94] sm:$0xf]  ;;  %v12252_v38 = vor.u32 %v17118_v19, %v12249_v20  ;;  %8772 = vmatpush.bf16.msrb.mxu3 %v14652_v21  ;;  %v11967_v21 = vld [vmem:[#allocation2 + $0x558] sm:$0xf] }
 0x1aa   :  { %8757 = vmatpush.bf16.msrb.mxu2 %v13980_v58  ;;  %v13017_v18 = vld [vmem:[#allocation2 + $0xdf0] sm:$0xf0]  ;;  %8730 = vmatpush.bf16.msrb.mxu0 %v12348_v15 }
 0x1ab   :  { %v17502_v24 = vld [vmem:[#allocation2 + $0x1394] sm:$0xf]  ;;  %v13020_v40 = vor.u32 %v17310_v10, %v13017_v18 }
 0x1ac   :  { %v13785_v26 = vld [vmem:[#allocation2 + $0x13f0] sm:$0xf0]  ;;  %8744 = vmatpush.bf16.msrb.mxu1 %v13116_v2 }
 0x1ad   :  { %v17694_v30 = vld [vmem:[#allocation2 + $0x1994] sm:$0xf]  ;;  %v13788_v43 = vor.u32 %v17502_v24, %v13785_v26  ;;  %v12735_v26 = vld [vmem:[#allocation2 + $0xb58] sm:$0xf] }
 0x1ae   :  { %v14553_v33 = vld [vmem:[#allocation2 + $0x19f0] sm:$0xf0]  ;;  %8758 = vmatpush.bf16.msrb.mxu2 %v13884_v17  ;;  %8731 = vmatpush.bf16.msrb.mxu0 %v12252_v38  ;;  %v11968_v38 = vor.u32 %v17059_v22, %v11967_v21  ;;  %v18661_v21 = vpop.f32.mrf.mxu1  ;;  %v18663_v22 = vpop.f32.mrf.mxu2 }
 0x1af   :  { %v17094_v46 = vld [vmem:[#allocation2 + $0x6d4] sm:$0xf]  ;;  %v14556_v51 = vor.u32 %v17694_v30, %v14553_v33  ;;  %19398 = vst [vmem:[#allocation25_spill] sm:$0xff] %v18661_v21 }
 0x1b0   :  { %v12153_v48 = vld [vmem:[#allocation2 + $0x730] sm:$0xf0]  ;;  %8745 = vmatpush.bf16.msrb.mxu1 %v13020_v40  ;;  %19399 = vst [vmem:[#allocation26_spill] sm:$0xff] %v18663_v22 }
 0x1b1   :  { %v17286_v50 = vld [vmem:[#allocation2 + $0xcd4] sm:$0xf]  ;;  %v12156_v60 = vor.u32 %v17094_v46, %v12153_v48  ;;  %8773 = vmatpush.bf16.msrb.mxu3 %v14556_v51  ;;  %v12736_v48 = vor.u32 %v17251_v27, %v12735_v26  ;;  %v11871_v51 = vld [vmem:[#allocation2 + $0x498] sm:$0xf] }
 0x1b2   :  { %v12921_v53 = vld [vmem:[#allocation2 + $0xd30] sm:$0xf0]  ;;  %8759 = vmatpush.bf16.msrb.mxu2 %v13788_v43  ;;  %v11679_v26 = vld [vmem:[#allocation2 + $0x318] sm:$0xf] }
 0x1b3   :  { %v17478_v54 = vld [vmem:[#allocation2 + $0x12d4] sm:$0xf]  ;;  %v12924_v1 = vor.u32 %v17286_v50, %v12921_v53  ;;  %8732 = vmatpush.bf16.msrb.mxu0 %v12156_v60  ;;  %v17035_v53 = vld [vmem:[#allocation2 + $0x4f4] sm:$0xf0] }
 0x1b4   :  { %v13689_v55 = vld [vmem:[#allocation2 + $0x1330] sm:$0xf0]  ;;  %v16987_v27 = vld [vmem:[#allocation2 + $0x374] sm:$0xf0] }
 0x1b5   :  { %v17670_v56 = vld [vmem:[#allocation2 + $0x18d4] sm:$0xf]  ;;  %v13692_v3 = vor.u32 %v17478_v54, %v13689_v55  ;;  %8746 = vmatpush.bf16.msrb.mxu1 %v12924_v1  ;;  %v18655_v54 = vpop.f32.mrf.mxu0  ;;  %v12639_v55 = vld [vmem:[#allocation2 + $0xa98] sm:$0xf] }
 0x1b6   :  { %v14457_v58 = vld [vmem:[#allocation2 + $0x1930] sm:$0xf0]  ;;  %19397 = vst [vmem:[#allocation24_spill] sm:$0xff] %v18655_v54 }
 0x1b7   :  { %v17070_v62 = vld [vmem:[#allocation2 + $0x614] sm:$0xf]  ;;  %v14460_v8 = vor.u32 %v17670_v56, %v14457_v58  ;;  %8760 = vmatpush.bf16.msrb.mxu2 %v13692_v3  ;;  %v17227_v56 = vld [vmem:[#allocation2 + $0xaf4] sm:$0xf0] }
 0x1b8   :  { %v12057_v63 = vld [vmem:[#allocation2 + $0x670] sm:$0xf0] }
 0x1b9   :  { %v17262_v4 = vld [vmem:[#allocation2 + $0xc14] sm:$0xf]  ;;  %v12060_v20 = vor.u32 %v17070_v62, %v12057_v63  ;;  %8774 = vmatpush.bf16.msrb.mxu3 %v14460_v8  ;;  %v11872_v62 = vor.u32 %v17035_v53, %v11871_v51  ;;  %v17011_v8 = vld [vmem:[#allocation2 + $0x434] sm:$0xf0] }
 0x1ba   :  { %v12825_v5 = vld [vmem:[#allocation2 + $0xc70] sm:$0xf0] }
 0x1bb   :  { %v17454_v7 = vld [vmem:[#allocation2 + $0x1214] sm:$0xf]  ;;  %v12828_v18 = vor.u32 %v17262_v4, %v12825_v5  ;;  %8733 = vmatpush.bf16.msrb.mxu0 %v12060_v20  ;;  %v12640_v4 = vor.u32 %v17227_v56, %v12639_v55 }
 0x1bc   :  { %v13593_v12 = vld [vmem:[#allocation2 + $0x1270] sm:$0xf0] }
 0x1bd   :  { %v17646_v14 = vld [vmem:[#allocation2 + $0x1814] sm:$0xf]  ;;  %v13596_v24 = vor.u32 %v17454_v7, %v13593_v12  ;;  %8747 = vmatpush.bf16.msrb.mxu1 %v12828_v18  ;;  %v11775_v7 = vld [vmem:[#allocation2 + $0x3d8] sm:$0xf] }
 0x1be   :  { %v14361_v15 = vld [vmem:[#allocation2 + $0x1870] sm:$0xf0]  ;;  %8734 = vmatmul.bf16.vlgmr.msrb.gmra.mxu0 %v18540_v11  ;;  %v12543_v12 = vld [vmem:[#allocation2 + $0x9d8] sm:$0xf] }
 0x1bf   :  { %v18006_v2 = vld [vmem:[#allocation2 + $0x2354] sm:$0xf]  ;;  %v14364_v30 = vor.u32 %v17646_v14, %v14361_v15  ;;  %8761 = vmatpush.bf16.msrb.mxu2 %v13596_v24  ;;  %v17203_v14 = vld [vmem:[#allocation2 + $0xa34] sm:$0xf0] }
 0x1c0   :  { %v15801_v17 = vld [vmem:[#allocation2 + $0x23b0] sm:$0xf0]  ;;  %8748 = vmatmul.bf16.vlgmr.msrb.gmra.mxu1 %v18530_v0  ;;  %v12544_v18 = vor.u32 %v17203_v14, %v12543_v12  ;;  %v11487_v14 = vld [vmem:[#allocation2 + $0x198] sm:$0xf] }
 0x1c1   :  { %v18198_v19 = vld [vmem:[#allocation2 + $0x2954] sm:$0xf]  ;;  %v15804_v33 = vor.u32 %v18006_v2, %v15801_v17  ;;  %8775 = vmatpush.bf16.msrb.mxu3 %v14364_v30  ;;  %v11776_v17 = vor.u32 %v17011_v8, %v11775_v7  ;;  %v8511_v30 = vpop.f32.mrf.mxu0 }
 0x1c2   :  { %v16569_v10 = vld [vmem:[#allocation2 + $0x29b0] sm:$0xf0]  ;;  %8762 = vmatmul.bf16.vlgmr.msrb.gmra.mxu2 %v18549_v23 }
 0x1c3   :  { %v16572_v36 = vor.u32 %v18198_v19, %v16569_v10  ;;  %v17982_v40 = vld [vmem:[#allocation2 + $0x2294] sm:$0xf]  ;;  %8782 = vmatpush.bf16.msra.mxu0 %v15804_v33  ;;  %8810 = vmatpush.bf16.msra.mxu2 %v11968_v38  ;;  %v12447_v33 = vld [vmem:[#allocation2 + $0x918] sm:$0xf]  ;;  %v18665_v38 = vpop.f32.mrf.mxu3 }
 0x1c4   :  { %v15705_v43 = vld [vmem:[#allocation2 + $0x22f0] sm:$0xf0]  ;;  %8776 = vmatmul.bf16.vlgmr.msrb.gmra.mxu3 %v18570_v37  ;;  %19400 = vst [vmem:[#allocation27_spill] sm:$0xff] %v18665_v38 }
 0x1c5   :  { %v18174_v46 = vld [vmem:[#allocation2 + $0x2894] sm:$0xf]  ;;  %v15708_v58 = vor.u32 %v17982_v40, %v15705_v43  ;;  %8796 = vmatpush.bf16.msra.mxu1 %v16572_v36  ;;  %8824 = vmatpush.bf16.msra.mxu3 %v12736_v48  ;;  %v17179_v36 = vld [vmem:[#allocation2 + $0x974] sm:$0xf0]  ;;  %v18668_v40 = vadd.f32 %v8511_v30, %v18653_v39  ;;  %v11680_v48 = vor.u32 %v16987_v27, %v11679_v26 }
 0x1c6   :  { %v16473_v50 = vld [vmem:[#allocation2 + $0x28f0] sm:$0xf0]  ;;  %v12448_v55 = vor.u32 %v17179_v36, %v12447_v33 }
 0x1c7   :  { %v16476_v60 = vor.u32 %v18174_v46, %v16473_v50  ;;  %v17958_v63 = vld [vmem:[#allocation2 + $0x21d4] sm:$0xf]  ;;  %8783 = vmatpush.bf16.msra.mxu0 %v15708_v58  ;;  %8811 = vmatpush.bf16.msra.mxu2 %v11872_v62  ;;  %v11583_v58 = vld [vmem:[#allocation2 + $0x258] sm:$0xf] }
 0x1c8   :  { %v15609_v1 = vld [vmem:[#allocation2 + $0x2230] sm:$0xf0]  ;;  %v12351_v62 = vld [vmem:[#allocation2 + $0x858] sm:$0xf] }
 0x1c9   :  { %v18150_v3 = vld [vmem:[#allocation2 + $0x27d4] sm:$0xf]  ;;  %v15612_v15 = vor.u32 %v17958_v63, %v15609_v1  ;;  %8797 = vmatpush.bf16.msra.mxu1 %v16476_v60  ;;  %8825 = vmatpush.bf16.msra.mxu3 %v12640_v4  ;;  %v16963_v60 = vld [vmem:[#allocation2 + $0x2b4] sm:$0xf0] }
 0x1ca   :  { %v16377_v5 = vld [vmem:[#allocation2 + $0x2830] sm:$0xf0]  ;;  %v17155_v63 = vld [vmem:[#allocation2 + $0x8b4] sm:$0xf0] }
 0x1cb   :  { %v16380_v2 = vor.u32 %v18150_v3, %v16377_v5  ;;  %v17934_v19 = vld [vmem:[#allocation2 + $0x2114] sm:$0xf]  ;;  %8784 = vmatpush.bf16.msra.mxu0 %v15612_v15  ;;  %8812 = vmatpush.bf16.msra.mxu2 %v11776_v17  ;;  %v11584_v3 = vor.u32 %v16963_v60, %v11583_v58  ;;  %v12352_v8 = vor.u32 %v17155_v63, %v12351_v62  ;;  %v16939_v15 = vld [vmem:[#allocation2 + $0x1f4] sm:$0xf0]  ;;  %v8539_v17 = vpop.f32.mrf.mxu2 }
 0x1cc   :  { %v15513_v20 = vld [vmem:[#allocation2 + $0x2170] sm:$0xf0]  ;;  %v11488_v27 = vor.u32 %v16939_v15, %v11487_v14  ;;  %v17443_v14 = vld [vmem:[#allocation2 + $0x11b4] sm:$0xf0] }
 0x1cd   :  { %v18126_v10 = vld [vmem:[#allocation2 + $0x2714] sm:$0xf]  ;;  %v15516_v43 = vor.u32 %v17934_v19, %v15513_v20  ;;  %8798 = vmatpush.bf16.msra.mxu1 %v16380_v2  ;;  %8826 = vmatpush.bf16.msra.mxu3 %v12544_v18  ;;  %v8525_v2 = vpop.f32.mrf.mxu1  ;;  %v12255_v19 = vld [vmem:[#allocation2 + $0x798] sm:$0xf] }
 0x1ce   :  { %v16281_v24 = vld [vmem:[#allocation2 + $0x2770] sm:$0xf0]  ;;  %v17131_v20 = vld [vmem:[#allocation2 + $0x7f4] sm:$0xf0] }
 0x1cf   :  { %v16284_v46 = vor.u32 %v18126_v10, %v16281_v24  ;;  %v17910_v50 = vld [vmem:[#allocation2 + $0x2054] sm:$0xf]  ;;  %8785 = vmatpush.bf16.msra.mxu0 %v15516_v43  ;;  %8813 = vmatpush.bf16.msra.mxu2 %v11680_v48  ;;  %v8540_v10 = vadd.f32 %v8539_v17, %v8525_v2  ;;  %v8553_v24 = vpop.f32.mrf.mxu3  ;;  %v14271_v15 = vld [vmem:[#allocation2 + $0x1758] sm:$0xf] }
 0x1d0   :  { %v15417_v51 = vld [vmem:[#allocation2 + $0x20b0] sm:$0xf0]  ;;  %v17635_v17 = vld [vmem:[#allocation2 + $0x17b4] sm:$0xf0] }
 0x1d1   :  { %v18102_v53 = vld [vmem:[#allocation2 + $0x2654] sm:$0xf]  ;;  %v15420_v1 = vor.u32 %v17910_v50, %v15417_v51  ;;  %8799 = vmatpush.bf16.msra.mxu1 %v16284_v46  ;;  %8827 = vmatpush.bf16.msra.mxu3 %v12448_v55  ;;  %v18670_v43 = vadd.f32 %v8553_v24, %v8540_v10  ;;  %v12256_v46 = vor.u32 %v17131_v20, %v12255_v19  ;;  %v11391_v50 = vld [vmem:[#allocation2 + $0xd8] sm:$0xf] }
 0x1d2   :  { %v16185_v56 = vld [vmem:[#allocation2 + $0x26b0] sm:$0xf0]  ;;  %v16915_v51 = vld [vmem:[#allocation2 + $0x134] sm:$0xf0] }
 0x1d3   :  { %v16188_v39 = vor.u32 %v18102_v53, %v16185_v56  ;;  %v17886_v4 = vld [vmem:[#allocation2 + $0x1f94] sm:$0xf]  ;;  %8786 = vmatpush.bf16.msra.mxu0 %v15420_v1  ;;  %8814 = vmatpush.bf16.msra.mxu2 %v11584_v3  ;;  %v12159_v53 = vld [vmem:[#allocation2 + $0x6d8] sm:$0xf]  ;;  %v11392_v63 = vor.u32 %v16915_v51, %v11391_v50 }
 0x1d4   :  { %v15321_v5 = vld [vmem:[#allocation2 + $0x1ff0] sm:$0xf0]  ;;  %v17107_v55 = vld [vmem:[#allocation2 + $0x734] sm:$0xf0] }
 0x1d5   :  { %v18078_v7 = vld [vmem:[#allocation2 + $0x2594] sm:$0xf]  ;;  %v15324_v18 = vor.u32 %v17886_v4, %v15321_v5  ;;  %8800 = vmatpush.bf16.msra.mxu1 %v16188_v39  ;;  %8828 = vmatpush.bf16.msra.mxu3 %v12352_v8  ;;  %v11295_v3 = vld [vmem:[#allocation2 + $0x18] sm:$0xf]  ;;  %v12160_v4 = vor.u32 %v17107_v55, %v12159_v53 }
 0x1d6   :  { %v16089_v12 = vld [vmem:[#allocation2 + $0x25f0] sm:$0xf0]  ;;  %v16891_v5 = vld [vmem:[#allocation2 + $0x74] sm:$0xf0] }
 0x1d7   :  { %v16092_v26 = vor.u32 %v18078_v7, %v16089_v12  ;;  %v17862_v30 = vld [vmem:[#allocation2 + $0x1ed4] sm:$0xf]  ;;  %8787 = vmatpush.bf16.msra.mxu0 %v15324_v18  ;;  %8815 = vmatpush.bf16.msra.mxu2 %v11488_v27  ;;  %v12063_v7 = vld [vmem:[#allocation2 + $0x618] sm:$0xf]  ;;  %v11296_v18 = vor.u32 %v16891_v5, %v11295_v3 }
 0x1d8   :  { %v15225_v33 = vld [vmem:[#allocation2 + $0x1f30] sm:$0xf0]  ;;  %v17083_v8 = vld [vmem:[#allocation2 + $0x674] sm:$0xf0] }
 0x1d9   :  { %v18054_v36 = vld [vmem:[#allocation2 + $0x24d4] sm:$0xf]  ;;  %v15228_v56 = vor.u32 %v17862_v30, %v15225_v33  ;;  %8801 = vmatpush.bf16.msra.mxu1 %v16092_v26  ;;  %8829 = vmatpush.bf16.msra.mxu3 %v12256_v46  ;;  %v13503_v12 = vld [vmem:[#allocation2 + $0x1158] sm:$0xf]  ;;  %v12064_v27 = vor.u32 %v17083_v8, %v12063_v7  ;;  %v14272_v33 = vor.u32 %v17635_v17, %v14271_v15 }
 0x1da   :  { %v15993_v48 = vld [vmem:[#allocation2 + $0x2530] sm:$0xf0]  ;;  %v15039_v19 = vld [vmem:[#allocation2 + $0x1d58] sm:$0xf]  ;;  %v13504_v30 = vor.u32 %v17443_v14, %v13503_v12 }
 0x1db   :  { %v17838_v58 = vld [vmem:[#allocation2 + $0x1e14] sm:$0xf]  ;;  %v15996_v62 = vor.u32 %v18054_v36, %v15993_v48  ;;  %8788 = vmatpush.bf16.msra.mxu0 %v15228_v56  ;;  %v17827_v20 = vld [vmem:[#allocation2 + $0x1db4] sm:$0xf0]  ;;  %8816 = vmatpush.bf16.msra.mxu2 %v11392_v63  ;;  %v18674_v63 = vpop.f32.mrf.mxu1 }
 0x1dc   :  { %v15129_v60 = vld [vmem:[#allocation2 + $0x1e70] sm:$0xf0]  ;;  %v15807_v24 = vld [vmem:[#allocation2 + $0x2358] sm:$0xf]  ;;  %v15040_v36 = vor.u32 %v17827_v20, %v15039_v19  ;;  %19402 = vst [vmem:[#allocation29_spill] sm:$0xff] %v18674_v63  ;;  %v18679_v20 = vpop.f32.mrf.mxu2 }
 0x1dd   :  { %v18030_v1 = vld [vmem:[#allocation2 + $0x2414] sm:$0xf]  ;;  %v15132_v2 = vor.u32 %v17838_v58, %v15129_v60  ;;  %8802 = vmatpush.bf16.msra.mxu1 %v15996_v62  ;;  %v18019_v26 = vld [vmem:[#allocation2 + $0x23b4] sm:$0xf0]  ;;  %8830 = vmatpush.bf16.msra.mxu3 %v12160_v4  ;;  %v18672_v58 = vpop.f32.mrf.mxu0  ;;  %19403 = vst [vmem:[#allocation30_spill] sm:$0xff] %v18679_v20 }
 0x1de   :  { %v15897_v39 = vld [vmem:[#allocation2 + $0x2470] sm:$0xf0]  ;;  %v13407_v46 = vld [vmem:[#allocation2 + $0x1098] sm:$0xf]  ;;  %v15808_v51 = vor.u32 %v18019_v26, %v15807_v24  ;;  %19401 = vst [vmem:[#allocation28_spill] sm:$0xff] %v18672_v58 }
 0x1df   :  { %v15900_v10 = vor.u32 %v18030_v1, %v15897_v39  ;;  %v17419_v48 = vld [vmem:[#allocation2 + $0x10f4] sm:$0xf0]  ;;  %8789 = vmatpush.bf16.msra.mxu0 %v15132_v2  ;;  %8817 = vmatpush.bf16.msra.mxu2 %v11296_v18  ;;  %v12641_v20 = vld [vmem:[#allocation2 + $0xaf8] sm:$0xf0]  ;;  %v17420_v58 = vld [vmem:[#allocation2 + $0x10fc] sm:$0xf0] }
 0x1e0   :  { %v14175_v50 = vld [vmem:[#allocation2 + $0x1698] sm:$0xf]  ;;  %v13408_v1 = vor.u32 %v17419_v48, %v13407_v46  ;;  %v17983_v63 = vld [vmem:[#allocation2 + $0x229c] sm:$0xf] }
 0x1e1   :  { %v17611_v53 = vld [vmem:[#allocation2 + $0x16f4] sm:$0xf0]  ;;  %8803 = vmatpush.bf16.msra.mxu1 %v15900_v10  ;;  %8831 = vmatpush.bf16.msra.mxu3 %v12064_v27 }
 0x1e2   :  { %v14943_v55 = vld [vmem:[#allocation2 + $0x1c98] sm:$0xf]  ;;  %v14176_v39 = vor.u32 %v17611_v53, %v14175_v50  ;;  %8790 = vmatmul.bf16.vlgmr.msra.gmra.mxu0 %v18574_v42  ;;  %8818 = vmatmul.bf16.vlgmr.msra.gmra.mxu2 %v18525_v57 }
 0x1e3   :  { %v17803_v56 = vld [vmem:[#allocation2 + $0x1cf4] sm:$0xf0]  ;;  %8838 = vmatpush.bf16.msrb.mxu0 %v13504_v30  ;;  %8866 = vmatpush.bf16.msrb.mxu2 %v15040_v36 }
 0x1e4   :  { %v15711_v60 = vld [vmem:[#allocation2 + $0x2298] sm:$0xf]  ;;  %v14944_v3 = vor.u32 %v17803_v56, %v14943_v55  ;;  %8804 = vmatmul.bf16.vlgmr.msra.gmra.mxu1 %v18572_v41  ;;  %8832 = vmatmul.bf16.vlgmr.msra.gmra.mxu3 %v18540_v11 }
 0x1e5   :  { %v17995_v62 = vld [vmem:[#allocation2 + $0x22f4] sm:$0xf0]  ;;  %8852 = vmatpush.bf16.msrb.mxu1 %v14272_v33  ;;  %8880 = vmatpush.bf16.msrb.mxu3 %v15808_v51  ;;  %v18682_v33 = vpop.f32.mrf.mxu3  ;;  %v8567_v50 = vpop.f32.mrf.mxu0 }
 0x1e6   :  { %v13311_v4 = vld [vmem:[#allocation2 + $0xfd8] sm:$0xf]  ;;  %v15712_v8 = vor.u32 %v17995_v62, %v15711_v60  ;;  %19404 = vst [vmem:[#allocation31_spill] sm:$0xff] %v18682_v33  ;;  %v8568_v55 = vadd.f32 %v8567_v50, %v18670_v43  ;;  %v17023_v33 = vld [vmem:[#allocation2 + $0x49c] sm:$0xf] }
 0x1e7   :  { %v17395_v5 = vld [vmem:[#allocation2 + $0x1034] sm:$0xf0]  ;;  %8839 = vmatpush.bf16.msrb.mxu0 %v13408_v1  ;;  %8867 = vmatpush.bf16.msrb.mxu2 %v14944_v3  ;;  %v8581_v1 = vpop.f32.mrf.mxu1 }
 0x1e8   :  { %v14079_v7 = vld [vmem:[#allocation2 + $0x15d8] sm:$0xf]  ;;  %v13312_v19 = vor.u32 %v17395_v5, %v13311_v4 }
 0x1e9   :  { %v17587_v12 = vld [vmem:[#allocation2 + $0x1634] sm:$0xf0]  ;;  %8853 = vmatpush.bf16.msrb.mxu1 %v14176_v39  ;;  %8881 = vmatpush.bf16.msrb.mxu3 %v15712_v8 }
 0x1ea   :  { %v14847_v14 = vld [vmem:[#allocation2 + $0x1bd8] sm:$0xf]  ;;  %v14080_v10 = vor.u32 %v17587_v12, %v14079_v7  ;;  %v8582_v7 = vadd.f32 %v8581_v1, %v8568_v55 }
 0x1eb   :  { %v17779_v15 = vld [vmem:[#allocation2 + $0x1c34] sm:$0xf0]  ;;  %8840 = vmatpush.bf16.msrb.mxu0 %v13312_v19 }
 0x1ec   :  { %v15615_v2 = vld [vmem:[#allocation2 + $0x21d8] sm:$0xf]  ;;  %v14848_v18 = vor.u32 %v17779_v15, %v14847_v14 }
 0x1ed   :  { %v17971_v17 = vld [vmem:[#allocation2 + $0x2234] sm:$0xf0]  ;;  %8854 = vmatpush.bf16.msrb.mxu1 %v14080_v10 }
 0x1ee   :  { %v13215_v24 = vld [vmem:[#allocation2 + $0xf18] sm:$0xf]  ;;  %v15616_v30 = vor.u32 %v17971_v17, %v15615_v2  ;;  %8868 = vmatpush.bf16.msrb.mxu2 %v14848_v18 }
 0x1ef   :  { %v17371_v26 = vld [vmem:[#allocation2 + $0xf74] sm:$0xf0] }
 0x1f0   :  { %v13983_v27 = vld [vmem:[#allocation2 + $0x1518] sm:$0xf]  ;;  %v13216_v56 = vor.u32 %v17371_v26, %v13215_v24  ;;  %8882 = vmatpush.bf16.msrb.mxu3 %v15616_v30 }
 0x1f1   :  { %v17563_v36 = vld [vmem:[#allocation2 + $0x1574] sm:$0xf0] }
 0x1f2   :  { %v14751_v46 = vld [vmem:[#allocation2 + $0x1b18] sm:$0xf]  ;;  %v13984_v60 = vor.u32 %v17563_v36, %v13983_v27  ;;  %8841 = vmatpush.bf16.msrb.mxu0 %v13216_v56  ;;  %v8595_v27 = vpop.f32.mrf.mxu2 }
 0x1f3   :  { %v17755_v48 = vld [vmem:[#allocation2 + $0x1b74] sm:$0xf0] }
 0x1f4   :  { %v15519_v51 = vld [vmem:[#allocation2 + $0x2118] sm:$0xf]  ;;  %v14752_v62 = vor.u32 %v17755_v48, %v14751_v46  ;;  %8855 = vmatpush.bf16.msrb.mxu1 %v13984_v60  ;;  %v8596_v48 = vadd.f32 %v8595_v27, %v8582_v7 }
 0x1f5   :  { %v17947_v53 = vld [vmem:[#allocation2 + $0x2174] sm:$0xf0] }
 0x1f6   :  { %v13119_v39 = vld [vmem:[#allocation2 + $0xe58] sm:$0xf]  ;;  %v15520_v5 = vor.u32 %v17947_v53, %v15519_v51  ;;  %8869 = vmatpush.bf16.msrb.mxu2 %v14752_v62  ;;  %v8609_v53 = vpop.f32.mrf.mxu3 }
 0x1f7   :  { %v17347_v3 = vld [vmem:[#allocation2 + $0xeb4] sm:$0xf0]  ;;  %v18685_v56 = vadd.f32 %v8609_v53, %v8596_v48  ;;  %v11969_v53 = vld [vmem:[#allocation2 + $0x5b8] sm:$0xf0] }
 0x1f8   :  { %v13887_v4 = vld [vmem:[#allocation2 + $0x1458] sm:$0xf]  ;;  %v13120_v17 = vor.u32 %v17347_v3, %v13119_v39  ;;  %8883 = vmatpush.bf16.msrb.mxu3 %v15520_v5 }
 0x1f9   :  { %v17539_v8 = vld [vmem:[#allocation2 + $0x14b4] sm:$0xf0] }
 0x1fa   :  { %v14655_v12 = vld [vmem:[#allocation2 + $0x1a58] sm:$0xf]  ;;  %v13888_v43 = vor.u32 %v17539_v8, %v13887_v4  ;;  %8842 = vmatpush.bf16.msrb.mxu0 %v13120_v17 }
 0x1fb   :  { %v17731_v14 = vld [vmem:[#allocation2 + $0x1ab4] sm:$0xf0] }
 0x1fc   :  { %v15423_v15 = vld [vmem:[#allocation2 + $0x2058] sm:$0xf]  ;;  %v14656_v19 = vor.u32 %v17731_v14, %v14655_v12  ;;  %8856 = vmatpush.bf16.msrb.mxu1 %v13888_v43 }
 0x1fd   :  { %v17923_v2 = vld [vmem:[#allocation2 + $0x20b4] sm:$0xf0] }
 0x1fe   :  { %v13023_v10 = vld [vmem:[#allocation2 + $0xd98] sm:$0xf]  ;;  %v15424_v26 = vor.u32 %v17923_v2, %v15423_v15  ;;  %8870 = vmatpush.bf16.msrb.mxu2 %v14656_v19 }
 0x1ff   :  { %v17323_v18 = vld [vmem:[#allocation2 + $0xdf4] sm:$0xf0] }
 0x200   :  { %v13791_v24 = vld [vmem:[#allocation2 + $0x1398] sm:$0xf]  ;;  %v13024_v55 = vor.u32 %v17323_v18, %v13023_v10  ;;  %8884 = vmatpush.bf16.msrb.mxu3 %v15424_v26 }
 0x201   :  { %v17515_v30 = vld [vmem:[#allocation2 + $0x13f4] sm:$0xf0] }
 0x202   :  { %v14559_v36 = vld [vmem:[#allocation2 + $0x1998] sm:$0xf]  ;;  %v13792_v60 = vor.u32 %v17515_v30, %v13791_v24  ;;  %8843 = vmatpush.bf16.msrb.mxu0 %v13024_v55  ;;  %v17239_v55 = vld [vmem:[#allocation2 + $0xb5c] sm:$0xf] }
 0x203   :  { %v17707_v46 = vld [vmem:[#allocation2 + $0x19f4] sm:$0xf0] }
 0x204   :  { %v15327_v50 = vld [vmem:[#allocation2 + $0x1f98] sm:$0xf]  ;;  %v14560_v62 = vor.u32 %v17707_v46, %v14559_v36  ;;  %8857 = vmatpush.bf16.msrb.mxu1 %v13792_v60 }
 0x205   :  { %v17899_v51 = vld [vmem:[#allocation2 + $0x1ff4] sm:$0xf0] }
 0x206   :  { %v12927_v1 = vld [vmem:[#allocation2 + $0xcd8] sm:$0xf]  ;;  %v15328_v4 = vor.u32 %v17899_v51, %v15327_v50  ;;  %8871 = vmatpush.bf16.msrb.mxu2 %v14560_v62  ;;  %v17047_v50 = vld [vmem:[#allocation2 + $0x55c] sm:$0xf] }
 0x207   :  { %v17299_v39 = vld [vmem:[#allocation2 + $0xd34] sm:$0xf0] }
 0x208   :  { %v13695_v3 = vld [vmem:[#allocation2 + $0x12d8] sm:$0xf]  ;;  %v12928_v15 = vor.u32 %v17299_v39, %v12927_v1  ;;  %8885 = vmatpush.bf16.msrb.mxu3 %v15328_v4  ;;  %v12737_v1 = vld [vmem:[#allocation2 + $0xbb8] sm:$0xf0] }
 0x209   :  { %v17491_v5 = vld [vmem:[#allocation2 + $0x1334] sm:$0xf0]  ;;  %v17431_v39 = vld [vmem:[#allocation2 + $0x115c] sm:$0xf] }
 0x20a   :  { %v14463_v8 = vld [vmem:[#allocation2 + $0x18d8] sm:$0xf]  ;;  %v13696_v43 = vor.u32 %v17491_v5, %v13695_v3  ;;  %8844 = vmatpush.bf16.msrb.mxu0 %v12928_v15  ;;  %v13505_v3 = vld [vmem:[#allocation2 + $0x11b8] sm:$0xf0] }
 0x20b   :  { %v17683_v12 = vld [vmem:[#allocation2 + $0x1934] sm:$0xf0]  ;;  %v13508_v15 = vor.u32 %v17431_v39, %v13505_v3  ;;  %v16975_v3 = vld [vmem:[#allocation2 + $0x31c] sm:$0xf] }
 0x20c   :  { %v15231_v7 = vld [vmem:[#allocation2 + $0x1ed8] sm:$0xf]  ;;  %v14464_v19 = vor.u32 %v17683_v12, %v14463_v8  ;;  %8858 = vmatpush.bf16.msrb.mxu1 %v13696_v43  ;;  %v11972_v8 = vor.u32 %v17047_v50, %v11969_v53  ;;  %v12740_v12 = vor.u32 %v17239_v55, %v12737_v1  ;;  %v17407_v43 = vld [vmem:[#allocation2 + $0x109c] sm:$0xf] }
 0x20d   :  { %v17875_v14 = vld [vmem:[#allocation2 + $0x1f34] sm:$0xf0]  ;;  %v11777_v50 = vld [vmem:[#allocation2 + $0x438] sm:$0xf0] }
 0x20e   :  { %v12831_v2 = vld [vmem:[#allocation2 + $0xc18] sm:$0xf]  ;;  %v15232_v27 = vor.u32 %v17875_v14, %v15231_v7  ;;  %8872 = vmatpush.bf16.msrb.mxu2 %v14464_v19  ;;  %v13409_v19 = vld [vmem:[#allocation2 + $0x10f8] sm:$0xf0] }
 0x20f   :  { %v17275_v17 = vld [vmem:[#allocation2 + $0xc74] sm:$0xf0]  ;;  %v12545_v53 = vld [vmem:[#allocation2 + $0xa38] sm:$0xf0] }
 0x210   :  { %v13599_v10 = vld [vmem:[#allocation2 + $0x1218] sm:$0xf]  ;;  %v12832_v51 = vor.u32 %v17275_v17, %v12831_v2  ;;  %8886 = vmatpush.bf16.msrb.mxu3 %v15232_v27  ;;  %v11873_v2 = vld [vmem:[#allocation2 + $0x4f8] sm:$0xf0] }
 0x211   :  { %v17467_v18 = vld [vmem:[#allocation2 + $0x1274] sm:$0xf0]  ;;  %v17215_v17 = vld [vmem:[#allocation2 + $0xa9c] sm:$0xf]  ;;  %v11876_v27 = vor.u32 %v17023_v33, %v11873_v2 }
 0x212   :  { %v14367_v24 = vld [vmem:[#allocation2 + $0x1818] sm:$0xf]  ;;  %v13600_v60 = vor.u32 %v17467_v18, %v13599_v10  ;;  %8845 = vmatpush.bf16.msrb.mxu0 %v12832_v51  ;;  %v18687_v10 = vpop.f32.mrf.mxu0  ;;  %v18689_v18 = vpop.f32.mrf.mxu1  ;;  %v17191_v51 = vld [vmem:[#allocation2 + $0x9dc] sm:$0xf] }
 0x213   :  { %v17659_v26 = vld [vmem:[#allocation2 + $0x1874] sm:$0xf0]  ;;  %19405 = vst [vmem:[#allocation32_spill] sm:$0xff] %v18687_v10  ;;  %v17383_v55 = vld [vmem:[#allocation2 + $0xfdc] sm:$0xf] }
 0x214   :  { %v15135_v30 = vld [vmem:[#allocation2 + $0x1e18] sm:$0xf]  ;;  %v14368_v62 = vor.u32 %v17659_v26, %v14367_v24  ;;  %8859 = vmatpush.bf16.msrb.mxu1 %v13600_v60  ;;  %19406 = vst [vmem:[#allocation33_spill] sm:$0xff] %v18689_v18  ;;  %v12644_v26 = vor.u32 %v17215_v17, %v12641_v20  ;;  %v13313_v1 = vld [vmem:[#allocation2 + $0x1038] sm:$0xf0]  ;;  %v12548_v60 = vor.u32 %v17191_v51, %v12545_v53 }
 0x215   :  { %v17851_v36 = vld [vmem:[#allocation2 + $0x1e74] sm:$0xf0]  ;;  %8846 = vmatmul.bf16.vlgmr.msrb.gmra.mxu0 %v18530_v0  ;;  %v13217_v2 = vld [vmem:[#allocation2 + $0xf78] sm:$0xf0] }
 0x216   :  { %v16575_v46 = vld [vmem:[#allocation2 + $0x2958] sm:$0xf]  ;;  %v15136_v4 = vor.u32 %v17851_v36, %v15135_v30  ;;  %8873 = vmatpush.bf16.msrb.mxu2 %v14368_v62  ;;  %v17143_v51 = vld [vmem:[#allocation2 + $0x85c] sm:$0xf] }
 0x217   :  { %v18211_v48 = vld [vmem:[#allocation2 + $0x29b4] sm:$0xf0]  ;;  %8860 = vmatmul.bf16.vlgmr.msrb.gmra.mxu1 %v18549_v23  ;;  %v12353_v53 = vld [vmem:[#allocation2 + $0x8b8] sm:$0xf0] }
 0x218   :  { %v16576_v5 = vor.u32 %v18211_v48, %v16575_v46  ;;  %v16479_v7 = vld [vmem:[#allocation2 + $0x2898] sm:$0xf]  ;;  %8887 = vmatpush.bf16.msrb.mxu3 %v15136_v4  ;;  %8908 = vmatpush.bf16.msra.mxu1 %v11972_v8  ;;  %v16999_v46 = vld [vmem:[#allocation2 + $0x3dc] sm:$0xf]  ;;  %v13412_v48 = vor.u32 %v17407_v43, %v13409_v19  ;;  %v18695_v4 = vpop.f32.mrf.mxu2 }
 0x219   :  { %v18187_v14 = vld [vmem:[#allocation2 + $0x28f4] sm:$0xf0]  ;;  %8874 = vmatmul.bf16.vlgmr.msrb.gmra.mxu2 %v18570_v37  ;;  %v11780_v33 = vor.u32 %v16999_v46, %v11777_v50  ;;  %19407 = vst [vmem:[#allocation34_spill] sm:$0xff] %v18695_v4  ;;  %v11681_v8 = vld [vmem:[#allocation2 + $0x378] sm:$0xf0] }
 0x21a   :  { %8894 = vmatpush.bf16.msra.mxu0 %v16576_v5  ;;  %v16480_v24 = vor.u32 %v18187_v14, %v16479_v7  ;;  %8922 = vmatpush.bf16.msra.mxu2 %v12740_v12  ;;  %v16383_v30 = vld [vmem:[#allocation2 + $0x27d8] sm:$0xf]  ;;  %v13316_v5 = vor.u32 %v17383_v55, %v13313_v1  ;;  %v17167_v12 = vld [vmem:[#allocation2 + $0x91c] sm:$0xf]  ;;  %v18697_v14 = vpop.f32.mrf.mxu3  ;;  %v8623_v43 = vpop.f32.mrf.mxu0 }
 0x21b   :  { %v18163_v36 = vld [vmem:[#allocation2 + $0x2834] sm:$0xf0]  ;;  %8888 = vmatmul.bf16.vlgmr.msrb.gmra.mxu3 %v18574_v42  ;;  %v12449_v7 = vld [vmem:[#allocation2 + $0x978] sm:$0xf0]  ;;  %19408 = vst [vmem:[#allocation35_spill] sm:$0xff] %v18697_v14  ;;  %v8637_v19 = vpop.f32.mrf.mxu1 }
 0x21c   :  { %8936 = vmatpush.bf16.msra.mxu3 %v13508_v15  ;;  %v16384_v20 = vor.u32 %v18163_v36, %v16383_v30  ;;  %8909 = vmatpush.bf16.msra.mxu1 %v11876_v27  ;;  %v16287_v62 = vld [vmem:[#allocation2 + $0x2718] sm:$0xf]  ;;  %v17359_v15 = vld [vmem:[#allocation2 + $0xf1c] sm:$0xf]  ;;  %v12452_v27 = vor.u32 %v17167_v12, %v12449_v7  ;;  %v8638_v46 = vadd.f32 %v8637_v19, %v8623_v43 }
 0x21d   :  { %v18139_v39 = vld [vmem:[#allocation2 + $0x2774] sm:$0xf0]  ;;  %v16951_v36 = vld [vmem:[#allocation2 + $0x25c] sm:$0xf] }
 0x21e   :  { %8895 = vmatpush.bf16.msra.mxu0 %v16480_v24  ;;  %8923 = vmatpush.bf16.msra.mxu2 %v12644_v26  ;;  %v16288_v17 = vor.u32 %v18139_v39, %v16287_v62  ;;  %v11684_v24 = vor.u32 %v16975_v3, %v11681_v8  ;;  %v16191_v26 = vld [vmem:[#allocation2 + $0x2658] sm:$0xf]  ;;  %v11585_v50 = vld [vmem:[#allocation2 + $0x2b8] sm:$0xf0] }
 0x21f   :  { %v18115_v30 = vld [vmem:[#allocation2 + $0x26b4] sm:$0xf0]  ;;  %v17335_v55 = vld [vmem:[#allocation2 + $0xe5c] sm:$0xf]  ;;  %v11588_v62 = vor.u32 %v16951_v36, %v11585_v50 }
 0x220   :  { %8937 = vmatpush.bf16.msra.mxu3 %v13412_v48  ;;  %8910 = vmatpush.bf16.msra.mxu1 %v11780_v33  ;;  %v13220_v48 = vor.u32 %v17359_v15, %v13217_v2  ;;  %v13121_v1 = vld [vmem:[#allocation2 + $0xeb8] sm:$0xf0]  ;;  %v12356_v33 = vor.u32 %v17143_v51, %v12353_v53  ;;  %v18091_v39 = vld [vmem:[#allocation2 + $0x25f4] sm:$0xf0]  ;;  %v8651_v15 = vpop.f32.mrf.mxu2 }
 0x221   :  { %v16927_v3 = vld [vmem:[#allocation2 + $0x19c] sm:$0xf]  ;;  %v13124_v8 = vor.u32 %v17335_v55, %v13121_v1  ;;  %v8652_v19 = vadd.f32 %v8651_v15, %v8638_v46 }
 0x222   :  { %8896 = vmatpush.bf16.msra.mxu0 %v16384_v20  ;;  %8924 = vmatpush.bf16.msra.mxu2 %v12548_v60  ;;  %v16192_v20 = vor.u32 %v18115_v30, %v16191_v26  ;;  %v16095_v60 = vld [vmem:[#allocation2 + $0x2598] sm:$0xf]  ;;  %v11489_v12 = vld [vmem:[#allocation2 + $0x1f8] sm:$0xf0] }
 0x223   :  { %v17119_v7 = vld [vmem:[#allocation2 + $0x79c] sm:$0xf]  ;;  %v16096_v14 = vor.u32 %v18091_v39, %v16095_v60  ;;  %v15999_v26 = vld [vmem:[#allocation2 + $0x24d8] sm:$0xf] }
 0x224   :  { %8938 = vmatpush.bf16.msra.mxu3 %v13316_v5  ;;  %8911 = vmatpush.bf16.msra.mxu1 %v11684_v24  ;;  %v12257_v5 = vld [vmem:[#allocation2 + $0x7f8] sm:$0xf0]  ;;  %v11492_v24 = vor.u32 %v16927_v3, %v11489_v12  ;;  %v18067_v30 = vld [vmem:[#allocation2 + $0x2534] sm:$0xf0] }
 0x225   :  { %v17311_v2 = vld [vmem:[#allocation2 + $0xd9c] sm:$0xf]  ;;  %v16000_v46 = vor.u32 %v18067_v30, %v15999_v26  ;;  %v18043_v60 = vld [vmem:[#allocation2 + $0x2474] sm:$0xf0] }
 0x226   :  { %8897 = vmatpush.bf16.msra.mxu0 %v16288_v17  ;;  %8925 = vmatpush.bf16.msra.mxu2 %v12452_v27  ;;  %v13025_v43 = vld [vmem:[#allocation2 + $0xdf8] sm:$0xf0]  ;;  %v8665_v17 = vpop.f32.mrf.mxu3  ;;  %v12260_v27 = vor.u32 %v17119_v7, %v12257_v5 }
 0x227   :  { %v16903_v36 = vld [vmem:[#allocation2 + $0xdc] sm:$0xf]  ;;  %v18699_v50 = vadd.f32 %v8665_v17, %v8652_v19 }
 0x228   :  { %8939 = vmatpush.bf16.msra.mxu3 %v13220_v48  ;;  %8912 = vmatpush.bf16.msra.mxu1 %v11588_v62  ;;  %v13028_v48 = vor.u32 %v17311_v2, %v13025_v43  ;;  %v11393_v51 = vld [vmem:[#allocation2 + $0x138] sm:$0xf0] }
 0x229   :  { %v17095_v53 = vld [vmem:[#allocation2 + $0x6dc] sm:$0xf]  ;;  %v11396_v62 = vor.u32 %v16903_v36, %v11393_v51 }
 0x22a   :  { %8898 = vmatpush.bf16.msra.mxu0 %v16192_v20  ;;  %8926 = vmatpush.bf16.msra.mxu2 %v12356_v33  ;;  %v12161_v55 = vld [vmem:[#allocation2 + $0x738] sm:$0xf0]  ;;  %v15903_v20 = vld [vmem:[#allocation2 + $0x2418] sm:$0xf] }
 0x22b   :  { %v17287_v1 = vld [vmem:[#allocation2 + $0xcdc] sm:$0xf]  ;;  %v12164_v33 = vor.u32 %v17095_v53, %v12161_v55 }
 0x22c   :  { %8940 = vmatpush.bf16.msra.mxu3 %v13124_v8  ;;  %v12929_v4 = vld [vmem:[#allocation2 + $0xd38] sm:$0xf0]  ;;  %8913 = vmatpush.bf16.msra.mxu1 %v11492_v24 }
 0x22d   :  { %v16879_v39 = vld [vmem:[#allocation2 + $0x1c] sm:$0xf]  ;;  %v12932_v7 = vor.u32 %v17287_v1, %v12929_v4  ;;  %v18701_v1 = vpop.f32.mrf.mxu0 }
 0x22e   :  { %8899 = vmatpush.bf16.msra.mxu0 %v16096_v14  ;;  %8927 = vmatpush.bf16.msra.mxu2 %v12260_v27  ;;  %v11297_v3 = vld [vmem:[#allocation2 + $0x78] sm:$0xf0]  ;;  %v15904_v14 = vor.u32 %v18043_v60, %v15903_v20  ;;  %19409 = vst [vmem:[#allocation36_spill] sm:$0xff] %v18701_v1  ;;  %v12647_v1 = vld [vmem:[#allocation2 + $0xaa0] sm:$0xf] }
 0x22f   :  { %v17071_v12 = vld [vmem:[#allocation2 + $0x61c] sm:$0xf]  ;;  %v11300_v24 = vor.u32 %v16879_v39, %v11297_v3  ;;  %v18703_v3 = vpop.f32.mrf.mxu1 }
 0x230   :  { %8941 = vmatpush.bf16.msra.mxu3 %v13028_v48  ;;  %v12065_v8 = vld [vmem:[#allocation2 + $0x678] sm:$0xf0]  ;;  %8914 = vmatpush.bf16.msra.mxu1 %v11396_v62  ;;  %19410 = vst [vmem:[#allocation37_spill] sm:$0xff] %v18703_v3  ;;  %v17036_v3 = vld [vmem:[#allocation2 + $0x4fc] sm:$0xf0] }
 0x231   :  { %v17263_v5 = vld [vmem:[#allocation2 + $0xc1c] sm:$0xf]  ;;  %v12068_v27 = vor.u32 %v17071_v12, %v12065_v8 }
 0x232   :  { %v12833_v15 = vld [vmem:[#allocation2 + $0xc78] sm:$0xf0]  ;;  %8900 = vmatpush.bf16.msra.mxu0 %v16000_v46  ;;  %8928 = vmatpush.bf16.msra.mxu2 %v12164_v33 }
 0x233   :  { %v17623_v2 = vld [vmem:[#allocation2 + $0x175c] sm:$0xf]  ;;  %v12836_v48 = vor.u32 %v17263_v5, %v12833_v15 }
 0x234   :  { %v14273_v43 = vld [vmem:[#allocation2 + $0x17b8] sm:$0xf0]  ;;  %8942 = vmatpush.bf16.msra.mxu3 %v12932_v7  ;;  %8915 = vmatpush.bf16.msra.mxu1 %v11300_v24 }
 0x235   :  { %v17815_v19 = vld [vmem:[#allocation2 + $0x1d5c] sm:$0xf]  ;;  %v14276_v4 = vor.u32 %v17623_v2, %v14273_v43 }
 0x236   :  { %v15041_v17 = vld [vmem:[#allocation2 + $0x1db8] sm:$0xf0]  ;;  %8901 = vmatpush.bf16.msra.mxu0 %v15904_v14  ;;  %8929 = vmatpush.bf16.msra.mxu2 %v12068_v27 }
 0x237   :  { %v18007_v26 = vld [vmem:[#allocation2 + $0x235c] sm:$0xf]  ;;  %v15044_v53 = vor.u32 %v17815_v19, %v15041_v17  ;;  %8916 = vmatmul.bf16.vlgmr.msra.gmra.mxu1 %v18525_v57 }
 0x238   :  { %v15809_v30 = vld [vmem:[#allocation2 + $0x23b8] sm:$0xf0]  ;;  %8943 = vmatpush.bf16.msra.mxu3 %v12836_v48 }
 0x239   :  { %v18199_v36 = vld [vmem:[#allocation2 + $0x295c] sm:$0xf]  ;;  %v15812_v55 = vor.u32 %v18007_v26, %v15809_v30  ;;  %8964 = vmatpush.bf16.msrb.mxu1 %v15044_v53  ;;  %8902 = vmatmul.bf16.vlgmr.msra.gmra.mxu0 %v18572_v41 }
 0x23a   :  { %v16577_v51 = vld [vmem:[#allocation2 + $0x29b8] sm:$0xf0]  ;;  %8950 = vmatpush.bf16.msrb.mxu0 %v14276_v4  ;;  %8930 = vmatmul.bf16.vlgmr.msra.gmra.mxu2 %v18540_v11 }
 0x23b   :  { %v17599_v18 = vld [vmem:[#allocation2 + $0x169c] sm:$0xf]  ;;  %v16580_v20 = vor.u32 %v18199_v36, %v16577_v51  ;;  %8978 = vmatpush.bf16.msrb.mxu2 %v15812_v55  ;;  %8944 = vmatmul.bf16.vlgmr.msra.gmra.mxu3 %v18530_v0 }
 0x23c   :  { %v14177_v10 = vld [vmem:[#allocation2 + $0x16f8] sm:$0xf0] }
 0x23d   :  { %v17791_v46 = vld [vmem:[#allocation2 + $0x1c9c] sm:$0xf]  ;;  %v14180_v12 = vor.u32 %v17599_v18, %v14177_v10  ;;  %8992 = vmatpush.bf16.msrb.mxu3 %v16580_v20  ;;  %v18708_v18 = vpop.f32.mrf.mxu2 }
 0x23e   :  { %v14945_v60 = vld [vmem:[#allocation2 + $0x1cf8] sm:$0xf0]  ;;  %19411 = vst [vmem:[#allocation38_spill] sm:$0xff] %v18708_v18  ;;  %v11879_v18 = vld [vmem:[#allocation2 + $0x4a0] sm:$0xf] }
 0x23f   :  { %v15713_v62 = vld [vmem:[#allocation2 + $0x22f8] sm:$0xf0]  ;;  %v14948_v7 = vor.u32 %v17791_v46, %v14945_v60  ;;  %8951 = vmatpush.bf16.msrb.mxu0 %v14180_v12  ;;  %v8679_v46 = vpop.f32.mrf.mxu0 }
 0x240   :  { %v18175_v33 = vld [vmem:[#allocation2 + $0x289c] sm:$0xf]  ;;  %v15716_v8 = vor.u32 %v17983_v63, %v15713_v62  ;;  %v8680_v62 = vadd.f32 %v8679_v46, %v18699_v50 }
 0x241   :  { %v16481_v39 = vld [vmem:[#allocation2 + $0x28f8] sm:$0xf0]  ;;  %8965 = vmatpush.bf16.msrb.mxu1 %v14948_v7  ;;  %v8693_v7 = vpop.f32.mrf.mxu1 }
 0x242   :  { %v17575_v5 = vld [vmem:[#allocation2 + $0x15dc] sm:$0xf]  ;;  %v16484_v43 = vor.u32 %v18175_v33, %v16481_v39  ;;  %8979 = vmatpush.bf16.msrb.mxu2 %v15716_v8 }
 0x243   :  { %v14081_v15 = vld [vmem:[#allocation2 + $0x1638] sm:$0xf0] }
 0x244   :  { %v17767_v2 = vld [vmem:[#allocation2 + $0x1bdc] sm:$0xf]  ;;  %v14084_v10 = vor.u32 %v17575_v5, %v14081_v15  ;;  %8993 = vmatpush.bf16.msrb.mxu3 %v16484_v43  ;;  %v8694_v43 = vadd.f32 %v8693_v7, %v8680_v62 }
 0x245   :  { %v14849_v19 = vld [vmem:[#allocation2 + $0x1c38] sm:$0xf0] }
 0x246   :  { %v17959_v14 = vld [vmem:[#allocation2 + $0x21dc] sm:$0xf]  ;;  %v14852_v63 = vor.u32 %v17767_v2, %v14849_v19  ;;  %8952 = vmatpush.bf16.msrb.mxu0 %v14084_v10 }
 0x247   :  { %v15617_v17 = vld [vmem:[#allocation2 + $0x2238] sm:$0xf0] }
 0x248   :  { %v18151_v26 = vld [vmem:[#allocation2 + $0x27dc] sm:$0xf]  ;;  %v15620_v24 = vor.u32 %v17959_v14, %v15617_v17  ;;  %8966 = vmatpush.bf16.msrb.mxu1 %v14852_v63 }
 0x249   :  { %v16385_v30 = vld [vmem:[#allocation2 + $0x2838] sm:$0xf0] }
 0x24a   :  { %v17551_v27 = vld [vmem:[#allocation2 + $0x151c] sm:$0xf]  ;;  %v16388_v48 = vor.u32 %v18151_v26, %v16385_v30  ;;  %8980 = vmatpush.bf16.msrb.mxu2 %v15620_v24 }
 0x24b   :  { %v13985_v36 = vld [vmem:[#allocation2 + $0x1578] sm:$0xf0] }
 0x24c   :  { %v17743_v51 = vld [vmem:[#allocation2 + $0x1b1c] sm:$0xf]  ;;  %v13988_v33 = vor.u32 %v17551_v27, %v13985_v36  ;;  %8994 = vmatpush.bf16.msrb.mxu3 %v16388_v48 }
 0x24d   :  { %v14753_v4 = vld [vmem:[#allocation2 + $0x1b78] sm:$0xf0] }
 0x24e   :  { %v17935_v53 = vld [vmem:[#allocation2 + $0x211c] sm:$0xf]  ;;  %v14756_v39 = vor.u32 %v17743_v51, %v14753_v4  ;;  %8953 = vmatpush.bf16.msrb.mxu0 %v13988_v33  ;;  %v8707_v4 = vpop.f32.mrf.mxu2 }
 0x24f   :  { %v15521_v55 = vld [vmem:[#allocation2 + $0x2178] sm:$0xf0]  ;;  %v18712_v46 = vadd.f32 %v8707_v4, %v8694_v43 }
 0x250   :  { %v18127_v20 = vld [vmem:[#allocation2 + $0x271c] sm:$0xf]  ;;  %v15524_v12 = vor.u32 %v17935_v53, %v15521_v55  ;;  %8967 = vmatpush.bf16.msrb.mxu1 %v14756_v39 }
 0x251   :  { %v16289_v60 = vld [vmem:[#allocation2 + $0x2778] sm:$0xf0] }
 0x252   :  { %v17527_v8 = vld [vmem:[#allocation2 + $0x145c] sm:$0xf]  ;;  %v16292_v2 = vor.u32 %v18127_v20, %v16289_v60  ;;  %8981 = vmatpush.bf16.msrb.mxu2 %v15524_v12 }
 0x253   :  { %v13889_v5 = vld [vmem:[#allocation2 + $0x14b8] sm:$0xf0] }
 0x254   :  { %v17719_v15 = vld [vmem:[#allocation2 + $0x1a5c] sm:$0xf]  ;;  %v13892_v10 = vor.u32 %v17527_v8, %v13889_v5  ;;  %8995 = vmatpush.bf16.msrb.mxu3 %v16292_v2  ;;  %v18714_v5 = vpop.f32.mrf.mxu3 }
 0x255   :  { %v14657_v19 = vld [vmem:[#allocation2 + $0x1ab8] sm:$0xf0]  ;;  %19412 = vst [vmem:[#allocation39_spill] sm:$0xff] %v18714_v5  ;;  %v17444_v5 = vld [vmem:[#allocation2 + $0x11bc] sm:$0xf0] }
 0x256   :  { %v17911_v14 = vld [vmem:[#allocation2 + $0x205c] sm:$0xf]  ;;  %v14660_v50 = vor.u32 %v17719_v15, %v14657_v19  ;;  %8954 = vmatpush.bf16.msrb.mxu0 %v13892_v10 }
 0x257   :  { %v15425_v17 = vld [vmem:[#allocation2 + $0x20b8] sm:$0xf0] }
 0x258   :  { %v18103_v26 = vld [vmem:[#allocation2 + $0x265c] sm:$0xf]  ;;  %v15428_v63 = vor.u32 %v17911_v14, %v15425_v17  ;;  %8968 = vmatpush.bf16.msrb.mxu1 %v14660_v50 }
 0x259   :  { %v16193_v30 = vld [vmem:[#allocation2 + $0x26b8] sm:$0xf0] }
 0x25a   :  { %v17503_v24 = vld [vmem:[#allocation2 + $0x139c] sm:$0xf]  ;;  %v16196_v51 = vor.u32 %v18103_v26, %v16193_v30  ;;  %8982 = vmatpush.bf16.msrb.mxu2 %v15428_v63 }
 0x25b   :  { %v13793_v27 = vld [vmem:[#allocation2 + $0x13f8] sm:$0xf0] }
 0x25c   :  { %v17695_v36 = vld [vmem:[#allocation2 + $0x199c] sm:$0xf]  ;;  %v13796_v62 = vor.u32 %v17503_v24, %v13793_v27  ;;  %8996 = vmatpush.bf16.msrb.mxu3 %v16196_v51 }
 0x25d   :  { %v14561_v48 = vld [vmem:[#allocation2 + $0x19f8] sm:$0xf0] }
 0x25e   :  { %v17887_v53 = vld [vmem:[#allocation2 + $0x1f9c] sm:$0xf]  ;;  %v14564_v33 = vor.u32 %v17695_v36, %v14561_v48  ;;  %8955 = vmatpush.bf16.msrb.mxu0 %v13796_v62 }
 0x25f   :  { %v15329_v55 = vld [vmem:[#allocation2 + $0x1ff8] sm:$0xf0] }
 0x260   :  { %v18079_v20 = vld [vmem:[#allocation2 + $0x259c] sm:$0xf]  ;;  %v15332_v39 = vor.u32 %v17887_v53, %v15329_v55  ;;  %8969 = vmatpush.bf16.msrb.mxu1 %v14564_v33  ;;  %v11975_v55 = vld [vmem:[#allocation2 + $0x560] sm:$0xf] }
 0x261   :  { %v16097_v60 = vld [vmem:[#allocation2 + $0x25f8] sm:$0xf0] }
 0x262   :  { %v17479_v12 = vld [vmem:[#allocation2 + $0x12dc] sm:$0xf]  ;;  %v16100_v15 = vor.u32 %v18079_v20, %v16097_v60  ;;  %8983 = vmatpush.bf16.msrb.mxu2 %v15332_v39  ;;  %v17060_v20 = vld [vmem:[#allocation2 + $0x5bc] sm:$0xf0] }
 0x263   :  { %v13697_v7 = vld [vmem:[#allocation2 + $0x1338] sm:$0xf0]  ;;  %v12743_v60 = vld [vmem:[#allocation2 + $0xb60] sm:$0xf] }
 0x264   :  { %v17671_v8 = vld [vmem:[#allocation2 + $0x18dc] sm:$0xf]  ;;  %v13700_v26 = vor.u32 %v17479_v12, %v13697_v7  ;;  %8997 = vmatpush.bf16.msrb.mxu3 %v16100_v15  ;;  %v17252_v12 = vld [vmem:[#allocation2 + $0xbbc] sm:$0xf0] }
 0x265   :  { %v14465_v2 = vld [vmem:[#allocation2 + $0x1938] sm:$0xf0]  ;;  %v13511_v7 = vld [vmem:[#allocation2 + $0x1160] sm:$0xf] }
 0x266   :  { %v17863_v19 = vld [vmem:[#allocation2 + $0x1edc] sm:$0xf]  ;;  %v14468_v50 = vor.u32 %v17671_v8, %v14465_v2  ;;  %8956 = vmatpush.bf16.msrb.mxu0 %v13700_v26  ;;  %v14279_v8 = vld [vmem:[#allocation2 + $0x1760] sm:$0xf] }
 0x267   :  { %v15233_v14 = vld [vmem:[#allocation2 + $0x1f38] sm:$0xf0]  ;;  %v17636_v2 = vld [vmem:[#allocation2 + $0x17bc] sm:$0xf0] }
 0x268   :  { %v18055_v43 = vld [vmem:[#allocation2 + $0x24dc] sm:$0xf]  ;;  %v15236_v63 = vor.u32 %v17863_v19, %v15233_v14  ;;  %8970 = vmatpush.bf16.msrb.mxu1 %v14468_v50  ;;  %v11976_v19 = vor.u32 %v17060_v20, %v11975_v55  ;;  %v8721_v14 = vpop.f32.mrf.mxu3  ;;  %v14280_v26 = vor.u32 %v17636_v2, %v14279_v8  ;;  %v18716_v50 = vpop.f32.mrf.mxu0  ;;  %v17204_v20 = vld [vmem:[#allocation2 + $0xa3c] sm:$0xf0] }
 0x269   :  { %v16001_v17 = vld [vmem:[#allocation2 + $0x2538] sm:$0xf0]  ;;  %19413 = vst [vmem:[#allocation40_spill] sm:$0xff] %v18716_v50  ;;  %v18724_v8 = vpop.f32.mrf.mxu2  ;;  %v18188_v50 = vld [vmem:[#allocation2 + $0x28fc] sm:$0xf0] }
 0x26a   :  { %v17455_v30 = vld [vmem:[#allocation2 + $0x121c] sm:$0xf]  ;;  %v16004_v4 = vor.u32 %v18055_v43, %v16001_v17  ;;  %8984 = vmatpush.bf16.msrb.mxu2 %v15236_v63  ;;  %v12744_v43 = vor.u32 %v17252_v12, %v12743_v60  ;;  %v13512_v17 = vor.u32 %v17444_v5, %v13511_v7  ;;  %v14183_v63 = vld [vmem:[#allocation2 + $0x16a0] sm:$0xf]  ;;  %19415 = vst [vmem:[#allocation42_spill] sm:$0xff] %v18724_v8 }
 0x26b   :  { %v13601_v10 = vld [vmem:[#allocation2 + $0x1278] sm:$0xf0]  ;;  %v13319_v60 = vld [vmem:[#allocation2 + $0xfe0] sm:$0xf] }
 0x26c   :  { %v17647_v24 = vld [vmem:[#allocation2 + $0x181c] sm:$0xf]  ;;  %v13604_v62 = vor.u32 %v17455_v30, %v13601_v10  ;;  %8998 = vmatpush.bf16.msrb.mxu3 %v16004_v4  ;;  %v17228_v30 = vld [vmem:[#allocation2 + $0xafc] sm:$0xf0] }
 0x26d   :  { %v14369_v27 = vld [vmem:[#allocation2 + $0x1878] sm:$0xf0]  ;;  %v13415_v10 = vld [vmem:[#allocation2 + $0x10a0] sm:$0xf]  ;;  %v12648_v5 = vor.u32 %v17228_v30, %v12647_v1 }
 0x26e   :  { %v17839_v36 = vld [vmem:[#allocation2 + $0x1e1c] sm:$0xf]  ;;  %v14372_v33 = vor.u32 %v17647_v24, %v14369_v27  ;;  %8957 = vmatpush.bf16.msrb.mxu0 %v13604_v62  ;;  %v17612_v24 = vld [vmem:[#allocation2 + $0x16fc] sm:$0xf0]  ;;  %v11880_v27 = vor.u32 %v17036_v3, %v11879_v18  ;;  %v13416_v4 = vor.u32 %v17420_v58, %v13415_v10 }
 0x26f   :  { %v15137_v51 = vld [vmem:[#allocation2 + $0x1e78] sm:$0xf0]  ;;  %v14184_v55 = vor.u32 %v17612_v24, %v14183_v63  ;;  %v17396_v62 = vld [vmem:[#allocation2 + $0x103c] sm:$0xf0] }
 0x270   :  { %v18031_v48 = vld [vmem:[#allocation2 + $0x241c] sm:$0xf]  ;;  %v15140_v39 = vor.u32 %v17839_v36, %v15137_v51  ;;  %8971 = vmatpush.bf16.msrb.mxu1 %v14372_v33  ;;  %v18718_v36 = vpop.f32.mrf.mxu1  ;;  %v11783_v51 = vld [vmem:[#allocation2 + $0x3e0] sm:$0xf]  ;;  %v13320_v12 = vor.u32 %v17396_v62, %v13319_v60 }
 0x271   :  { %v15905_v53 = vld [vmem:[#allocation2 + $0x2478] sm:$0xf0]  ;;  %19414 = vst [vmem:[#allocation41_spill] sm:$0xff] %v18718_v36  ;;  %8958 = vmatmul.bf16.vlgmr.msrb.gmra.mxu0 %v18549_v23  ;;  %v14087_v3 = vld [vmem:[#allocation2 + $0x15e0] sm:$0xf] }
 0x272   :  { %v15908_v15 = vor.u32 %v18031_v48, %v15905_v53  ;;  %8985 = vmatpush.bf16.msrb.mxu2 %v15140_v39  ;;  %9006 = vmatpush.bf16.msra.mxu0 %v11976_v19  ;;  %v17012_v48 = vld [vmem:[#allocation2 + $0x43c] sm:$0xf0] }
 0x273   :  { %v12551_v53 = vld [vmem:[#allocation2 + $0x9e0] sm:$0xf]  ;;  %8972 = vmatmul.bf16.vlgmr.msrb.gmra.mxu1 %v18570_v37  ;;  %v11784_v58 = vor.u32 %v17012_v48, %v11783_v51 }
 0x274   :  { %8999 = vmatpush.bf16.msrb.mxu3 %v15908_v15  ;;  %9020 = vmatpush.bf16.msra.mxu1 %v12744_v43  ;;  %v17588_v18 = vld [vmem:[#allocation2 + $0x163c] sm:$0xf0]  ;;  %v12552_v1 = vor.u32 %v17204_v20, %v12551_v53  ;;  %v18726_v15 = vpop.f32.mrf.mxu3 }
 0x275   :  { %8986 = vmatmul.bf16.vlgmr.msrb.gmra.mxu2 %v18574_v42  ;;  %v11687_v7 = vld [vmem:[#allocation2 + $0x320] sm:$0xf]  ;;  %v14088_v2 = vor.u32 %v17588_v18, %v14087_v3  ;;  %19416 = vst [vmem:[#allocation43_spill] sm:$0xff] %v18726_v15 }
 0x276   :  { %9034 = vmatpush.bf16.msra.mxu2 %v13512_v17  ;;  %9007 = vmatpush.bf16.msra.mxu0 %v11880_v27  ;;  %v16988_v33 = vld [vmem:[#allocation2 + $0x37c] sm:$0xf0] }
 0x277   :  { %9000 = vmatmul.bf16.vlgmr.msrb.gmra.mxu3 %v18572_v41  ;;  %v12455_v39 = vld [vmem:[#allocation2 + $0x920] sm:$0xf]  ;;  %v11688_v24 = vor.u32 %v16988_v33, %v11687_v7 }
 0x278   :  { %9048 = vmatpush.bf16.msra.mxu3 %v14280_v26  ;;  %9021 = vmatpush.bf16.msra.mxu1 %v12648_v5  ;;  %v17180_v19 = vld [vmem:[#allocation2 + $0x97c] sm:$0xf0]  ;;  %v8735_v26 = vpop.f32.mrf.mxu0 }
 0x279   :  { %v13223_v43 = vld [vmem:[#allocation2 + $0xf20] sm:$0xf]  ;;  %v8736_v63 = vadd.f32 %v8735_v26, %v8721_v14  ;;  %v12456_v27 = vor.u32 %v17180_v19, %v12455_v39  ;;  %v8763_v19 = vpop.f32.mrf.mxu2 }
 0x27a   :  { %9035 = vmatpush.bf16.msra.mxu2 %v13416_v4  ;;  %v17372_v17 = vld [vmem:[#allocation2 + $0xf7c] sm:$0xf0]  ;;  %9008 = vmatpush.bf16.msra.mxu0 %v11784_v58  ;;  %v8749_v4 = vpop.f32.mrf.mxu1 }
 0x27b   :  { %v13991_v30 = vld [vmem:[#allocation2 + $0x1520] sm:$0xf]  ;;  %v13224_v5 = vor.u32 %v17372_v17, %v13223_v43  ;;  %v8750_v20 = vadd.f32 %v8749_v4, %v8736_v63 }
 0x27c   :  { %9049 = vmatpush.bf16.msra.mxu3 %v14184_v55  ;;  %v17564_v10 = vld [vmem:[#allocation2 + $0x157c] sm:$0xf0]  ;;  %9022 = vmatpush.bf16.msra.mxu1 %v12552_v1  ;;  %v8777_v63 = vpop.f32.mrf.mxu3 }
 0x27d   :  { %v11591_v51 = vld [vmem:[#allocation2 + $0x260] sm:$0xf]  ;;  %v13992_v55 = vor.u32 %v17564_v10, %v13991_v30  ;;  %v8764_v26 = vadd.f32 %v8763_v19, %v8750_v20 }
 0x27e   :  { %9036 = vmatpush.bf16.msra.mxu2 %v13320_v12  ;;  %v16964_v48 = vld [vmem:[#allocation2 + $0x2bc] sm:$0xf0]  ;;  %9009 = vmatpush.bf16.msra.mxu0 %v11688_v24 }
 0x27f   :  { %v12359_v53 = vld [vmem:[#allocation2 + $0x860] sm:$0xf]  ;;  %v11592_v58 = vor.u32 %v16964_v48, %v11591_v51 }
 0x280   :  { %9050 = vmatpush.bf16.msra.mxu3 %v14088_v2  ;;  %v17156_v60 = vld [vmem:[#allocation2 + $0x8bc] sm:$0xf0]  ;;  %9023 = vmatpush.bf16.msra.mxu1 %v12456_v27  ;;  %v18728_v27 = vadd.f32 %v8777_v63, %v8764_v26  ;;  %v18730_v13 = vpop.f32.mrf.mxu0 }
 0x281   :  { %v13127_v62 = vld [vmem:[#allocation2 + $0xe60] sm:$0xf]  ;;  %v12360_v14 = vor.u32 %v17156_v60, %v12359_v53  ;;  %19417 = vst [vmem:[#allocation44_spill] sm:$0xff] %v18730_v13  ;;  %v14185_v13 = vld [vmem:[#allocation2 + $0x1700] sm:$0xf0] }
 0x282   :  { %v17348_v3 = vld [vmem:[#allocation2 + $0xebc] sm:$0xf0]  ;;  %9037 = vmatpush.bf16.msra.mxu2 %v13224_v5  ;;  %9010 = vmatpush.bf16.msra.mxu0 %v11592_v58 }
 0x283   :  { %v13895_v18 = vld [vmem:[#allocation2 + $0x1460] sm:$0xf]  ;;  %v13128_v1 = vor.u32 %v17348_v3, %v13127_v62 }
 0x284   :  { %v17540_v15 = vld [vmem:[#allocation2 + $0x14bc] sm:$0xf0]  ;;  %9051 = vmatpush.bf16.msra.mxu3 %v13992_v55  ;;  %9024 = vmatpush.bf16.msra.mxu1 %v12360_v14 }
 0x285   :  { %v11495_v12 = vld [vmem:[#allocation2 + $0x1a0] sm:$0xf]  ;;  %v13896_v39 = vor.u32 %v17540_v15, %v13895_v18 }
 0x286   :  { %v16940_v7 = vld [vmem:[#allocation2 + $0x1fc] sm:$0xf0]  ;;  %9038 = vmatpush.bf16.msra.mxu2 %v13128_v1 }
 0x287   :  { %v12263_v33 = vld [vmem:[#allocation2 + $0x7a0] sm:$0xf]  ;;  %v11496_v24 = vor.u32 %v16940_v7, %v11495_v12 }
 0x288   :  { %v17132_v2 = vld [vmem:[#allocation2 + $0x7fc] sm:$0xf0]  ;;  %9052 = vmatpush.bf16.msra.mxu3 %v13896_v39 }
 0x289   :  { %v13031_v43 = vld [vmem:[#allocation2 + $0xda0] sm:$0xf]  ;;  %v12264_v5 = vor.u32 %v17132_v2, %v12263_v33  ;;  %9011 = vmatpush.bf16.msra.mxu0 %v11496_v24 }
 0x28a   :  { %v17324_v17 = vld [vmem:[#allocation2 + $0xdfc] sm:$0xf0] }
 0x28b   :  { %v13799_v30 = vld [vmem:[#allocation2 + $0x13a0] sm:$0xf]  ;;  %v13032_v4 = vor.u32 %v17324_v17, %v13031_v43  ;;  %9025 = vmatpush.bf16.msra.mxu1 %v12264_v5 }
 0x28c   :  { %v17516_v10 = vld [vmem:[#allocation2 + $0x13fc] sm:$0xf0] }
 0x28d   :  { %v11399_v51 = vld [vmem:[#allocation2 + $0xe0] sm:$0xf]  ;;  %v13800_v15 = vor.u32 %v17516_v10, %v13799_v30  ;;  %9039 = vmatpush.bf16.msra.mxu2 %v13032_v4 }
 0x28e   :  { %v16916_v48 = vld [vmem:[#allocation2 + $0x13c] sm:$0xf0] }
 0x28f   :  { %v12167_v53 = vld [vmem:[#allocation2 + $0x6e0] sm:$0xf]  ;;  %v11400_v18 = vor.u32 %v16916_v48, %v11399_v51  ;;  %9053 = vmatpush.bf16.msra.mxu3 %v13800_v15 }
 0x290   :  { %v17108_v55 = vld [vmem:[#allocation2 + $0x73c] sm:$0xf0] }
 0x291   :  { %v12935_v60 = vld [vmem:[#allocation2 + $0xce0] sm:$0xf]  ;;  %v12168_v14 = vor.u32 %v17108_v55, %v12167_v53  ;;  %9012 = vmatpush.bf16.msra.mxu0 %v11400_v18  ;;  %v17048_v53 = vld [vmem:[#allocation2 + $0x564] sm:$0xf] }
 0x292   :  { %v17300_v62 = vld [vmem:[#allocation2 + $0xd3c] sm:$0xf0]  ;;  %v11977_v55 = vld [vmem:[#allocation2 + $0x5c0] sm:$0xf0] }
 0x293   :  { %v13703_v20 = vld [vmem:[#allocation2 + $0x12e0] sm:$0xf]  ;;  %v12936_v1 = vor.u32 %v17300_v62, %v12935_v60  ;;  %9026 = vmatpush.bf16.msra.mxu1 %v12168_v14  ;;  %v11980_v18 = vor.u32 %v17048_v53, %v11977_v55  ;;  %v17024_v14 = vld [vmem:[#allocation2 + $0x4a4] sm:$0xf]  ;;  %v18738_v53 = vpop.f32.mrf.mxu2 }
 0x294   :  { %v17492_v3 = vld [vmem:[#allocation2 + $0x133c] sm:$0xf0]  ;;  %19419 = vst [vmem:[#allocation46_spill] sm:$0xff] %v18738_v53  ;;  %v12649_v53 = vld [vmem:[#allocation2 + $0xb00] sm:$0xf0] }
 0x295   :  { %v11303_v58 = vld [vmem:[#allocation2 + $0x20] sm:$0xf]  ;;  %v13704_v2 = vor.u32 %v17492_v3, %v13703_v20  ;;  %9040 = vmatpush.bf16.msra.mxu2 %v12936_v1  ;;  %v11881_v1 = vld [vmem:[#allocation2 + $0x500] sm:$0xf0] }
 0x296   :  { %v16892_v12 = vld [vmem:[#allocation2 + $0x7c] sm:$0xf0] }
 0x297   :  { %v12071_v7 = vld [vmem:[#allocation2 + $0x620] sm:$0xf]  ;;  %v11304_v63 = vor.u32 %v16892_v12, %v11303_v58  ;;  %9054 = vmatpush.bf16.msra.mxu3 %v13704_v2 }
 0x298   :  { %v17084_v33 = vld [vmem:[#allocation2 + $0x67c] sm:$0xf0] }
 0x299   :  { %v12839_v19 = vld [vmem:[#allocation2 + $0xc20] sm:$0xf]  ;;  %v12072_v5 = vor.u32 %v17084_v33, %v12071_v7  ;;  %9013 = vmatpush.bf16.msra.mxu0 %v11304_v63  ;;  %v18732_v7 = vpop.f32.mrf.mxu1 }
 0x29a   :  { %v17276_v39 = vld [vmem:[#allocation2 + $0xc7c] sm:$0xf0]  ;;  %19418 = vst [vmem:[#allocation45_spill] sm:$0xff] %v18732_v7  ;;  %v17408_v7 = vld [vmem:[#allocation2 + $0x10a4] sm:$0xf] }
 0x29b   :  { %v13607_v43 = vld [vmem:[#allocation2 + $0x1220] sm:$0xf]  ;;  %v12840_v4 = vor.u32 %v17276_v39, %v12839_v19  ;;  %9027 = vmatpush.bf16.msra.mxu1 %v12072_v5 }
 0x29c   :  { %v17468_v17 = vld [vmem:[#allocation2 + $0x127c] sm:$0xf0]  ;;  %9014 = vmatmul.bf16.vlgmr.msra.gmra.mxu0 %v18525_v57 }
 0x29d   :  { %v15047_v26 = vld [vmem:[#allocation2 + $0x1d60] sm:$0xf]  ;;  %v13608_v15 = vor.u32 %v17468_v17, %v13607_v43  ;;  %9041 = vmatpush.bf16.msra.mxu2 %v12840_v4 }
 0x29e   :  { %v17828_v30 = vld [vmem:[#allocation2 + $0x1dbc] sm:$0xf0]  ;;  %9028 = vmatmul.bf16.vlgmr.msra.gmra.mxu1 %v18540_v11 }
 0x29f   :  { %v15815_v10 = vld [vmem:[#allocation2 + $0x2360] sm:$0xf]  ;;  %v15048_v60 = vor.u32 %v17828_v30, %v15047_v26  ;;  %9055 = vmatpush.bf16.msra.mxu3 %v13608_v15  ;;  %v11884_v26 = vor.u32 %v17024_v14, %v11881_v1 }
 0x2a0   :  { %v18020_v24 = vld [vmem:[#allocation2 + $0x23bc] sm:$0xf0]  ;;  %9042 = vmatmul.bf16.vlgmr.msra.gmra.mxu2 %v18530_v0 }
 0x2a1   :  { %v16583_v51 = vld [vmem:[#allocation2 + $0x2960] sm:$0xf]  ;;  %v15816_v62 = vor.u32 %v18020_v24, %v15815_v10  ;;  %9062 = vmatpush.bf16.msrb.mxu0 %v15048_v60  ;;  %v17000_v24 = vld [vmem:[#allocation2 + $0x3e4] sm:$0xf]  ;;  %v8805_v1 = vpop.f32.mrf.mxu1 }
 0x2a2   :  { %v18212_v48 = vld [vmem:[#allocation2 + $0x29bc] sm:$0xf0]  ;;  %9056 = vmatmul.bf16.vlgmr.msra.gmra.mxu3 %v18549_v23 }
 0x2a3   :  { %v16584_v20 = vor.u32 %v18212_v48, %v16583_v51  ;;  %v14951_v3 = vld [vmem:[#allocation2 + $0x1ca0] sm:$0xf]  ;;  %9076 = vmatpush.bf16.msrb.mxu1 %v15816_v62  ;;  %9104 = vmatpush.bf16.msrb.mxu3 %v11980_v18  ;;  %v11785_v51 = vld [vmem:[#allocation2 + $0x440] sm:$0xf0] }
 0x2a4   :  { %v17804_v8 = vld [vmem:[#allocation2 + $0x1cfc] sm:$0xf0]  ;;  %v11788_v55 = vor.u32 %v17000_v24, %v11785_v51  ;;  %v16976_v18 = vld [vmem:[#allocation2 + $0x324] sm:$0xf] }
 0x2a5   :  { %v15719_v36 = vld [vmem:[#allocation2 + $0x22a0] sm:$0xf]  ;;  %v14952_v33 = vor.u32 %v17804_v8, %v14951_v3  ;;  %9090 = vmatpush.bf16.msrb.mxu2 %v16584_v20  ;;  %v18740_v20 = vpop.f32.mrf.mxu3  ;;  %v8791_v3 = vpop.f32.mrf.mxu0  ;;  %v16952_v24 = vld [vmem:[#allocation2 + $0x264] sm:$0xf] }
 0x2a6   :  { %v17996_v58 = vld [vmem:[#allocation2 + $0x22fc] sm:$0xf0]  ;;  %19420 = vst [vmem:[#allocation47_spill] sm:$0xff] %v18740_v20  ;;  %v11593_v51 = vld [vmem:[#allocation2 + $0x2c0] sm:$0xf0] }
 0x2a7   :  { %v16487_v12 = vld [vmem:[#allocation2 + $0x28a0] sm:$0xf]  ;;  %v15720_v19 = vor.u32 %v17996_v58, %v15719_v36  ;;  %9063 = vmatpush.bf16.msrb.mxu0 %v14952_v33  ;;  %9105 = vmatpush.bf16.msrb.mxu3 %v11884_v26  ;;  %v11689_v58 = vld [vmem:[#allocation2 + $0x380] sm:$0xf0] }
 0x2a8   :  { %v16488_v2 = vor.u32 %v18188_v50, %v16487_v12  ;;  %v14855_v39 = vld [vmem:[#allocation2 + $0x1be0] sm:$0xf]  ;;  %v8792_v12 = vadd.f32 %v8791_v3, %v18728_v27  ;;  %v11497_v3 = vld [vmem:[#allocation2 + $0x200] sm:$0xf0] }
 0x2a9   :  { %v17780_v43 = vld [vmem:[#allocation2 + $0x1c3c] sm:$0xf0]  ;;  %9077 = vmatpush.bf16.msrb.mxu1 %v15720_v19  ;;  %v14281_v20 = vld [vmem:[#allocation2 + $0x17c0] sm:$0xf0] }
 0x2aa   :  { %v15623_v17 = vld [vmem:[#allocation2 + $0x21e0] sm:$0xf]  ;;  %v14856_v8 = vor.u32 %v17780_v43, %v14855_v39  ;;  %9091 = vmatpush.bf16.msrb.mxu2 %v16488_v2  ;;  %v18743_v26 = vadd.f32 %v8805_v1, %v8792_v12 }
 0x2ab   :  { %v17972_v30 = vld [vmem:[#allocation2 + $0x223c] sm:$0xf0]  ;;  %9106 = vmatpush.bf16.msrb.mxu3 %v11788_v55 }
 0x2ac   :  { %v16391_v10 = vld [vmem:[#allocation2 + $0x27e0] sm:$0xf]  ;;  %v15624_v50 = vor.u32 %v17972_v30, %v15623_v17  ;;  %9064 = vmatpush.bf16.msrb.mxu0 %v14856_v8  ;;  %v11692_v17 = vor.u32 %v16976_v18, %v11689_v58  ;;  %v8819_v18 = vpop.f32.mrf.mxu2 }
 0x2ad   :  { %v18164_v63 = vld [vmem:[#allocation2 + $0x283c] sm:$0xf0]  ;;  %v8833_v58 = vpop.f32.mrf.mxu3  ;;  %v18747_v38 = vpop.f32.mrf.mxu0 }
 0x2ae   :  { %v16392_v36 = vor.u32 %v18164_v63, %v16391_v10  ;;  %v14759_v48 = vld [vmem:[#allocation2 + $0x1b20] sm:$0xf]  ;;  %9078 = vmatpush.bf16.msrb.mxu1 %v15624_v50  ;;  %19421 = vst [vmem:[#allocation48_spill] sm:$0xff] %v18747_v38  ;;  %v18176_v38 = vld [vmem:[#allocation2 + $0x28a4] sm:$0xf] }
 0x2af   :  { %v17756_v5 = vld [vmem:[#allocation2 + $0x1b7c] sm:$0xf0]  ;;  %9107 = vmatpush.bf16.msrb.mxu3 %v11692_v17 }
 0x2b0   :  { %v15527_v4 = vld [vmem:[#allocation2 + $0x2120] sm:$0xf]  ;;  %v14760_v14 = vor.u32 %v17756_v5, %v14759_v48  ;;  %9092 = vmatpush.bf16.msrb.mxu2 %v16392_v36 }
 0x2b1   :  { %v17948_v15 = vld [vmem:[#allocation2 + $0x217c] sm:$0xf0] }
 0x2b2   :  { %v16295_v60 = vld [vmem:[#allocation2 + $0x2720] sm:$0xf]  ;;  %v15528_v33 = vor.u32 %v17948_v15, %v15527_v4  ;;  %9065 = vmatpush.bf16.msrb.mxu0 %v14760_v14  ;;  %v11596_v4 = vor.u32 %v16952_v24, %v11593_v51  ;;  %v18745_v14 = vadd.f32 %v8833_v58, %v8819_v18  ;;  %v11401_v24 = vld [vmem:[#allocation2 + $0x140] sm:$0xf0] }
 0x2b3   :  { %v18140_v62 = vld [vmem:[#allocation2 + $0x277c] sm:$0xf0]  ;;  %v12745_v18 = vld [vmem:[#allocation2 + $0xbc0] sm:$0xf0] }
 0x2b4   :  { %v16296_v19 = vor.u32 %v18140_v62, %v16295_v60  ;;  %v14663_v2 = vld [vmem:[#allocation2 + $0x1a60] sm:$0xf]  ;;  %9079 = vmatpush.bf16.msrb.mxu1 %v15528_v33  ;;  %v16928_v62 = vld [vmem:[#allocation2 + $0x1a4] sm:$0xf]  ;;  %9108 = vmatpush.bf16.msrb.mxu3 %v11596_v4 }
 0x2b5   :  { %v17732_v39 = vld [vmem:[#allocation2 + $0x1abc] sm:$0xf0]  ;;  %v17432_v58 = vld [vmem:[#allocation2 + $0x1164] sm:$0xf] }
 0x2b6   :  { %v15431_v43 = vld [vmem:[#allocation2 + $0x2060] sm:$0xf]  ;;  %v14664_v27 = vor.u32 %v17732_v39, %v14663_v2  ;;  %9093 = vmatpush.bf16.msrb.mxu2 %v16296_v19 }
 0x2b7   :  { %v17924_v30 = vld [vmem:[#allocation2 + $0x20bc] sm:$0xf0] }
 0x2b8   :  { %v16199_v10 = vld [vmem:[#allocation2 + $0x2660] sm:$0xf]  ;;  %v15432_v8 = vor.u32 %v17924_v30, %v15431_v43  ;;  %9066 = vmatpush.bf16.msrb.mxu0 %v14664_v27  ;;  %v11500_v43 = vor.u32 %v16928_v62, %v11497_v3  ;;  %v11305_v62 = vld [vmem:[#allocation2 + $0x80] sm:$0xf0] }
 0x2b9   :  { %v18116_v63 = vld [vmem:[#allocation2 + $0x26bc] sm:$0xf0]  ;;  %v17240_v3 = vld [vmem:[#allocation2 + $0xb64] sm:$0xf] }
 0x2ba   :  { %v16200_v50 = vor.u32 %v18116_v63, %v16199_v10  ;;  %v14567_v36 = vld [vmem:[#allocation2 + $0x19a0] sm:$0xf]  ;;  %9080 = vmatpush.bf16.msrb.mxu1 %v15432_v8  ;;  %v16904_v63 = vld [vmem:[#allocation2 + $0xe4] sm:$0xf]  ;;  %9109 = vmatpush.bf16.msrb.mxu3 %v11500_v43 }
 0x2bb   :  { %v17708_v48 = vld [vmem:[#allocation2 + $0x19fc] sm:$0xf0] }
 0x2bc   :  { %v15335_v5 = vld [vmem:[#allocation2 + $0x1fa0] sm:$0xf]  ;;  %v14568_v12 = vor.u32 %v17708_v48, %v14567_v36  ;;  %9094 = vmatpush.bf16.msrb.mxu2 %v16200_v50 }
 0x2bd   :  { %v17900_v55 = vld [vmem:[#allocation2 + $0x1ffc] sm:$0xf0] }
 0x2be   :  { %v16103_v15 = vld [vmem:[#allocation2 + $0x25a0] sm:$0xf]  ;;  %v15336_v1 = vor.u32 %v17900_v55, %v15335_v5  ;;  %9067 = vmatpush.bf16.msrb.mxu0 %v14568_v12 }
 0x2bf   :  { %v18092_v60 = vld [vmem:[#allocation2 + $0x25fc] sm:$0xf0] }
 0x2c0   :  { %v16104_v33 = vor.u32 %v18092_v60, %v16103_v15  ;;  %v14471_v19 = vld [vmem:[#allocation2 + $0x18e0] sm:$0xf]  ;;  %9081 = vmatpush.bf16.msrb.mxu1 %v15336_v1  ;;  %v11404_v15 = vor.u32 %v16904_v63, %v11401_v24  ;;  %v16880_v60 = vld [vmem:[#allocation2 + $0x24] sm:$0xf] }
 0x2c1   :  { %v17684_v2 = vld [vmem:[#allocation2 + $0x193c] sm:$0xf0]  ;;  %v11308_v43 = vor.u32 %v16880_v60, %v11305_v62  ;;  %v17216_v24 = vld [vmem:[#allocation2 + $0xaa4] sm:$0xf] }
 0x2c2   :  { %v15239_v39 = vld [vmem:[#allocation2 + $0x1ee0] sm:$0xf]  ;;  %v14472_v51 = vor.u32 %v17684_v2, %v14471_v19  ;;  %9095 = vmatpush.bf16.msrb.mxu2 %v16104_v33  ;;  %v13513_v19 = vld [vmem:[#allocation2 + $0x11c0] sm:$0xf0]  ;;  %9110 = vmatpush.bf16.msrb.mxu3 %v11404_v15 }
 0x2c3   :  { %v17876_v17 = vld [vmem:[#allocation2 + $0x1f3c] sm:$0xf0]  ;;  %v17624_v2 = vld [vmem:[#allocation2 + $0x1764] sm:$0xf] }
 0x2c4   :  { %v16007_v30 = vld [vmem:[#allocation2 + $0x24e0] sm:$0xf]  ;;  %v15240_v8 = vor.u32 %v17876_v17, %v15239_v39  ;;  %9068 = vmatpush.bf16.msrb.mxu0 %v14472_v51  ;;  %v17816_v39 = vld [vmem:[#allocation2 + $0x1d64] sm:$0xf]  ;;  %v14284_v63 = vor.u32 %v17624_v2, %v14281_v20 }
 0x2c5   :  { %v18068_v10 = vld [vmem:[#allocation2 + $0x253c] sm:$0xf0]  ;;  %v15049_v17 = vld [vmem:[#allocation2 + $0x1dc0] sm:$0xf0] }
 0x2c6   :  { %v14375_v27 = vld [vmem:[#allocation2 + $0x1820] sm:$0xf]  ;;  %v16008_v50 = vor.u32 %v18068_v10, %v16007_v30  ;;  %9082 = vmatpush.bf16.msrb.mxu1 %v15240_v8  ;;  %v12748_v30 = vor.u32 %v17240_v3, %v12745_v18  ;;  %v13516_v10 = vor.u32 %v17432_v58, %v13513_v19  ;;  %v15052_v51 = vor.u32 %v17816_v39, %v15049_v17  ;;  %v17792_v8 = vld [vmem:[#allocation2 + $0x1ca4] sm:$0xf] }
 0x2c7   :  { %v17660_v36 = vld [vmem:[#allocation2 + $0x187c] sm:$0xf0]  ;;  %9111 = vmatpush.bf16.msrb.mxu3 %v11308_v43  ;;  %v17192_v15 = vld [vmem:[#allocation2 + $0x9e4] sm:$0xf]  ;;  %v18757_v43 = vpop.f32.mrf.mxu3 }
 0x2c8   :  { %v15143_v48 = vld [vmem:[#allocation2 + $0x1e20] sm:$0xf]  ;;  %v14376_v12 = vor.u32 %v17660_v36, %v14375_v27  ;;  %9096 = vmatpush.bf16.msrb.mxu2 %v16008_v50  ;;  %v13417_v27 = vld [vmem:[#allocation2 + $0x1100] sm:$0xf0] }
 0x2c9   :  { %v17852_v5 = vld [vmem:[#allocation2 + $0x1e7c] sm:$0xf0]  ;;  %v17600_v36 = vld [vmem:[#allocation2 + $0x16a4] sm:$0xf]  ;;  %v13420_v20 = vor.u32 %v17408_v7, %v13417_v27  ;;  %v18754_v7 = vpop.f32.mrf.mxu2 }
 0x2ca   :  { %v15911_v55 = vld [vmem:[#allocation2 + $0x2420] sm:$0xf]  ;;  %v15144_v1 = vor.u32 %v17852_v5, %v15143_v48  ;;  %9069 = vmatpush.bf16.msrb.mxu0 %v14376_v12  ;;  %v14953_v50 = vld [vmem:[#allocation2 + $0x1d00] sm:$0xf0]  ;;  %v12652_v48 = vor.u32 %v17216_v24, %v12649_v53  ;;  %v18749_v5 = vpop.f32.mrf.mxu1  ;;  %9112 = vmatmul.bf16.vlgmr.msrb.gmra.mxu3 %v18525_v57  ;;  %v8847_v24 = vpop.f32.mrf.mxu0 }
 0x2cb   :  { %v18044_v4 = vld [vmem:[#allocation2 + $0x247c] sm:$0xf0]  ;;  %19422 = vst [vmem:[#allocation49_spill] sm:$0xff] %v18749_v5  ;;  %v17384_v60 = vld [vmem:[#allocation2 + $0xfe4] sm:$0xf]  ;;  %9160 = vmatpush.bf16.msra.mxu3 %v15052_v51  ;;  %v14956_v62 = vor.u32 %v17792_v8, %v14953_v50 }
 0x2cc   :  { %v15912_v33 = vor.u32 %v18044_v4, %v15911_v55  ;;  %9083 = vmatpush.bf16.msrb.mxu1 %v15144_v1  ;;  %v14188_v55 = vor.u32 %v17600_v36, %v14185_v13  ;;  %v12553_v4 = vld [vmem:[#allocation2 + $0xa40] sm:$0xf0]  ;;  %v8848_v36 = vadd.f32 %v8847_v24, %v18745_v14 }
 0x2cd   :  { %9070 = vmatmul.bf16.vlgmr.msrb.gmra.mxu0 %v18570_v37  ;;  %v13321_v3 = vld [vmem:[#allocation2 + $0x1040] sm:$0xf0]  ;;  %v12556_v19 = vor.u32 %v17192_v15, %v12553_v4 }
 0x2ce   :  { %9097 = vmatpush.bf16.msrb.mxu2 %v15912_v33  ;;  %9118 = vmatpush.bf16.msra.mxu0 %v12748_v30  ;;  %v17576_v18 = vld [vmem:[#allocation2 + $0x15e4] sm:$0xf]  ;;  %v13324_v13 = vor.u32 %v17384_v60, %v13321_v3 }
 0x2cf   :  { %v14089_v58 = vld [vmem:[#allocation2 + $0x1640] sm:$0xf0]  ;;  %9084 = vmatmul.bf16.vlgmr.msrb.gmra.mxu1 %v18574_v42  ;;  %9161 = vmatpush.bf16.msra.mxu3 %v14956_v62 }
 0x2d0   :  { %9132 = vmatpush.bf16.msra.mxu1 %v13516_v10  ;;  %v17768_v53 = vld [vmem:[#allocation2 + $0x1be4] sm:$0xf]  ;;  %v14092_v2 = vor.u32 %v17576_v18, %v14089_v58 }
 0x2d1   :  { %9098 = vmatmul.bf16.vlgmr.msrb.gmra.mxu2 %v18572_v41  ;;  %v14857_v12 = vld [vmem:[#allocation2 + $0x1c40] sm:$0xf0] }
 0x2d2   :  { %9146 = vmatpush.bf16.msra.mxu2 %v14284_v63  ;;  %9119 = vmatpush.bf16.msra.mxu0 %v12652_v48  ;;  %v17168_v1 = vld [vmem:[#allocation2 + $0x924] sm:$0xf]  ;;  %v14860_v17 = vor.u32 %v17768_v53, %v14857_v12  ;;  %v18762_v22 = vpop.f32.mrf.mxu0 }
 0x2d3   :  { %v12457_v33 = vld [vmem:[#allocation2 + $0x980] sm:$0xf0]  ;;  %19423 = vst [vmem:[#allocation50_spill] sm:$0xff] %v18762_v22  ;;  %v17422_v22 = vld [vmem:[#allocation2 + $0x110c] sm:$0xf0] }
 0x2d4   :  { %9133 = vmatpush.bf16.msra.mxu1 %v13420_v20  ;;  %v17360_v39 = vld [vmem:[#allocation2 + $0xf24] sm:$0xf]  ;;  %v12460_v8 = vor.u32 %v17168_v1, %v12457_v33  ;;  %v8861_v20 = vpop.f32.mrf.mxu1  ;;  %9162 = vmatpush.bf16.msra.mxu3 %v14860_v17 }
 0x2d5   :  { %v13225_v30 = vld [vmem:[#allocation2 + $0xf80] sm:$0xf0]  ;;  %v8862_v62 = vadd.f32 %v8861_v20, %v8848_v36  ;;  %v8889_v36 = vpop.f32.mrf.mxu3 }
 0x2d6   :  { %9147 = vmatpush.bf16.msra.mxu2 %v14188_v55  ;;  %v17552_v10 = vld [vmem:[#allocation2 + $0x1524] sm:$0xf]  ;;  %9120 = vmatpush.bf16.msra.mxu0 %v12556_v19  ;;  %v13228_v50 = vor.u32 %v17360_v39, %v13225_v30  ;;  %v8875_v30 = vpop.f32.mrf.mxu2 }
 0x2d7   :  { %v13993_v63 = vld [vmem:[#allocation2 + $0x1580] sm:$0xf0]  ;;  %v8876_v24 = vadd.f32 %v8875_v30, %v8862_v62 }
 0x2d8   :  { %v17744_v51 = vld [vmem:[#allocation2 + $0x1b24] sm:$0xf]  ;;  %9134 = vmatpush.bf16.msra.mxu1 %v13324_v13  ;;  %v13996_v48 = vor.u32 %v17552_v10, %v13993_v63 }
 0x2d9   :  { %v14761_v27 = vld [vmem:[#allocation2 + $0x1b80] sm:$0xf0] }
 0x2da   :  { %9148 = vmatpush.bf16.msra.mxu2 %v14092_v2  ;;  %v17144_v55 = vld [vmem:[#allocation2 + $0x864] sm:$0xf]  ;;  %v14764_v60 = vor.u32 %v17744_v51, %v14761_v27  ;;  %9121 = vmatpush.bf16.msra.mxu0 %v12460_v8 }
 0x2db   :  { %v12361_v15 = vld [vmem:[#allocation2 + $0x8c0] sm:$0xf0] }
 0x2dc   :  { %v17336_v4 = vld [vmem:[#allocation2 + $0xe64] sm:$0xf]  ;;  %v12364_v19 = vor.u32 %v17144_v55, %v12361_v15  ;;  %9135 = vmatpush.bf16.msra.mxu1 %v13228_v50  ;;  %9163 = vmatpush.bf16.msra.mxu3 %v14764_v60  ;;  %v18760_v50 = vadd.f32 %v8889_v36, %v8876_v24 }
 0x2dd   :  { %v13129_v3 = vld [vmem:[#allocation2 + $0xec0] sm:$0xf0] }
 0x2de   :  { %v17528_v18 = vld [vmem:[#allocation2 + $0x1464] sm:$0xf]  ;;  %9149 = vmatpush.bf16.msra.mxu2 %v13996_v48  ;;  %v13132_v14 = vor.u32 %v17336_v4, %v13129_v3  ;;  %9122 = vmatpush.bf16.msra.mxu0 %v12364_v19 }
 0x2df   :  { %v13897_v58 = vld [vmem:[#allocation2 + $0x14c0] sm:$0xf0] }
 0x2e0   :  { %v17720_v53 = vld [vmem:[#allocation2 + $0x1a64] sm:$0xf]  ;;  %v13900_v13 = vor.u32 %v17528_v18, %v13897_v58  ;;  %9136 = vmatpush.bf16.msra.mxu1 %v13132_v14 }
 0x2e1   :  { %v14665_v12 = vld [vmem:[#allocation2 + $0x1ac0] sm:$0xf0] }
 0x2e2   :  { %v17120_v2 = vld [vmem:[#allocation2 + $0x7a4] sm:$0xf]  ;;  %v14668_v39 = vor.u32 %v17720_v53, %v14665_v12  ;;  %9150 = vmatpush.bf16.msra.mxu2 %v13900_v13 }
 0x2e3   :  { %v12265_v1 = vld [vmem:[#allocation2 + $0x800] sm:$0xf0] }
 0x2e4   :  { %v17312_v33 = vld [vmem:[#allocation2 + $0xda4] sm:$0xf]  ;;  %v12268_v8 = vor.u32 %v17120_v2, %v12265_v1  ;;  %9164 = vmatpush.bf16.msra.mxu3 %v14668_v39 }
 0x2e5   :  { %v13033_v17 = vld [vmem:[#allocation2 + $0xe00] sm:$0xf0] }
 0x2e6   :  { %v17504_v10 = vld [vmem:[#allocation2 + $0x13a4] sm:$0xf]  ;;  %v13036_v48 = vor.u32 %v17312_v33, %v13033_v17  ;;  %9123 = vmatpush.bf16.msra.mxu0 %v12268_v8 }
 0x2e7   :  { %v13801_v63 = vld [vmem:[#allocation2 + $0x1400] sm:$0xf0] }
 0x2e8   :  { %v17696_v51 = vld [vmem:[#allocation2 + $0x19a4] sm:$0xf]  ;;  %v13804_v20 = vor.u32 %v17504_v10, %v13801_v63  ;;  %9137 = vmatpush.bf16.msra.mxu1 %v13036_v48 }
 0x2e9   :  { %v14569_v27 = vld [vmem:[#allocation2 + $0x1a00] sm:$0xf0] }
 0x2ea   :  { %v17096_v55 = vld [vmem:[#allocation2 + $0x6e4] sm:$0xf]  ;;  %v14572_v60 = vor.u32 %v17696_v51, %v14569_v27  ;;  %9151 = vmatpush.bf16.msra.mxu2 %v13804_v20 }
 0x2eb   :  { %v12169_v15 = vld [vmem:[#allocation2 + $0x740] sm:$0xf0] }
 0x2ec   :  { %v17288_v4 = vld [vmem:[#allocation2 + $0xce4] sm:$0xf]  ;;  %v12172_v12 = vor.u32 %v17096_v55, %v12169_v15  ;;  %9165 = vmatpush.bf16.msra.mxu3 %v14572_v60  ;;  %v11983_v55 = vld [vmem:[#allocation2 + $0x568] sm:$0xf] }
 0x2ed   :  { %v12937_v3 = vld [vmem:[#allocation2 + $0xd40] sm:$0xf0]  ;;  %v17061_v15 = vld [vmem:[#allocation2 + $0x5c4] sm:$0xf0] }
 0x2ee   :  { %v17480_v18 = vld [vmem:[#allocation2 + $0x12e4] sm:$0xf]  ;;  %v12940_v14 = vor.u32 %v17288_v4, %v12937_v3  ;;  %9124 = vmatpush.bf16.msra.mxu0 %v12172_v12  ;;  %v12751_v4 = vld [vmem:[#allocation2 + $0xb68] sm:$0xf] }
 0x2ef   :  { %v13705_v58 = vld [vmem:[#allocation2 + $0x1340] sm:$0xf0]  ;;  %v17253_v3 = vld [vmem:[#allocation2 + $0xbc4] sm:$0xf0] }
 0x2f0   :  { %v17672_v62 = vld [vmem:[#allocation2 + $0x18e4] sm:$0xf]  ;;  %v13708_v13 = vor.u32 %v17480_v18, %v13705_v58  ;;  %9138 = vmatpush.bf16.msra.mxu1 %v12940_v14  ;;  %v12752_v12 = vor.u32 %v17253_v3, %v12751_v4  ;;  %v12655_v14 = vld [vmem:[#allocation2 + $0xaa8] sm:$0xf]  ;;  %v18770_v4 = vpop.f32.mrf.mxu2 }
 0x2f1   :  { %v14473_v53 = vld [vmem:[#allocation2 + $0x1940] sm:$0xf0]  ;;  %19425 = vst [vmem:[#allocation52_spill] sm:$0xff] %v18770_v4  ;;  %v17421_v4 = vld [vmem:[#allocation2 + $0x1104] sm:$0xf0] }
 0x2f2   :  { %v17072_v19 = vld [vmem:[#allocation2 + $0x624] sm:$0xf]  ;;  %v14476_v17 = vor.u32 %v17672_v62, %v14473_v53  ;;  %9152 = vmatpush.bf16.msra.mxu2 %v13708_v13  ;;  %v11984_v62 = vor.u32 %v17061_v15, %v11983_v55  ;;  %v17229_v13 = vld [vmem:[#allocation2 + $0xb04] sm:$0xf0] }
 0x2f3   :  { %v12073_v2 = vld [vmem:[#allocation2 + $0x680] sm:$0xf0] }
 0x2f4   :  { %v17264_v1 = vld [vmem:[#allocation2 + $0xc24] sm:$0xf]  ;;  %v12076_v36 = vor.u32 %v17072_v19, %v12073_v2  ;;  %9166 = vmatpush.bf16.msra.mxu3 %v14476_v17  ;;  %v11887_v2 = vld [vmem:[#allocation2 + $0x4a8] sm:$0xf] }
 0x2f5   :  { %v12841_v33 = vld [vmem:[#allocation2 + $0xc80] sm:$0xf0] }
 0x2f6   :  { %v17456_v30 = vld [vmem:[#allocation2 + $0x1224] sm:$0xf]  ;;  %v12844_v48 = vor.u32 %v17264_v1, %v12841_v33  ;;  %9125 = vmatpush.bf16.msra.mxu0 %v12076_v36  ;;  %v12559_v36 = vld [vmem:[#allocation2 + $0x9e8] sm:$0xf] }
 0x2f7   :  { %v13609_v39 = vld [vmem:[#allocation2 + $0x1280] sm:$0xf0] }
 0x2f8   :  { %v17648_v10 = vld [vmem:[#allocation2 + $0x1824] sm:$0xf]  ;;  %v13612_v20 = vor.u32 %v17456_v30, %v13609_v39  ;;  %9139 = vmatpush.bf16.msra.mxu1 %v12844_v48  ;;  %v11888_v30 = vor.u32 %v17037_v6, %v11887_v2 }
 0x2f9   :  { %v14377_v63 = vld [vmem:[#allocation2 + $0x1880] sm:$0xf0]  ;;  %9126 = vmatmul.bf16.vlgmr.msra.gmra.mxu0 %v18540_v11 }
 0x2fa   :  { %v18008_v24 = vld [vmem:[#allocation2 + $0x2364] sm:$0xf]  ;;  %v14380_v60 = vor.u32 %v17648_v10, %v14377_v63  ;;  %9153 = vmatpush.bf16.msra.mxu2 %v13612_v20  ;;  %v12656_v63 = vor.u32 %v17229_v13, %v12655_v14  ;;  %v18768_v20 = vpop.f32.mrf.mxu1 }
 0x2fb   :  { %v15817_v51 = vld [vmem:[#allocation2 + $0x23c0] sm:$0xf0]  ;;  %9140 = vmatmul.bf16.vlgmr.msra.gmra.mxu1 %v18530_v0  ;;  %19424 = vst [vmem:[#allocation51_spill] sm:$0xff] %v18768_v20  ;;  %v17805_v20 = vld [vmem:[#allocation2 + $0x1d04] sm:$0xf0] }
 0x2fc   :  { %v18200_v27 = vld [vmem:[#allocation2 + $0x2964] sm:$0xf]  ;;  %v15820_v18 = vor.u32 %v18008_v24, %v15817_v51  ;;  %9167 = vmatpush.bf16.msra.mxu3 %v14380_v60  ;;  %v11791_v51 = vld [vmem:[#allocation2 + $0x3e8] sm:$0xf] }
 0x2fd   :  { %v16585_v8 = vld [vmem:[#allocation2 + $0x29c0] sm:$0xf0]  ;;  %9154 = vmatmul.bf16.vlgmr.msra.gmra.mxu2 %v18549_v23 }
 0x2fe   :  { %v16588_v58 = vor.u32 %v18200_v27, %v16585_v8  ;;  %v17984_v53 = vld [vmem:[#allocation2 + $0x22a4] sm:$0xf]  ;;  %9174 = vmatpush.bf16.msrb.mxu0 %v15820_v18  ;;  %9202 = vmatpush.bf16.msrb.mxu2 %v11984_v62  ;;  %v17013_v27 = vld [vmem:[#allocation2 + $0x444] sm:$0xf0]  ;;  %v8903_v62 = vpop.f32.mrf.mxu0 }
 0x2ff   :  { %v15721_v5 = vld [vmem:[#allocation2 + $0x2300] sm:$0xf0]  ;;  %9168 = vmatmul.bf16.vlgmr.msra.gmra.mxu3 %v18570_v37  ;;  %v11792_v8 = vor.u32 %v17013_v27, %v11791_v51  ;;  %v11695_v18 = vld [vmem:[#allocation2 + $0x328] sm:$0xf]  ;;  %v18775_v2 = vadd.f32 %v8903_v62, %v18760_v50 }
 0x300   :  { %v16489_v19 = vld [vmem:[#allocation2 + $0x2900] sm:$0xf0]  ;;  %v15724_v1 = vor.u32 %v17984_v53, %v15721_v5  ;;  %9188 = vmatpush.bf16.msrb.mxu1 %v16588_v58  ;;  %9216 = vmatpush.bf16.msrb.mxu3 %v12752_v12  ;;  %v17205_v5 = vld [vmem:[#allocation2 + $0xa44] sm:$0xf0] }
 0x301   :  { %v16492_v33 = vor.u32 %v18176_v38, %v16489_v19  ;;  %v17960_v17 = vld [vmem:[#allocation2 + $0x21e4] sm:$0xf]  ;;  %v12560_v3 = vor.u32 %v17205_v5, %v12559_v36  ;;  %v16989_v58 = vld [vmem:[#allocation2 + $0x384] sm:$0xf0]  ;;  %v18772_v19 = vpop.f32.mrf.mxu3 }
 0x302   :  { %v15625_v39 = vld [vmem:[#allocation2 + $0x2240] sm:$0xf0]  ;;  %9175 = vmatpush.bf16.msrb.mxu0 %v15724_v1  ;;  %9203 = vmatpush.bf16.msrb.mxu2 %v11888_v30  ;;  %v12463_v53 = vld [vmem:[#allocation2 + $0x928] sm:$0xf]  ;;  %19426 = vst [vmem:[#allocation53_spill] sm:$0xff] %v18772_v19  ;;  %v11696_v1 = vor.u32 %v16989_v58, %v11695_v18  ;;  %v8917_v18 = vpop.f32.mrf.mxu1  ;;  %v8931_v58 = vpop.f32.mrf.mxu2 }
 0x303   :  { %v18152_v10 = vld [vmem:[#allocation2 + $0x27e4] sm:$0xf]  ;;  %v15628_v6 = vor.u32 %v17960_v17, %v15625_v39  ;;  %v17181_v12 = vld [vmem:[#allocation2 + $0x984] sm:$0xf0] }
 0x304   :  { %v16393_v24 = vld [vmem:[#allocation2 + $0x2840] sm:$0xf0]  ;;  %9189 = vmatpush.bf16.msrb.mxu1 %v16492_v33  ;;  %9217 = vmatpush.bf16.msrb.mxu3 %v12656_v63  ;;  %v16965_v51 = vld [vmem:[#allocation2 + $0x2c4] sm:$0xf0] }
 0x305   :  { %v16396_v38 = vor.u32 %v18152_v10, %v16393_v24  ;;  %v17936_v55 = vld [vmem:[#allocation2 + $0x2124] sm:$0xf]  ;;  %v12464_v10 = vor.u32 %v17181_v12, %v12463_v53  ;;  %v11599_v24 = vld [vmem:[#allocation2 + $0x268] sm:$0xf]  ;;  %v8932_v12 = vadd.f32 %v8931_v58, %v8917_v18 }
 0x306   :  { %v15529_v15 = vld [vmem:[#allocation2 + $0x2180] sm:$0xf0]  ;;  %9176 = vmatpush.bf16.msrb.mxu0 %v15628_v6  ;;  %9204 = vmatpush.bf16.msrb.mxu2 %v11792_v8  ;;  %v12367_v27 = vld [vmem:[#allocation2 + $0x868] sm:$0xf]  ;;  %v11600_v6 = vor.u32 %v16965_v51, %v11599_v24  ;;  %v18781_v21 = vpop.f32.mrf.mxu0 }
 0x307   :  { %v18128_v48 = vld [vmem:[#allocation2 + $0x2724] sm:$0xf]  ;;  %v15532_v14 = vor.u32 %v17936_v55, %v15529_v15  ;;  %v17157_v36 = vld [vmem:[#allocation2 + $0x8c4] sm:$0xf0]  ;;  %19427 = vst [vmem:[#allocation54_spill] sm:$0xff] %v18781_v21 }
 0x308   :  { %v16297_v60 = vld [vmem:[#allocation2 + $0x2780] sm:$0xf0]  ;;  %9190 = vmatpush.bf16.msrb.mxu1 %v16396_v38  ;;  %9218 = vmatpush.bf16.msrb.mxu3 %v12560_v3  ;;  %v12368_v15 = vor.u32 %v17157_v36, %v12367_v27  ;;  %v11503_v3 = vld [vmem:[#allocation2 + $0x1a8] sm:$0xf] }
 0x309   :  { %v16300_v13 = vor.u32 %v18128_v48, %v16297_v60  ;;  %v17912_v33 = vld [vmem:[#allocation2 + $0x2064] sm:$0xf]  ;;  %v16941_v60 = vld [vmem:[#allocation2 + $0x204] sm:$0xf0] }
 0x30a   :  { %v15433_v30 = vld [vmem:[#allocation2 + $0x20c0] sm:$0xf0]  ;;  %9177 = vmatpush.bf16.msrb.mxu0 %v15532_v14  ;;  %9205 = vmatpush.bf16.msrb.mxu2 %v11696_v1  ;;  %v12271_v62 = vld [vmem:[#allocation2 + $0x7a8] sm:$0xf]  ;;  %v11504_v1 = vor.u32 %v16941_v60, %v11503_v3 }
 0x30b   :  { %v18104_v17 = vld [vmem:[#allocation2 + $0x2664] sm:$0xf]  ;;  %v15436_v50 = vor.u32 %v17912_v33, %v15433_v30  ;;  %v17133_v53 = vld [vmem:[#allocation2 + $0x804] sm:$0xf0]  ;;  %v8945_v33 = vpop.f32.mrf.mxu3 }
 0x30c   :  { %v16201_v63 = vld [vmem:[#allocation2 + $0x26c0] sm:$0xf0]  ;;  %9191 = vmatpush.bf16.msrb.mxu1 %v16300_v13  ;;  %9219 = vmatpush.bf16.msrb.mxu3 %v12464_v10  ;;  %v18779_v10 = vadd.f32 %v8945_v33, %v8932_v12  ;;  %v12272_v24 = vor.u32 %v17133_v53, %v12271_v62  ;;  %v11407_v27 = vld [vmem:[#allocation2 + $0xe8] sm:$0xf] }
 0x30d   :  { %v16204_v5 = vor.u32 %v18104_v17, %v16201_v63  ;;  %v17888_v38 = vld [vmem:[#allocation2 + $0x1fa4] sm:$0xf]  ;;  %v16917_v36 = vld [vmem:[#allocation2 + $0x144] sm:$0xf0] }
 0x30e   :  { %v15337_v8 = vld [vmem:[#allocation2 + $0x2000] sm:$0xf0]  ;;  %9178 = vmatpush.bf16.msrb.mxu0 %v15436_v50  ;;  %9206 = vmatpush.bf16.msrb.mxu2 %v11600_v6  ;;  %v12175_v39 = vld [vmem:[#allocation2 + $0x6e8] sm:$0xf]  ;;  %v11408_v6 = vor.u32 %v16917_v36, %v11407_v27 }
 0x30f   :  { %v18080_v55 = vld [vmem:[#allocation2 + $0x25a4] sm:$0xf]  ;;  %v15340_v14 = vor.u32 %v17888_v38, %v15337_v8  ;;  %v17109_v19 = vld [vmem:[#allocation2 + $0x744] sm:$0xf0] }
 0x310   :  { %v16105_v48 = vld [vmem:[#allocation2 + $0x2600] sm:$0xf0]  ;;  %9192 = vmatpush.bf16.msrb.mxu1 %v16204_v5  ;;  %9220 = vmatpush.bf16.msrb.mxu3 %v12368_v15  ;;  %v11311_v3 = vld [vmem:[#allocation2 + $0x28] sm:$0xf]  ;;  %v12176_v60 = vor.u32 %v17109_v19, %v12175_v39 }
 0x311   :  { %v16108_v13 = vor.u32 %v18080_v55, %v16105_v48  ;;  %v17864_v30 = vld [vmem:[#allocation2 + $0x1ee4] sm:$0xf]  ;;  %v16893_v15 = vld [vmem:[#allocation2 + $0x84] sm:$0xf0] }
 0x312   :  { %v15241_v17 = vld [vmem:[#allocation2 + $0x1f40] sm:$0xf0]  ;;  %9179 = vmatpush.bf16.msrb.mxu0 %v15340_v14  ;;  %9207 = vmatpush.bf16.msrb.mxu2 %v11504_v1  ;;  %v12079_v18 = vld [vmem:[#allocation2 + $0x628] sm:$0xf]  ;;  %v11312_v1 = vor.u32 %v16893_v15, %v11311_v3 }
 0x313   :  { %v18056_v63 = vld [vmem:[#allocation2 + $0x24e4] sm:$0xf]  ;;  %v15244_v50 = vor.u32 %v17864_v30, %v15241_v17  ;;  %v17085_v58 = vld [vmem:[#allocation2 + $0x684] sm:$0xf0] }
 0x314   :  { %v16009_v51 = vld [vmem:[#allocation2 + $0x2540] sm:$0xf0]  ;;  %9193 = vmatpush.bf16.msrb.mxu1 %v16108_v13  ;;  %9221 = vmatpush.bf16.msrb.mxu3 %v12272_v24  ;;  %v13519_v62 = vld [vmem:[#allocation2 + $0x1168] sm:$0xf]  ;;  %v12080_v24 = vor.u32 %v17085_v58, %v12079_v18 }
 0x315   :  { %v17840_v38 = vld [vmem:[#allocation2 + $0x1e24] sm:$0xf]  ;;  %v16012_v5 = vor.u32 %v18056_v63, %v16009_v51  ;;  %v17445_v53 = vld [vmem:[#allocation2 + $0x11c4] sm:$0xf0] }
 0x316   :  { %v15145_v8 = vld [vmem:[#allocation2 + $0x1e80] sm:$0xf0]  ;;  %v14287_v12 = vld [vmem:[#allocation2 + $0x1768] sm:$0xf]  ;;  %9180 = vmatpush.bf16.msrb.mxu0 %v15244_v50  ;;  %9208 = vmatpush.bf16.msrb.mxu2 %v11408_v6  ;;  %v13520_v19 = vor.u32 %v17445_v53, %v13519_v62 }
 0x317   :  { %v18032_v55 = vld [vmem:[#allocation2 + $0x2424] sm:$0xf]  ;;  %v15148_v14 = vor.u32 %v17840_v38, %v15145_v8  ;;  %v17637_v33 = vld [vmem:[#allocation2 + $0x17c4] sm:$0xf0] }
 0x318   :  { %v15913_v48 = vld [vmem:[#allocation2 + $0x2480] sm:$0xf0]  ;;  %v15055_v30 = vld [vmem:[#allocation2 + $0x1d68] sm:$0xf]  ;;  %9194 = vmatpush.bf16.msrb.mxu1 %v16012_v5  ;;  %9222 = vmatpush.bf16.msrb.mxu3 %v12176_v60  ;;  %v14288_v39 = vor.u32 %v17637_v33, %v14287_v12 }
 0x319   :  { %v17829_v17 = vld [vmem:[#allocation2 + $0x1dc4] sm:$0xf0]  ;;  %v15916_v13 = vor.u32 %v18032_v55, %v15913_v48  ;;  %v18783_v55 = vpop.f32.mrf.mxu1 }
 0x31a   :  { %v15823_v63 = vld [vmem:[#allocation2 + $0x2368] sm:$0xf]  ;;  %v15056_v27 = vor.u32 %v17829_v17, %v15055_v30  ;;  %9181 = vmatpush.bf16.msrb.mxu0 %v15148_v14  ;;  %9209 = vmatpush.bf16.msrb.mxu2 %v11312_v1 }
 0x31b   :  { %v18021_v51 = vld [vmem:[#allocation2 + $0x23c4] sm:$0xf0] }
 0x31c   :  { %v13423_v36 = vld [vmem:[#allocation2 + $0x10a8] sm:$0xf]  ;;  %v15824_v50 = vor.u32 %v18021_v51, %v15823_v63  ;;  %9195 = vmatpush.bf16.msrb.mxu1 %v15916_v13  ;;  %9223 = vmatpush.bf16.msrb.mxu3 %v12080_v24  ;;  %v18791_v13 = vpop.f32.mrf.mxu3 }
 0x31d   :  { %v17613_v38 = vld [vmem:[#allocation2 + $0x1704] sm:$0xf0]  ;;  %v13424_v48 = vor.u32 %v17421_v4, %v13423_v36  ;;  %9182 = vmatmul.bf16.vlgmr.msrb.gmra.mxu0 %v18574_v42  ;;  %9210 = vmatmul.bf16.vlgmr.msrb.gmra.mxu2 %v18525_v57  ;;  %19428 = vst [vmem:[#allocation55_spill] sm:$0xff] %v18791_v13  ;;  %v8959_v36 = vpop.f32.mrf.mxu0  ;;  %v17985_v13 = vld [vmem:[#allocation2 + $0x22ac] sm:$0xf] }
 0x31e   :  { %v14959_v8 = vld [vmem:[#allocation2 + $0x1ca8] sm:$0xf]  ;;  %9230 = vmatpush.bf16.msra.mxu0 %v13520_v19  ;;  %9258 = vmatpush.bf16.msra.mxu2 %v15056_v27  ;;  %v14192_v3 = vor.u32 %v17613_v38, %v14191_v16  ;;  %v18788_v16 = vpop.f32.mrf.mxu2 }
 0x31f   :  { %v15727_v5 = vld [vmem:[#allocation2 + $0x22a8] sm:$0xf]  ;;  %v14960_v60 = vor.u32 %v17805_v20, %v14959_v8  ;;  %9196 = vmatmul.bf16.vlgmr.msrb.gmra.mxu1 %v18572_v41  ;;  %9224 = vmatmul.bf16.vlgmr.msrb.gmra.mxu3 %v18540_v11  ;;  %v8960_v8 = vadd.f32 %v8959_v36, %v18779_v10 }
 0x320   :  { %v17997_v6 = vld [vmem:[#allocation2 + $0x2304] sm:$0xf0]  ;;  %9244 = vmatpush.bf16.msra.mxu1 %v14288_v39  ;;  %9272 = vmatpush.bf16.msra.mxu3 %v15824_v50 }
 0x321   :  { %v13327_v15 = vld [vmem:[#allocation2 + $0xfe8] sm:$0xf]  ;;  %v15728_v62 = vor.u32 %v17997_v6, %v15727_v5 }
 0x322   :  { %v17397_v18 = vld [vmem:[#allocation2 + $0x1044] sm:$0xf0]  ;;  %9231 = vmatpush.bf16.msra.mxu0 %v13424_v48  ;;  %9259 = vmatpush.bf16.msra.mxu2 %v14960_v60 }
 0x323   :  { %v14095_v58 = vld [vmem:[#allocation2 + $0x15e8] sm:$0xf]  ;;  %v13328_v4 = vor.u32 %v17397_v18, %v13327_v15 }
 0x324   :  { %v17589_v53 = vld [vmem:[#allocation2 + $0x1644] sm:$0xf0]  ;;  %9245 = vmatpush.bf16.msra.mxu1 %v14192_v3  ;;  %9273 = vmatpush.bf16.msra.mxu3 %v15728_v62  ;;  %v8973_v3 = vpop.f32.mrf.mxu1 }
 0x325   :  { %v14863_v12 = vld [vmem:[#allocation2 + $0x1be8] sm:$0xf]  ;;  %v14096_v20 = vor.u32 %v17589_v53, %v14095_v58  ;;  %v8974_v62 = vadd.f32 %v8973_v3, %v8960_v8 }
 0x326   :  { %v17781_v14 = vld [vmem:[#allocation2 + $0x1c44] sm:$0xf0]  ;;  %9232 = vmatpush.bf16.msra.mxu0 %v13328_v4 }
 0x327   :  { %v15631_v33 = vld [vmem:[#allocation2 + $0x21e8] sm:$0xf]  ;;  %v14864_v17 = vor.u32 %v17781_v14, %v14863_v12 }
 0x328   :  { %v17973_v30 = vld [vmem:[#allocation2 + $0x2244] sm:$0xf0]  ;;  %9246 = vmatpush.bf16.msra.mxu1 %v14096_v20 }
 0x329   :  { %v13231_v1 = vld [vmem:[#allocation2 + $0xf28] sm:$0xf]  ;;  %v15632_v24 = vor.u32 %v17973_v30, %v15631_v33  ;;  %9260 = vmatpush.bf16.msra.mxu2 %v14864_v17 }
 0x32a   :  { %v17373_v63 = vld [vmem:[#allocation2 + $0xf84] sm:$0xf0] }
 0x32b   :  { %v13999_v51 = vld [vmem:[#allocation2 + $0x1528] sm:$0xf]  ;;  %v13232_v5 = vor.u32 %v17373_v63, %v13231_v1  ;;  %9274 = vmatpush.bf16.msra.mxu3 %v15632_v24 }
 0x32c   :  { %v17565_v19 = vld [vmem:[#allocation2 + $0x1584] sm:$0xf0] }
 0x32d   :  { %v14767_v39 = vld [vmem:[#allocation2 + $0x1b28] sm:$0xf]  ;;  %v14000_v6 = vor.u32 %v17565_v19, %v13999_v51  ;;  %9233 = vmatpush.bf16.msra.mxu0 %v13232_v5  ;;  %v8987_v19 = vpop.f32.mrf.mxu2 }
 0x32e   :  { %v17757_v27 = vld [vmem:[#allocation2 + $0x1b84] sm:$0xf0]  ;;  %v8988_v36 = vadd.f32 %v8987_v19, %v8974_v62  ;;  %v12753_v62 = vld [vmem:[#allocation2 + $0xbc8] sm:$0xf0] }
 0x32f   :  { %v15535_v50 = vld [vmem:[#allocation2 + $0x2128] sm:$0xf]  ;;  %v14768_v48 = vor.u32 %v17757_v27, %v14767_v39  ;;  %9247 = vmatpush.bf16.msra.mxu1 %v14000_v6 }
 0x330   :  { %v17949_v38 = vld [vmem:[#allocation2 + $0x2184] sm:$0xf0] }
 0x331   :  { %v13135_v60 = vld [vmem:[#allocation2 + $0xe68] sm:$0xf]  ;;  %v15536_v58 = vor.u32 %v17949_v38, %v15535_v50  ;;  %9261 = vmatpush.bf16.msra.mxu2 %v14768_v48  ;;  %v9001_v50 = vpop.f32.mrf.mxu3 }
 0x332   :  { %v17349_v15 = vld [vmem:[#allocation2 + $0xec4] sm:$0xf0]  ;;  %v18794_v6 = vadd.f32 %v9001_v50, %v8988_v36 }
 0x333   :  { %v13903_v18 = vld [vmem:[#allocation2 + $0x1468] sm:$0xf]  ;;  %v13136_v4 = vor.u32 %v17349_v15, %v13135_v60  ;;  %9275 = vmatpush.bf16.msra.mxu3 %v15536_v58 }
 0x334   :  { %v17541_v53 = vld [vmem:[#allocation2 + $0x14c4] sm:$0xf0] }
 0x335   :  { %v14671_v12 = vld [vmem:[#allocation2 + $0x1a68] sm:$0xf]  ;;  %v13904_v10 = vor.u32 %v17541_v53, %v13903_v18  ;;  %9234 = vmatpush.bf16.msra.mxu0 %v13136_v4 }
 0x336   :  { %v17733_v14 = vld [vmem:[#allocation2 + $0x1ac4] sm:$0xf0] }
 0x337   :  { %v15439_v33 = vld [vmem:[#allocation2 + $0x2068] sm:$0xf]  ;;  %v14672_v20 = vor.u32 %v17733_v14, %v14671_v12  ;;  %9248 = vmatpush.bf16.msra.mxu1 %v13904_v10 }
 0x338   :  { %v17925_v30 = vld [vmem:[#allocation2 + $0x20c4] sm:$0xf0] }
 0x339   :  { %v13039_v17 = vld [vmem:[#allocation2 + $0xda8] sm:$0xf]  ;;  %v15440_v51 = vor.u32 %v17925_v30, %v15439_v33  ;;  %9262 = vmatpush.bf16.msra.mxu2 %v14672_v20 }
 0x33a   :  { %v17325_v1 = vld [vmem:[#allocation2 + $0xe04] sm:$0xf0] }
 0x33b   :  { %v13807_v63 = vld [vmem:[#allocation2 + $0x13a8] sm:$0xf]  ;;  %v13040_v5 = vor.u32 %v17325_v1, %v13039_v17  ;;  %9276 = vmatpush.bf16.msra.mxu3 %v15440_v51 }
 0x33c   :  { %v17517_v24 = vld [vmem:[#allocation2 + $0x1404] sm:$0xf0] }
 0x33d   :  { %v14575_v39 = vld [vmem:[#allocation2 + $0x19a8] sm:$0xf]  ;;  %v13808_v48 = vor.u32 %v17517_v24, %v13807_v63  ;;  %9235 = vmatpush.bf16.msra.mxu0 %v13040_v5 }
 0x33e   :  { %v17709_v27 = vld [vmem:[#allocation2 + $0x1a04] sm:$0xf0] }
 0x33f   :  { %v15343_v38 = vld [vmem:[#allocation2 + $0x1fa8] sm:$0xf]  ;;  %v14576_v3 = vor.u32 %v17709_v27, %v14575_v39  ;;  %9249 = vmatpush.bf16.msra.mxu1 %v13808_v48 }
 0x340   :  { %v17901_v8 = vld [vmem:[#allocation2 + $0x2004] sm:$0xf0] }
 0x341   :  { %v12943_v60 = vld [vmem:[#allocation2 + $0xce8] sm:$0xf]  ;;  %v15344_v58 = vor.u32 %v17901_v8, %v15343_v38  ;;  %9263 = vmatpush.bf16.msra.mxu2 %v14576_v3  ;;  %v17049_v8 = vld [vmem:[#allocation2 + $0x56c] sm:$0xf] }
 0x342   :  { %v17301_v15 = vld [vmem:[#allocation2 + $0xd44] sm:$0xf0] }
 0x343   :  { %v13711_v18 = vld [vmem:[#allocation2 + $0x12e8] sm:$0xf]  ;;  %v12944_v4 = vor.u32 %v17301_v15, %v12943_v60  ;;  %9277 = vmatpush.bf16.msra.mxu3 %v15344_v58  ;;  %v11985_v60 = vld [vmem:[#allocation2 + $0x5c8] sm:$0xf0] }
 0x344   :  { %v17493_v53 = vld [vmem:[#allocation2 + $0x1344] sm:$0xf0]  ;;  %v17241_v15 = vld [vmem:[#allocation2 + $0xb6c] sm:$0xf] }
 0x345   :  { %v14479_v12 = vld [vmem:[#allocation2 + $0x18e8] sm:$0xf]  ;;  %v13712_v17 = vor.u32 %v17493_v53, %v13711_v18  ;;  %9236 = vmatpush.bf16.msra.mxu0 %v12944_v4  ;;  %v17433_v18 = vld [vmem:[#allocation2 + $0x116c] sm:$0xf] }
 0x346   :  { %v17685_v14 = vld [vmem:[#allocation2 + $0x1944] sm:$0xf0]  ;;  %v13521_v53 = vld [vmem:[#allocation2 + $0x11c8] sm:$0xf0] }
 0x347   :  { %v15247_v33 = vld [vmem:[#allocation2 + $0x1ee8] sm:$0xf]  ;;  %v14480_v1 = vor.u32 %v17685_v14, %v14479_v12  ;;  %9250 = vmatpush.bf16.msra.mxu1 %v13712_v17  ;;  %v11988_v14 = vor.u32 %v17049_v8, %v11985_v60  ;;  %v13524_v4 = vor.u32 %v17433_v18, %v13521_v53  ;;  %v17409_v17 = vld [vmem:[#allocation2 + $0x10ac] sm:$0xf]  ;;  %v18806_v53 = vpop.f32.mrf.mxu2 }
 0x348   :  { %v17877_v30 = vld [vmem:[#allocation2 + $0x1f44] sm:$0xf0]  ;;  %v17193_v8 = vld [vmem:[#allocation2 + $0x9ec] sm:$0xf]  ;;  %19431 = vst [vmem:[#allocation58_spill] sm:$0xff] %v18806_v53 }
 0x349   :  { %v12847_v10 = vld [vmem:[#allocation2 + $0xc28] sm:$0xf]  ;;  %v15248_v24 = vor.u32 %v17877_v30, %v15247_v33  ;;  %9264 = vmatpush.bf16.msra.mxu2 %v14480_v1  ;;  %v12756_v33 = vor.u32 %v17241_v15, %v12753_v62  ;;  %v13425_v1 = vld [vmem:[#allocation2 + $0x1108] sm:$0xf0] }
 0x34a   :  { %v17277_v20 = vld [vmem:[#allocation2 + $0xc84] sm:$0xf0]  ;;  %v17385_v60 = vld [vmem:[#allocation2 + $0xfec] sm:$0xf] }
 0x34b   :  { %v13615_v63 = vld [vmem:[#allocation2 + $0x1228] sm:$0xf]  ;;  %v12848_v5 = vor.u32 %v17277_v20, %v12847_v10  ;;  %9278 = vmatpush.bf16.msra.mxu3 %v15248_v24  ;;  %v11889_v10 = vld [vmem:[#allocation2 + $0x508] sm:$0xf0] }
 0x34c   :  { %v17469_v19 = vld [vmem:[#allocation2 + $0x1284] sm:$0xf0]  ;;  %v17217_v20 = vld [vmem:[#allocation2 + $0xaac] sm:$0xf]  ;;  %v11892_v62 = vor.u32 %v17025_v59, %v11889_v10 }
 0x34d   :  { %v14383_v51 = vld [vmem:[#allocation2 + $0x1828] sm:$0xf]  ;;  %v13616_v48 = vor.u32 %v17469_v19, %v13615_v63  ;;  %9237 = vmatpush.bf16.msra.mxu0 %v12848_v5  ;;  %v18798_v63 = vpop.f32.mrf.mxu0  ;;  %v18800_v19 = vpop.f32.mrf.mxu1  ;;  %v12660_v24 = vor.u32 %v17217_v20, %v12657_v9  ;;  %v12561_v5 = vld [vmem:[#allocation2 + $0xa48] sm:$0xf0] }
 0x34e   :  { %v17661_v39 = vld [vmem:[#allocation2 + $0x1884] sm:$0xf0]  ;;  %19429 = vst [vmem:[#allocation56_spill] sm:$0xff] %v18798_v63  ;;  %v12564_v15 = vor.u32 %v17193_v8, %v12561_v5  ;;  %v16977_v18 = vld [vmem:[#allocation2 + $0x32c] sm:$0xf] }
 0x34f   :  { %v15151_v27 = vld [vmem:[#allocation2 + $0x1e28] sm:$0xf]  ;;  %v14384_v3 = vor.u32 %v17661_v39, %v14383_v51  ;;  %9251 = vmatpush.bf16.msra.mxu1 %v13616_v48  ;;  %19430 = vst [vmem:[#allocation57_spill] sm:$0xff] %v18800_v19  ;;  %v13233_v10 = vld [vmem:[#allocation2 + $0xf88] sm:$0xf0] }
 0x350   :  { %v17853_v36 = vld [vmem:[#allocation2 + $0x1e84] sm:$0xf0]  ;;  %9238 = vmatmul.bf16.vlgmr.msra.gmra.mxu0 %v18530_v0  ;;  %v17145_v8 = vld [vmem:[#allocation2 + $0x86c] sm:$0xf] }
 0x351   :  { %v16591_v50 = vld [vmem:[#allocation2 + $0x2968] sm:$0xf]  ;;  %v15152_v58 = vor.u32 %v17853_v36, %v15151_v27  ;;  %9265 = vmatpush.bf16.msra.mxu2 %v14384_v3  ;;  %v17001_v36 = vld [vmem:[#allocation2 + $0x3ec] sm:$0xf] }
 0x352   :  { %v18213_v38 = vld [vmem:[#allocation2 + $0x29c4] sm:$0xf0]  ;;  %9252 = vmatmul.bf16.vlgmr.msra.gmra.mxu1 %v18549_v23  ;;  %v12369_v5 = vld [vmem:[#allocation2 + $0x8c8] sm:$0xf0] }
 0x353   :  { %v16592_v12 = vor.u32 %v18213_v38, %v16591_v50  ;;  %v16495_v30 = vld [vmem:[#allocation2 + $0x28a8] sm:$0xf]  ;;  %9279 = vmatpush.bf16.msra.mxu3 %v15152_v58  ;;  %9300 = vmatpush.bf16.msrb.mxu1 %v11988_v14  ;;  %v13428_v50 = vor.u32 %v17409_v17, %v13425_v1  ;;  %v11793_v38 = vld [vmem:[#allocation2 + $0x448] sm:$0xf0] }
 0x354   :  { %v18189_v21 = vld [vmem:[#allocation2 + $0x2904] sm:$0xf0]  ;;  %9266 = vmatmul.bf16.vlgmr.msra.gmra.mxu2 %v18570_v37  ;;  %v11796_v9 = vor.u32 %v17001_v36, %v11793_v38  ;;  %v17169_v14 = vld [vmem:[#allocation2 + $0x92c] sm:$0xf] }
 0x355   :  { %9286 = vmatpush.bf16.msrb.mxu0 %v16592_v12  ;;  %v16496_v51 = vor.u32 %v18189_v21, %v16495_v30  ;;  %9314 = vmatpush.bf16.msrb.mxu2 %v12756_v33  ;;  %v16399_v39 = vld [vmem:[#allocation2 + $0x27e8] sm:$0xf]  ;;  %v13329_v21 = vld [vmem:[#allocation2 + $0x1048] sm:$0xf0]  ;;  %v18808_v30 = vpop.f32.mrf.mxu3  ;;  %v9015_v17 = vpop.f32.mrf.mxu0 }
 0x356   :  { %v18165_v27 = vld [vmem:[#allocation2 + $0x2844] sm:$0xf0]  ;;  %9280 = vmatmul.bf16.vlgmr.msra.gmra.mxu3 %v18574_v42  ;;  %v13332_v58 = vor.u32 %v17385_v60, %v13329_v21  ;;  %v11697_v12 = vld [vmem:[#allocation2 + $0x388] sm:$0xf0]  ;;  %19432 = vst [vmem:[#allocation59_spill] sm:$0xff] %v18808_v30  ;;  %v9029_v1 = vpop.f32.mrf.mxu1 }
 0x357   :  { %9328 = vmatpush.bf16.msrb.mxu3 %v13524_v4  ;;  %v16400_v59 = vor.u32 %v18165_v27, %v16399_v39  ;;  %9301 = vmatpush.bf16.msrb.mxu1 %v11892_v62  ;;  %v16303_v48 = vld [vmem:[#allocation2 + $0x2728] sm:$0xf]  ;;  %v12465_v33 = vld [vmem:[#allocation2 + $0x988] sm:$0xf0]  ;;  %v9030_v36 = vadd.f32 %v9029_v1, %v9015_v17 }
 0x358   :  { %v18141_v3 = vld [vmem:[#allocation2 + $0x2784] sm:$0xf0]  ;;  %v17361_v4 = vld [vmem:[#allocation2 + $0xf2c] sm:$0xf]  ;;  %v12468_v62 = vor.u32 %v17169_v14, %v12465_v33 }
 0x359   :  { %9287 = vmatpush.bf16.msrb.mxu0 %v16496_v51  ;;  %9315 = vmatpush.bf16.msrb.mxu2 %v12660_v24  ;;  %v16304_v20 = vor.u32 %v18141_v3, %v16303_v48  ;;  %v11700_v51 = vor.u32 %v16977_v18, %v11697_v12  ;;  %v16207_v24 = vld [vmem:[#allocation2 + $0x2668] sm:$0xf]  ;;  %v16953_v27 = vld [vmem:[#allocation2 + $0x26c] sm:$0xf] }
 0x35a   :  { %v18117_v39 = vld [vmem:[#allocation2 + $0x26c4] sm:$0xf0]  ;;  %v11601_v38 = vld [vmem:[#allocation2 + $0x2c8] sm:$0xf0] }
 0x35b   :  { %9329 = vmatpush.bf16.msrb.mxu3 %v13428_v50  ;;  %9302 = vmatpush.bf16.msrb.mxu1 %v11796_v9  ;;  %v13236_v50 = vor.u32 %v17361_v4, %v13233_v10  ;;  %v17337_v60 = vld [vmem:[#allocation2 + $0xe6c] sm:$0xf]  ;;  %v11604_v48 = vor.u32 %v16953_v27, %v11601_v38  ;;  %v12372_v9 = vor.u32 %v17145_v8, %v12369_v5  ;;  %v18093_v3 = vld [vmem:[#allocation2 + $0x2604] sm:$0xf0]  ;;  %v9043_v4 = vpop.f32.mrf.mxu2 }
 0x35c   :  { %v13137_v21 = vld [vmem:[#allocation2 + $0xec8] sm:$0xf0]  ;;  %v9044_v1 = vadd.f32 %v9043_v4, %v9030_v36 }
 0x35d   :  { %9288 = vmatpush.bf16.msrb.mxu0 %v16400_v59  ;;  %9316 = vmatpush.bf16.msrb.mxu2 %v12564_v15  ;;  %v16208_v59 = vor.u32 %v18117_v39, %v16207_v24  ;;  %v16111_v15 = vld [vmem:[#allocation2 + $0x25a8] sm:$0xf]  ;;  %v16929_v18 = vld [vmem:[#allocation2 + $0x1ac] sm:$0xf]  ;;  %v13140_v12 = vor.u32 %v17337_v60, %v13137_v21 }
 0x35e   :  { %v11505_v14 = vld [vmem:[#allocation2 + $0x208] sm:$0xf0]  ;;  %v16112_v30 = vor.u32 %v18093_v3, %v16111_v15  ;;  %v16015_v24 = vld [vmem:[#allocation2 + $0x24e8] sm:$0xf] }
 0x35f   :  { %9330 = vmatpush.bf16.msrb.mxu3 %v13332_v58  ;;  %9303 = vmatpush.bf16.msrb.mxu1 %v11700_v51  ;;  %v17121_v33 = vld [vmem:[#allocation2 + $0x7ac] sm:$0xf]  ;;  %v11508_v51 = vor.u32 %v16929_v18, %v11505_v14  ;;  %v18069_v39 = vld [vmem:[#allocation2 + $0x2544] sm:$0xf0] }
 0x360   :  { %v12273_v58 = vld [vmem:[#allocation2 + $0x808] sm:$0xf0]  ;;  %v16016_v36 = vor.u32 %v18069_v39, %v16015_v24  ;;  %v18045_v15 = vld [vmem:[#allocation2 + $0x2484] sm:$0xf0] }
 0x361   :  { %9289 = vmatpush.bf16.msrb.mxu0 %v16304_v20  ;;  %9317 = vmatpush.bf16.msrb.mxu2 %v12468_v62  ;;  %v17313_v10 = vld [vmem:[#allocation2 + $0xdac] sm:$0xf]  ;;  %v9057_v20 = vpop.f32.mrf.mxu3  ;;  %v12276_v62 = vor.u32 %v17121_v33, %v12273_v58 }
 0x362   :  { %v13041_v17 = vld [vmem:[#allocation2 + $0xe08] sm:$0xf0]  ;;  %v18810_v38 = vadd.f32 %v9057_v20, %v9044_v1 }
 0x363   :  { %9331 = vmatpush.bf16.msrb.mxu3 %v13236_v50  ;;  %9304 = vmatpush.bf16.msrb.mxu1 %v11604_v48  ;;  %v16905_v27 = vld [vmem:[#allocation2 + $0xec] sm:$0xf]  ;;  %v13044_v50 = vor.u32 %v17313_v10, %v13041_v17 }
 0x364   :  { %v11409_v8 = vld [vmem:[#allocation2 + $0x148] sm:$0xf0] }
 0x365   :  { %9290 = vmatpush.bf16.msrb.mxu0 %v16208_v59  ;;  %9318 = vmatpush.bf16.msrb.mxu2 %v12372_v9  ;;  %v17097_v5 = vld [vmem:[#allocation2 + $0x6ec] sm:$0xf]  ;;  %v15919_v59 = vld [vmem:[#allocation2 + $0x2428] sm:$0xf]  ;;  %v11412_v48 = vor.u32 %v16905_v27, %v11409_v8 }
 0x366   :  { %v12177_v60 = vld [vmem:[#allocation2 + $0x748] sm:$0xf0] }
 0x367   :  { %9332 = vmatpush.bf16.msrb.mxu3 %v13140_v12  ;;  %v17289_v21 = vld [vmem:[#allocation2 + $0xcec] sm:$0xf]  ;;  %9305 = vmatpush.bf16.msrb.mxu1 %v11508_v51  ;;  %v12180_v9 = vor.u32 %v17097_v5, %v12177_v60 }
 0x368   :  { %v12945_v53 = vld [vmem:[#allocation2 + $0xd48] sm:$0xf0] }
 0x369   :  { %9291 = vmatpush.bf16.msrb.mxu0 %v16112_v30  ;;  %9319 = vmatpush.bf16.msrb.mxu2 %v12276_v62  ;;  %v16881_v3 = vld [vmem:[#allocation2 + $0x2c] sm:$0xf]  ;;  %v12948_v33 = vor.u32 %v17289_v21, %v12945_v53  ;;  %v15920_v30 = vor.u32 %v18045_v15, %v15919_v59  ;;  %v18812_v21 = vpop.f32.mrf.mxu0 }
 0x36a   :  { %v11313_v18 = vld [vmem:[#allocation2 + $0x88] sm:$0xf0]  ;;  %19433 = vst [vmem:[#allocation60_spill] sm:$0xff] %v18812_v21  ;;  %v12663_v21 = vld [vmem:[#allocation2 + $0xab0] sm:$0xf] }
 0x36b   :  { %v17073_v14 = vld [vmem:[#allocation2 + $0x62c] sm:$0xf]  ;;  %9333 = vmatpush.bf16.msrb.mxu3 %v13044_v50  ;;  %9306 = vmatpush.bf16.msrb.mxu1 %v11412_v48  ;;  %v11316_v51 = vor.u32 %v16881_v3, %v11313_v18  ;;  %v18814_v18 = vpop.f32.mrf.mxu1 }
 0x36c   :  { %v12081_v12 = vld [vmem:[#allocation2 + $0x688] sm:$0xf0]  ;;  %19434 = vst [vmem:[#allocation61_spill] sm:$0xff] %v18814_v18  ;;  %v17038_v18 = vld [vmem:[#allocation2 + $0x50c] sm:$0xf0] }
 0x36d   :  { %v17265_v58 = vld [vmem:[#allocation2 + $0xc2c] sm:$0xf]  ;;  %9292 = vmatpush.bf16.msrb.mxu0 %v16016_v36  ;;  %9320 = vmatpush.bf16.msrb.mxu2 %v12180_v9  ;;  %v12084_v62 = vor.u32 %v17073_v14, %v12081_v12 }
 0x36e   :  { %v12849_v4 = vld [vmem:[#allocation2 + $0xc88] sm:$0xf0] }
 0x36f   :  { %v17625_v10 = vld [vmem:[#allocation2 + $0x176c] sm:$0xf]  ;;  %9334 = vmatpush.bf16.msrb.mxu3 %v12948_v33  ;;  %v12852_v50 = vor.u32 %v17265_v58, %v12849_v4  ;;  %9307 = vmatpush.bf16.msrb.mxu1 %v11316_v51 }
 0x370   :  { %v14289_v17 = vld [vmem:[#allocation2 + $0x17c8] sm:$0xf0] }
 0x371   :  { %v17817_v1 = vld [vmem:[#allocation2 + $0x1d6c] sm:$0xf]  ;;  %v14292_v53 = vor.u32 %v17625_v10, %v14289_v17  ;;  %9293 = vmatpush.bf16.msrb.mxu0 %v15920_v30  ;;  %9321 = vmatpush.bf16.msrb.mxu2 %v12084_v62 }
 0x372   :  { %v15057_v20 = vld [vmem:[#allocation2 + $0x1dc8] sm:$0xf0]  ;;  %9308 = vmatmul.bf16.vlgmr.msrb.gmra.mxu1 %v18525_v57 }
 0x373   :  { %v18009_v24 = vld [vmem:[#allocation2 + $0x236c] sm:$0xf]  ;;  %v15060_v5 = vor.u32 %v17817_v1, %v15057_v20  ;;  %9335 = vmatpush.bf16.msrb.mxu3 %v12852_v50 }
 0x374   :  { %v15825_v39 = vld [vmem:[#allocation2 + $0x23c8] sm:$0xf0]  ;;  %9294 = vmatmul.bf16.vlgmr.msrb.gmra.mxu0 %v18572_v41  ;;  %9322 = vmatmul.bf16.vlgmr.msrb.gmra.mxu2 %v18540_v11 }
 0x375   :  { %v18201_v27 = vld [vmem:[#allocation2 + $0x296c] sm:$0xf]  ;;  %v15828_v60 = vor.u32 %v18009_v24, %v15825_v39  ;;  %9342 = vmatpush.bf16.msra.mxu0 %v14292_v53  ;;  %9356 = vmatpush.bf16.msra.mxu1 %v15060_v5 }
 0x376   :  { %v16593_v8 = vld [vmem:[#allocation2 + $0x29c8] sm:$0xf0]  ;;  %9336 = vmatmul.bf16.vlgmr.msrb.gmra.mxu3 %v18530_v0 }
 0x377   :  { %v17601_v19 = vld [vmem:[#allocation2 + $0x16ac] sm:$0xf]  ;;  %v16596_v59 = vor.u32 %v18201_v27, %v16593_v8  ;;  %9370 = vmatpush.bf16.msra.mxu2 %v15828_v60 }
 0x378   :  { %v14193_v63 = vld [vmem:[#allocation2 + $0x1708] sm:$0xf0] }
 0x379   :  { %v17793_v36 = vld [vmem:[#allocation2 + $0x1cac] sm:$0xf]  ;;  %v14196_v14 = vor.u32 %v17601_v19, %v14193_v63  ;;  %9384 = vmatpush.bf16.msra.mxu3 %v16596_v59  ;;  %v18819_v19 = vpop.f32.mrf.mxu2 }
 0x37a   :  { %v14961_v15 = vld [vmem:[#allocation2 + $0x1d08] sm:$0xf0]  ;;  %19435 = vst [vmem:[#allocation62_spill] sm:$0xff] %v18819_v19  ;;  %v11895_v19 = vld [vmem:[#allocation2 + $0x4b0] sm:$0xf] }
 0x37b   :  { %v15729_v48 = vld [vmem:[#allocation2 + $0x2308] sm:$0xf0]  ;;  %v14964_v33 = vor.u32 %v17793_v36, %v14961_v15  ;;  %9343 = vmatpush.bf16.msra.mxu0 %v14196_v14  ;;  %v9071_v36 = vpop.f32.mrf.mxu0 }
 0x37c   :  { %v18177_v9 = vld [vmem:[#allocation2 + $0x28ac] sm:$0xf]  ;;  %v15732_v12 = vor.u32 %v17985_v13, %v15729_v48  ;;  %v9072_v48 = vadd.f32 %v9071_v36, %v18810_v38 }
 0x37d   :  { %v16497_v3 = vld [vmem:[#allocation2 + $0x2908] sm:$0xf0]  ;;  %9357 = vmatpush.bf16.msra.mxu1 %v14964_v33  ;;  %v9085_v33 = vpop.f32.mrf.mxu1 }
 0x37e   :  { %v17577_v58 = vld [vmem:[#allocation2 + $0x15ec] sm:$0xf]  ;;  %v16500_v17 = vor.u32 %v18177_v9, %v16497_v3  ;;  %9371 = vmatpush.bf16.msra.mxu2 %v15732_v12 }
 0x37f   :  { %v14097_v4 = vld [vmem:[#allocation2 + $0x1648] sm:$0xf0] }
 0x380   :  { %v17769_v10 = vld [vmem:[#allocation2 + $0x1bec] sm:$0xf]  ;;  %v14100_v63 = vor.u32 %v17577_v58, %v14097_v4  ;;  %9385 = vmatpush.bf16.msra.mxu3 %v16500_v17  ;;  %v9086_v17 = vadd.f32 %v9085_v33, %v9072_v48 }
 0x381   :  { %v14865_v1 = vld [vmem:[#allocation2 + $0x1c48] sm:$0xf0] }
 0x382   :  { %v17961_v30 = vld [vmem:[#allocation2 + $0x21ec] sm:$0xf]  ;;  %v14868_v13 = vor.u32 %v17769_v10, %v14865_v1  ;;  %9344 = vmatpush.bf16.msra.mxu0 %v14100_v63 }
 0x383   :  { %v15633_v20 = vld [vmem:[#allocation2 + $0x2248] sm:$0xf0] }
 0x384   :  { %v18153_v24 = vld [vmem:[#allocation2 + $0x27ec] sm:$0xf]  ;;  %v15636_v51 = vor.u32 %v17961_v30, %v15633_v20  ;;  %9358 = vmatpush.bf16.msra.mxu1 %v14868_v13 }
 0x385   :  { %v16401_v39 = vld [vmem:[#allocation2 + $0x2848] sm:$0xf0] }
 0x386   :  { %v17553_v62 = vld [vmem:[#allocation2 + $0x152c] sm:$0xf]  ;;  %v16404_v50 = vor.u32 %v18153_v24, %v16401_v39  ;;  %9372 = vmatpush.bf16.msra.mxu2 %v15636_v51 }
 0x387   :  { %v14001_v27 = vld [vmem:[#allocation2 + $0x1588] sm:$0xf0] }
 0x388   :  { %v17745_v8 = vld [vmem:[#allocation2 + $0x1b2c] sm:$0xf]  ;;  %v14004_v9 = vor.u32 %v17553_v62, %v14001_v27  ;;  %9386 = vmatpush.bf16.msra.mxu3 %v16404_v50 }
 0x389   :  { %v14769_v53 = vld [vmem:[#allocation2 + $0x1b88] sm:$0xf0] }
 0x38a   :  { %v17937_v5 = vld [vmem:[#allocation2 + $0x212c] sm:$0xf]  ;;  %v14772_v3 = vor.u32 %v17745_v8, %v14769_v53  ;;  %9345 = vmatpush.bf16.msra.mxu0 %v14004_v9  ;;  %v9099_v53 = vpop.f32.mrf.mxu2  ;;  %v12759_v9 = vld [vmem:[#allocation2 + $0xb70] sm:$0xf] }
 0x38b   :  { %v15537_v60 = vld [vmem:[#allocation2 + $0x2188] sm:$0xf0]  ;;  %v18823_v36 = vadd.f32 %v9099_v53, %v9086_v17 }
 0x38c   :  { %v18129_v59 = vld [vmem:[#allocation2 + $0x272c] sm:$0xf]  ;;  %v15540_v14 = vor.u32 %v17937_v5, %v15537_v60  ;;  %9359 = vmatpush.bf16.msra.mxu1 %v14772_v3 }
 0x38d   :  { %v16305_v15 = vld [vmem:[#allocation2 + $0x2788] sm:$0xf0] }
 0x38e   :  { %v17529_v12 = vld [vmem:[#allocation2 + $0x146c] sm:$0xf]  ;;  %v16308_v10 = vor.u32 %v18129_v59, %v16305_v15  ;;  %9373 = vmatpush.bf16.msra.mxu2 %v15540_v14 }
 0x38f   :  { %v13905_v58 = vld [vmem:[#allocation2 + $0x14c8] sm:$0xf0] }
 0x390   :  { %v17721_v4 = vld [vmem:[#allocation2 + $0x1a6c] sm:$0xf]  ;;  %v13908_v63 = vor.u32 %v17529_v12, %v13905_v58  ;;  %9387 = vmatpush.bf16.msra.mxu3 %v16308_v10 }
 0x391   :  { %v14673_v1 = vld [vmem:[#allocation2 + $0x1ac8] sm:$0xf0] }
 0x392   :  { %v17913_v30 = vld [vmem:[#allocation2 + $0x206c] sm:$0xf]  ;;  %v14676_v38 = vor.u32 %v17721_v4, %v14673_v1  ;;  %9346 = vmatpush.bf16.msra.mxu0 %v13908_v63  ;;  %v18827_v4 = vpop.f32.mrf.mxu3 }
 0x393   :  { %v15441_v20 = vld [vmem:[#allocation2 + $0x20c8] sm:$0xf0]  ;;  %19436 = vst [vmem:[#allocation63_spill] sm:$0xff] %v18827_v4  ;;  %v17446_v4 = vld [vmem:[#allocation2 + $0x11cc] sm:$0xf0] }
 0x394   :  { %v18105_v24 = vld [vmem:[#allocation2 + $0x266c] sm:$0xf]  ;;  %v15444_v13 = vor.u32 %v17913_v30, %v15441_v20  ;;  %9360 = vmatpush.bf16.msra.mxu1 %v14676_v38 }
 0x395   :  { %v16209_v39 = vld [vmem:[#allocation2 + $0x26c8] sm:$0xf0] }
 0x396   :  { %v17505_v51 = vld [vmem:[#allocation2 + $0x13ac] sm:$0xf]  ;;  %v16212_v8 = vor.u32 %v18105_v24, %v16209_v39  ;;  %9374 = vmatpush.bf16.msra.mxu2 %v15444_v13 }
 0x397   :  { %v13809_v62 = vld [vmem:[#allocation2 + $0x1408] sm:$0xf0] }
 0x398   :  { %v17697_v27 = vld [vmem:[#allocation2 + $0x19ac] sm:$0xf]  ;;  %v13812_v48 = vor.u32 %v17505_v51, %v13809_v62  ;;  %9388 = vmatpush.bf16.msra.mxu3 %v16212_v8 }
 0x399   :  { %v14577_v50 = vld [vmem:[#allocation2 + $0x1a08] sm:$0xf0] }
 0x39a   :  { %v17889_v5 = vld [vmem:[#allocation2 + $0x1fac] sm:$0xf]  ;;  %v14580_v3 = vor.u32 %v17697_v27, %v14577_v50  ;;  %9347 = vmatpush.bf16.msra.mxu0 %v13812_v48 }
 0x39b   :  { %v15345_v60 = vld [vmem:[#allocation2 + $0x2008] sm:$0xf0] }
 0x39c   :  { %v18081_v59 = vld [vmem:[#allocation2 + $0x25ac] sm:$0xf]  ;;  %v15348_v14 = vor.u32 %v17889_v5, %v15345_v60  ;;  %9361 = vmatpush.bf16.msra.mxu1 %v14580_v3 }
 0x39d   :  { %v16113_v15 = vld [vmem:[#allocation2 + $0x2608] sm:$0xf0] }
 0x39e   :  { %v17481_v33 = vld [vmem:[#allocation2 + $0x12ec] sm:$0xf]  ;;  %v16116_v10 = vor.u32 %v18081_v59, %v16113_v15  ;;  %9375 = vmatpush.bf16.msra.mxu2 %v15348_v14  ;;  %v11991_v59 = vld [vmem:[#allocation2 + $0x570] sm:$0xf] }
 0x39f   :  { %v13713_v12 = vld [vmem:[#allocation2 + $0x1348] sm:$0xf0]  ;;  %v17062_v15 = vld [vmem:[#allocation2 + $0x5cc] sm:$0xf0] }
 0x3a0   :  { %v17673_v58 = vld [vmem:[#allocation2 + $0x18ec] sm:$0xf]  ;;  %v13716_v39 = vor.u32 %v17481_v33, %v13713_v12  ;;  %9389 = vmatpush.bf16.msra.mxu3 %v16116_v10  ;;  %v17254_v33 = vld [vmem:[#allocation2 + $0xbcc] sm:$0xf0] }
 0x3a1   :  { %v14481_v17 = vld [vmem:[#allocation2 + $0x1948] sm:$0xf0]  ;;  %v13527_v12 = vld [vmem:[#allocation2 + $0x1170] sm:$0xf] }
 0x3a2   :  { %v17865_v1 = vld [vmem:[#allocation2 + $0x1eec] sm:$0xf]  ;;  %v14484_v13 = vor.u32 %v17673_v58, %v14481_v17  ;;  %9348 = vmatpush.bf16.msra.mxu0 %v13716_v39  ;;  %v14295_v58 = vld [vmem:[#allocation2 + $0x1770] sm:$0xf] }
 0x3a3   :  { %v15249_v30 = vld [vmem:[#allocation2 + $0x1f48] sm:$0xf0]  ;;  %v17638_v17 = vld [vmem:[#allocation2 + $0x17cc] sm:$0xf0] }
 0x3a4   :  { %v18057_v20 = vld [vmem:[#allocation2 + $0x24ec] sm:$0xf]  ;;  %v15252_v51 = vor.u32 %v17865_v1, %v15249_v30  ;;  %9362 = vmatpush.bf16.msra.mxu1 %v14484_v13  ;;  %v11992_v1 = vor.u32 %v17062_v15, %v11991_v59  ;;  %v9113_v30 = vpop.f32.mrf.mxu3  ;;  %v14296_v39 = vor.u32 %v17638_v17, %v14295_v58  ;;  %v18829_v13 = vpop.f32.mrf.mxu0  ;;  %v17206_v59 = vld [vmem:[#allocation2 + $0xa4c] sm:$0xf0] }
 0x3a5   :  { %v16017_v24 = vld [vmem:[#allocation2 + $0x2548] sm:$0xf0]  ;;  %19437 = vst [vmem:[#allocation64_spill] sm:$0xff] %v18829_v13  ;;  %v13335_v15 = vld [vmem:[#allocation2 + $0xff0] sm:$0xf]  ;;  %v18837_v58 = vpop.f32.mrf.mxu2 }
 0x3a6   :  { %v17457_v63 = vld [vmem:[#allocation2 + $0x122c] sm:$0xf]  ;;  %v16020_v50 = vor.u32 %v18057_v20, %v16017_v24  ;;  %9376 = vmatpush.bf16.msra.mxu2 %v15252_v51  ;;  %v12760_v20 = vor.u32 %v17254_v33, %v12759_v9  ;;  %v13528_v24 = vor.u32 %v17446_v4, %v13527_v12  ;;  %v14199_v51 = vld [vmem:[#allocation2 + $0x16b0] sm:$0xf]  ;;  %19439 = vst [vmem:[#allocation66_spill] sm:$0xff] %v18837_v58 }
 0x3a7   :  { %v13617_v38 = vld [vmem:[#allocation2 + $0x1288] sm:$0xf0]  ;;  %v11703_v12 = vld [vmem:[#allocation2 + $0x330] sm:$0xf] }
 0x3a8   :  { %v17649_v62 = vld [vmem:[#allocation2 + $0x182c] sm:$0xf]  ;;  %v13620_v48 = vor.u32 %v17457_v63, %v13617_v38  ;;  %9390 = vmatpush.bf16.msra.mxu3 %v16020_v50  ;;  %v17230_v63 = vld [vmem:[#allocation2 + $0xb0c] sm:$0xf0] }
 0x3a9   :  { %v14385_v27 = vld [vmem:[#allocation2 + $0x1888] sm:$0xf0]  ;;  %v13431_v38 = vld [vmem:[#allocation2 + $0x10b0] sm:$0xf]  ;;  %v12664_v9 = vor.u32 %v17230_v63, %v12663_v21 }
 0x3aa   :  { %v17841_v53 = vld [vmem:[#allocation2 + $0x1e2c] sm:$0xf]  ;;  %v14388_v3 = vor.u32 %v17649_v62, %v14385_v27  ;;  %9349 = vmatpush.bf16.msra.mxu0 %v13620_v48  ;;  %v17614_v62 = vld [vmem:[#allocation2 + $0x170c] sm:$0xf0]  ;;  %v11896_v27 = vor.u32 %v17038_v18, %v11895_v19  ;;  %v13432_v4 = vor.u32 %v17422_v22, %v13431_v38 }
 0x3ab   :  { %v15153_v8 = vld [vmem:[#allocation2 + $0x1e88] sm:$0xf0]  ;;  %v11799_v50 = vld [vmem:[#allocation2 + $0x3f0] sm:$0xf] }
 0x3ac   :  { %v18033_v5 = vld [vmem:[#allocation2 + $0x242c] sm:$0xf]  ;;  %v15156_v14 = vor.u32 %v17841_v53, %v15153_v8  ;;  %9363 = vmatpush.bf16.msra.mxu1 %v14388_v3  ;;  %v18831_v53 = vpop.f32.mrf.mxu1  ;;  %v17014_v8 = vld [vmem:[#allocation2 + $0x44c] sm:$0xf0] }
 0x3ad   :  { %v15921_v60 = vld [vmem:[#allocation2 + $0x2488] sm:$0xf0]  ;;  %19438 = vst [vmem:[#allocation65_spill] sm:$0xff] %v18831_v53  ;;  %9350 = vmatmul.bf16.vlgmr.msra.gmra.mxu0 %v18549_v23  ;;  %v17398_v48 = vld [vmem:[#allocation2 + $0x104c] sm:$0xf0]  ;;  %v11800_v22 = vor.u32 %v17014_v8, %v11799_v50 }
 0x3ae   :  { %v15924_v10 = vor.u32 %v18033_v5, %v15921_v60  ;;  %9377 = vmatpush.bf16.msra.mxu2 %v15156_v14  ;;  %9398 = vmatpush.bf16.msrb.mxu0 %v11992_v1  ;;  %v12567_v5 = vld [vmem:[#allocation2 + $0x9f0] sm:$0xf]  ;;  %v14200_v60 = vor.u32 %v17614_v62, %v14199_v51  ;;  %v13336_v33 = vor.u32 %v17398_v48, %v13335_v15 }
 0x3af   :  { %9364 = vmatmul.bf16.vlgmr.msra.gmra.mxu1 %v18570_v37  ;;  %v14103_v18 = vld [vmem:[#allocation2 + $0x15f0] sm:$0xf]  ;;  %v12568_v21 = vor.u32 %v17206_v59, %v12567_v5 }
 0x3b0   :  { %9391 = vmatpush.bf16.msra.mxu3 %v15924_v10  ;;  %9412 = vmatpush.bf16.msrb.mxu1 %v12760_v20  ;;  %v17590_v19 = vld [vmem:[#allocation2 + $0x164c] sm:$0xf0]  ;;  %v18839_v10 = vpop.f32.mrf.mxu3 }
 0x3b1   :  { %9378 = vmatmul.bf16.vlgmr.msra.gmra.mxu2 %v18574_v42  ;;  %v16990_v3 = vld [vmem:[#allocation2 + $0x38c] sm:$0xf0]  ;;  %v14104_v17 = vor.u32 %v17590_v19, %v14103_v18  ;;  %19440 = vst [vmem:[#allocation67_spill] sm:$0xff] %v18839_v10 }
 0x3b2   :  { %9426 = vmatpush.bf16.msrb.mxu2 %v13528_v24  ;;  %9399 = vmatpush.bf16.msrb.mxu0 %v11896_v27  ;;  %v12471_v14 = vld [vmem:[#allocation2 + $0x930] sm:$0xf]  ;;  %v11704_v62 = vor.u32 %v16990_v3, %v11703_v12 }
 0x3b3   :  { %9392 = vmatmul.bf16.vlgmr.msra.gmra.mxu3 %v18572_v41  ;;  %v17182_v1 = vld [vmem:[#allocation2 + $0x98c] sm:$0xf0] }
 0x3b4   :  { %9440 = vmatpush.bf16.msrb.mxu3 %v14296_v39  ;;  %9413 = vmatpush.bf16.msrb.mxu1 %v12664_v9  ;;  %v13239_v20 = vld [vmem:[#allocation2 + $0xf30] sm:$0xf]  ;;  %v9127_v39 = vpop.f32.mrf.mxu0  ;;  %v12472_v27 = vor.u32 %v17182_v1, %v12471_v14  ;;  %v9155_v1 = vpop.f32.mrf.mxu2 }
 0x3b5   :  { %v17374_v24 = vld [vmem:[#allocation2 + $0xf8c] sm:$0xf0]  ;;  %v9128_v51 = vadd.f32 %v9127_v39, %v9113_v30 }
 0x3b6   :  { %9427 = vmatpush.bf16.msrb.mxu2 %v13432_v4  ;;  %v14007_v63 = vld [vmem:[#allocation2 + $0x1530] sm:$0xf]  ;;  %9400 = vmatpush.bf16.msrb.mxu0 %v11800_v22  ;;  %v13240_v9 = vor.u32 %v17374_v24, %v13239_v20  ;;  %v9141_v4 = vpop.f32.mrf.mxu1 }
 0x3b7   :  { %v17566_v38 = vld [vmem:[#allocation2 + $0x158c] sm:$0xf0]  ;;  %v9142_v59 = vadd.f32 %v9141_v4, %v9128_v51 }
 0x3b8   :  { %9441 = vmatpush.bf16.msrb.mxu3 %v14200_v60  ;;  %9414 = vmatpush.bf16.msrb.mxu1 %v12568_v21  ;;  %v11607_v50 = vld [vmem:[#allocation2 + $0x270] sm:$0xf]  ;;  %v14008_v60 = vor.u32 %v17566_v38, %v14007_v63  ;;  %v9169_v51 = vpop.f32.mrf.mxu3 }
 0x3b9   :  { %v16966_v8 = vld [vmem:[#allocation2 + $0x2cc] sm:$0xf0]  ;;  %v9156_v39 = vadd.f32 %v9155_v1, %v9142_v59 }
 0x3ba   :  { %9428 = vmatpush.bf16.msrb.mxu2 %v13336_v33  ;;  %v12375_v5 = vld [vmem:[#allocation2 + $0x870] sm:$0xf]  ;;  %9401 = vmatpush.bf16.msrb.mxu0 %v11704_v62  ;;  %v11608_v22 = vor.u32 %v16966_v8, %v11607_v50 }
 0x3bb   :  { %v17158_v15 = vld [vmem:[#allocation2 + $0x8cc] sm:$0xf0] }
 0x3bc   :  { %9442 = vmatpush.bf16.msrb.mxu3 %v14104_v17  ;;  %v13143_v48 = vld [vmem:[#allocation2 + $0xe70] sm:$0xf]  ;;  %9415 = vmatpush.bf16.msrb.mxu1 %v12472_v27  ;;  %v12376_v30 = vor.u32 %v17158_v15, %v12375_v5  ;;  %v18841_v27 = vadd.f32 %v9169_v51, %v9156_v39  ;;  %v18843_v49 = vpop.f32.mrf.mxu0 }
 0x3bd   :  { %v17350_v18 = vld [vmem:[#allocation2 + $0xecc] sm:$0xf0]  ;;  %19441 = vst [vmem:[#allocation68_spill] sm:$0xff] %v18843_v49  ;;  %v14201_v49 = vld [vmem:[#allocation2 + $0x1710] sm:$0xf0] }
 0x3be   :  { %v13911_v19 = vld [vmem:[#allocation2 + $0x1470] sm:$0xf]  ;;  %9429 = vmatpush.bf16.msrb.mxu2 %v13240_v9  ;;  %v13144_v21 = vor.u32 %v17350_v18, %v13143_v48  ;;  %9402 = vmatpush.bf16.msrb.mxu0 %v11608_v22 }
 0x3bf   :  { %v17542_v10 = vld [vmem:[#allocation2 + $0x14cc] sm:$0xf0] }
 0x3c0   :  { %v11511_v33 = vld [vmem:[#allocation2 + $0x1b0] sm:$0xf]  ;;  %9443 = vmatpush.bf16.msrb.mxu3 %v14008_v60  ;;  %v13912_v14 = vor.u32 %v17542_v10, %v13911_v19  ;;  %9416 = vmatpush.bf16.msrb.mxu1 %v12376_v30 }
 0x3c1   :  { %v16942_v12 = vld [vmem:[#allocation2 + $0x20c] sm:$0xf0] }
 0x3c2   :  { %v12279_v3 = vld [vmem:[#allocation2 + $0x7b0] sm:$0xf]  ;;  %v11512_v62 = vor.u32 %v16942_v12, %v11511_v33  ;;  %9430 = vmatpush.bf16.msrb.mxu2 %v13144_v21 }
 0x3c3   :  { %v17134_v17 = vld [vmem:[#allocation2 + $0x80c] sm:$0xf0] }
 0x3c4   :  { %v13047_v20 = vld [vmem:[#allocation2 + $0xdb0] sm:$0xf]  ;;  %v12280_v9 = vor.u32 %v17134_v17, %v12279_v3  ;;  %9444 = vmatpush.bf16.msrb.mxu3 %v13912_v14  ;;  %9403 = vmatpush.bf16.msrb.mxu0 %v11512_v62 }
 0x3c5   :  { %v17326_v24 = vld [vmem:[#allocation2 + $0xe0c] sm:$0xf0] }
 0x3c6   :  { %v13815_v63 = vld [vmem:[#allocation2 + $0x13b0] sm:$0xf]  ;;  %v13048_v4 = vor.u32 %v17326_v24, %v13047_v20  ;;  %9417 = vmatpush.bf16.msrb.mxu1 %v12280_v9 }
 0x3c7   :  { %v17518_v38 = vld [vmem:[#allocation2 + $0x140c] sm:$0xf0] }
 0x3c8   :  { %v11415_v50 = vld [vmem:[#allocation2 + $0xf0] sm:$0xf]  ;;  %v13816_v10 = vor.u32 %v17518_v38, %v13815_v63  ;;  %9431 = vmatpush.bf16.msrb.mxu2 %v13048_v4 }
 0x3c9   :  { %v16918_v8 = vld [vmem:[#allocation2 + $0x14c] sm:$0xf0] }
 0x3ca   :  { %v12183_v5 = vld [vmem:[#allocation2 + $0x6f0] sm:$0xf]  ;;  %v11416_v19 = vor.u32 %v16918_v8, %v11415_v50  ;;  %9445 = vmatpush.bf16.msrb.mxu3 %v13816_v10 }
 0x3cb   :  { %v17110_v60 = vld [vmem:[#allocation2 + $0x74c] sm:$0xf0] }
 0x3cc   :  { %v12951_v15 = vld [vmem:[#allocation2 + $0xcf0] sm:$0xf]  ;;  %v12184_v30 = vor.u32 %v17110_v60, %v12183_v5  ;;  %9404 = vmatpush.bf16.msrb.mxu0 %v11416_v19  ;;  %v17050_v5 = vld [vmem:[#allocation2 + $0x574] sm:$0xf] }
 0x3cd   :  { %v17302_v48 = vld [vmem:[#allocation2 + $0xd4c] sm:$0xf0]  ;;  %v11993_v60 = vld [vmem:[#allocation2 + $0x5d0] sm:$0xf0] }
 0x3ce   :  { %v13719_v59 = vld [vmem:[#allocation2 + $0x12f0] sm:$0xf]  ;;  %v12952_v21 = vor.u32 %v17302_v48, %v12951_v15  ;;  %9418 = vmatpush.bf16.msrb.mxu1 %v12184_v30  ;;  %v11996_v19 = vor.u32 %v17050_v5, %v11993_v60  ;;  %v17026_v30 = vld [vmem:[#allocation2 + $0x4b4] sm:$0xf]  ;;  %v18851_v5 = vpop.f32.mrf.mxu2 }
 0x3cf   :  { %v17494_v18 = vld [vmem:[#allocation2 + $0x134c] sm:$0xf0]  ;;  %19443 = vst [vmem:[#allocation70_spill] sm:$0xff] %v18851_v5  ;;  %v12665_v5 = vld [vmem:[#allocation2 + $0xb10] sm:$0xf0] }
 0x3d0   :  { %v11319_v22 = vld [vmem:[#allocation2 + $0x30] sm:$0xf]  ;;  %v13720_v17 = vor.u32 %v17494_v18, %v13719_v59  ;;  %9432 = vmatpush.bf16.msrb.mxu2 %v12952_v21  ;;  %v11897_v21 = vld [vmem:[#allocation2 + $0x510] sm:$0xf0] }
 0x3d1   :  { %v16894_v33 = vld [vmem:[#allocation2 + $0x8c] sm:$0xf0] }
 0x3d2   :  { %v12087_v12 = vld [vmem:[#allocation2 + $0x630] sm:$0xf]  ;;  %v11320_v51 = vor.u32 %v16894_v33, %v11319_v22  ;;  %9446 = vmatpush.bf16.msrb.mxu3 %v13720_v17 }
 0x3d3   :  { %v17086_v3 = vld [vmem:[#allocation2 + $0x68c] sm:$0xf0] }
 0x3d4   :  { %v12855_v1 = vld [vmem:[#allocation2 + $0xc30] sm:$0xf]  ;;  %v12088_v9 = vor.u32 %v17086_v3, %v12087_v12  ;;  %9405 = vmatpush.bf16.msrb.mxu0 %v11320_v51  ;;  %v18845_v12 = vpop.f32.mrf.mxu1 }
 0x3d5   :  { %v17278_v14 = vld [vmem:[#allocation2 + $0xc8c] sm:$0xf0]  ;;  %19442 = vst [vmem:[#allocation69_spill] sm:$0xff] %v18845_v12  ;;  %v17410_v12 = vld [vmem:[#allocation2 + $0x10b4] sm:$0xf] }
 0x3d6   :  { %v13623_v20 = vld [vmem:[#allocation2 + $0x1230] sm:$0xf]  ;;  %v12856_v4 = vor.u32 %v17278_v14, %v12855_v1  ;;  %9419 = vmatpush.bf16.msrb.mxu1 %v12088_v9 }
 0x3d7   :  { %v17470_v24 = vld [vmem:[#allocation2 + $0x128c] sm:$0xf0]  ;;  %9406 = vmatmul.bf16.vlgmr.msrb.gmra.mxu0 %v18525_v57 }
 0x3d8   :  { %v15063_v39 = vld [vmem:[#allocation2 + $0x1d70] sm:$0xf]  ;;  %v13624_v10 = vor.u32 %v17470_v24, %v13623_v20  ;;  %9433 = vmatpush.bf16.msrb.mxu2 %v12856_v4 }
 0x3d9   :  { %v17830_v63 = vld [vmem:[#allocation2 + $0x1dcc] sm:$0xf0]  ;;  %9420 = vmatmul.bf16.vlgmr.msrb.gmra.mxu1 %v18540_v11 }
 0x3da   :  { %v15831_v38 = vld [vmem:[#allocation2 + $0x2370] sm:$0xf]  ;;  %v15064_v15 = vor.u32 %v17830_v63, %v15063_v39  ;;  %9447 = vmatpush.bf16.msrb.mxu3 %v13624_v10  ;;  %v11900_v39 = vor.u32 %v17026_v30, %v11897_v21 }
 0x3db   :  { %v18022_v62 = vld [vmem:[#allocation2 + $0x23cc] sm:$0xf0]  ;;  %9434 = vmatmul.bf16.vlgmr.msrb.gmra.mxu2 %v18530_v0 }
 0x3dc   :  { %v16599_v50 = vld [vmem:[#allocation2 + $0x2970] sm:$0xf]  ;;  %v15832_v48 = vor.u32 %v18022_v62, %v15831_v38  ;;  %9454 = vmatpush.bf16.msra.mxu0 %v15064_v15  ;;  %v17002_v62 = vld [vmem:[#allocation2 + $0x3f4] sm:$0xf]  ;;  %v9197_v21 = vpop.f32.mrf.mxu1 }
 0x3dd   :  { %v18214_v8 = vld [vmem:[#allocation2 + $0x29cc] sm:$0xf0]  ;;  %9448 = vmatmul.bf16.vlgmr.msrb.gmra.mxu3 %v18549_v23 }
 0x3de   :  { %v16600_v59 = vor.u32 %v18214_v8, %v16599_v50  ;;  %v14967_v18 = vld [vmem:[#allocation2 + $0x1cb0] sm:$0xf]  ;;  %9468 = vmatpush.bf16.msra.mxu1 %v15832_v48  ;;  %9496 = vmatpush.bf16.msra.mxu3 %v11996_v19  ;;  %v11801_v50 = vld [vmem:[#allocation2 + $0x450] sm:$0xf0] }
 0x3df   :  { %v17806_v58 = vld [vmem:[#allocation2 + $0x1d0c] sm:$0xf0]  ;;  %v11804_v60 = vor.u32 %v17002_v62, %v11801_v50  ;;  %v16978_v19 = vld [vmem:[#allocation2 + $0x334] sm:$0xf] }
 0x3e0   :  { %v15735_v53 = vld [vmem:[#allocation2 + $0x22b0] sm:$0xf]  ;;  %v14968_v3 = vor.u32 %v17806_v58, %v14967_v18  ;;  %9482 = vmatpush.bf16.msra.mxu2 %v16600_v59  ;;  %v18853_v59 = vpop.f32.mrf.mxu3  ;;  %v9183_v18 = vpop.f32.mrf.mxu0  ;;  %v16954_v62 = vld [vmem:[#allocation2 + $0x274] sm:$0xf] }
 0x3e1   :  { %v17998_v22 = vld [vmem:[#allocation2 + $0x230c] sm:$0xf0]  ;;  %19444 = vst [vmem:[#allocation71_spill] sm:$0xff] %v18853_v59  ;;  %v11609_v50 = vld [vmem:[#allocation2 + $0x2d0] sm:$0xf0] }
 0x3e2   :  { %v16503_v33 = vld [vmem:[#allocation2 + $0x28b0] sm:$0xf]  ;;  %v15736_v1 = vor.u32 %v17998_v22, %v15735_v53  ;;  %9455 = vmatpush.bf16.msra.mxu0 %v14968_v3  ;;  %9497 = vmatpush.bf16.msra.mxu3 %v11900_v39  ;;  %v11705_v22 = vld [vmem:[#allocation2 + $0x390] sm:$0xf0] }
 0x3e3   :  { %v18190_v13 = vld [vmem:[#allocation2 + $0x290c] sm:$0xf0]  ;;  %v14297_v59 = vld [vmem:[#allocation2 + $0x17d0] sm:$0xf0] }
 0x3e4   :  { %v16504_v17 = vor.u32 %v18190_v13, %v16503_v33  ;;  %v14871_v14 = vld [vmem:[#allocation2 + $0x1bf0] sm:$0xf]  ;;  %9469 = vmatpush.bf16.msra.mxu1 %v15736_v1  ;;  %v9184_v33 = vadd.f32 %v9183_v18, %v18841_v27  ;;  %v16930_v18 = vld [vmem:[#allocation2 + $0x1b4] sm:$0xf] }
 0x3e5   :  { %v17782_v20 = vld [vmem:[#allocation2 + $0x1c4c] sm:$0xf0] }
 0x3e6   :  { %v15639_v24 = vld [vmem:[#allocation2 + $0x21f0] sm:$0xf]  ;;  %v14872_v58 = vor.u32 %v17782_v20, %v14871_v14  ;;  %9483 = vmatpush.bf16.msra.mxu2 %v16504_v17  ;;  %9498 = vmatpush.bf16.msra.mxu3 %v11804_v60  ;;  %v18856_v39 = vadd.f32 %v9197_v21, %v9184_v33  ;;  %v11612_v60 = vor.u32 %v16954_v62, %v11609_v50  ;;  %v16906_v62 = vld [vmem:[#allocation2 + $0xf4] sm:$0xf] }
 0x3e7   :  { %v17974_v63 = vld [vmem:[#allocation2 + $0x224c] sm:$0xf0]  ;;  %v11417_v50 = vld [vmem:[#allocation2 + $0x150] sm:$0xf0] }
 0x3e8   :  { %v16407_v38 = vld [vmem:[#allocation2 + $0x27f0] sm:$0xf]  ;;  %v15640_v13 = vor.u32 %v17974_v63, %v15639_v24  ;;  %9456 = vmatpush.bf16.msra.mxu0 %v14872_v58  ;;  %v11708_v24 = vor.u32 %v16978_v19, %v11705_v22  ;;  %v11513_v19 = vld [vmem:[#allocation2 + $0x210] sm:$0xf0]  ;;  %v9211_v22 = vpop.f32.mrf.mxu2  ;;  %v9225_v33 = vpop.f32.mrf.mxu3 }
 0x3e9   :  { %v18166_v51 = vld [vmem:[#allocation2 + $0x284c] sm:$0xf0]  ;;  %v18860_v21 = vadd.f32 %v9225_v33, %v9211_v22  ;;  %v12761_v22 = vld [vmem:[#allocation2 + $0xbd0] sm:$0xf0]  ;;  %v18862_v34 = vpop.f32.mrf.mxu0 }
 0x3ea   :  { %v16408_v53 = vor.u32 %v18166_v51, %v16407_v38  ;;  %v14775_v8 = vld [vmem:[#allocation2 + $0x1b30] sm:$0xf]  ;;  %9470 = vmatpush.bf16.msra.mxu1 %v15640_v13  ;;  %9499 = vmatpush.bf16.msra.mxu3 %v11708_v24  ;;  %v11516_v24 = vor.u32 %v16930_v18, %v11513_v19  ;;  %v11321_v18 = vld [vmem:[#allocation2 + $0x90] sm:$0xf0]  ;;  %19445 = vst [vmem:[#allocation72_spill] sm:$0xff] %v18862_v34 }
 0x3eb   :  { %v17758_v9 = vld [vmem:[#allocation2 + $0x1b8c] sm:$0xf0]  ;;  %v17242_v19 = vld [vmem:[#allocation2 + $0xb74] sm:$0xf] }
 0x3ec   :  { %v15543_v4 = vld [vmem:[#allocation2 + $0x2130] sm:$0xf]  ;;  %v14776_v30 = vor.u32 %v17758_v9, %v14775_v8  ;;  %9484 = vmatpush.bf16.msra.mxu2 %v16408_v53  ;;  %v17434_v33 = vld [vmem:[#allocation2 + $0x1174] sm:$0xf] }
 0x3ed   :  { %v17950_v10 = vld [vmem:[#allocation2 + $0x218c] sm:$0xf0] }
 0x3ee   :  { %v16311_v15 = vld [vmem:[#allocation2 + $0x2730] sm:$0xf]  ;;  %v15544_v3 = vor.u32 %v17950_v10, %v15543_v4  ;;  %9457 = vmatpush.bf16.msra.mxu0 %v14776_v30  ;;  %9500 = vmatpush.bf16.msra.mxu3 %v11612_v60 }
 0x3ef   :  { %v18142_v48 = vld [vmem:[#allocation2 + $0x278c] sm:$0xf0] }
 0x3f0   :  { %v16312_v1 = vor.u32 %v18142_v48, %v16311_v15  ;;  %v14679_v17 = vld [vmem:[#allocation2 + $0x1a70] sm:$0xf]  ;;  %9471 = vmatpush.bf16.msra.mxu1 %v15544_v3 }
 0x3f1   :  { %v17734_v14 = vld [vmem:[#allocation2 + $0x1acc] sm:$0xf0] }
 0x3f2   :  { %v15447_v20 = vld [vmem:[#allocation2 + $0x2070] sm:$0xf]  ;;  %v14680_v58 = vor.u32 %v17734_v14, %v14679_v17  ;;  %9485 = vmatpush.bf16.msra.mxu2 %v16312_v1  ;;  %9501 = vmatpush.bf16.msra.mxu3 %v11516_v24 }
 0x3f3   :  { %v17926_v63 = vld [vmem:[#allocation2 + $0x20cc] sm:$0xf0] }
 0x3f4   :  { %v16215_v38 = vld [vmem:[#allocation2 + $0x2670] sm:$0xf]  ;;  %v15448_v13 = vor.u32 %v17926_v63, %v15447_v20  ;;  %9458 = vmatpush.bf16.msra.mxu0 %v14680_v58 }
 0x3f5   :  { %v18118_v51 = vld [vmem:[#allocation2 + $0x26cc] sm:$0xf0] }
 0x3f6   :  { %v16216_v53 = vor.u32 %v18118_v51, %v16215_v38  ;;  %v14583_v8 = vld [vmem:[#allocation2 + $0x19b0] sm:$0xf]  ;;  %9472 = vmatpush.bf16.msra.mxu1 %v15448_v13 }
 0x3f7   :  { %v17710_v9 = vld [vmem:[#allocation2 + $0x1a0c] sm:$0xf0] }
 0x3f8   :  { %v15351_v4 = vld [vmem:[#allocation2 + $0x1fb0] sm:$0xf]  ;;  %v14584_v30 = vor.u32 %v17710_v9, %v14583_v8  ;;  %9486 = vmatpush.bf16.msra.mxu2 %v16216_v53 }
 0x3f9   :  { %v17902_v10 = vld [vmem:[#allocation2 + $0x200c] sm:$0xf0] }
 0x3fa   :  { %v16119_v15 = vld [vmem:[#allocation2 + $0x25b0] sm:$0xf]  ;;  %v15352_v3 = vor.u32 %v17902_v10, %v15351_v4  ;;  %9459 = vmatpush.bf16.msra.mxu0 %v14584_v30 }
 0x3fb   :  { %v18094_v48 = vld [vmem:[#allocation2 + $0x260c] sm:$0xf0] }
 0x3fc   :  { %v16120_v1 = vor.u32 %v18094_v48, %v16119_v15  ;;  %v14487_v17 = vld [vmem:[#allocation2 + $0x18f0] sm:$0xf]  ;;  %9473 = vmatpush.bf16.msra.mxu1 %v15352_v3  ;;  %v11420_v15 = vor.u32 %v16906_v62, %v11417_v50  ;;  %v16882_v48 = vld [vmem:[#allocation2 + $0x34] sm:$0xf] }
 0x3fd   :  { %v17686_v14 = vld [vmem:[#allocation2 + $0x194c] sm:$0xf0]  ;;  %v11324_v24 = vor.u32 %v16882_v48, %v11321_v18  ;;  %v17218_v50 = vld [vmem:[#allocation2 + $0xab4] sm:$0xf] }
 0x3fe   :  { %v15255_v20 = vld [vmem:[#allocation2 + $0x1ef0] sm:$0xf]  ;;  %v14488_v27 = vor.u32 %v17686_v14, %v14487_v17  ;;  %9487 = vmatpush.bf16.msra.mxu2 %v16120_v1  ;;  %v13529_v17 = vld [vmem:[#allocation2 + $0x11d0] sm:$0xf0]  ;;  %9502 = vmatpush.bf16.msra.mxu3 %v11420_v15 }
 0x3ff   :  { %v17878_v63 = vld [vmem:[#allocation2 + $0x1f4c] sm:$0xf0]  ;;  %v17626_v14 = vld [vmem:[#allocation2 + $0x1774] sm:$0xf] }
 0x400   :  { %v16023_v38 = vld [vmem:[#allocation2 + $0x24f0] sm:$0xf]  ;;  %v15256_v13 = vor.u32 %v17878_v63, %v15255_v20  ;;  %9460 = vmatpush.bf16.msra.mxu0 %v14488_v27  ;;  %v17818_v20 = vld [vmem:[#allocation2 + $0x1d74] sm:$0xf]  ;;  %v14300_v62 = vor.u32 %v17626_v14, %v14297_v59 }
 0x401   :  { %v18070_v51 = vld [vmem:[#allocation2 + $0x254c] sm:$0xf0]  ;;  %v15065_v63 = vld [vmem:[#allocation2 + $0x1dd0] sm:$0xf0] }
 0x402   :  { %v14391_v58 = vld [vmem:[#allocation2 + $0x1830] sm:$0xf]  ;;  %v16024_v53 = vor.u32 %v18070_v51, %v16023_v38  ;;  %9474 = vmatpush.bf16.msra.mxu1 %v15256_v13  ;;  %v12764_v38 = vor.u32 %v17242_v19, %v12761_v22  ;;  %v13532_v51 = vor.u32 %v17434_v33, %v13529_v17  ;;  %v15068_v27 = vor.u32 %v17818_v20, %v15065_v63  ;;  %v17794_v13 = vld [vmem:[#allocation2 + $0x1cb4] sm:$0xf] }
 0x403   :  { %v17662_v8 = vld [vmem:[#allocation2 + $0x188c] sm:$0xf0]  ;;  %9503 = vmatpush.bf16.msra.mxu3 %v11324_v24  ;;  %v17194_v15 = vld [vmem:[#allocation2 + $0x9f4] sm:$0xf]  ;;  %v18872_v24 = vpop.f32.mrf.mxu3 }
 0x404   :  { %v15159_v9 = vld [vmem:[#allocation2 + $0x1e30] sm:$0xf]  ;;  %v14392_v30 = vor.u32 %v17662_v8, %v14391_v58  ;;  %9488 = vmatpush.bf16.msra.mxu2 %v16024_v53  ;;  %v13433_v58 = vld [vmem:[#allocation2 + $0x1110] sm:$0xf0]  ;;  %19448 = vst [vmem:[#allocation75_spill] sm:$0xff] %v18872_v24 }
 0x405   :  { %v17854_v4 = vld [vmem:[#allocation2 + $0x1e8c] sm:$0xf0]  ;;  %v17602_v8 = vld [vmem:[#allocation2 + $0x16b4] sm:$0xf]  ;;  %v13436_v59 = vor.u32 %v17410_v12, %v13433_v58  ;;  %v18869_v12 = vpop.f32.mrf.mxu2 }
 0x406   :  { %v15927_v10 = vld [vmem:[#allocation2 + $0x2430] sm:$0xf]  ;;  %v15160_v3 = vor.u32 %v17854_v4, %v15159_v9  ;;  %9461 = vmatpush.bf16.msra.mxu0 %v14392_v30  ;;  %v14969_v53 = vld [vmem:[#allocation2 + $0x1d10] sm:$0xf0]  ;;  %v12668_v9 = vor.u32 %v17218_v50, %v12665_v5  ;;  %v18864_v4 = vpop.f32.mrf.mxu1  ;;  %19447 = vst [vmem:[#allocation74_spill] sm:$0xff] %v18869_v12  ;;  %9504 = vmatmul.bf16.vlgmr.msra.gmra.mxu3 %v18525_v57  ;;  %v9239_v50 = vpop.f32.mrf.mxu0 }
 0x407   :  { %v18046_v60 = vld [vmem:[#allocation2 + $0x248c] sm:$0xf0]  ;;  %19446 = vst [vmem:[#allocation73_spill] sm:$0xff] %v18864_v4  ;;  %v17386_v48 = vld [vmem:[#allocation2 + $0xff4] sm:$0xf]  ;;  %9552 = vmatpush.bf16.msrb.mxu3 %v15068_v27  ;;  %v14972_v18 = vor.u32 %v17794_v13, %v14969_v53 }
 0x408   :  { %v15928_v1 = vor.u32 %v18046_v60, %v15927_v10  ;;  %9475 = vmatpush.bf16.msra.mxu1 %v15160_v3  ;;  %v14204_v10 = vor.u32 %v17602_v8, %v14201_v49  ;;  %v12569_v60 = vld [vmem:[#allocation2 + $0xa50] sm:$0xf0]  ;;  %v9240_v8 = vadd.f32 %v9239_v50, %v18860_v21  ;;  %v17039_v4 = vld [vmem:[#allocation2 + $0x514] sm:$0xf0] }
 0x409   :  { %9462 = vmatmul.bf16.vlgmr.msra.gmra.mxu0 %v18570_v37  ;;  %v13337_v19 = vld [vmem:[#allocation2 + $0x1050] sm:$0xf0]  ;;  %v12572_v17 = vor.u32 %v17194_v15, %v12569_v60 }
 0x40a   :  { %9489 = vmatpush.bf16.msra.mxu2 %v15928_v1  ;;  %9510 = vmatpush.bf16.msrb.mxu0 %v12764_v38  ;;  %v17578_v22 = vld [vmem:[#allocation2 + $0x15f4] sm:$0xf]  ;;  %v13340_v49 = vor.u32 %v17386_v48, %v13337_v19 }
 0x40b   :  { %v14105_v33 = vld [vmem:[#allocation2 + $0x1650] sm:$0xf0]  ;;  %9476 = vmatmul.bf16.vlgmr.msra.gmra.mxu1 %v18574_v42  ;;  %9553 = vmatpush.bf16.msrb.mxu3 %v14972_v18 }
 0x40c   :  { %9524 = vmatpush.bf16.msrb.mxu1 %v13532_v51  ;;  %v17770_v5 = vld [vmem:[#allocation2 + $0x1bf4] sm:$0xf]  ;;  %v14108_v14 = vor.u32 %v17578_v22, %v14105_v33 }
 0x40d   :  { %9490 = vmatmul.bf16.vlgmr.msra.gmra.mxu2 %v18572_v41  ;;  %v14873_v30 = vld [vmem:[#allocation2 + $0x1c50] sm:$0xf0] }
 0x40e   :  { %9538 = vmatpush.bf16.msrb.mxu2 %v14300_v62  ;;  %9511 = vmatpush.bf16.msrb.mxu0 %v12668_v9  ;;  %v17170_v3 = vld [vmem:[#allocation2 + $0x934] sm:$0xf]  ;;  %v14876_v63 = vor.u32 %v17770_v5, %v14873_v30  ;;  %v18877_v34 = vpop.f32.mrf.mxu0 }
 0x40f   :  { %v12473_v1 = vld [vmem:[#allocation2 + $0x990] sm:$0xf0]  ;;  %19449 = vst [vmem:[#allocation76_spill] sm:$0xff] %v18877_v34  ;;  %v17807_v34 = vld [vmem:[#allocation2 + $0x1d14] sm:$0xf0] }
 0x410   :  { %9525 = vmatpush.bf16.msrb.mxu1 %v13436_v59  ;;  %v17362_v20 = vld [vmem:[#allocation2 + $0xf34] sm:$0xf]  ;;  %v12476_v13 = vor.u32 %v17170_v3, %v12473_v1  ;;  %v9253_v59 = vpop.f32.mrf.mxu1  ;;  %9554 = vmatpush.bf16.msrb.mxu3 %v14876_v63 }
 0x411   :  { %v13241_v38 = vld [vmem:[#allocation2 + $0xf90] sm:$0xf0]  ;;  %v9254_v18 = vadd.f32 %v9253_v59, %v9240_v8  ;;  %v9281_v8 = vpop.f32.mrf.mxu3 }
 0x412   :  { %9539 = vmatpush.bf16.msrb.mxu2 %v14204_v10  ;;  %v17554_v51 = vld [vmem:[#allocation2 + $0x1534] sm:$0xf]  ;;  %9512 = vmatpush.bf16.msrb.mxu0 %v12572_v17  ;;  %v13244_v53 = vor.u32 %v17362_v20, %v13241_v38  ;;  %v9267_v38 = vpop.f32.mrf.mxu2 }
 0x413   :  { %v14009_v62 = vld [vmem:[#allocation2 + $0x1590] sm:$0xf0]  ;;  %v9268_v50 = vadd.f32 %v9267_v38, %v9254_v18 }
 0x414   :  { %v17746_v27 = vld [vmem:[#allocation2 + $0x1b34] sm:$0xf]  ;;  %9526 = vmatpush.bf16.msrb.mxu1 %v13340_v49  ;;  %v14012_v9 = vor.u32 %v17554_v51, %v14009_v62 }
 0x415   :  { %v14777_v58 = vld [vmem:[#allocation2 + $0x1b90] sm:$0xf0] }
 0x416   :  { %9540 = vmatpush.bf16.msrb.mxu2 %v14108_v14  ;;  %v17146_v10 = vld [vmem:[#allocation2 + $0x874] sm:$0xf]  ;;  %v14780_v48 = vor.u32 %v17746_v27, %v14777_v58  ;;  %9513 = vmatpush.bf16.msrb.mxu0 %v12476_v13 }
 0x417   :  { %v12377_v15 = vld [vmem:[#allocation2 + $0x8d0] sm:$0xf0] }
 0x418   :  { %v17338_v60 = vld [vmem:[#allocation2 + $0xe74] sm:$0xf]  ;;  %v12380_v17 = vor.u32 %v17146_v10, %v12377_v15  ;;  %9527 = vmatpush.bf16.msrb.mxu1 %v13244_v53  ;;  %9555 = vmatpush.bf16.msrb.mxu3 %v14780_v48  ;;  %v18875_v53 = vadd.f32 %v9281_v8, %v9268_v50 }
 0x419   :  { %v13145_v19 = vld [vmem:[#allocation2 + $0xed0] sm:$0xf0] }
 0x41a   :  { %v17530_v22 = vld [vmem:[#allocation2 + $0x1474] sm:$0xf]  ;;  %9541 = vmatpush.bf16.msrb.mxu2 %v14012_v9  ;;  %v13148_v21 = vor.u32 %v17338_v60, %v13145_v19  ;;  %9514 = vmatpush.bf16.msrb.mxu0 %v12380_v17 }
 0x41b   :  { %v13913_v33 = vld [vmem:[#allocation2 + $0x14d0] sm:$0xf0] }
 0x41c   :  { %v17722_v5 = vld [vmem:[#allocation2 + $0x1a74] sm:$0xf]  ;;  %v13916_v49 = vor.u32 %v17530_v22, %v13913_v33  ;;  %9528 = vmatpush.bf16.msrb.mxu1 %v13148_v21 }
 0x41d   :  { %v14681_v30 = vld [vmem:[#allocation2 + $0x1ad0] sm:$0xf0] }
 0x41e   :  { %v17122_v14 = vld [vmem:[#allocation2 + $0x7b4] sm:$0xf]  ;;  %v14684_v20 = vor.u32 %v17722_v5, %v14681_v30  ;;  %9542 = vmatpush.bf16.msrb.mxu2 %v13916_v49 }
 0x41f   :  { %v12281_v3 = vld [vmem:[#allocation2 + $0x810] sm:$0xf0] }
 0x420   :  { %v17314_v1 = vld [vmem:[#allocation2 + $0xdb4] sm:$0xf]  ;;  %v12284_v13 = vor.u32 %v17122_v14, %v12281_v3  ;;  %9556 = vmatpush.bf16.msrb.mxu3 %v14684_v20 }
 0x421   :  { %v13049_v63 = vld [vmem:[#allocation2 + $0xe10] sm:$0xf0] }
 0x422   :  { %v17506_v51 = vld [vmem:[#allocation2 + $0x13b4] sm:$0xf]  ;;  %v13052_v9 = vor.u32 %v17314_v1, %v13049_v63  ;;  %9515 = vmatpush.bf16.msrb.mxu0 %v12284_v13 }
 0x423   :  { %v13817_v62 = vld [vmem:[#allocation2 + $0x1410] sm:$0xf0] }
 0x424   :  { %v17698_v27 = vld [vmem:[#allocation2 + $0x19b4] sm:$0xf]  ;;  %v13820_v59 = vor.u32 %v17506_v51, %v13817_v62  ;;  %9529 = vmatpush.bf16.msrb.mxu1 %v13052_v9 }
 0x425   :  { %v14585_v58 = vld [vmem:[#allocation2 + $0x1a10] sm:$0xf0] }
 0x426   :  { %v17098_v10 = vld [vmem:[#allocation2 + $0x6f4] sm:$0xf]  ;;  %v14588_v48 = vor.u32 %v17698_v27, %v14585_v58  ;;  %9543 = vmatpush.bf16.msrb.mxu2 %v13820_v59 }
 0x427   :  { %v12185_v15 = vld [vmem:[#allocation2 + $0x750] sm:$0xf0] }
 0x428   :  { %v17290_v60 = vld [vmem:[#allocation2 + $0xcf4] sm:$0xf]  ;;  %v12188_v30 = vor.u32 %v17098_v10, %v12185_v15  ;;  %9557 = vmatpush.bf16.msrb.mxu3 %v14588_v48  ;;  %v11999_v10 = vld [vmem:[#allocation2 + $0x578] sm:$0xf] }
 0x429   :  { %v12953_v19 = vld [vmem:[#allocation2 + $0xd50] sm:$0xf0]  ;;  %v17063_v15 = vld [vmem:[#allocation2 + $0x5d4] sm:$0xf0] }
 0x42a   :  { %v17482_v22 = vld [vmem:[#allocation2 + $0x12f4] sm:$0xf]  ;;  %v12956_v21 = vor.u32 %v17290_v60, %v12953_v19  ;;  %9516 = vmatpush.bf16.msrb.mxu0 %v12188_v30  ;;  %v12767_v60 = vld [vmem:[#allocation2 + $0xb78] sm:$0xf] }
 0x42b   :  { %v13721_v33 = vld [vmem:[#allocation2 + $0x1350] sm:$0xf0]  ;;  %v17255_v19 = vld [vmem:[#allocation2 + $0xbd4] sm:$0xf0] }
 0x42c   :  { %v17674_v18 = vld [vmem:[#allocation2 + $0x18f4] sm:$0xf]  ;;  %v13724_v49 = vor.u32 %v17482_v22, %v13721_v33  ;;  %9530 = vmatpush.bf16.msrb.mxu1 %v12956_v21  ;;  %v12768_v30 = vor.u32 %v17255_v19, %v12767_v60  ;;  %v12671_v21 = vld [vmem:[#allocation2 + $0xab8] sm:$0xf]  ;;  %v18885_v60 = vpop.f32.mrf.mxu2 }
 0x42d   :  { %v14489_v5 = vld [vmem:[#allocation2 + $0x1950] sm:$0xf0]  ;;  %19451 = vst [vmem:[#allocation78_spill] sm:$0xff] %v18885_v60  ;;  %v17423_v60 = vld [vmem:[#allocation2 + $0x1114] sm:$0xf0] }
 0x42e   :  { %v17074_v17 = vld [vmem:[#allocation2 + $0x634] sm:$0xf]  ;;  %v14492_v63 = vor.u32 %v17674_v18, %v14489_v5  ;;  %9544 = vmatpush.bf16.msrb.mxu2 %v13724_v49  ;;  %v12000_v18 = vor.u32 %v17063_v15, %v11999_v10  ;;  %v17231_v49 = vld [vmem:[#allocation2 + $0xb14] sm:$0xf0] }
 0x42f   :  { %v12089_v14 = vld [vmem:[#allocation2 + $0x690] sm:$0xf0] }
 0x430   :  { %v17266_v3 = vld [vmem:[#allocation2 + $0xc34] sm:$0xf]  ;;  %v12092_v8 = vor.u32 %v17074_v17, %v12089_v14  ;;  %9558 = vmatpush.bf16.msrb.mxu3 %v14492_v63  ;;  %v11903_v14 = vld [vmem:[#allocation2 + $0x4b8] sm:$0xf] }
 0x431   :  { %v12857_v1 = vld [vmem:[#allocation2 + $0xc90] sm:$0xf0] }
 0x432   :  { %v17458_v38 = vld [vmem:[#allocation2 + $0x1234] sm:$0xf]  ;;  %v12860_v9 = vor.u32 %v17266_v3, %v12857_v1  ;;  %9517 = vmatpush.bf16.msrb.mxu0 %v12092_v8  ;;  %v12575_v8 = vld [vmem:[#allocation2 + $0x9f8] sm:$0xf] }
 0x433   :  { %v13625_v20 = vld [vmem:[#allocation2 + $0x1290] sm:$0xf0] }
 0x434   :  { %v17650_v51 = vld [vmem:[#allocation2 + $0x1834] sm:$0xf]  ;;  %v13628_v59 = vor.u32 %v17458_v38, %v13625_v20  ;;  %9531 = vmatpush.bf16.msrb.mxu1 %v12860_v9  ;;  %v11904_v38 = vor.u32 %v17039_v4, %v11903_v14 }
 0x435   :  { %v14393_v62 = vld [vmem:[#allocation2 + $0x1890] sm:$0xf0]  ;;  %9518 = vmatmul.bf16.vlgmr.msrb.gmra.mxu0 %v18540_v11 }
 0x436   :  { %v18010_v50 = vld [vmem:[#allocation2 + $0x2374] sm:$0xf]  ;;  %v14396_v48 = vor.u32 %v17650_v51, %v14393_v62  ;;  %9545 = vmatpush.bf16.msrb.mxu2 %v13628_v59  ;;  %v12672_v62 = vor.u32 %v17231_v49, %v12671_v21  ;;  %v18883_v59 = vpop.f32.mrf.mxu1 }
 0x437   :  { %v15833_v27 = vld [vmem:[#allocation2 + $0x23d0] sm:$0xf0]  ;;  %9532 = vmatmul.bf16.vlgmr.msrb.gmra.mxu1 %v18530_v0  ;;  %19450 = vst [vmem:[#allocation77_spill] sm:$0xff] %v18883_v59  ;;  %v14207_v59 = vld [vmem:[#allocation2 + $0x16b8] sm:$0xf] }
 0x438   :  { %v18202_v58 = vld [vmem:[#allocation2 + $0x2974] sm:$0xf]  ;;  %v15836_v22 = vor.u32 %v18010_v50, %v15833_v27  ;;  %9559 = vmatpush.bf16.msrb.mxu3 %v14396_v48  ;;  %v11807_v27 = vld [vmem:[#allocation2 + $0x3f8] sm:$0xf] }
 0x439   :  { %v16601_v13 = vld [vmem:[#allocation2 + $0x29d0] sm:$0xf0]  ;;  %9546 = vmatmul.bf16.vlgmr.msrb.gmra.mxu2 %v18549_v23 }
 0x43a   :  { %v16604_v33 = vor.u32 %v18202_v58, %v16601_v13  ;;  %v17986_v5 = vld [vmem:[#allocation2 + $0x22b4] sm:$0xf]  ;;  %9566 = vmatpush.bf16.msra.mxu0 %v15836_v22  ;;  %9594 = vmatpush.bf16.msra.mxu2 %v12000_v18  ;;  %v17015_v58 = vld [vmem:[#allocation2 + $0x454] sm:$0xf0]  ;;  %v9295_v18 = vpop.f32.mrf.mxu0 }
 0x43b   :  { %v15737_v24 = vld [vmem:[#allocation2 + $0x2310] sm:$0xf0]  ;;  %9560 = vmatmul.bf16.vlgmr.msrb.gmra.mxu3 %v18570_v37  ;;  %v11808_v13 = vor.u32 %v17015_v58, %v11807_v27  ;;  %v11711_v22 = vld [vmem:[#allocation2 + $0x338] sm:$0xf]  ;;  %v18890_v14 = vadd.f32 %v9295_v18, %v18875_v53 }
 0x43c   :  { %v18178_v12 = vld [vmem:[#allocation2 + $0x28b4] sm:$0xf]  ;;  %v15740_v3 = vor.u32 %v17986_v5, %v15737_v24  ;;  %9580 = vmatpush.bf16.msra.mxu1 %v16604_v33  ;;  %9608 = vmatpush.bf16.msra.mxu3 %v12768_v30  ;;  %v17207_v24 = vld [vmem:[#allocation2 + $0xa54] sm:$0xf0] }
 0x43d   :  { %v16505_v17 = vld [vmem:[#allocation2 + $0x2910] sm:$0xf0]  ;;  %v12576_v19 = vor.u32 %v17207_v24, %v12575_v8  ;;  %v16991_v33 = vld [vmem:[#allocation2 + $0x394] sm:$0xf0] }
 0x43e   :  { %v16508_v1 = vor.u32 %v18178_v12, %v16505_v17  ;;  %v17962_v63 = vld [vmem:[#allocation2 + $0x21f4] sm:$0xf]  ;;  %9567 = vmatpush.bf16.msra.mxu0 %v15740_v3  ;;  %9595 = vmatpush.bf16.msra.mxu2 %v11904_v38  ;;  %v12479_v5 = vld [vmem:[#allocation2 + $0x938] sm:$0xf]  ;;  %v18887_v17 = vpop.f32.mrf.mxu3  ;;  %v11712_v3 = vor.u32 %v16991_v33, %v11711_v22  ;;  %v9309_v22 = vpop.f32.mrf.mxu1 }
 0x43f   :  { %v15641_v20 = vld [vmem:[#allocation2 + $0x2250] sm:$0xf0]  ;;  %v17183_v30 = vld [vmem:[#allocation2 + $0x994] sm:$0xf0]  ;;  %19452 = vst [vmem:[#allocation79_spill] sm:$0xff] %v18887_v17  ;;  %v9323_v33 = vpop.f32.mrf.mxu2 }
 0x440   :  { %v18154_v51 = vld [vmem:[#allocation2 + $0x27f4] sm:$0xf]  ;;  %v15644_v4 = vor.u32 %v17962_v63, %v15641_v20  ;;  %9581 = vmatpush.bf16.msra.mxu1 %v16508_v1  ;;  %9609 = vmatpush.bf16.msra.mxu3 %v12672_v62  ;;  %v16967_v27 = vld [vmem:[#allocation2 + $0x2d4] sm:$0xf0] }
 0x441   :  { %v16409_v50 = vld [vmem:[#allocation2 + $0x2850] sm:$0xf0]  ;;  %v12383_v58 = vld [vmem:[#allocation2 + $0x878] sm:$0xf] }
 0x442   :  { %v16412_v12 = vor.u32 %v18154_v51, %v16409_v50  ;;  %v17938_v10 = vld [vmem:[#allocation2 + $0x2134] sm:$0xf]  ;;  %9568 = vmatpush.bf16.msra.mxu0 %v15644_v4  ;;  %9596 = vmatpush.bf16.msra.mxu2 %v11808_v13  ;;  %v12480_v51 = vor.u32 %v17183_v30, %v12479_v5  ;;  %v11615_v50 = vld [vmem:[#allocation2 + $0x278] sm:$0xf]  ;;  %v9324_v30 = vadd.f32 %v9323_v33, %v9309_v22  ;;  %v18896_v54 = vpop.f32.mrf.mxu0 }
 0x443   :  { %v15545_v15 = vld [vmem:[#allocation2 + $0x2190] sm:$0xf0]  ;;  %v17159_v8 = vld [vmem:[#allocation2 + $0x8d4] sm:$0xf0]  ;;  %v11616_v4 = vor.u32 %v16967_v27, %v11615_v50  ;;  %19453 = vst [vmem:[#allocation80_spill] sm:$0xff] %v18896_v54 }
 0x444   :  { %v18130_v9 = vld [vmem:[#allocation2 + $0x2734] sm:$0xf]  ;;  %v15548_v21 = vor.u32 %v17938_v10, %v15545_v15  ;;  %9582 = vmatpush.bf16.msra.mxu1 %v16412_v12  ;;  %9610 = vmatpush.bf16.msra.mxu3 %v12576_v19  ;;  %v12384_v15 = vor.u32 %v17159_v8, %v12383_v58  ;;  %v11519_v19 = vld [vmem:[#allocation2 + $0x1b8] sm:$0xf]  ;;  %v17987_v54 = vld [vmem:[#allocation2 + $0x22bc] sm:$0xf] }
 0x445   :  { %v16313_v48 = vld [vmem:[#allocation2 + $0x2790] sm:$0xf0]  ;;  %v12287_v18 = vld [vmem:[#allocation2 + $0x7b8] sm:$0xf] }
 0x446   :  { %v16316_v49 = vor.u32 %v18130_v9, %v16313_v48  ;;  %v17914_v1 = vld [vmem:[#allocation2 + $0x2074] sm:$0xf]  ;;  %9569 = vmatpush.bf16.msra.mxu0 %v15548_v21  ;;  %9597 = vmatpush.bf16.msra.mxu2 %v11712_v3  ;;  %v16943_v48 = vld [vmem:[#allocation2 + $0x214] sm:$0xf0] }
 0x447   :  { %v15449_v38 = vld [vmem:[#allocation2 + $0x20d0] sm:$0xf0]  ;;  %v17135_v5 = vld [vmem:[#allocation2 + $0x814] sm:$0xf0]  ;;  %v11520_v3 = vor.u32 %v16943_v48, %v11519_v19 }
 0x448   :  { %v18106_v63 = vld [vmem:[#allocation2 + $0x2674] sm:$0xf]  ;;  %v15452_v53 = vor.u32 %v17914_v1, %v15449_v38  ;;  %9583 = vmatpush.bf16.msra.mxu1 %v16316_v49  ;;  %9611 = vmatpush.bf16.msra.mxu3 %v12480_v51  ;;  %v9337_v1 = vpop.f32.mrf.mxu3  ;;  %v12288_v50 = vor.u32 %v17135_v5, %v12287_v18  ;;  %v11423_v58 = vld [vmem:[#allocation2 + $0xf8] sm:$0xf] }
 0x449   :  { %v16217_v62 = vld [vmem:[#allocation2 + $0x26d0] sm:$0xf0]  ;;  %v18894_v51 = vadd.f32 %v9337_v1, %v9324_v30  ;;  %v16919_v8 = vld [vmem:[#allocation2 + $0x154] sm:$0xf0] }
 0x44a   :  { %v16220_v24 = vor.u32 %v18106_v63, %v16217_v62  ;;  %v17890_v12 = vld [vmem:[#allocation2 + $0x1fb4] sm:$0xf]  ;;  %9570 = vmatpush.bf16.msra.mxu0 %v15452_v53  ;;  %9598 = vmatpush.bf16.msra.mxu2 %v11616_v4  ;;  %v12191_v20 = vld [vmem:[#allocation2 + $0x6f8] sm:$0xf]  ;;  %v11424_v4 = vor.u32 %v16919_v8, %v11423_v58 }
 0x44b   :  { %v15353_v13 = vld [vmem:[#allocation2 + $0x2010] sm:$0xf0]  ;;  %v17111_v17 = vld [vmem:[#allocation2 + $0x754] sm:$0xf0] }
 0x44c   :  { %v18082_v10 = vld [vmem:[#allocation2 + $0x25b4] sm:$0xf]  ;;  %v15356_v21 = vor.u32 %v17890_v12, %v15353_v13  ;;  %9584 = vmatpush.bf16.msra.mxu1 %v16220_v24  ;;  %9612 = vmatpush.bf16.msra.mxu3 %v12384_v15  ;;  %v11327_v19 = vld [vmem:[#allocation2 + $0x38] sm:$0xf]  ;;  %v12192_v48 = vor.u32 %v17111_v17, %v12191_v20 }
 0x44d   :  { %v16121_v9 = vld [vmem:[#allocation2 + $0x2610] sm:$0xf0]  ;;  %v16895_v15 = vld [vmem:[#allocation2 + $0x94] sm:$0xf0] }
 0x44e   :  { %v16124_v49 = vor.u32 %v18082_v10, %v16121_v9  ;;  %v17866_v38 = vld [vmem:[#allocation2 + $0x1ef4] sm:$0xf]  ;;  %9571 = vmatpush.bf16.msra.mxu0 %v15356_v21  ;;  %9599 = vmatpush.bf16.msra.mxu2 %v11520_v3  ;;  %v12095_v22 = vld [vmem:[#allocation2 + $0x638] sm:$0xf]  ;;  %v11328_v3 = vor.u32 %v16895_v15, %v11327_v19 }
 0x44f   :  { %v15257_v63 = vld [vmem:[#allocation2 + $0x1f50] sm:$0xf0]  ;;  %v17087_v33 = vld [vmem:[#allocation2 + $0x694] sm:$0xf0] }
 0x450   :  { %v18058_v62 = vld [vmem:[#allocation2 + $0x24f4] sm:$0xf]  ;;  %v15260_v53 = vor.u32 %v17866_v38, %v15257_v63  ;;  %9585 = vmatpush.bf16.msra.mxu1 %v16124_v49  ;;  %9613 = vmatpush.bf16.msra.mxu3 %v12288_v50  ;;  %v13535_v18 = vld [vmem:[#allocation2 + $0x1178] sm:$0xf]  ;;  %v12096_v50 = vor.u32 %v17087_v33, %v12095_v22 }
 0x451   :  { %v16025_v27 = vld [vmem:[#allocation2 + $0x2550] sm:$0xf0]  ;;  %v17447_v5 = vld [vmem:[#allocation2 + $0x11d4] sm:$0xf0] }
 0x452   :  { %v17842_v12 = vld [vmem:[#allocation2 + $0x1e34] sm:$0xf]  ;;  %v16028_v24 = vor.u32 %v18058_v62, %v16025_v27  ;;  %v14303_v30 = vld [vmem:[#allocation2 + $0x1778] sm:$0xf]  ;;  %9572 = vmatpush.bf16.msra.mxu0 %v15260_v53  ;;  %9600 = vmatpush.bf16.msra.mxu2 %v11424_v4  ;;  %v13536_v17 = vor.u32 %v17447_v5, %v13535_v18 }
 0x453   :  { %v15161_v13 = vld [vmem:[#allocation2 + $0x1e90] sm:$0xf0]  ;;  %v17639_v1 = vld [vmem:[#allocation2 + $0x17d4] sm:$0xf0] }
 0x454   :  { %v18034_v10 = vld [vmem:[#allocation2 + $0x2434] sm:$0xf]  ;;  %v15164_v21 = vor.u32 %v17842_v12, %v15161_v13  ;;  %v15071_v38 = vld [vmem:[#allocation2 + $0x1d78] sm:$0xf]  ;;  %9586 = vmatpush.bf16.msra.mxu1 %v16028_v24  ;;  %9614 = vmatpush.bf16.msra.mxu3 %v12192_v48  ;;  %v14304_v20 = vor.u32 %v17639_v1, %v14303_v30 }
 0x455   :  { %v15929_v9 = vld [vmem:[#allocation2 + $0x2490] sm:$0xf0]  ;;  %v17831_v63 = vld [vmem:[#allocation2 + $0x1dd4] sm:$0xf0] }
 0x456   :  { %v15932_v49 = vor.u32 %v18034_v10, %v15929_v9  ;;  %v15839_v62 = vld [vmem:[#allocation2 + $0x2378] sm:$0xf]  ;;  %v15072_v58 = vor.u32 %v17831_v63, %v15071_v38  ;;  %9573 = vmatpush.bf16.msra.mxu0 %v15164_v21  ;;  %9601 = vmatpush.bf16.msra.mxu2 %v11328_v3  ;;  %v18898_v10 = vpop.f32.mrf.mxu1 }
 0x457   :  { %v18023_v27 = vld [vmem:[#allocation2 + $0x23d4] sm:$0xf0]  ;;  %19454 = vst [vmem:[#allocation81_spill] sm:$0xff] %v18898_v10  ;;  %v12673_v10 = vld [vmem:[#allocation2 + $0xb18] sm:$0xf0] }
 0x458   :  { %v13439_v8 = vld [vmem:[#allocation2 + $0x10b8] sm:$0xf]  ;;  %v15840_v53 = vor.u32 %v18023_v27, %v15839_v62  ;;  %9587 = vmatpush.bf16.msra.mxu1 %v15932_v49  ;;  %9615 = vmatpush.bf16.msra.mxu3 %v12096_v50  ;;  %v18906_v49 = vpop.f32.mrf.mxu3 }
 0x459   :  { %v17615_v12 = vld [vmem:[#allocation2 + $0x1714] sm:$0xf0]  ;;  %v13440_v9 = vor.u32 %v17423_v60, %v13439_v8  ;;  %9574 = vmatmul.bf16.vlgmr.msra.gmra.mxu0 %v18574_v42  ;;  %9602 = vmatmul.bf16.vlgmr.msra.gmra.mxu2 %v18525_v57  ;;  %19456 = vst [vmem:[#allocation83_spill] sm:$0xff] %v18906_v49  ;;  %v9351_v8 = vpop.f32.mrf.mxu0 }
 0x45a   :  { %v14975_v13 = vld [vmem:[#allocation2 + $0x1cb8] sm:$0xf]  ;;  %9622 = vmatpush.bf16.msrb.mxu0 %v13536_v17  ;;  %9650 = vmatpush.bf16.msrb.mxu2 %v15072_v58  ;;  %v14208_v19 = vor.u32 %v17615_v12, %v14207_v59  ;;  %v18903_v59 = vpop.f32.mrf.mxu2 }
 0x45b   :  { %v15743_v24 = vld [vmem:[#allocation2 + $0x22b8] sm:$0xf]  ;;  %v14976_v48 = vor.u32 %v17807_v34, %v14975_v13  ;;  %9588 = vmatmul.bf16.vlgmr.msra.gmra.mxu1 %v18572_v41  ;;  %19455 = vst [vmem:[#allocation82_spill] sm:$0xff] %v18903_v59  ;;  %9616 = vmatmul.bf16.vlgmr.msra.gmra.mxu3 %v18540_v11  ;;  %v9352_v13 = vadd.f32 %v9351_v8, %v18894_v51  ;;  %v17027_v59 = vld [vmem:[#allocation2 + $0x4bc] sm:$0xf] }
 0x45c   :  { %v17999_v4 = vld [vmem:[#allocation2 + $0x2314] sm:$0xf0]  ;;  %9636 = vmatpush.bf16.msrb.mxu1 %v14304_v20  ;;  %9664 = vmatpush.bf16.msrb.mxu3 %v15840_v53 }
 0x45d   :  { %v13343_v15 = vld [vmem:[#allocation2 + $0xff8] sm:$0xf]  ;;  %v15744_v18 = vor.u32 %v17999_v4, %v15743_v24 }
 0x45e   :  { %v17399_v22 = vld [vmem:[#allocation2 + $0x1054] sm:$0xf0]  ;;  %9623 = vmatpush.bf16.msrb.mxu0 %v13440_v9  ;;  %9651 = vmatpush.bf16.msrb.mxu2 %v14976_v48 }
 0x45f   :  { %v14111_v33 = vld [vmem:[#allocation2 + $0x15f8] sm:$0xf]  ;;  %v13344_v60 = vor.u32 %v17399_v22, %v13343_v15 }
 0x460   :  { %v17591_v5 = vld [vmem:[#allocation2 + $0x1654] sm:$0xf0]  ;;  %9637 = vmatpush.bf16.msrb.mxu1 %v14208_v19  ;;  %9665 = vmatpush.bf16.msrb.mxu3 %v15744_v18  ;;  %v9365_v19 = vpop.f32.mrf.mxu1 }
 0x461   :  { %v14879_v30 = vld [vmem:[#allocation2 + $0x1bf8] sm:$0xf]  ;;  %v14112_v34 = vor.u32 %v17591_v5, %v14111_v33  ;;  %v9366_v18 = vadd.f32 %v9365_v19, %v9352_v13 }
 0x462   :  { %v17783_v21 = vld [vmem:[#allocation2 + $0x1c54] sm:$0xf0]  ;;  %9624 = vmatpush.bf16.msrb.mxu0 %v13344_v60 }
 0x463   :  { %v15647_v1 = vld [vmem:[#allocation2 + $0x21f8] sm:$0xf]  ;;  %v14880_v63 = vor.u32 %v17783_v21, %v14879_v30 }
 0x464   :  { %v17975_v38 = vld [vmem:[#allocation2 + $0x2254] sm:$0xf0]  ;;  %9638 = vmatpush.bf16.msrb.mxu1 %v14112_v34 }
 0x465   :  { %v13247_v3 = vld [vmem:[#allocation2 + $0xf38] sm:$0xf]  ;;  %v15648_v50 = vor.u32 %v17975_v38, %v15647_v1  ;;  %9652 = vmatpush.bf16.msrb.mxu2 %v14880_v63 }
 0x466   :  { %v17375_v62 = vld [vmem:[#allocation2 + $0xf94] sm:$0xf0] }
 0x467   :  { %v14015_v27 = vld [vmem:[#allocation2 + $0x1538] sm:$0xf]  ;;  %v13248_v24 = vor.u32 %v17375_v62, %v13247_v3  ;;  %9666 = vmatpush.bf16.msrb.mxu3 %v15648_v50 }
 0x468   :  { %v17567_v17 = vld [vmem:[#allocation2 + $0x1594] sm:$0xf0] }
 0x469   :  { %v14783_v20 = vld [vmem:[#allocation2 + $0x1b38] sm:$0xf]  ;;  %v14016_v4 = vor.u32 %v17567_v17, %v14015_v27  ;;  %9625 = vmatpush.bf16.msrb.mxu0 %v13248_v24  ;;  %v9379_v17 = vpop.f32.mrf.mxu2 }
 0x46a   :  { %v17759_v58 = vld [vmem:[#allocation2 + $0x1b94] sm:$0xf0]  ;;  %v9380_v8 = vadd.f32 %v9379_v17, %v9366_v18  ;;  %v12769_v18 = vld [vmem:[#allocation2 + $0xbd8] sm:$0xf0] }
 0x46b   :  { %v15551_v53 = vld [vmem:[#allocation2 + $0x2138] sm:$0xf]  ;;  %v14784_v9 = vor.u32 %v17759_v58, %v14783_v20  ;;  %9639 = vmatpush.bf16.msrb.mxu1 %v14016_v4 }
 0x46c   :  { %v17951_v12 = vld [vmem:[#allocation2 + $0x2194] sm:$0xf0] }
 0x46d   :  { %v13151_v48 = vld [vmem:[#allocation2 + $0xe78] sm:$0xf]  ;;  %v15552_v33 = vor.u32 %v17951_v12, %v15551_v53  ;;  %9653 = vmatpush.bf16.msrb.mxu2 %v14784_v9  ;;  %v9393_v53 = vpop.f32.mrf.mxu3 }
 0x46e   :  { %v17351_v15 = vld [vmem:[#allocation2 + $0xed4] sm:$0xf0]  ;;  %v18909_v4 = vadd.f32 %v9393_v53, %v9380_v8 }
 0x46f   :  { %v13919_v22 = vld [vmem:[#allocation2 + $0x1478] sm:$0xf]  ;;  %v13152_v60 = vor.u32 %v17351_v15, %v13151_v48  ;;  %9667 = vmatpush.bf16.msrb.mxu3 %v15552_v33 }
 0x470   :  { %v17543_v5 = vld [vmem:[#allocation2 + $0x14d4] sm:$0xf0] }
 0x471   :  { %v14687_v30 = vld [vmem:[#allocation2 + $0x1a78] sm:$0xf]  ;;  %v13920_v51 = vor.u32 %v17543_v5, %v13919_v22  ;;  %9626 = vmatpush.bf16.msrb.mxu0 %v13152_v60 }
 0x472   :  { %v17735_v21 = vld [vmem:[#allocation2 + $0x1ad4] sm:$0xf0] }
 0x473   :  { %v15455_v1 = vld [vmem:[#allocation2 + $0x2078] sm:$0xf]  ;;  %v14688_v34 = vor.u32 %v17735_v21, %v14687_v30  ;;  %9640 = vmatpush.bf16.msrb.mxu1 %v13920_v51 }
 0x474   :  { %v17927_v38 = vld [vmem:[#allocation2 + $0x20d4] sm:$0xf0] }
 0x475   :  { %v13055_v63 = vld [vmem:[#allocation2 + $0xdb8] sm:$0xf]  ;;  %v15456_v27 = vor.u32 %v17927_v38, %v15455_v1  ;;  %9654 = vmatpush.bf16.msrb.mxu2 %v14688_v34 }
 0x476   :  { %v17327_v3 = vld [vmem:[#allocation2 + $0xe14] sm:$0xf0] }
 0x477   :  { %v13823_v62 = vld [vmem:[#allocation2 + $0x13b8] sm:$0xf]  ;;  %v13056_v24 = vor.u32 %v17327_v3, %v13055_v63  ;;  %9668 = vmatpush.bf16.msrb.mxu3 %v15456_v27 }
 0x478   :  { %v17519_v50 = vld [vmem:[#allocation2 + $0x1414] sm:$0xf0] }
 0x479   :  { %v14591_v20 = vld [vmem:[#allocation2 + $0x19b8] sm:$0xf]  ;;  %v13824_v9 = vor.u32 %v17519_v50, %v13823_v62  ;;  %9627 = vmatpush.bf16.msrb.mxu0 %v13056_v24 }
 0x47a   :  { %v17711_v58 = vld [vmem:[#allocation2 + $0x1a14] sm:$0xf0] }
 0x47b   :  { %v15359_v12 = vld [vmem:[#allocation2 + $0x1fb8] sm:$0xf]  ;;  %v14592_v19 = vor.u32 %v17711_v58, %v14591_v20  ;;  %9641 = vmatpush.bf16.msrb.mxu1 %v13824_v9 }
 0x47c   :  { %v17903_v13 = vld [vmem:[#allocation2 + $0x2014] sm:$0xf0] }
 0x47d   :  { %v12959_v48 = vld [vmem:[#allocation2 + $0xcf8] sm:$0xf]  ;;  %v15360_v33 = vor.u32 %v17903_v13, %v15359_v12  ;;  %9655 = vmatpush.bf16.msrb.mxu2 %v14592_v19  ;;  %v17051_v13 = vld [vmem:[#allocation2 + $0x57c] sm:$0xf] }
 0x47e   :  { %v17303_v15 = vld [vmem:[#allocation2 + $0xd54] sm:$0xf0] }
 0x47f   :  { %v13727_v22 = vld [vmem:[#allocation2 + $0x12f8] sm:$0xf]  ;;  %v12960_v60 = vor.u32 %v17303_v15, %v12959_v48  ;;  %9669 = vmatpush.bf16.msrb.mxu3 %v15360_v33  ;;  %v12001_v48 = vld [vmem:[#allocation2 + $0x5d8] sm:$0xf0] }
 0x480   :  { %v17495_v5 = vld [vmem:[#allocation2 + $0x1354] sm:$0xf0]  ;;  %v17243_v15 = vld [vmem:[#allocation2 + $0xb7c] sm:$0xf] }
 0x481   :  { %v14495_v30 = vld [vmem:[#allocation2 + $0x18f8] sm:$0xf]  ;;  %v13728_v63 = vor.u32 %v17495_v5, %v13727_v22  ;;  %9628 = vmatpush.bf16.msrb.mxu0 %v12960_v60  ;;  %v17435_v22 = vld [vmem:[#allocation2 + $0x117c] sm:$0xf] }
 0x482   :  { %v17687_v21 = vld [vmem:[#allocation2 + $0x1954] sm:$0xf0]  ;;  %v13537_v5 = vld [vmem:[#allocation2 + $0x11d8] sm:$0xf0] }
 0x483   :  { %v15263_v1 = vld [vmem:[#allocation2 + $0x1ef8] sm:$0xf]  ;;  %v14496_v3 = vor.u32 %v17687_v21, %v14495_v30  ;;  %9642 = vmatpush.bf16.msrb.mxu1 %v13728_v63  ;;  %v12004_v21 = vor.u32 %v17051_v13, %v12001_v48  ;;  %v13540_v60 = vor.u32 %v17435_v22, %v13537_v5  ;;  %v17411_v63 = vld [vmem:[#allocation2 + $0x10bc] sm:$0xf]  ;;  %v18921_v5 = vpop.f32.mrf.mxu2 }
 0x484   :  { %v17879_v38 = vld [vmem:[#allocation2 + $0x1f54] sm:$0xf0]  ;;  %v17195_v13 = vld [vmem:[#allocation2 + $0x9fc] sm:$0xf]  ;;  %19459 = vst [vmem:[#allocation86_spill] sm:$0xff] %v18921_v5 }
 0x485   :  { %v12863_v51 = vld [vmem:[#allocation2 + $0xc38] sm:$0xf]  ;;  %v15264_v50 = vor.u32 %v17879_v38, %v15263_v1  ;;  %9656 = vmatpush.bf16.msrb.mxu2 %v14496_v3  ;;  %v12772_v1 = vor.u32 %v17243_v15, %v12769_v18  ;;  %v13441_v3 = vld [vmem:[#allocation2 + $0x1118] sm:$0xf0] }
 0x486   :  { %v17279_v34 = vld [vmem:[#allocation2 + $0xc94] sm:$0xf0]  ;;  %v17387_v48 = vld [vmem:[#allocation2 + $0xffc] sm:$0xf] }
 0x487   :  { %v13631_v62 = vld [vmem:[#allocation2 + $0x1238] sm:$0xf]  ;;  %v12864_v24 = vor.u32 %v17279_v34, %v12863_v51  ;;  %9670 = vmatpush.bf16.msrb.mxu3 %v15264_v50  ;;  %v11905_v51 = vld [vmem:[#allocation2 + $0x518] sm:$0xf0] }
 0x488   :  { %v17471_v17 = vld [vmem:[#allocation2 + $0x1294] sm:$0xf0]  ;;  %v17219_v34 = vld [vmem:[#allocation2 + $0xabc] sm:$0xf]  ;;  %v11908_v18 = vor.u32 %v17027_v59, %v11905_v51 }
 0x489   :  { %v14399_v27 = vld [vmem:[#allocation2 + $0x1838] sm:$0xf]  ;;  %v13632_v9 = vor.u32 %v17471_v17, %v13631_v62  ;;  %9629 = vmatpush.bf16.msrb.mxu0 %v12864_v24  ;;  %v18913_v62 = vpop.f32.mrf.mxu0  ;;  %v18915_v17 = vpop.f32.mrf.mxu1  ;;  %v12676_v50 = vor.u32 %v17219_v34, %v12673_v10  ;;  %v12577_v24 = vld [vmem:[#allocation2 + $0xa58] sm:$0xf0] }
 0x48a   :  { %v17663_v20 = vld [vmem:[#allocation2 + $0x1894] sm:$0xf0]  ;;  %19457 = vst [vmem:[#allocation84_spill] sm:$0xff] %v18913_v62  ;;  %v12580_v15 = vor.u32 %v17195_v13, %v12577_v24  ;;  %v16979_v22 = vld [vmem:[#allocation2 + $0x33c] sm:$0xf] }
 0x48b   :  { %v15167_v58 = vld [vmem:[#allocation2 + $0x1e38] sm:$0xf]  ;;  %v14400_v19 = vor.u32 %v17663_v20, %v14399_v27  ;;  %9643 = vmatpush.bf16.msrb.mxu1 %v13632_v9  ;;  %19458 = vst [vmem:[#allocation85_spill] sm:$0xff] %v18915_v17  ;;  %v13249_v51 = vld [vmem:[#allocation2 + $0xf98] sm:$0xf0] }
 0x48c   :  { %v17855_v8 = vld [vmem:[#allocation2 + $0x1e94] sm:$0xf0]  ;;  %9630 = vmatmul.bf16.vlgmr.msrb.gmra.mxu0 %v18530_v0  ;;  %v17147_v13 = vld [vmem:[#allocation2 + $0x87c] sm:$0xf] }
 0x48d   :  { %v16607_v53 = vld [vmem:[#allocation2 + $0x2978] sm:$0xf]  ;;  %v15168_v33 = vor.u32 %v17855_v8, %v15167_v58  ;;  %9657 = vmatpush.bf16.msrb.mxu2 %v14400_v19  ;;  %v17003_v8 = vld [vmem:[#allocation2 + $0x3fc] sm:$0xf] }
 0x48e   :  { %v18215_v12 = vld [vmem:[#allocation2 + $0x29d4] sm:$0xf0]  ;;  %9644 = vmatmul.bf16.vlgmr.msrb.gmra.mxu1 %v18549_v23  ;;  %v12385_v24 = vld [vmem:[#allocation2 + $0x8d8] sm:$0xf0] }
 0x48f   :  { %v16608_v30 = vor.u32 %v18215_v12, %v16607_v53  ;;  %v16511_v38 = vld [vmem:[#allocation2 + $0x28b8] sm:$0xf]  ;;  %9671 = vmatpush.bf16.msrb.mxu3 %v15168_v33  ;;  %9692 = vmatpush.bf16.msra.mxu1 %v12004_v21  ;;  %v13444_v53 = vor.u32 %v17411_v63, %v13441_v3  ;;  %v11809_v12 = vld [vmem:[#allocation2 + $0x458] sm:$0xf0] }
 0x490   :  { %v18191_v49 = vld [vmem:[#allocation2 + $0x2914] sm:$0xf0]  ;;  %9658 = vmatmul.bf16.vlgmr.msrb.gmra.mxu2 %v18570_v37  ;;  %v11812_v59 = vor.u32 %v17003_v8, %v11809_v12  ;;  %v17171_v21 = vld [vmem:[#allocation2 + $0x93c] sm:$0xf] }
 0x491   :  { %9678 = vmatpush.bf16.msra.mxu0 %v16608_v30  ;;  %v16512_v27 = vor.u32 %v18191_v49, %v16511_v38  ;;  %9706 = vmatpush.bf16.msra.mxu2 %v12772_v1  ;;  %v16415_v20 = vld [vmem:[#allocation2 + $0x27f8] sm:$0xf]  ;;  %v13345_v49 = vld [vmem:[#allocation2 + $0x1058] sm:$0xf0]  ;;  %v18923_v38 = vpop.f32.mrf.mxu3  ;;  %v9407_v63 = vpop.f32.mrf.mxu0 }
 0x492   :  { %v18167_v58 = vld [vmem:[#allocation2 + $0x2854] sm:$0xf0]  ;;  %9672 = vmatmul.bf16.vlgmr.msrb.gmra.mxu3 %v18574_v42  ;;  %v13348_v33 = vor.u32 %v17387_v48, %v13345_v49  ;;  %v11713_v30 = vld [vmem:[#allocation2 + $0x398] sm:$0xf0]  ;;  %19460 = vst [vmem:[#allocation87_spill] sm:$0xff] %v18923_v38  ;;  %v9421_v3 = vpop.f32.mrf.mxu1 }
 0x493   :  { %9720 = vmatpush.bf16.msra.mxu3 %v13540_v60  ;;  %v16416_v10 = vor.u32 %v18167_v58, %v16415_v20  ;;  %9693 = vmatpush.bf16.msra.mxu1 %v11908_v18  ;;  %v16319_v9 = vld [vmem:[#allocation2 + $0x2738] sm:$0xf]  ;;  %v12481_v1 = vld [vmem:[#allocation2 + $0x998] sm:$0xf0]  ;;  %v9422_v8 = vadd.f32 %v9421_v3, %v9407_v63 }
 0x494   :  { %v18143_v19 = vld [vmem:[#allocation2 + $0x2794] sm:$0xf0]  ;;  %v17363_v60 = vld [vmem:[#allocation2 + $0xf3c] sm:$0xf]  ;;  %v12484_v18 = vor.u32 %v17171_v21, %v12481_v1 }
 0x495   :  { %9679 = vmatpush.bf16.msra.mxu0 %v16512_v27  ;;  %9707 = vmatpush.bf16.msra.mxu2 %v12676_v50  ;;  %v16320_v34 = vor.u32 %v18143_v19, %v16319_v9  ;;  %v11716_v27 = vor.u32 %v16979_v22, %v11713_v30  ;;  %v16223_v50 = vld [vmem:[#allocation2 + $0x2678] sm:$0xf]  ;;  %v16955_v58 = vld [vmem:[#allocation2 + $0x27c] sm:$0xf] }
 0x496   :  { %v18119_v20 = vld [vmem:[#allocation2 + $0x26d4] sm:$0xf0]  ;;  %v11617_v12 = vld [vmem:[#allocation2 + $0x2d8] sm:$0xf0] }
 0x497   :  { %9721 = vmatpush.bf16.msra.mxu3 %v13444_v53  ;;  %9694 = vmatpush.bf16.msra.mxu1 %v11812_v59  ;;  %v13252_v53 = vor.u32 %v17363_v60, %v13249_v51  ;;  %v17339_v48 = vld [vmem:[#allocation2 + $0xe7c] sm:$0xf]  ;;  %v11620_v9 = vor.u32 %v16955_v58, %v11617_v12  ;;  %v12388_v59 = vor.u32 %v17147_v13, %v12385_v24  ;;  %v18095_v19 = vld [vmem:[#allocation2 + $0x2614] sm:$0xf0]  ;;  %v9435_v60 = vpop.f32.mrf.mxu2 }
 0x498   :  { %v13153_v49 = vld [vmem:[#allocation2 + $0xed8] sm:$0xf0]  ;;  %v9436_v3 = vadd.f32 %v9435_v60, %v9422_v8 }
 0x499   :  { %9680 = vmatpush.bf16.msra.mxu0 %v16416_v10  ;;  %9708 = vmatpush.bf16.msra.mxu2 %v12580_v15  ;;  %v16224_v10 = vor.u32 %v18119_v20, %v16223_v50  ;;  %v16127_v15 = vld [vmem:[#allocation2 + $0x25b8] sm:$0xf]  ;;  %v16931_v22 = vld [vmem:[#allocation2 + $0x1bc] sm:$0xf]  ;;  %v13156_v30 = vor.u32 %v17339_v48, %v13153_v49 }
 0x49a   :  { %v11521_v21 = vld [vmem:[#allocation2 + $0x218] sm:$0xf0]  ;;  %v16128_v38 = vor.u32 %v18095_v19, %v16127_v15  ;;  %v16031_v50 = vld [vmem:[#allocation2 + $0x24f8] sm:$0xf] }
 0x49b   :  { %9722 = vmatpush.bf16.msra.mxu3 %v13348_v33  ;;  %9695 = vmatpush.bf16.msra.mxu1 %v11716_v27  ;;  %v17123_v1 = vld [vmem:[#allocation2 + $0x7bc] sm:$0xf]  ;;  %v11524_v27 = vor.u32 %v16931_v22, %v11521_v21  ;;  %v18071_v20 = vld [vmem:[#allocation2 + $0x2554] sm:$0xf0] }
 0x49c   :  { %v12289_v33 = vld [vmem:[#allocation2 + $0x818] sm:$0xf0]  ;;  %v16032_v8 = vor.u32 %v18071_v20, %v16031_v50  ;;  %v18047_v15 = vld [vmem:[#allocation2 + $0x2494] sm:$0xf0] }
 0x49d   :  { %9681 = vmatpush.bf16.msra.mxu0 %v16320_v34  ;;  %9709 = vmatpush.bf16.msra.mxu2 %v12484_v18  ;;  %v17315_v51 = vld [vmem:[#allocation2 + $0xdbc] sm:$0xf]  ;;  %v9449_v34 = vpop.f32.mrf.mxu3  ;;  %v12292_v18 = vor.u32 %v17123_v1, %v12289_v33 }
 0x49e   :  { %v13057_v63 = vld [vmem:[#allocation2 + $0xe18] sm:$0xf0]  ;;  %v18925_v12 = vadd.f32 %v9449_v34, %v9436_v3 }
 0x49f   :  { %9723 = vmatpush.bf16.msra.mxu3 %v13252_v53  ;;  %9696 = vmatpush.bf16.msra.mxu1 %v11620_v9  ;;  %v16907_v58 = vld [vmem:[#allocation2 + $0xfc] sm:$0xf]  ;;  %v13060_v53 = vor.u32 %v17315_v51, %v13057_v63 }
 0x4a0   :  { %v11425_v13 = vld [vmem:[#allocation2 + $0x158] sm:$0xf0] }
 0x4a1   :  { %9682 = vmatpush.bf16.msra.mxu0 %v16224_v10  ;;  %9710 = vmatpush.bf16.msra.mxu2 %v12388_v59  ;;  %v17099_v24 = vld [vmem:[#allocation2 + $0x6fc] sm:$0xf]  ;;  %v15935_v10 = vld [vmem:[#allocation2 + $0x2438] sm:$0xf]  ;;  %v11428_v9 = vor.u32 %v16907_v58, %v11425_v13 }
 0x4a2   :  { %v12193_v48 = vld [vmem:[#allocation2 + $0x758] sm:$0xf0] }
 0x4a3   :  { %9724 = vmatpush.bf16.msra.mxu3 %v13156_v30  ;;  %v17291_v49 = vld [vmem:[#allocation2 + $0xcfc] sm:$0xf]  ;;  %9697 = vmatpush.bf16.msra.mxu1 %v11524_v27  ;;  %v12196_v59 = vor.u32 %v17099_v24, %v12193_v48 }
 0x4a4   :  { %v12961_v5 = vld [vmem:[#allocation2 + $0xd58] sm:$0xf0] }
 0x4a5   :  { %9683 = vmatpush.bf16.msra.mxu0 %v16128_v38  ;;  %9711 = vmatpush.bf16.msra.mxu2 %v12292_v18  ;;  %v16883_v19 = vld [vmem:[#allocation2 + $0x3c] sm:$0xf]  ;;  %v12964_v1 = vor.u32 %v17291_v49, %v12961_v5  ;;  %v15936_v38 = vor.u32 %v18047_v15, %v15935_v10  ;;  %v18927_v49 = vpop.f32.mrf.mxu0 }
 0x4a6   :  { %v11329_v22 = vld [vmem:[#allocation2 + $0x98] sm:$0xf0]  ;;  %19461 = vst [vmem:[#allocation88_spill] sm:$0xff] %v18927_v49 }
 0x4a7   :  { %v17075_v21 = vld [vmem:[#allocation2 + $0x63c] sm:$0xf]  ;;  %9725 = vmatpush.bf16.msra.mxu3 %v13060_v53  ;;  %9698 = vmatpush.bf16.msra.mxu1 %v11428_v9  ;;  %v11332_v27 = vor.u32 %v16883_v19, %v11329_v22  ;;  %v18929_v22 = vpop.f32.mrf.mxu1 }
 0x4a8   :  { %v12097_v30 = vld [vmem:[#allocation2 + $0x698] sm:$0xf0]  ;;  %19462 = vst [vmem:[#allocation89_spill] sm:$0xff] %v18929_v22  ;;  %v17424_v22 = vld [vmem:[#allocation2 + $0x111c] sm:$0xf0] }
 0x4a9   :  { %v17267_v33 = vld [vmem:[#allocation2 + $0xc3c] sm:$0xf]  ;;  %9684 = vmatpush.bf16.msra.mxu0 %v16032_v8  ;;  %9712 = vmatpush.bf16.msra.mxu2 %v12196_v59  ;;  %v12100_v18 = vor.u32 %v17075_v21, %v12097_v30 }
 0x4aa   :  { %v12865_v60 = vld [vmem:[#allocation2 + $0xc98] sm:$0xf0] }
 0x4ab   :  { %v17627_v51 = vld [vmem:[#allocation2 + $0x177c] sm:$0xf]  ;;  %9726 = vmatpush.bf16.msra.mxu3 %v12964_v1  ;;  %v12868_v53 = vor.u32 %v17267_v33, %v12865_v60  ;;  %9699 = vmatpush.bf16.msra.mxu1 %v11332_v27 }
 0x4ac   :  { %v14305_v63 = vld [vmem:[#allocation2 + $0x17d8] sm:$0xf0] }
 0x4ad   :  { %v17819_v3 = vld [vmem:[#allocation2 + $0x1d7c] sm:$0xf]  ;;  %v14308_v5 = vor.u32 %v17627_v51, %v14305_v63  ;;  %9685 = vmatpush.bf16.msra.mxu0 %v15936_v38  ;;  %9713 = vmatpush.bf16.msra.mxu2 %v12100_v18 }
 0x4ae   :  { %v15073_v34 = vld [vmem:[#allocation2 + $0x1dd8] sm:$0xf0]  ;;  %9700 = vmatmul.bf16.vlgmr.msra.gmra.mxu1 %v18525_v57 }
 0x4af   :  { %v18011_v50 = vld [vmem:[#allocation2 + $0x237c] sm:$0xf]  ;;  %v15076_v24 = vor.u32 %v17819_v3, %v15073_v34  ;;  %9727 = vmatpush.bf16.msra.mxu3 %v12868_v53 }
 0x4b0   :  { %v15841_v20 = vld [vmem:[#allocation2 + $0x23d8] sm:$0xf0]  ;;  %9686 = vmatmul.bf16.vlgmr.msra.gmra.mxu0 %v18572_v41  ;;  %9714 = vmatmul.bf16.vlgmr.msra.gmra.mxu2 %v18540_v11 }
 0x4b1   :  { %v18203_v58 = vld [vmem:[#allocation2 + $0x297c] sm:$0xf]  ;;  %v15844_v48 = vor.u32 %v18011_v50, %v15841_v20  ;;  %9734 = vmatpush.bf16.msrb.mxu0 %v14308_v5  ;;  %9748 = vmatpush.bf16.msrb.mxu1 %v15076_v24 }
 0x4b2   :  { %v16609_v13 = vld [vmem:[#allocation2 + $0x29d8] sm:$0xf0]  ;;  %9728 = vmatmul.bf16.vlgmr.msra.gmra.mxu3 %v18530_v0 }
 0x4b3   :  { %v17603_v17 = vld [vmem:[#allocation2 + $0x16bc] sm:$0xf]  ;;  %v16612_v10 = vor.u32 %v18203_v58, %v16609_v13  ;;  %9762 = vmatpush.bf16.msrb.mxu2 %v15844_v48 }
 0x4b4   :  { %v14209_v62 = vld [vmem:[#allocation2 + $0x1718] sm:$0xf0] }
 0x4b5   :  { %v17795_v8 = vld [vmem:[#allocation2 + $0x1cbc] sm:$0xf]  ;;  %v14212_v21 = vor.u32 %v17603_v17, %v14209_v62  ;;  %9776 = vmatpush.bf16.msrb.mxu3 %v16612_v10  ;;  %v18934_v17 = vpop.f32.mrf.mxu2 }
 0x4b6   :  { %v14977_v15 = vld [vmem:[#allocation2 + $0x1d18] sm:$0xf0]  ;;  %19463 = vst [vmem:[#allocation90_spill] sm:$0xff] %v18934_v17  ;;  %v12679_v17 = vld [vmem:[#allocation2 + $0xac0] sm:$0xf] }
 0x4b7   :  { %v15745_v9 = vld [vmem:[#allocation2 + $0x2318] sm:$0xf0]  ;;  %v14980_v1 = vor.u32 %v17795_v8, %v14977_v15  ;;  %9735 = vmatpush.bf16.msrb.mxu0 %v14212_v21  ;;  %v9463_v8 = vpop.f32.mrf.mxu0 }
 0x4b8   :  { %v18179_v59 = vld [vmem:[#allocation2 + $0x28bc] sm:$0xf]  ;;  %v15748_v30 = vor.u32 %v17987_v54, %v15745_v9  ;;  %v9464_v9 = vadd.f32 %v9463_v8, %v18925_v12 }
 0x4b9   :  { %v16513_v19 = vld [vmem:[#allocation2 + $0x2918] sm:$0xf0]  ;;  %9749 = vmatpush.bf16.msrb.mxu1 %v14980_v1  ;;  %v9477_v1 = vpop.f32.mrf.mxu1 }
 0x4ba   :  { %v17579_v33 = vld [vmem:[#allocation2 + $0x15fc] sm:$0xf]  ;;  %v16516_v63 = vor.u32 %v18179_v59, %v16513_v19  ;;  %9763 = vmatpush.bf16.msrb.mxu2 %v15748_v30 }
 0x4bb   :  { %v14113_v60 = vld [vmem:[#allocation2 + $0x1658] sm:$0xf0] }
 0x4bc   :  { %v17771_v51 = vld [vmem:[#allocation2 + $0x1bfc] sm:$0xf]  ;;  %v14116_v62 = vor.u32 %v17579_v33, %v14113_v60  ;;  %9777 = vmatpush.bf16.msrb.mxu3 %v16516_v63  ;;  %v9478_v63 = vadd.f32 %v9477_v1, %v9464_v9 }
 0x4bd   :  { %v14881_v3 = vld [vmem:[#allocation2 + $0x1c58] sm:$0xf0] }
 0x4be   :  { %v17963_v38 = vld [vmem:[#allocation2 + $0x21fc] sm:$0xf]  ;;  %v14884_v54 = vor.u32 %v17771_v51, %v14881_v3  ;;  %9736 = vmatpush.bf16.msrb.mxu0 %v14116_v62 }
 0x4bf   :  { %v15649_v34 = vld [vmem:[#allocation2 + $0x2258] sm:$0xf0] }
 0x4c0   :  { %v18155_v50 = vld [vmem:[#allocation2 + $0x27fc] sm:$0xf]  ;;  %v15652_v27 = vor.u32 %v17963_v38, %v15649_v34  ;;  %9750 = vmatpush.bf16.msrb.mxu1 %v14884_v54 }
 0x4c1   :  { %v16417_v20 = vld [vmem:[#allocation2 + $0x2858] sm:$0xf0] }
 0x4c2   :  { %v17555_v18 = vld [vmem:[#allocation2 + $0x153c] sm:$0xf]  ;;  %v16420_v53 = vor.u32 %v18155_v50, %v16417_v20  ;;  %9764 = vmatpush.bf16.msrb.mxu2 %v15652_v27 }
 0x4c3   :  { %v14017_v58 = vld [vmem:[#allocation2 + $0x1598] sm:$0xf0] }
 0x4c4   :  { %v17747_v13 = vld [vmem:[#allocation2 + $0x1b3c] sm:$0xf]  ;;  %v14020_v59 = vor.u32 %v17555_v18, %v14017_v58  ;;  %9778 = vmatpush.bf16.msrb.mxu3 %v16420_v53 }
 0x4c5   :  { %v14785_v5 = vld [vmem:[#allocation2 + $0x1b98] sm:$0xf0] }
 0x4c6   :  { %v17939_v24 = vld [vmem:[#allocation2 + $0x213c] sm:$0xf]  ;;  %v14788_v19 = vor.u32 %v17747_v13, %v14785_v5  ;;  %9737 = vmatpush.bf16.msrb.mxu0 %v14020_v59  ;;  %v9491_v5 = vpop.f32.mrf.mxu2  ;;  %v19464_v59 = vmax.f32 %v18605_v32, %v18775_v2 }
 0x4c7   :  { %v15553_v48 = vld [vmem:[#allocation2 + $0x2198] sm:$0xf0]  ;;  %v9492_v8 = vadd.f32 %v9491_v5, %v9478_v63 }
 0x4c8   :  { %v18131_v10 = vld [vmem:[#allocation2 + $0x273c] sm:$0xf]  ;;  %v15556_v21 = vor.u32 %v17939_v24, %v15553_v48  ;;  %9751 = vmatpush.bf16.msrb.mxu1 %v14788_v19 }
 0x4c9   :  { %v16321_v15 = vld [vmem:[#allocation2 + $0x2798] sm:$0xf0]  ;;  %v18941_v19 = vmax.f32 %v19464_v59, %v9492_v8  ;;  %v17064_v8 = vld [vmem:[#allocation2 + $0x5dc] sm:$0xf0] }
 0x4ca   :  { %v17531_v30 = vld [vmem:[#allocation2 + $0x147c] sm:$0xf]  ;;  %v16324_v51 = vor.u32 %v18131_v10, %v16321_v15  ;;  %9765 = vmatpush.bf16.msrb.mxu2 %v15556_v21  ;;  %v13543_v59 = vld [vmem:[#allocation2 + $0x1180] sm:$0xf] }
 0x4cb   :  { %v13921_v33 = vld [vmem:[#allocation2 + $0x14d8] sm:$0xf0]  ;;  %19465 = vst [vmem:[#allocation91_spill] sm:$0xff] %v18941_v19 }
 0x4cc   :  { %v17723_v60 = vld [vmem:[#allocation2 + $0x1a7c] sm:$0xf]  ;;  %v13924_v62 = vor.u32 %v17531_v30, %v13921_v33  ;;  %9779 = vmatpush.bf16.msrb.mxu3 %v16324_v51  ;;  %v18943_v51 = vpop.f32.mrf.mxu3 }
 0x4cd   :  { %v14689_v3 = vld [vmem:[#allocation2 + $0x1ad8] sm:$0xf0]  ;;  %19466 = vst [vmem:[#allocation92_spill] sm:$0xff] %v18943_v51  ;;  %v17040_v51 = vld [vmem:[#allocation2 + $0x51c] sm:$0xf0] }
 0x4ce   :  { %v17915_v38 = vld [vmem:[#allocation2 + $0x207c] sm:$0xf]  ;;  %v14692_v12 = vor.u32 %v17723_v60, %v14689_v3  ;;  %9738 = vmatpush.bf16.msrb.mxu0 %v13924_v62 }
 0x4cf   :  { %v15457_v34 = vld [vmem:[#allocation2 + $0x20d8] sm:$0xf0] }
 0x4d0   :  { %v18107_v50 = vld [vmem:[#allocation2 + $0x267c] sm:$0xf]  ;;  %v15460_v54 = vor.u32 %v17915_v38, %v15457_v34  ;;  %9752 = vmatpush.bf16.msrb.mxu1 %v14692_v12 }
 0x4d1   :  { %v16225_v20 = vld [vmem:[#allocation2 + $0x26d8] sm:$0xf0] }
 0x4d2   :  { %v17507_v27 = vld [vmem:[#allocation2 + $0x13bc] sm:$0xf]  ;;  %v16228_v13 = vor.u32 %v18107_v50, %v16225_v20  ;;  %9766 = vmatpush.bf16.msrb.mxu2 %v15460_v54 }
 0x4d3   :  { %v13825_v18 = vld [vmem:[#allocation2 + $0x1418] sm:$0xf0] }
 0x4d4   :  { %v17699_v58 = vld [vmem:[#allocation2 + $0x19bc] sm:$0xf]  ;;  %v13828_v9 = vor.u32 %v17507_v27, %v13825_v18  ;;  %9780 = vmatpush.bf16.msrb.mxu3 %v16228_v13 }
 0x4d5   :  { %v14593_v53 = vld [vmem:[#allocation2 + $0x1a18] sm:$0xf0] }
 0x4d6   :  { %v17891_v24 = vld [vmem:[#allocation2 + $0x1fbc] sm:$0xf]  ;;  %v14596_v21 = vor.u32 %v17699_v58, %v14593_v53  ;;  %9739 = vmatpush.bf16.msrb.mxu0 %v13828_v9  ;;  %v17256_v9 = vld [vmem:[#allocation2 + $0xbdc] sm:$0xf0] }
 0x4d7   :  { %v15361_v48 = vld [vmem:[#allocation2 + $0x2018] sm:$0xf0] }
 0x4d8   :  { %v18083_v10 = vld [vmem:[#allocation2 + $0x25bc] sm:$0xf]  ;;  %v15364_v1 = vor.u32 %v17891_v24, %v15361_v48  ;;  %9753 = vmatpush.bf16.msrb.mxu1 %v14596_v21  ;;  %v12007_v48 = vld [vmem:[#allocation2 + $0x580] sm:$0xf] }
 0x4d9   :  { %v16129_v15 = vld [vmem:[#allocation2 + $0x2618] sm:$0xf0] }
 0x4da   :  { %v17483_v30 = vld [vmem:[#allocation2 + $0x12fc] sm:$0xf]  ;;  %v16132_v63 = vor.u32 %v18083_v10, %v16129_v15  ;;  %9767 = vmatpush.bf16.msrb.mxu2 %v15364_v1  ;;  %v12775_v10 = vld [vmem:[#allocation2 + $0xb80] sm:$0xf] }
 0x4db   :  { %v13729_v33 = vld [vmem:[#allocation2 + $0x1358] sm:$0xf0] }
 0x4dc   :  { %v17675_v60 = vld [vmem:[#allocation2 + $0x18fc] sm:$0xf]  ;;  %v13732_v62 = vor.u32 %v17483_v30, %v13729_v33  ;;  %9781 = vmatpush.bf16.msrb.mxu3 %v16132_v63  ;;  %v17448_v30 = vld [vmem:[#allocation2 + $0x11dc] sm:$0xf0] }
 0x4dd   :  { %v14497_v3 = vld [vmem:[#allocation2 + $0x1958] sm:$0xf0]  ;;  %v14311_v33 = vld [vmem:[#allocation2 + $0x1780] sm:$0xf] }
 0x4de   :  { %v17867_v38 = vld [vmem:[#allocation2 + $0x1efc] sm:$0xf]  ;;  %v14500_v2 = vor.u32 %v17675_v60, %v14497_v3  ;;  %9740 = vmatpush.bf16.msrb.mxu0 %v13732_v62  ;;  %v17640_v60 = vld [vmem:[#allocation2 + $0x17dc] sm:$0xf0]  ;;  %v12008_v3 = vor.u32 %v17064_v8, %v12007_v48 }
 0x4df   :  { %v15265_v34 = vld [vmem:[#allocation2 + $0x1f58] sm:$0xf0]  ;;  %v14312_v62 = vor.u32 %v17640_v60, %v14311_v33  ;;  %v12583_v48 = vld [vmem:[#allocation2 + $0xa00] sm:$0xf]  ;;  %v18953_v60 = vpop.f32.mrf.mxu2 }
 0x4e0   :  { %v18059_v50 = vld [vmem:[#allocation2 + $0x24fc] sm:$0xf]  ;;  %v15268_v54 = vor.u32 %v17867_v38, %v15265_v34  ;;  %9754 = vmatpush.bf16.msrb.mxu1 %v14500_v2  ;;  %v9505_v38 = vpop.f32.mrf.mxu3  ;;  %v12776_v34 = vor.u32 %v17256_v9, %v12775_v10  ;;  %v18945_v2 = vpop.f32.mrf.mxu0  ;;  %v17208_v10 = vld [vmem:[#allocation2 + $0xa5c] sm:$0xf0]  ;;  %19469 = vst [vmem:[#allocation95_spill] sm:$0xff] %v18953_v60 }
 0x4e1   :  { %v16033_v20 = vld [vmem:[#allocation2 + $0x2558] sm:$0xf0]  ;;  %19467 = vst [vmem:[#allocation93_spill] sm:$0xff] %v18945_v2  ;;  %v17400_v9 = vld [vmem:[#allocation2 + $0x105c] sm:$0xf0] }
 0x4e2   :  { %v17459_v12 = vld [vmem:[#allocation2 + $0x123c] sm:$0xf]  ;;  %v16036_v5 = vor.u32 %v18059_v50, %v16033_v20  ;;  %9768 = vmatpush.bf16.msrb.mxu2 %v15268_v54  ;;  %v13544_v50 = vor.u32 %v17448_v30, %v13543_v59  ;;  %v11911_v20 = vld [vmem:[#allocation2 + $0x4c0] sm:$0xf] }
 0x4e3   :  { %v13633_v32 = vld [vmem:[#allocation2 + $0x1298] sm:$0xf0]  ;;  %v14215_v54 = vld [vmem:[#allocation2 + $0x16c0] sm:$0xf] }
 0x4e4   :  { %v17651_v27 = vld [vmem:[#allocation2 + $0x183c] sm:$0xf]  ;;  %v13636_v15 = vor.u32 %v17459_v12, %v13633_v32  ;;  %9782 = vmatpush.bf16.msrb.mxu3 %v16036_v5  ;;  %v17232_v12 = vld [vmem:[#allocation2 + $0xb1c] sm:$0xf0] }
 0x4e5   :  { %v14401_v18 = vld [vmem:[#allocation2 + $0x1898] sm:$0xf0]  ;;  %v13447_v32 = vld [vmem:[#allocation2 + $0x10c0] sm:$0xf]  ;;  %v12680_v5 = vor.u32 %v17232_v12, %v12679_v17  ;;  %v12584_v17 = vor.u32 %v17208_v10, %v12583_v48 }
 0x4e6   :  { %v17843_v58 = vld [vmem:[#allocation2 + $0x1e3c] sm:$0xf]  ;;  %v14404_v21 = vor.u32 %v17651_v27, %v14401_v18  ;;  %9741 = vmatpush.bf16.msrb.mxu0 %v13636_v15  ;;  %v17616_v27 = vld [vmem:[#allocation2 + $0x171c] sm:$0xf0]  ;;  %v11912_v18 = vor.u32 %v17040_v51, %v11911_v20 }
 0x4e7   :  { %v15169_v13 = vld [vmem:[#allocation2 + $0x1e98] sm:$0xf0]  ;;  %v14216_v8 = vor.u32 %v17616_v27, %v14215_v54  ;;  %v13351_v15 = vld [vmem:[#allocation2 + $0x1000] sm:$0xf] }
 0x4e8   :  { %v18035_v53 = vld [vmem:[#allocation2 + $0x243c] sm:$0xf]  ;;  %v15172_v1 = vor.u32 %v17843_v58, %v15169_v13  ;;  %9755 = vmatpush.bf16.msrb.mxu1 %v14404_v21  ;;  %v18947_v58 = vpop.f32.mrf.mxu1  ;;  %v13448_v13 = vor.u32 %v17424_v22, %v13447_v32  ;;  %v14119_v51 = vld [vmem:[#allocation2 + $0x1600] sm:$0xf]  ;;  %v13352_v30 = vor.u32 %v17400_v9, %v13351_v15 }
 0x4e9   :  { %v15937_v24 = vld [vmem:[#allocation2 + $0x2498] sm:$0xf0]  ;;  %19468 = vst [vmem:[#allocation94_spill] sm:$0xff] %v18947_v58  ;;  %9742 = vmatmul.bf16.vlgmr.msrb.gmra.mxu0 %v18549_v23  ;;  %v17592_v59 = vld [vmem:[#allocation2 + $0x165c] sm:$0xf0] }
 0x4ea   :  { %v15940_v63 = vor.u32 %v18035_v53, %v15937_v24  ;;  %9769 = vmatpush.bf16.msrb.mxu2 %v15172_v1  ;;  %9790 = vmatpush.bf16.msra.mxu0 %v12008_v3  ;;  %v11815_v53 = vld [vmem:[#allocation2 + $0x400] sm:$0xf]  ;;  %v18955_v3 = vpop.f32.mrf.mxu3 }
 0x4eb   :  { %v17016_v24 = vld [vmem:[#allocation2 + $0x45c] sm:$0xf0]  ;;  %9756 = vmatmul.bf16.vlgmr.msrb.gmra.mxu1 %v18570_v37  ;;  %19470 = vst [vmem:[#allocation96_spill] sm:$0xff] %v18955_v3 }
 0x4ec   :  { %9783 = vmatpush.bf16.msrb.mxu3 %v15940_v63  ;;  %9804 = vmatpush.bf16.msra.mxu1 %v12776_v34  ;;  %v11816_v22 = vor.u32 %v17016_v24, %v11815_v53  ;;  %v11719_v21 = vld [vmem:[#allocation2 + $0x340] sm:$0xf]  ;;  %v14120_v63 = vor.u32 %v17592_v59, %v14119_v51 }
 0x4ed   :  { %9770 = vmatmul.bf16.vlgmr.msrb.gmra.mxu2 %v18574_v42  ;;  %v16992_v1 = vld [vmem:[#allocation2 + $0x39c] sm:$0xf0] }
 0x4ee   :  { %9818 = vmatpush.bf16.msra.mxu2 %v13544_v50  ;;  %9791 = vmatpush.bf16.msra.mxu0 %v11912_v18  ;;  %v12487_v33 = vld [vmem:[#allocation2 + $0x940] sm:$0xf]  ;;  %v11720_v27 = vor.u32 %v16992_v1, %v11719_v21 }
 0x4ef   :  { %9784 = vmatmul.bf16.vlgmr.msrb.gmra.mxu3 %v18572_v41  ;;  %v17184_v34 = vld [vmem:[#allocation2 + $0x99c] sm:$0xf0] }
 0x4f0   :  { %9832 = vmatpush.bf16.msra.mxu3 %v14312_v62  ;;  %9805 = vmatpush.bf16.msra.mxu1 %v12680_v5  ;;  %v13255_v50 = vld [vmem:[#allocation2 + $0xf40] sm:$0xf]  ;;  %v9519_v62 = vpop.f32.mrf.mxu0  ;;  %v12488_v18 = vor.u32 %v17184_v34, %v12487_v33  ;;  %v9547_v34 = vpop.f32.mrf.mxu2 }
 0x4f1   :  { %v17376_v20 = vld [vmem:[#allocation2 + $0xf9c] sm:$0xf0]  ;;  %v9520_v54 = vadd.f32 %v9519_v62, %v9505_v38 }
 0x4f2   :  { %9819 = vmatpush.bf16.msra.mxu2 %v13448_v13  ;;  %v14023_v12 = vld [vmem:[#allocation2 + $0x1540] sm:$0xf]  ;;  %9792 = vmatpush.bf16.msra.mxu0 %v11816_v22  ;;  %v13256_v5 = vor.u32 %v17376_v20, %v13255_v50  ;;  %v9533_v13 = vpop.f32.mrf.mxu1 }
 0x4f3   :  { %v17568_v32 = vld [vmem:[#allocation2 + $0x159c] sm:$0xf0]  ;;  %v9534_v10 = vadd.f32 %v9533_v13, %v9520_v54  ;;  %v9561_v54 = vpop.f32.mrf.mxu3 }
 0x4f4   :  { %9833 = vmatpush.bf16.msra.mxu3 %v14216_v8  ;;  %9806 = vmatpush.bf16.msra.mxu1 %v12584_v17  ;;  %v11623_v53 = vld [vmem:[#allocation2 + $0x280] sm:$0xf]  ;;  %v14024_v8 = vor.u32 %v17568_v32, %v14023_v12 }
 0x4f5   :  { %v16968_v24 = vld [vmem:[#allocation2 + $0x2dc] sm:$0xf0]  ;;  %v9548_v62 = vadd.f32 %v9547_v34, %v9534_v10 }
 0x4f6   :  { %9820 = vmatpush.bf16.msra.mxu2 %v13352_v30  ;;  %v12391_v48 = vld [vmem:[#allocation2 + $0x880] sm:$0xf]  ;;  %9793 = vmatpush.bf16.msra.mxu0 %v11720_v27  ;;  %v11624_v22 = vor.u32 %v16968_v24, %v11623_v53 }
 0x4f7   :  { %v17160_v15 = vld [vmem:[#allocation2 + $0x8dc] sm:$0xf0] }
 0x4f8   :  { %9834 = vmatpush.bf16.msra.mxu3 %v14120_v63  ;;  %v13159_v9 = vld [vmem:[#allocation2 + $0xe80] sm:$0xf]  ;;  %9807 = vmatpush.bf16.msra.mxu1 %v12488_v18  ;;  %v12392_v38 = vor.u32 %v17160_v15, %v12391_v48  ;;  %v18957_v18 = vadd.f32 %v9561_v54, %v9548_v62  ;;  %v18959_v49 = vpop.f32.mrf.mxu0 }
 0x4f9   :  { %v17352_v51 = vld [vmem:[#allocation2 + $0xedc] sm:$0xf0] }
 0x4fa   :  { %v13927_v59 = vld [vmem:[#allocation2 + $0x1480] sm:$0xf]  ;;  %9821 = vmatpush.bf16.msra.mxu2 %v13256_v5  ;;  %v13160_v17 = vor.u32 %v17352_v51, %v13159_v9  ;;  %9794 = vmatpush.bf16.msra.mxu0 %v11624_v22 }
 0x4fb   :  { %v17544_v60 = vld [vmem:[#allocation2 + $0x14dc] sm:$0xf0] }
 0x4fc   :  { %v11527_v30 = vld [vmem:[#allocation2 + $0x1c0] sm:$0xf]  ;;  %9835 = vmatpush.bf16.msra.mxu3 %v14024_v8  ;;  %v13928_v33 = vor.u32 %v17544_v60, %v13927_v59  ;;  %9808 = vmatpush.bf16.msra.mxu1 %v12392_v38 }
 0x4fd   :  { %v16944_v21 = vld [vmem:[#allocation2 + $0x21c] sm:$0xf0] }
 0x4fe   :  { %v12295_v1 = vld [vmem:[#allocation2 + $0x7c0] sm:$0xf]  ;;  %v11528_v27 = vor.u32 %v16944_v21, %v11527_v30  ;;  %9822 = vmatpush.bf16.msra.mxu2 %v13160_v17 }
 0x4ff   :  { %v17136_v63 = vld [vmem:[#allocation2 + $0x81c] sm:$0xf0] }
 0x500   :  { %v13063_v50 = vld [vmem:[#allocation2 + $0xdc0] sm:$0xf]  ;;  %v12296_v5 = vor.u32 %v17136_v63, %v12295_v1  ;;  %9836 = vmatpush.bf16.msra.mxu3 %v13928_v33  ;;  %9795 = vmatpush.bf16.msra.mxu0 %v11528_v27 }
 0x501   :  { %v17328_v20 = vld [vmem:[#allocation2 + $0xe1c] sm:$0xf0] }
 0x502   :  { %v13831_v12 = vld [vmem:[#allocation2 + $0x13c0] sm:$0xf]  ;;  %v13064_v13 = vor.u32 %v17328_v20, %v13063_v50  ;;  %9809 = vmatpush.bf16.msra.mxu1 %v12296_v5 }
 0x503   :  { %v17520_v32 = vld [vmem:[#allocation2 + $0x141c] sm:$0xf0] }
 0x504   :  { %v11431_v53 = vld [vmem:[#allocation2 + $0x100] sm:$0xf]  ;;  %v13832_v60 = vor.u32 %v17520_v32, %v13831_v12  ;;  %9823 = vmatpush.bf16.msra.mxu2 %v13064_v13 }
 0x505   :  { %v16920_v24 = vld [vmem:[#allocation2 + $0x15c] sm:$0xf0] }
 0x506   :  { %v12199_v48 = vld [vmem:[#allocation2 + $0x700] sm:$0xf]  ;;  %v11432_v59 = vor.u32 %v16920_v24, %v11431_v53  ;;  %9837 = vmatpush.bf16.msra.mxu3 %v13832_v60 }
 0x507   :  { %v17112_v8 = vld [vmem:[#allocation2 + $0x75c] sm:$0xf0] }
 0x508   :  { %v12967_v15 = vld [vmem:[#allocation2 + $0xd00] sm:$0xf]  ;;  %v12200_v38 = vor.u32 %v17112_v8, %v12199_v48  ;;  %9796 = vmatpush.bf16.msra.mxu0 %v11432_v59  ;;  %v17052_v48 = vld [vmem:[#allocation2 + $0x584] sm:$0xf] }
 0x509   :  { %v17304_v9 = vld [vmem:[#allocation2 + $0xd5c] sm:$0xf0]  ;;  %v12009_v8 = vld [vmem:[#allocation2 + $0x5e0] sm:$0xf0] }
 0x50a   :  { %v13735_v10 = vld [vmem:[#allocation2 + $0x1300] sm:$0xf]  ;;  %v12968_v17 = vor.u32 %v17304_v9, %v12967_v15  ;;  %9810 = vmatpush.bf16.msra.mxu1 %v12200_v38  ;;  %v12012_v59 = vor.u32 %v17052_v48, %v12009_v8  ;;  %v17028_v38 = vld [vmem:[#allocation2 + $0x4c4] sm:$0xf]  ;;  %v18967_v48 = vpop.f32.mrf.mxu2 }
 0x50b   :  { %v17496_v51 = vld [vmem:[#allocation2 + $0x135c] sm:$0xf0]  ;;  %19472 = vst [vmem:[#allocation98_spill] sm:$0xff] %v18967_v48 }
 0x50c   :  { %v11335_v22 = vld [vmem:[#allocation2 + $0x40] sm:$0xf]  ;;  %v13736_v63 = vor.u32 %v17496_v51, %v13735_v10  ;;  %9824 = vmatpush.bf16.msra.mxu2 %v12968_v17  ;;  %v11913_v17 = vld [vmem:[#allocation2 + $0x520] sm:$0xf0] }
 0x50d   :  { %v16896_v30 = vld [vmem:[#allocation2 + $0x9c] sm:$0xf0] }
 0x50e   :  { %v12103_v21 = vld [vmem:[#allocation2 + $0x640] sm:$0xf]  ;;  %v11336_v54 = vor.u32 %v16896_v30, %v11335_v22  ;;  %9838 = vmatpush.bf16.msra.mxu3 %v13736_v63 }
 0x50f   :  { %v17088_v1 = vld [vmem:[#allocation2 + $0x69c] sm:$0xf0] }
 0x510   :  { %v12871_v34 = vld [vmem:[#allocation2 + $0xc40] sm:$0xf]  ;;  %v12104_v5 = vor.u32 %v17088_v1, %v12103_v21  ;;  %9797 = vmatpush.bf16.msra.mxu0 %v11336_v54  ;;  %v18961_v21 = vpop.f32.mrf.mxu1 }
 0x511   :  { %v17280_v33 = vld [vmem:[#allocation2 + $0xc9c] sm:$0xf0]  ;;  %19471 = vst [vmem:[#allocation97_spill] sm:$0xff] %v18961_v21  ;;  %v17041_v21 = vld [vmem:[#allocation2 + $0x524] sm:$0xf0] }
 0x512   :  { %v13639_v50 = vld [vmem:[#allocation2 + $0x1240] sm:$0xf]  ;;  %v12872_v13 = vor.u32 %v17280_v33, %v12871_v34  ;;  %9811 = vmatpush.bf16.msra.mxu1 %v12104_v5 }
 0x513   :  { %v17472_v20 = vld [vmem:[#allocation2 + $0x129c] sm:$0xf0]  ;;  %9798 = vmatmul.bf16.vlgmr.msra.gmra.mxu0 %v18525_v57 }
 0x514   :  { %v15079_v62 = vld [vmem:[#allocation2 + $0x1d80] sm:$0xf]  ;;  %v13640_v60 = vor.u32 %v17472_v20, %v13639_v50  ;;  %9825 = vmatpush.bf16.msra.mxu2 %v12872_v13 }
 0x515   :  { %v17832_v12 = vld [vmem:[#allocation2 + $0x1ddc] sm:$0xf0]  ;;  %9812 = vmatmul.bf16.vlgmr.msra.gmra.mxu1 %v18540_v11 }
 0x516   :  { %v15847_v32 = vld [vmem:[#allocation2 + $0x2380] sm:$0xf]  ;;  %v15080_v15 = vor.u32 %v17832_v12, %v15079_v62  ;;  %9839 = vmatpush.bf16.msra.mxu3 %v13640_v60  ;;  %v11916_v62 = vor.u32 %v17028_v38, %v11913_v17 }
 0x517   :  { %v18024_v27 = vld [vmem:[#allocation2 + $0x23dc] sm:$0xf0]  ;;  %9826 = vmatmul.bf16.vlgmr.msra.gmra.mxu2 %v18530_v0 }
 0x518   :  { %v16615_v53 = vld [vmem:[#allocation2 + $0x2980] sm:$0xf]  ;;  %v15848_v9 = vor.u32 %v18024_v27, %v15847_v32  ;;  %9846 = vmatpush.bf16.msrb.mxu0 %v15080_v15  ;;  %v17004_v27 = vld [vmem:[#allocation2 + $0x404] sm:$0xf]  ;;  %v9589_v17 = vpop.f32.mrf.mxu1 }
 0x519   :  { %v18216_v24 = vld [vmem:[#allocation2 + $0x29dc] sm:$0xf0]  ;;  %9840 = vmatmul.bf16.vlgmr.msra.gmra.mxu3 %v18549_v23 }
 0x51a   :  { %v16616_v10 = vor.u32 %v18216_v24, %v16615_v53  ;;  %v14983_v51 = vld [vmem:[#allocation2 + $0x1cc0] sm:$0xf]  ;;  %9860 = vmatpush.bf16.msrb.mxu1 %v15848_v9  ;;  %9888 = vmatpush.bf16.msrb.mxu3 %v12012_v59  ;;  %v11817_v53 = vld [vmem:[#allocation2 + $0x460] sm:$0xf0] }
 0x51b   :  { %v17808_v58 = vld [vmem:[#allocation2 + $0x1d1c] sm:$0xf0]  ;;  %v11820_v8 = vor.u32 %v17004_v27, %v11817_v53  ;;  %v16980_v59 = vld [vmem:[#allocation2 + $0x344] sm:$0xf] }
 0x51c   :  { %v15751_v2 = vld [vmem:[#allocation2 + $0x22c0] sm:$0xf]  ;;  %v14984_v1 = vor.u32 %v17808_v58, %v14983_v51  ;;  %9874 = vmatpush.bf16.msrb.mxu2 %v16616_v10  ;;  %v18969_v10 = vpop.f32.mrf.mxu3  ;;  %v9575_v51 = vpop.f32.mrf.mxu0  ;;  %v16956_v27 = vld [vmem:[#allocation2 + $0x284] sm:$0xf] }
 0x51d   :  { %v18000_v22 = vld [vmem:[#allocation2 + $0x231c] sm:$0xf0]  ;;  %19473 = vst [vmem:[#allocation99_spill] sm:$0xff] %v18969_v10  ;;  %v11625_v53 = vld [vmem:[#allocation2 + $0x2e0] sm:$0xf0] }
 0x51e   :  { %v16519_v30 = vld [vmem:[#allocation2 + $0x28c0] sm:$0xf]  ;;  %v15752_v34 = vor.u32 %v18000_v22, %v15751_v2  ;;  %9847 = vmatpush.bf16.msrb.mxu0 %v14984_v1  ;;  %9889 = vmatpush.bf16.msrb.mxu3 %v11916_v62  ;;  %v11721_v22 = vld [vmem:[#allocation2 + $0x3a0] sm:$0xf0] }
 0x51f   :  { %v18192_v3 = vld [vmem:[#allocation2 + $0x291c] sm:$0xf0]  ;;  %v14217_v10 = vld [vmem:[#allocation2 + $0x1720] sm:$0xf0] }
 0x520   :  { %v16520_v63 = vor.u32 %v18192_v3, %v16519_v30  ;;  %v14887_v33 = vld [vmem:[#allocation2 + $0x1c00] sm:$0xf]  ;;  %9861 = vmatpush.bf16.msrb.mxu1 %v15752_v34  ;;  %v9576_v30 = vadd.f32 %v9575_v51, %v18957_v18  ;;  %v19474_v18 = vmax.f32 %v18636_v31, %v18794_v6 }
 0x521   :  { %v17784_v50 = vld [vmem:[#allocation2 + $0x1c5c] sm:$0xf0] }
 0x522   :  { %v15655_v20 = vld [vmem:[#allocation2 + $0x2200] sm:$0xf]  ;;  %v14888_v58 = vor.u32 %v17784_v50, %v14887_v33  ;;  %9875 = vmatpush.bf16.msrb.mxu2 %v16520_v63  ;;  %9890 = vmatpush.bf16.msrb.mxu3 %v11820_v8  ;;  %v9590_v62 = vadd.f32 %v9589_v17, %v9576_v30  ;;  %v9603_v30 = vpop.f32.mrf.mxu2 }
 0x523   :  { %v17976_v12 = vld [vmem:[#allocation2 + $0x225c] sm:$0xf0] }
 0x524   :  { %v16423_v32 = vld [vmem:[#allocation2 + $0x2800] sm:$0xf]  ;;  %v15656_v2 = vor.u32 %v17976_v12, %v15655_v20  ;;  %9848 = vmatpush.bf16.msrb.mxu0 %v14888_v58  ;;  %v11724_v20 = vor.u32 %v16980_v59, %v11721_v22  ;;  %v18975_v58 = vmax.f32 %v19474_v18, %v9590_v62  ;;  %v16932_v59 = vld [vmem:[#allocation2 + $0x1c4] sm:$0xf]  ;;  %v18979_v48 = vpop.f32.mrf.mxu0 }
 0x525   :  { %v18168_v54 = vld [vmem:[#allocation2 + $0x285c] sm:$0xf0]  ;;  %v11529_v22 = vld [vmem:[#allocation2 + $0x220] sm:$0xf0]  ;;  %19476 = vst [vmem:[#allocation101_spill] sm:$0xff] %v18979_v48 }
 0x526   :  { %v16424_v3 = vor.u32 %v18168_v54, %v16423_v32  ;;  %v14791_v24 = vld [vmem:[#allocation2 + $0x1b40] sm:$0xf]  ;;  %9862 = vmatpush.bf16.msrb.mxu1 %v15656_v2  ;;  %19475 = vst [vmem:[#allocation100_spill] sm:$0xff] %v18975_v58  ;;  %9891 = vmatpush.bf16.msrb.mxu3 %v11724_v20  ;;  %v17412_v58 = vld [vmem:[#allocation2 + $0x10c4] sm:$0xf] }
 0x527   :  { %v17760_v5 = vld [vmem:[#allocation2 + $0x1b9c] sm:$0xf0]  ;;  %v18180_v48 = vld [vmem:[#allocation2 + $0x28c4] sm:$0xf] }
 0x528   :  { %v15559_v13 = vld [vmem:[#allocation2 + $0x2140] sm:$0xf]  ;;  %v14792_v38 = vor.u32 %v17760_v5, %v14791_v24  ;;  %9876 = vmatpush.bf16.msrb.mxu2 %v16424_v3 }
 0x529   :  { %v17952_v60 = vld [vmem:[#allocation2 + $0x219c] sm:$0xf0] }
 0x52a   :  { %v16327_v15 = vld [vmem:[#allocation2 + $0x2740] sm:$0xf]  ;;  %v15560_v1 = vor.u32 %v17952_v60, %v15559_v13  ;;  %9849 = vmatpush.bf16.msrb.mxu0 %v14792_v38  ;;  %v11628_v60 = vor.u32 %v16956_v27, %v11625_v53  ;;  %v9617_v38 = vpop.f32.mrf.mxu3 }
 0x52b   :  { %v18144_v9 = vld [vmem:[#allocation2 + $0x279c] sm:$0xf0]  ;;  %v18977_v6 = vadd.f32 %v9617_v38, %v9603_v30  ;;  %v13545_v38 = vld [vmem:[#allocation2 + $0x11e0] sm:$0xf0] }
 0x52c   :  { %v16328_v34 = vor.u32 %v18144_v9, %v16327_v15  ;;  %v14695_v63 = vld [vmem:[#allocation2 + $0x1a80] sm:$0xf]  ;;  %9863 = vmatpush.bf16.msrb.mxu1 %v15560_v1  ;;  %9892 = vmatpush.bf16.msrb.mxu3 %v11628_v60 }
 0x52d   :  { %v17736_v33 = vld [vmem:[#allocation2 + $0x1adc] sm:$0xf0] }
 0x52e   :  { %v15463_v50 = vld [vmem:[#allocation2 + $0x2080] sm:$0xf]  ;;  %v14696_v2 = vor.u32 %v17736_v33, %v14695_v63  ;;  %9877 = vmatpush.bf16.msrb.mxu2 %v16328_v34 }
 0x52f   :  { %v17928_v12 = vld [vmem:[#allocation2 + $0x20dc] sm:$0xf0] }
 0x530   :  { %v16231_v32 = vld [vmem:[#allocation2 + $0x2680] sm:$0xf]  ;;  %v15464_v3 = vor.u32 %v17928_v12, %v15463_v50  ;;  %9850 = vmatpush.bf16.msrb.mxu0 %v14696_v2  ;;  %v11532_v50 = vor.u32 %v16932_v59, %v11529_v22  ;;  %v12777_v59 = vld [vmem:[#allocation2 + $0xbe0] sm:$0xf0] }
 0x531   :  { %v18120_v54 = vld [vmem:[#allocation2 + $0x26dc] sm:$0xf0]  ;;  %v17436_v22 = vld [vmem:[#allocation2 + $0x1184] sm:$0xf] }
 0x532   :  { %v16232_v24 = vor.u32 %v18120_v54, %v16231_v32  ;;  %v14599_v5 = vld [vmem:[#allocation2 + $0x19c0] sm:$0xf]  ;;  %9864 = vmatpush.bf16.msrb.mxu1 %v15464_v3  ;;  %v16908_v32 = vld [vmem:[#allocation2 + $0x104] sm:$0xf]  ;;  %9893 = vmatpush.bf16.msrb.mxu3 %v11532_v50 }
 0x533   :  { %v17712_v13 = vld [vmem:[#allocation2 + $0x1a1c] sm:$0xf0]  ;;  %v11433_v54 = vld [vmem:[#allocation2 + $0x160] sm:$0xf0] }
 0x534   :  { %v15367_v8 = vld [vmem:[#allocation2 + $0x1fc0] sm:$0xf]  ;;  %v14600_v31 = vor.u32 %v17712_v13, %v14599_v5  ;;  %9878 = vmatpush.bf16.msrb.mxu2 %v16232_v24 }
 0x535   :  { %v17904_v15 = vld [vmem:[#allocation2 + $0x201c] sm:$0xf0] }
 0x536   :  { %v16135_v9 = vld [vmem:[#allocation2 + $0x25c0] sm:$0xf]  ;;  %v15368_v17 = vor.u32 %v17904_v15, %v15367_v8  ;;  %9851 = vmatpush.bf16.msrb.mxu0 %v14600_v31  ;;  %v11436_v8 = vor.u32 %v16908_v32, %v11433_v54  ;;  %v16884_v15 = vld [vmem:[#allocation2 + $0x44] sm:$0xf] }
 0x537   :  { %v18096_v51 = vld [vmem:[#allocation2 + $0x261c] sm:$0xf0]  ;;  %v17628_v31 = vld [vmem:[#allocation2 + $0x1784] sm:$0xf] }
 0x538   :  { %v16136_v1 = vor.u32 %v18096_v51, %v16135_v9  ;;  %v14503_v34 = vld [vmem:[#allocation2 + $0x1900] sm:$0xf]  ;;  %9865 = vmatpush.bf16.msrb.mxu1 %v15368_v17  ;;  %v11337_v9 = vld [vmem:[#allocation2 + $0xa0] sm:$0xf0]  ;;  %9894 = vmatpush.bf16.msrb.mxu3 %v11436_v8 }
 0x539   :  { %v17688_v63 = vld [vmem:[#allocation2 + $0x195c] sm:$0xf0]  ;;  %v17244_v51 = vld [vmem:[#allocation2 + $0xb84] sm:$0xf]  ;;  %v11340_v50 = vor.u32 %v16884_v15, %v11337_v9 }
 0x53a   :  { %v15271_v33 = vld [vmem:[#allocation2 + $0x1f00] sm:$0xf]  ;;  %v14504_v27 = vor.u32 %v17688_v63, %v14503_v34  ;;  %9879 = vmatpush.bf16.msrb.mxu2 %v16136_v1  ;;  %v14313_v34 = vld [vmem:[#allocation2 + $0x17e0] sm:$0xf0] }
 0x53b   :  { %v17880_v20 = vld [vmem:[#allocation2 + $0x1f5c] sm:$0xf0]  ;;  %v17820_v63 = vld [vmem:[#allocation2 + $0x1d84] sm:$0xf] }
 0x53c   :  { %v16039_v62 = vld [vmem:[#allocation2 + $0x2500] sm:$0xf]  ;;  %v15272_v2 = vor.u32 %v17880_v20, %v15271_v33  ;;  %9852 = vmatpush.bf16.msrb.mxu0 %v14504_v27  ;;  %v15081_v33 = vld [vmem:[#allocation2 + $0x1de0] sm:$0xf0]  ;;  %v12780_v20 = vor.u32 %v17244_v51, %v12777_v59  ;;  %9895 = vmatpush.bf16.msrb.mxu3 %v11340_v50 }
 0x53d   :  { %v18072_v12 = vld [vmem:[#allocation2 + $0x255c] sm:$0xf0]  ;;  %v17220_v32 = vld [vmem:[#allocation2 + $0xac4] sm:$0xf]  ;;  %v15084_v27 = vor.u32 %v17820_v63, %v15081_v33 }
 0x53e   :  { %v14407_v53 = vld [vmem:[#allocation2 + $0x1840] sm:$0xf]  ;;  %v16040_v3 = vor.u32 %v18072_v12, %v16039_v62  ;;  %9866 = vmatpush.bf16.msrb.mxu1 %v15272_v2  ;;  %v13548_v62 = vor.u32 %v17436_v22, %v13545_v38  ;;  %v14316_v12 = vor.u32 %v17628_v31, %v14313_v34  ;;  %v12681_v54 = vld [vmem:[#allocation2 + $0xb20] sm:$0xf0] }
 0x53f   :  { %v17664_v18 = vld [vmem:[#allocation2 + $0x189c] sm:$0xf0]  ;;  %v17796_v2 = vld [vmem:[#allocation2 + $0x1cc4] sm:$0xf]  ;;  %9896 = vmatmul.bf16.vlgmr.msrb.gmra.mxu3 %v18525_v57 }
 0x540   :  { %v15175_v24 = vld [vmem:[#allocation2 + $0x1e40] sm:$0xf]  ;;  %v14408_v30 = vor.u32 %v17664_v18, %v14407_v53  ;;  %9880 = vmatpush.bf16.msrb.mxu2 %v16040_v3  ;;  %v13449_v53 = vld [vmem:[#allocation2 + $0x1120] sm:$0xf0]  ;;  %9944 = vmatpush.bf16.msra.mxu3 %v15084_v27 }
 0x541   :  { %v17856_v5 = vld [vmem:[#allocation2 + $0x1e9c] sm:$0xf0]  ;;  %v17604_v18 = vld [vmem:[#allocation2 + $0x16c4] sm:$0xf] }
 0x542   :  { %v15943_v13 = vld [vmem:[#allocation2 + $0x2440] sm:$0xf]  ;;  %v15176_v17 = vor.u32 %v17856_v5, %v15175_v24  ;;  %9853 = vmatpush.bf16.msrb.mxu0 %v14408_v30  ;;  %v14985_v3 = vld [vmem:[#allocation2 + $0x1d20] sm:$0xf0]  ;;  %v12684_v24 = vor.u32 %v17220_v32, %v12681_v54  ;;  %v18981_v5 = vpop.f32.mrf.mxu1  ;;  %v14220_v8 = vor.u32 %v17604_v18, %v14217_v10  ;;  %v9631_v54 = vpop.f32.mrf.mxu0 }
 0x543   :  { %v18048_v60 = vld [vmem:[#allocation2 + $0x249c] sm:$0xf0]  ;;  %19477 = vst [vmem:[#allocation102_spill] sm:$0xff] %v18981_v5  ;;  %v12585_v15 = vld [vmem:[#allocation2 + $0xa60] sm:$0xf0]  ;;  %v14988_v51 = vor.u32 %v17796_v2, %v14985_v3  ;;  %v9632_v18 = vadd.f32 %v9631_v54, %v18977_v6 }
 0x544   :  { %v15944_v1 = vor.u32 %v18048_v60, %v15943_v13  ;;  %9867 = vmatpush.bf16.msrb.mxu1 %v15176_v17  ;;  %v13452_v13 = vor.u32 %v17412_v58, %v13449_v53  ;;  %v17196_v60 = vld [vmem:[#allocation2 + $0xa04] sm:$0xf]  ;;  %v18986_v58 = vpop.f32.mrf.mxu2 }
 0x545   :  { %v17388_v9 = vld [vmem:[#allocation2 + $0x1004] sm:$0xf]  ;;  %9854 = vmatmul.bf16.vlgmr.msrb.gmra.mxu0 %v18570_v37  ;;  %v12588_v34 = vor.u32 %v17196_v60, %v12585_v15  ;;  %9945 = vmatpush.bf16.msra.mxu3 %v14988_v51 }
 0x546   :  { %9881 = vmatpush.bf16.msrb.mxu2 %v15944_v1  ;;  %9902 = vmatpush.bf16.msra.mxu0 %v12780_v20  ;;  %v13353_v59 = vld [vmem:[#allocation2 + $0x1060] sm:$0xf0]  ;;  %v18989_v20 = vpop.f32.mrf.mxu3 }
 0x547   :  { %v17580_v22 = vld [vmem:[#allocation2 + $0x1604] sm:$0xf]  ;;  %9868 = vmatmul.bf16.vlgmr.msrb.gmra.mxu1 %v18574_v42  ;;  %v13356_v10 = vor.u32 %v17388_v9, %v13353_v59  ;;  %19478 = vst [vmem:[#allocation103_spill] sm:$0xff] %v18989_v20 }
 0x548   :  { %9916 = vmatpush.bf16.msra.mxu1 %v13548_v62  ;;  %v14121_v30 = vld [vmem:[#allocation2 + $0x1660] sm:$0xf0] }
 0x549   :  { %9882 = vmatmul.bf16.vlgmr.msrb.gmra.mxu2 %v18572_v41  ;;  %v17772_v38 = vld [vmem:[#allocation2 + $0x1c04] sm:$0xf]  ;;  %v14124_v17 = vor.u32 %v17580_v22, %v14121_v30 }
 0x54a   :  { %9930 = vmatpush.bf16.msra.mxu2 %v14316_v12  ;;  %v14889_v31 = vld [vmem:[#allocation2 + $0x1c60] sm:$0xf0]  ;;  %9903 = vmatpush.bf16.msra.mxu0 %v12684_v24  ;;  %v18994_v20 = vpop.f32.mrf.mxu0 }
 0x54b   :  { %v17172_v1 = vld [vmem:[#allocation2 + $0x944] sm:$0xf]  ;;  %v14892_v50 = vor.u32 %v17772_v38, %v14889_v31 }
 0x54c   :  { %9917 = vmatpush.bf16.msra.mxu1 %v13452_v13  ;;  %v12489_v63 = vld [vmem:[#allocation2 + $0x9a0] sm:$0xf0]  ;;  %v9645_v13 = vpop.f32.mrf.mxu1 }
 0x54d   :  { %v17364_v33 = vld [vmem:[#allocation2 + $0xf44] sm:$0xf]  ;;  %v12492_v2 = vor.u32 %v17172_v1, %v12489_v63  ;;  %9946 = vmatpush.bf16.msra.mxu3 %v14892_v50  ;;  %v9646_v51 = vadd.f32 %v9645_v13, %v9632_v18 }
 0x54e   :  { %9931 = vmatpush.bf16.msra.mxu2 %v14220_v8  ;;  %v13257_v62 = vld [vmem:[#allocation2 + $0xfa0] sm:$0xf0]  ;;  %9904 = vmatpush.bf16.msra.mxu0 %v12588_v34  ;;  %v9673_v18 = vpop.f32.mrf.mxu3 }
 0x54f   :  { %v17556_v12 = vld [vmem:[#allocation2 + $0x1544] sm:$0xf]  ;;  %v13260_v3 = vor.u32 %v17364_v33, %v13257_v62  ;;  %v9659_v62 = vpop.f32.mrf.mxu2 }
 0x550   :  { %v14025_v32 = vld [vmem:[#allocation2 + $0x15a0] sm:$0xf0]  ;;  %9918 = vmatpush.bf16.msra.mxu1 %v13356_v10  ;;  %v9660_v54 = vadd.f32 %v9659_v62, %v9646_v51 }
 0x551   :  { %v17748_v27 = vld [vmem:[#allocation2 + $0x1b44] sm:$0xf]  ;;  %v14028_v24 = vor.u32 %v17556_v12, %v14025_v32 }
 0x552   :  { %v14793_v53 = vld [vmem:[#allocation2 + $0x1ba0] sm:$0xf0]  ;;  %9932 = vmatpush.bf16.msra.mxu2 %v14124_v17  ;;  %9905 = vmatpush.bf16.msra.mxu0 %v12492_v2 }
 0x553   :  { %v17148_v8 = vld [vmem:[#allocation2 + $0x884] sm:$0xf]  ;;  %v14796_v9 = vor.u32 %v17748_v27, %v14793_v53 }
 0x554   :  { %v12393_v60 = vld [vmem:[#allocation2 + $0x8e0] sm:$0xf0]  ;;  %9919 = vmatpush.bf16.msra.mxu1 %v13260_v3  ;;  %v18992_v3 = vadd.f32 %v9673_v18, %v9660_v54 }
 0x555   :  { %v17340_v15 = vld [vmem:[#allocation2 + $0xe84] sm:$0xf]  ;;  %v12396_v34 = vor.u32 %v17148_v8, %v12393_v60  ;;  %9947 = vmatpush.bf16.msra.mxu3 %v14796_v9 }
 0x556   :  { %v13161_v59 = vld [vmem:[#allocation2 + $0xee0] sm:$0xf0]  ;;  %9933 = vmatpush.bf16.msra.mxu2 %v14028_v24 }
 0x557   :  { %v17532_v22 = vld [vmem:[#allocation2 + $0x1484] sm:$0xf]  ;;  %v13164_v6 = vor.u32 %v17340_v15, %v13161_v59  ;;  %9906 = vmatpush.bf16.msra.mxu0 %v12396_v34 }
 0x558   :  { %v13929_v30 = vld [vmem:[#allocation2 + $0x14e0] sm:$0xf0] }
 0x559   :  { %v17724_v38 = vld [vmem:[#allocation2 + $0x1a84] sm:$0xf]  ;;  %v13932_v10 = vor.u32 %v17532_v22, %v13929_v30  ;;  %9920 = vmatpush.bf16.msra.mxu1 %v13164_v6 }
 0x55a   :  { %v14697_v31 = vld [vmem:[#allocation2 + $0x1ae0] sm:$0xf0] }
 0x55b   :  { %v17124_v17 = vld [vmem:[#allocation2 + $0x7c4] sm:$0xf]  ;;  %v14700_v33 = vor.u32 %v17724_v38, %v14697_v31  ;;  %9934 = vmatpush.bf16.msra.mxu2 %v13932_v10 }
 0x55c   :  { %v12297_v1 = vld [vmem:[#allocation2 + $0x820] sm:$0xf0] }
 0x55d   :  { %v17316_v63 = vld [vmem:[#allocation2 + $0xdc4] sm:$0xf]  ;;  %v12300_v2 = vor.u32 %v17124_v17, %v12297_v1  ;;  %9948 = vmatpush.bf16.msra.mxu3 %v14700_v33 }
 0x55e   :  { %v13065_v50 = vld [vmem:[#allocation2 + $0xe20] sm:$0xf0] }
 0x55f   :  { %v17508_v12 = vld [vmem:[#allocation2 + $0x13c4] sm:$0xf]  ;;  %v13068_v24 = vor.u32 %v17316_v63, %v13065_v50  ;;  %9907 = vmatpush.bf16.msra.mxu0 %v12300_v2 }
 0x560   :  { %v13833_v32 = vld [vmem:[#allocation2 + $0x1420] sm:$0xf0] }
 0x561   :  { %v17700_v27 = vld [vmem:[#allocation2 + $0x19c4] sm:$0xf]  ;;  %v13836_v13 = vor.u32 %v17508_v12, %v13833_v32  ;;  %9921 = vmatpush.bf16.msra.mxu1 %v13068_v24 }
 0x562   :  { %v14601_v53 = vld [vmem:[#allocation2 + $0x1a20] sm:$0xf0] }
 0x563   :  { %v17100_v8 = vld [vmem:[#allocation2 + $0x704] sm:$0xf]  ;;  %v14604_v9 = vor.u32 %v17700_v27, %v14601_v53  ;;  %9935 = vmatpush.bf16.msra.mxu2 %v13836_v13 }
 0x564   :  { %v12201_v60 = vld [vmem:[#allocation2 + $0x760] sm:$0xf0] }
 0x565   :  { %v17292_v15 = vld [vmem:[#allocation2 + $0xd04] sm:$0xf]  ;;  %v12204_v31 = vor.u32 %v17100_v8, %v12201_v60  ;;  %9949 = vmatpush.bf16.msra.mxu3 %v14604_v9  ;;  %v12015_v8 = vld [vmem:[#allocation2 + $0x588] sm:$0xf] }
 0x566   :  { %v12969_v59 = vld [vmem:[#allocation2 + $0xd60] sm:$0xf0]  ;;  %v17065_v60 = vld [vmem:[#allocation2 + $0x5e4] sm:$0xf0] }
 0x567   :  { %v17484_v22 = vld [vmem:[#allocation2 + $0x1304] sm:$0xf]  ;;  %v12972_v6 = vor.u32 %v17292_v15, %v12969_v59  ;;  %9908 = vmatpush.bf16.msra.mxu0 %v12204_v31  ;;  %v12783_v15 = vld [vmem:[#allocation2 + $0xb88] sm:$0xf] }
 0x568   :  { %v13737_v30 = vld [vmem:[#allocation2 + $0x1360] sm:$0xf0]  ;;  %v17257_v59 = vld [vmem:[#allocation2 + $0xbe4] sm:$0xf0] }
 0x569   :  { %v17676_v51 = vld [vmem:[#allocation2 + $0x1904] sm:$0xf]  ;;  %v13740_v10 = vor.u32 %v17484_v22, %v13737_v30  ;;  %9922 = vmatpush.bf16.msra.mxu1 %v12972_v6  ;;  %v12784_v31 = vor.u32 %v17257_v59, %v12783_v15  ;;  %v12687_v6 = vld [vmem:[#allocation2 + $0xac8] sm:$0xf]  ;;  %v19002_v15 = vpop.f32.mrf.mxu2 }
 0x56a   :  { %v14505_v38 = vld [vmem:[#allocation2 + $0x1960] sm:$0xf0]  ;;  %19479 = vst [vmem:[#allocation104_spill] sm:$0xff] %v19002_v15 }
 0x56b   :  { %v17076_v34 = vld [vmem:[#allocation2 + $0x644] sm:$0xf]  ;;  %v14508_v50 = vor.u32 %v17676_v51, %v14505_v38  ;;  %9936 = vmatpush.bf16.msra.mxu2 %v13740_v10  ;;  %v12016_v51 = vor.u32 %v17065_v60, %v12015_v8  ;;  %v17233_v10 = vld [vmem:[#allocation2 + $0xb24] sm:$0xf0] }
 0x56c   :  { %v12105_v17 = vld [vmem:[#allocation2 + $0x6a0] sm:$0xf0] }
 0x56d   :  { %v17268_v1 = vld [vmem:[#allocation2 + $0xc44] sm:$0xf]  ;;  %v12108_v18 = vor.u32 %v17076_v34, %v12105_v17  ;;  %9950 = vmatpush.bf16.msra.mxu3 %v14508_v50  ;;  %v11919_v17 = vld [vmem:[#allocation2 + $0x4c8] sm:$0xf] }
 0x56e   :  { %v12873_v63 = vld [vmem:[#allocation2 + $0xca0] sm:$0xf0] }
 0x56f   :  { %v17460_v62 = vld [vmem:[#allocation2 + $0x1244] sm:$0xf]  ;;  %v12876_v24 = vor.u32 %v17268_v1, %v12873_v63  ;;  %9909 = vmatpush.bf16.msra.mxu0 %v12108_v18  ;;  %v12591_v18 = vld [vmem:[#allocation2 + $0xa08] sm:$0xf] }
 0x570   :  { %v13641_v33 = vld [vmem:[#allocation2 + $0x12a0] sm:$0xf0] }
 0x571   :  { %v17652_v12 = vld [vmem:[#allocation2 + $0x1844] sm:$0xf]  ;;  %v13644_v13 = vor.u32 %v17460_v62, %v13641_v33  ;;  %9923 = vmatpush.bf16.msra.mxu1 %v12876_v24  ;;  %v11920_v62 = vor.u32 %v17041_v21, %v11919_v17 }
 0x572   :  { %v14409_v32 = vld [vmem:[#allocation2 + $0x18a0] sm:$0xf0]  ;;  %9910 = vmatmul.bf16.vlgmr.msra.gmra.mxu0 %v18540_v11 }
 0x573   :  { %v18012_v54 = vld [vmem:[#allocation2 + $0x2384] sm:$0xf]  ;;  %v14412_v9 = vor.u32 %v17652_v12, %v14409_v32  ;;  %9937 = vmatpush.bf16.msra.mxu2 %v13644_v13  ;;  %v12688_v32 = vor.u32 %v17233_v10, %v12687_v6  ;;  %v19000_v13 = vpop.f32.mrf.mxu1 }
 0x574   :  { %v15849_v27 = vld [vmem:[#allocation2 + $0x23e0] sm:$0xf0]  ;;  %9924 = vmatmul.bf16.vlgmr.msra.gmra.mxu1 %v18530_v0 }
 0x575   :  { %v18204_v53 = vld [vmem:[#allocation2 + $0x2984] sm:$0xf]  ;;  %v15852_v22 = vor.u32 %v18012_v54, %v15849_v27  ;;  %9951 = vmatpush.bf16.msra.mxu3 %v14412_v9  ;;  %v11823_v27 = vld [vmem:[#allocation2 + $0x408] sm:$0xf] }
 0x576   :  { %v16617_v2 = vld [vmem:[#allocation2 + $0x29e0] sm:$0xf0]  ;;  %9938 = vmatmul.bf16.vlgmr.msra.gmra.mxu2 %v18549_v23 }
 0x577   :  { %v16620_v30 = vor.u32 %v18204_v53, %v16617_v2  ;;  %v17988_v38 = vld [vmem:[#allocation2 + $0x22c4] sm:$0xf]  ;;  %9958 = vmatpush.bf16.msrb.mxu0 %v15852_v22  ;;  %9986 = vmatpush.bf16.msrb.mxu2 %v12016_v51  ;;  %v17017_v53 = vld [vmem:[#allocation2 + $0x464] sm:$0xf0]  ;;  %v9687_v51 = vpop.f32.mrf.mxu0 }
 0x578   :  { %v15753_v5 = vld [vmem:[#allocation2 + $0x2320] sm:$0xf0]  ;;  %9952 = vmatmul.bf16.vlgmr.msra.gmra.mxu3 %v18570_v37  ;;  %v11824_v2 = vor.u32 %v17017_v53, %v11823_v27  ;;  %v11727_v22 = vld [vmem:[#allocation2 + $0x348] sm:$0xf]  ;;  %v9688_v17 = vadd.f32 %v9687_v51, %v18992_v3 }
 0x579   :  { %v16521_v34 = vld [vmem:[#allocation2 + $0x2920] sm:$0xf0]  ;;  %v15756_v1 = vor.u32 %v17988_v38, %v15753_v5  ;;  %9972 = vmatpush.bf16.msrb.mxu1 %v16620_v30  ;;  %10000 = vmatpush.bf16.msrb.mxu3 %v12784_v31  ;;  %v17209_v5 = vld [vmem:[#allocation2 + $0xa64] sm:$0xf0] }
 0x57a   :  { %v16524_v63 = vor.u32 %v18180_v48, %v16521_v34  ;;  %v17964_v50 = vld [vmem:[#allocation2 + $0x2204] sm:$0xf]  ;;  %v12592_v59 = vor.u32 %v17209_v5, %v12591_v18  ;;  %v16993_v30 = vld [vmem:[#allocation2 + $0x3a4] sm:$0xf0]  ;;  %v19004_v34 = vpop.f32.mrf.mxu3 }
 0x57b   :  { %v15657_v33 = vld [vmem:[#allocation2 + $0x2260] sm:$0xf0]  ;;  %9959 = vmatpush.bf16.msrb.mxu0 %v15756_v1  ;;  %9987 = vmatpush.bf16.msrb.mxu2 %v11920_v62  ;;  %v12495_v38 = vld [vmem:[#allocation2 + $0x948] sm:$0xf]  ;;  %19480 = vst [vmem:[#allocation105_spill] sm:$0xff] %v19004_v34  ;;  %v11728_v1 = vor.u32 %v16993_v30, %v11727_v22  ;;  %v9715_v22 = vpop.f32.mrf.mxu2 }
 0x57c   :  { %v18156_v12 = vld [vmem:[#allocation2 + $0x2804] sm:$0xf]  ;;  %v15660_v21 = vor.u32 %v17964_v50, %v15657_v33  ;;  %v17185_v31 = vld [vmem:[#allocation2 + $0x9a4] sm:$0xf0]  ;;  %v19481_v33 = vmax.f32 %v18668_v40, %v18823_v36 }
 0x57d   :  { %v16425_v54 = vld [vmem:[#allocation2 + $0x2860] sm:$0xf0]  ;;  %9973 = vmatpush.bf16.msrb.mxu1 %v16524_v63  ;;  %10001 = vmatpush.bf16.msrb.mxu3 %v12688_v32  ;;  %v12496_v32 = vor.u32 %v17185_v31, %v12495_v38  ;;  %v11631_v27 = vld [vmem:[#allocation2 + $0x288] sm:$0xf] }
 0x57e   :  { %v16428_v48 = vor.u32 %v18156_v12, %v16425_v54  ;;  %v17940_v8 = vld [vmem:[#allocation2 + $0x2144] sm:$0xf]  ;;  %v19010_v12 = vmax.f32 %v19481_v33, %v9688_v17  ;;  %v16969_v53 = vld [vmem:[#allocation2 + $0x2e4] sm:$0xf0] }
 0x57f   :  { %v15561_v60 = vld [vmem:[#allocation2 + $0x21a0] sm:$0xf0]  ;;  %9960 = vmatpush.bf16.msrb.mxu0 %v15660_v21  ;;  %9988 = vmatpush.bf16.msrb.mxu2 %v11824_v2  ;;  %v12399_v18 = vld [vmem:[#allocation2 + $0x888] sm:$0xf]  ;;  %v19014_v15 = vpop.f32.mrf.mxu0 }
 0x580   :  { %v18132_v24 = vld [vmem:[#allocation2 + $0x2744] sm:$0xf]  ;;  %v15564_v6 = vor.u32 %v17940_v8, %v15561_v60  ;;  %19482 = vst [vmem:[#allocation106_spill] sm:$0xff] %v19010_v12  ;;  %v17161_v3 = vld [vmem:[#allocation2 + $0x8e4] sm:$0xf0] }
 0x581   :  { %v16329_v9 = vld [vmem:[#allocation2 + $0x27a0] sm:$0xf0]  ;;  %9974 = vmatpush.bf16.msrb.mxu1 %v16428_v48  ;;  %10002 = vmatpush.bf16.msrb.mxu3 %v12592_v59  ;;  %v11632_v48 = vor.u32 %v16969_v53, %v11631_v27  ;;  %v11535_v36 = vld [vmem:[#allocation2 + $0x1c8] sm:$0xf]  ;;  %19483 = vst [vmem:[#allocation107_spill] sm:$0xff] %v19014_v15 }
 0x582   :  { %v16332_v10 = vor.u32 %v18132_v24, %v16329_v9  ;;  %v17916_v63 = vld [vmem:[#allocation2 + $0x2084] sm:$0xf]  ;;  %v12400_v24 = vor.u32 %v17161_v3, %v12399_v18  ;;  %v16945_v59 = vld [vmem:[#allocation2 + $0x224] sm:$0xf0]  ;;  %v9701_v9 = vpop.f32.mrf.mxu1  ;;  %v9729_v17 = vpop.f32.mrf.mxu3 }
 0x583   :  { %v15465_v62 = vld [vmem:[#allocation2 + $0x20e0] sm:$0xf0]  ;;  %9961 = vmatpush.bf16.msrb.mxu0 %v15564_v6  ;;  %9989 = vmatpush.bf16.msrb.mxu2 %v11728_v1  ;;  %v12303_v30 = vld [vmem:[#allocation2 + $0x7c8] sm:$0xf]  ;;  %v9716_v38 = vadd.f32 %v9715_v22, %v9701_v9 }
 0x584   :  { %v18108_v50 = vld [vmem:[#allocation2 + $0x2684] sm:$0xf]  ;;  %v15468_v5 = vor.u32 %v17916_v63, %v15465_v62  ;;  %v17137_v51 = vld [vmem:[#allocation2 + $0x824] sm:$0xf0] }
 0x585   :  { %v16233_v54 = vld [vmem:[#allocation2 + $0x26e0] sm:$0xf0]  ;;  %9975 = vmatpush.bf16.msrb.mxu1 %v16332_v10  ;;  %10003 = vmatpush.bf16.msrb.mxu3 %v12496_v32  ;;  %v11536_v10 = vor.u32 %v16945_v59, %v11535_v36  ;;  %v12304_v33 = vor.u32 %v17137_v51, %v12303_v30  ;;  %v16921_v27 = vld [vmem:[#allocation2 + $0x164] sm:$0xf0] }
 0x586   :  { %v16236_v21 = vor.u32 %v18108_v50, %v16233_v54  ;;  %v17892_v2 = vld [vmem:[#allocation2 + $0x1fc4] sm:$0xf]  ;;  %v19012_v50 = vadd.f32 %v9729_v17, %v9716_v38  ;;  %v11439_v54 = vld [vmem:[#allocation2 + $0x108] sm:$0xf] }
 0x587   :  { %v15369_v8 = vld [vmem:[#allocation2 + $0x2020] sm:$0xf0]  ;;  %9962 = vmatpush.bf16.msrb.mxu0 %v15468_v5  ;;  %9990 = vmatpush.bf16.msrb.mxu2 %v11632_v48  ;;  %v12207_v53 = vld [vmem:[#allocation2 + $0x708] sm:$0xf]  ;;  %v11440_v48 = vor.u32 %v16921_v27, %v11439_v54 }
 0x588   :  { %v18084_v60 = vld [vmem:[#allocation2 + $0x25c4] sm:$0xf]  ;;  %v15372_v31 = vor.u32 %v17892_v2, %v15369_v8  ;;  %v17113_v18 = vld [vmem:[#allocation2 + $0x764] sm:$0xf0] }
 0x589   :  { %v16137_v40 = vld [vmem:[#allocation2 + $0x2620] sm:$0xf0]  ;;  %9976 = vmatpush.bf16.msrb.mxu1 %v16236_v21  ;;  %10004 = vmatpush.bf16.msrb.mxu3 %v12400_v24  ;;  %v12208_v36 = vor.u32 %v17113_v18, %v12207_v53  ;;  %v16897_v24 = vld [vmem:[#allocation2 + $0xa4] sm:$0xf0] }
 0x58a   :  { %v16140_v6 = vor.u32 %v18084_v60, %v16137_v40  ;;  %v17868_v1 = vld [vmem:[#allocation2 + $0x1f04] sm:$0xf]  ;;  %v11343_v40 = vld [vmem:[#allocation2 + $0x48] sm:$0xf] }
 0x58b   :  { %v15273_v63 = vld [vmem:[#allocation2 + $0x1f60] sm:$0xf0]  ;;  %9963 = vmatpush.bf16.msrb.mxu0 %v15372_v31  ;;  %9991 = vmatpush.bf16.msrb.mxu2 %v11536_v10  ;;  %v12111_v59 = vld [vmem:[#allocation2 + $0x648] sm:$0xf]  ;;  %v11344_v10 = vor.u32 %v16897_v24, %v11343_v40 }
 0x58c   :  { %v18060_v62 = vld [vmem:[#allocation2 + $0x2504] sm:$0xf]  ;;  %v15276_v3 = vor.u32 %v17868_v1, %v15273_v63  ;;  %v17089_v9 = vld [vmem:[#allocation2 + $0x6a4] sm:$0xf0] }
 0x58d   :  { %v16041_v32 = vld [vmem:[#allocation2 + $0x2560] sm:$0xf0]  ;;  %9977 = vmatpush.bf16.msrb.mxu1 %v16140_v6  ;;  %10005 = vmatpush.bf16.msrb.mxu3 %v12304_v33  ;;  %v13551_v22 = vld [vmem:[#allocation2 + $0x1188] sm:$0xf]  ;;  %v12112_v33 = vor.u32 %v17089_v9, %v12111_v59 }
 0x58e   :  { %v17844_v5 = vld [vmem:[#allocation2 + $0x1e44] sm:$0xf]  ;;  %v16044_v21 = vor.u32 %v18060_v62, %v16041_v32  ;;  %v17449_v30 = vld [vmem:[#allocation2 + $0x11e4] sm:$0xf0] }
 0x58f   :  { %v15177_v2 = vld [vmem:[#allocation2 + $0x1ea0] sm:$0xf0]  ;;  %v14319_v51 = vld [vmem:[#allocation2 + $0x1788] sm:$0xf]  ;;  %9964 = vmatpush.bf16.msrb.mxu0 %v15276_v3  ;;  %9992 = vmatpush.bf16.msrb.mxu2 %v11440_v48  ;;  %v13552_v32 = vor.u32 %v17449_v30, %v13551_v22 }
 0x590   :  { %v18036_v8 = vld [vmem:[#allocation2 + $0x2444] sm:$0xf]  ;;  %v15180_v38 = vor.u32 %v17844_v5, %v15177_v2  ;;  %v17641_v31 = vld [vmem:[#allocation2 + $0x17e4] sm:$0xf0] }
 0x591   :  { %v15945_v60 = vld [vmem:[#allocation2 + $0x24a0] sm:$0xf0]  ;;  %v15087_v17 = vld [vmem:[#allocation2 + $0x1d88] sm:$0xf]  ;;  %9978 = vmatpush.bf16.msrb.mxu1 %v16044_v21  ;;  %10006 = vmatpush.bf16.msrb.mxu3 %v12208_v36  ;;  %v14320_v54 = vor.u32 %v17641_v31, %v14319_v51 }
 0x592   :  { %v17833_v1 = vld [vmem:[#allocation2 + $0x1de4] sm:$0xf0]  ;;  %v15948_v6 = vor.u32 %v18036_v8, %v15945_v60  ;;  %v19016_v8 = vpop.f32.mrf.mxu1 }
 0x593   :  { %v15855_v63 = vld [vmem:[#allocation2 + $0x2388] sm:$0xf]  ;;  %v15088_v27 = vor.u32 %v17833_v1, %v15087_v17  ;;  %9965 = vmatpush.bf16.msrb.mxu0 %v15180_v38  ;;  %9993 = vmatpush.bf16.msrb.mxu2 %v11344_v10  ;;  %19484 = vst [vmem:[#allocation108_spill] sm:$0xff] %v19016_v8  ;;  %v19024_v10 = vpop.f32.mrf.mxu3  ;;  %v12993_v8 = vld [vmem:[#allocation2 + $0xd78] sm:$0xf0] }
 0x594   :  { %v18025_v62 = vld [vmem:[#allocation2 + $0x23e4] sm:$0xf0]  ;;  %19486 = vst [vmem:[#allocation110_spill] sm:$0xff] %v19024_v10  ;;  %v17989_v10 = vld [vmem:[#allocation2 + $0x22cc] sm:$0xf] }
 0x595   :  { %v13455_v53 = vld [vmem:[#allocation2 + $0x10c8] sm:$0xf]  ;;  %v15856_v3 = vor.u32 %v18025_v62, %v15855_v63  ;;  %9979 = vmatpush.bf16.msrb.mxu1 %v15948_v6  ;;  %10007 = vmatpush.bf16.msrb.mxu3 %v12112_v33 }
 0x596   :  { %v17425_v18 = vld [vmem:[#allocation2 + $0x1124] sm:$0xf0]  ;;  %9966 = vmatmul.bf16.vlgmr.msrb.gmra.mxu0 %v18574_v42  ;;  %9994 = vmatmul.bf16.vlgmr.msrb.gmra.mxu2 %v18525_v57 }
 0x597   :  { %v14223_v12 = vld [vmem:[#allocation2 + $0x16c8] sm:$0xf]  ;;  %10014 = vmatpush.bf16.msra.mxu0 %v13552_v32  ;;  %v13456_v60 = vor.u32 %v17425_v18, %v13455_v53  ;;  %10042 = vmatpush.bf16.msra.mxu2 %v15088_v27  ;;  %v9743_v18 = vpop.f32.mrf.mxu0 }
 0x598   :  { %v17617_v5 = vld [vmem:[#allocation2 + $0x1724] sm:$0xf0]  ;;  %9980 = vmatmul.bf16.vlgmr.msrb.gmra.mxu1 %v18572_v41  ;;  %10008 = vmatmul.bf16.vlgmr.msrb.gmra.mxu3 %v18540_v11 }
 0x599   :  { %v14991_v2 = vld [vmem:[#allocation2 + $0x1cc8] sm:$0xf]  ;;  %10028 = vmatpush.bf16.msra.mxu1 %v14320_v54  ;;  %v14224_v40 = vor.u32 %v17617_v5, %v14223_v12  ;;  %10056 = vmatpush.bf16.msra.mxu3 %v15856_v3  ;;  %v19021_v12 = vpop.f32.mrf.mxu2 }
 0x59a   :  { %v17809_v34 = vld [vmem:[#allocation2 + $0x1d24] sm:$0xf0]  ;;  %19485 = vst [vmem:[#allocation109_spill] sm:$0xff] %v19021_v12  ;;  %v12705_v12 = vld [vmem:[#allocation2 + $0xb38] sm:$0xf0] }
 0x59b   :  { %v15759_v21 = vld [vmem:[#allocation2 + $0x22c8] sm:$0xf]  ;;  %v14992_v36 = vor.u32 %v17809_v34, %v14991_v2  ;;  %10015 = vmatpush.bf16.msra.mxu0 %v13456_v60  ;;  %v9744_v2 = vadd.f32 %v9743_v18, %v19012_v50 }
 0x59c   :  { %v18001_v48 = vld [vmem:[#allocation2 + $0x2324] sm:$0xf0] }
 0x59d   :  { %v13359_v24 = vld [vmem:[#allocation2 + $0x1008] sm:$0xf]  ;;  %v15760_v22 = vor.u32 %v18001_v48, %v15759_v21  ;;  %10029 = vmatpush.bf16.msra.mxu1 %v14224_v40  ;;  %10043 = vmatpush.bf16.msra.mxu2 %v14992_v36  ;;  %v9757_v40 = vpop.f32.mrf.mxu1 }
 0x59e   :  { %v17401_v59 = vld [vmem:[#allocation2 + $0x1064] sm:$0xf0] }
 0x59f   :  { %v14127_v9 = vld [vmem:[#allocation2 + $0x1608] sm:$0xf]  ;;  %v13360_v1 = vor.u32 %v17401_v59, %v13359_v24  ;;  %10057 = vmatpush.bf16.msra.mxu3 %v15760_v22  ;;  %v9758_v22 = vadd.f32 %v9757_v40, %v9744_v2 }
 0x5a0   :  { %v17593_v30 = vld [vmem:[#allocation2 + $0x1664] sm:$0xf0] }
 0x5a1   :  { %v14895_v51 = vld [vmem:[#allocation2 + $0x1c08] sm:$0xf]  ;;  %v14128_v34 = vor.u32 %v17593_v30, %v14127_v9  ;;  %10016 = vmatpush.bf16.msra.mxu0 %v13360_v1 }
 0x5a2   :  { %v17785_v38 = vld [vmem:[#allocation2 + $0x1c64] sm:$0xf0] }
 0x5a3   :  { %v15663_v31 = vld [vmem:[#allocation2 + $0x2208] sm:$0xf]  ;;  %v14896_v6 = vor.u32 %v17785_v38, %v14895_v51  ;;  %10030 = vmatpush.bf16.msra.mxu1 %v14128_v34 }
 0x5a4   :  { %v17977_v17 = vld [vmem:[#allocation2 + $0x2264] sm:$0xf0] }
 0x5a5   :  { %v13263_v63 = vld [vmem:[#allocation2 + $0xf48] sm:$0xf]  ;;  %v15664_v32 = vor.u32 %v17977_v17, %v15663_v31  ;;  %10044 = vmatpush.bf16.msra.mxu2 %v14896_v6 }
 0x5a6   :  { %v17377_v62 = vld [vmem:[#allocation2 + $0xfa4] sm:$0xf0] }
 0x5a7   :  { %v14031_v33 = vld [vmem:[#allocation2 + $0x1548] sm:$0xf]  ;;  %v13264_v21 = vor.u32 %v17377_v62, %v13263_v63  ;;  %10058 = vmatpush.bf16.msra.mxu3 %v15664_v32 }
 0x5a8   :  { %v17569_v54 = vld [vmem:[#allocation2 + $0x15a4] sm:$0xf0] }
 0x5a9   :  { %v14799_v27 = vld [vmem:[#allocation2 + $0x1b48] sm:$0xf]  ;;  %v14032_v48 = vor.u32 %v17569_v54, %v14031_v33  ;;  %10017 = vmatpush.bf16.msra.mxu0 %v13264_v21  ;;  %v9771_v54 = vpop.f32.mrf.mxu2 }
 0x5aa   :  { %v17761_v53 = vld [vmem:[#allocation2 + $0x1ba4] sm:$0xf0]  ;;  %v9772_v18 = vadd.f32 %v9771_v54, %v9758_v22  ;;  %v19487_v22 = vmax.f32 %v18685_v56, %v18856_v39 }
 0x5ab   :  { %v15567_v3 = vld [vmem:[#allocation2 + $0x2148] sm:$0xf]  ;;  %v14800_v60 = vor.u32 %v17761_v53, %v14799_v27  ;;  %10031 = vmatpush.bf16.msra.mxu1 %v14032_v48 }
 0x5ac   :  { %v17953_v5 = vld [vmem:[#allocation2 + $0x21a4] sm:$0xf0] }
 0x5ad   :  { %v13167_v36 = vld [vmem:[#allocation2 + $0xe88] sm:$0xf]  ;;  %v15568_v9 = vor.u32 %v17953_v5, %v15567_v3  ;;  %10045 = vmatpush.bf16.msra.mxu2 %v14800_v60  ;;  %v9785_v3 = vpop.f32.mrf.mxu3 }
 0x5ae   :  { %v17353_v24 = vld [vmem:[#allocation2 + $0xee4] sm:$0xf0]  ;;  %v9786_v48 = vadd.f32 %v9785_v3, %v9772_v18 }
 0x5af   :  { %v13935_v59 = vld [vmem:[#allocation2 + $0x1488] sm:$0xf]  ;;  %v13168_v1 = vor.u32 %v17353_v24, %v13167_v36  ;;  %10059 = vmatpush.bf16.msra.mxu3 %v15568_v9 }
 0x5b0   :  { %v17545_v30 = vld [vmem:[#allocation2 + $0x14e4] sm:$0xf0] }
 0x5b1   :  { %v14703_v51 = vld [vmem:[#allocation2 + $0x1a88] sm:$0xf]  ;;  %v13936_v50 = vor.u32 %v17545_v30, %v13935_v59  ;;  %10018 = vmatpush.bf16.msra.mxu0 %v13168_v1 }
 0x5b2   :  { %v17737_v38 = vld [vmem:[#allocation2 + $0x1ae4] sm:$0xf0] }
 0x5b3   :  { %v15471_v31 = vld [vmem:[#allocation2 + $0x2088] sm:$0xf]  ;;  %v14704_v34 = vor.u32 %v17737_v38, %v14703_v51  ;;  %10032 = vmatpush.bf16.msra.mxu1 %v13936_v50 }
 0x5b4   :  { %v17929_v17 = vld [vmem:[#allocation2 + $0x20e4] sm:$0xf0] }
 0x5b5   :  { %v13071_v6 = vld [vmem:[#allocation2 + $0xdc8] sm:$0xf]  ;;  %v15472_v33 = vor.u32 %v17929_v17, %v15471_v31  ;;  %10046 = vmatpush.bf16.msra.mxu2 %v14704_v34  ;;  %v19030_v31 = vmax.f32 %v19487_v22, %v9786_v48  ;;  %v17245_v48 = vld [vmem:[#allocation2 + $0xb8c] sm:$0xf] }
 0x5b6   :  { %v17329_v63 = vld [vmem:[#allocation2 + $0xe24] sm:$0xf0] }
 0x5b7   :  { %v13839_v62 = vld [vmem:[#allocation2 + $0x13c8] sm:$0xf]  ;;  %v13072_v21 = vor.u32 %v17329_v63, %v13071_v6  ;;  %10060 = vmatpush.bf16.msra.mxu3 %v15472_v33  ;;  %19488 = vst [vmem:[#allocation111_spill] sm:$0xff] %v19030_v31  ;;  %v12689_v31 = vld [vmem:[#allocation2 + $0xb28] sm:$0xf0] }
 0x5b8   :  { %v17521_v32 = vld [vmem:[#allocation2 + $0x1424] sm:$0xf0] }
 0x5b9   :  { %v14607_v27 = vld [vmem:[#allocation2 + $0x19c8] sm:$0xf]  ;;  %v13840_v60 = vor.u32 %v17521_v32, %v13839_v62  ;;  %10019 = vmatpush.bf16.msra.mxu0 %v13072_v21  ;;  %v12017_v21 = vld [vmem:[#allocation2 + $0x5e8] sm:$0xf0] }
 0x5ba   :  { %v17713_v53 = vld [vmem:[#allocation2 + $0x1a24] sm:$0xf0] }
 0x5bb   :  { %v15375_v5 = vld [vmem:[#allocation2 + $0x1fc8] sm:$0xf]  ;;  %v14608_v40 = vor.u32 %v17713_v53, %v14607_v27  ;;  %10033 = vmatpush.bf16.msra.mxu1 %v13840_v60 }
 0x5bc   :  { %v17905_v2 = vld [vmem:[#allocation2 + $0x2024] sm:$0xf0] }
 0x5bd   :  { %v12975_v36 = vld [vmem:[#allocation2 + $0xd08] sm:$0xf]  ;;  %v15376_v9 = vor.u32 %v17905_v2, %v15375_v5  ;;  %10047 = vmatpush.bf16.msra.mxu2 %v14608_v40  ;;  %v17053_v5 = vld [vmem:[#allocation2 + $0x58c] sm:$0xf] }
 0x5be   :  { %v17305_v24 = vld [vmem:[#allocation2 + $0xd64] sm:$0xf0] }
 0x5bf   :  { %v13743_v59 = vld [vmem:[#allocation2 + $0x1308] sm:$0xf]  ;;  %v12976_v50 = vor.u32 %v17305_v24, %v12975_v36  ;;  %10061 = vmatpush.bf16.msra.mxu3 %v15376_v9  ;;  %v12785_v36 = vld [vmem:[#allocation2 + $0xbe8] sm:$0xf0] }
 0x5c0   :  { %v17497_v30 = vld [vmem:[#allocation2 + $0x1364] sm:$0xf0]  ;;  %v17437_v24 = vld [vmem:[#allocation2 + $0x118c] sm:$0xf] }
 0x5c1   :  { %v14511_v51 = vld [vmem:[#allocation2 + $0x1908] sm:$0xf]  ;;  %v13744_v63 = vor.u32 %v17497_v30, %v13743_v59  ;;  %10020 = vmatpush.bf16.msra.mxu0 %v12976_v50  ;;  %v13553_v59 = vld [vmem:[#allocation2 + $0x11e8] sm:$0xf0] }
 0x5c2   :  { %v17689_v38 = vld [vmem:[#allocation2 + $0x1964] sm:$0xf0]  ;;  %v13556_v50 = vor.u32 %v17437_v24, %v13553_v59 }
 0x5c3   :  { %v15279_v17 = vld [vmem:[#allocation2 + $0x1f08] sm:$0xf]  ;;  %v14512_v62 = vor.u32 %v17689_v38, %v14511_v51  ;;  %10034 = vmatpush.bf16.msra.mxu1 %v13744_v63  ;;  %v12020_v51 = vor.u32 %v17053_v5, %v12017_v21  ;;  %v12788_v38 = vor.u32 %v17245_v48, %v12785_v36  ;;  %v17413_v63 = vld [vmem:[#allocation2 + $0x10cc] sm:$0xf] }
 0x5c4   :  { %v17881_v1 = vld [vmem:[#allocation2 + $0x1f64] sm:$0xf0]  ;;  %v11825_v5 = vld [vmem:[#allocation2 + $0x468] sm:$0xf0] }
 0x5c5   :  { %v12879_v34 = vld [vmem:[#allocation2 + $0xc48] sm:$0xf]  ;;  %v15280_v27 = vor.u32 %v17881_v1, %v15279_v17  ;;  %10048 = vmatpush.bf16.msra.mxu2 %v14512_v62  ;;  %v17029_v1 = vld [vmem:[#allocation2 + $0x4cc] sm:$0xf] }
 0x5c6   :  { %v17281_v6 = vld [vmem:[#allocation2 + $0xca4] sm:$0xf0]  ;;  %v13457_v62 = vld [vmem:[#allocation2 + $0x1128] sm:$0xf0] }
 0x5c7   :  { %v13647_v33 = vld [vmem:[#allocation2 + $0x1248] sm:$0xf]  ;;  %v12880_v2 = vor.u32 %v17281_v6, %v12879_v34  ;;  %10062 = vmatpush.bf16.msra.mxu3 %v15280_v27  ;;  %v11921_v34 = vld [vmem:[#allocation2 + $0x528] sm:$0xf0] }
 0x5c8   :  { %v17473_v54 = vld [vmem:[#allocation2 + $0x12a4] sm:$0xf0]  ;;  %v17221_v6 = vld [vmem:[#allocation2 + $0xacc] sm:$0xf]  ;;  %v11924_v27 = vor.u32 %v17029_v1, %v11921_v34  ;;  %v19042_v1 = vpop.f32.mrf.mxu3 }
 0x5c9   :  { %v14415_v32 = vld [vmem:[#allocation2 + $0x1848] sm:$0xf]  ;;  %v13648_v60 = vor.u32 %v17473_v54, %v13647_v33  ;;  %10021 = vmatpush.bf16.msra.mxu0 %v12880_v2  ;;  %v19032_v33 = vpop.f32.mrf.mxu0  ;;  %v19034_v54 = vpop.f32.mrf.mxu1  ;;  %v17197_v2 = vld [vmem:[#allocation2 + $0xa0c] sm:$0xf]  ;;  %19492 = vst [vmem:[#allocation115_spill] sm:$0xff] %v19042_v1 }
 0x5ca   :  { %v17665_v53 = vld [vmem:[#allocation2 + $0x18a4] sm:$0xf0]  ;;  %19489 = vst [vmem:[#allocation112_spill] sm:$0xff] %v19032_v33  ;;  %v12593_v21 = vld [vmem:[#allocation2 + $0xa68] sm:$0xf0] }
 0x5cb   :  { %v15183_v18 = vld [vmem:[#allocation2 + $0x1e48] sm:$0xf]  ;;  %v14416_v40 = vor.u32 %v17665_v53, %v14415_v32  ;;  %10035 = vmatpush.bf16.msra.mxu1 %v13648_v60  ;;  %19490 = vst [vmem:[#allocation113_spill] sm:$0xff] %v19034_v54  ;;  %v12692_v53 = vor.u32 %v17221_v6, %v12689_v31  ;;  %v17389_v48 = vld [vmem:[#allocation2 + $0x100c] sm:$0xf] }
 0x5cc   :  { %v17857_v56 = vld [vmem:[#allocation2 + $0x1ea4] sm:$0xf0]  ;;  %10022 = vmatmul.bf16.vlgmr.msra.gmra.mxu0 %v18530_v0  ;;  %v13361_v36 = vld [vmem:[#allocation2 + $0x1068] sm:$0xf0] }
 0x5cd   :  { %v16623_v39 = vld [vmem:[#allocation2 + $0x2988] sm:$0xf]  ;;  %v15184_v9 = vor.u32 %v17857_v56, %v15183_v18  ;;  %10049 = vmatpush.bf16.msra.mxu2 %v14416_v40  ;;  %v12596_v40 = vor.u32 %v17197_v2, %v12593_v21  ;;  %v13265_v34 = vld [vmem:[#allocation2 + $0xfa8] sm:$0xf0] }
 0x5ce   :  { %v18217_v3 = vld [vmem:[#allocation2 + $0x29e4] sm:$0xf0]  ;;  %10036 = vmatmul.bf16.vlgmr.msra.gmra.mxu1 %v18549_v23  ;;  %v17149_v2 = vld [vmem:[#allocation2 + $0x88c] sm:$0xf] }
 0x5cf   :  { %v16624_v30 = vor.u32 %v18217_v3, %v16623_v39  ;;  %v16527_v22 = vld [vmem:[#allocation2 + $0x28c8] sm:$0xf]  ;;  %10063 = vmatpush.bf16.msra.mxu3 %v15184_v9  ;;  %10084 = vmatpush.bf16.msrb.mxu1 %v12020_v51  ;;  %v17005_v39 = vld [vmem:[#allocation2 + $0x40c] sm:$0xf]  ;;  %v13460_v3 = vor.u32 %v17413_v63, %v13457_v62  ;;  %v13364_v51 = vor.u32 %v17389_v48, %v13361_v36 }
 0x5d0   :  { %v18193_v17 = vld [vmem:[#allocation2 + $0x2924] sm:$0xf0]  ;;  %10050 = vmatmul.bf16.vlgmr.msra.gmra.mxu2 %v18570_v37  ;;  %v11828_v60 = vor.u32 %v17005_v39, %v11825_v5  ;;  %v16981_v9 = vld [vmem:[#allocation2 + $0x34c] sm:$0xf] }
 0x5d1   :  { %10070 = vmatpush.bf16.msrb.mxu0 %v16624_v30  ;;  %v16528_v32 = vor.u32 %v18193_v17, %v16527_v22  ;;  %10098 = vmatpush.bf16.msrb.mxu2 %v12788_v38  ;;  %v16431_v18 = vld [vmem:[#allocation2 + $0x2808] sm:$0xf]  ;;  %v19040_v30 = vpop.f32.mrf.mxu2  ;;  %v11729_v38 = vld [vmem:[#allocation2 + $0x3a8] sm:$0xf0]  ;;  %v9799_v63 = vpop.f32.mrf.mxu0 }
 0x5d2   :  { %v18169_v56 = vld [vmem:[#allocation2 + $0x2864] sm:$0xf0]  ;;  %10064 = vmatmul.bf16.vlgmr.msra.gmra.mxu3 %v18574_v42  ;;  %19491 = vst [vmem:[#allocation114_spill] sm:$0xff] %v19040_v30  ;;  %v17173_v22 = vld [vmem:[#allocation2 + $0x94c] sm:$0xf]  ;;  %v9813_v62 = vpop.f32.mrf.mxu1 }
 0x5d3   :  { %10112 = vmatpush.bf16.msrb.mxu3 %v13556_v50  ;;  %v16432_v31 = vor.u32 %v18169_v56, %v16431_v18  ;;  %10085 = vmatpush.bf16.msrb.mxu1 %v11924_v27  ;;  %v16335_v24 = vld [vmem:[#allocation2 + $0x2748] sm:$0xf]  ;;  %v12497_v17 = vld [vmem:[#allocation2 + $0x9a8] sm:$0xf0]  ;;  %v9814_v39 = vadd.f32 %v9813_v62, %v9799_v63 }
 0x5d4   :  { %v18145_v59 = vld [vmem:[#allocation2 + $0x27a4] sm:$0xf0]  ;;  %v17365_v50 = vld [vmem:[#allocation2 + $0xf4c] sm:$0xf]  ;;  %v12500_v27 = vor.u32 %v17173_v22, %v12497_v17 }
 0x5d5   :  { %10071 = vmatpush.bf16.msrb.mxu0 %v16528_v32  ;;  %10099 = vmatpush.bf16.msrb.mxu2 %v12692_v53  ;;  %v16336_v6 = vor.u32 %v18145_v59, %v16335_v24  ;;  %v11732_v32 = vor.u32 %v16981_v9, %v11729_v38  ;;  %v16239_v53 = vld [vmem:[#allocation2 + $0x2688] sm:$0xf]  ;;  %v16957_v56 = vld [vmem:[#allocation2 + $0x28c] sm:$0xf] }
 0x5d6   :  { %v18121_v18 = vld [vmem:[#allocation2 + $0x26e4] sm:$0xf0]  ;;  %v11633_v5 = vld [vmem:[#allocation2 + $0x2e8] sm:$0xf0] }
 0x5d7   :  { %10113 = vmatpush.bf16.msrb.mxu3 %v13460_v3  ;;  %10086 = vmatpush.bf16.msrb.mxu1 %v11828_v60  ;;  %v13268_v3 = vor.u32 %v17365_v50, %v13265_v34  ;;  %v12401_v21 = vld [vmem:[#allocation2 + $0x8e8] sm:$0xf0]  ;;  %v11636_v24 = vor.u32 %v16957_v56, %v11633_v5  ;;  %v18097_v59 = vld [vmem:[#allocation2 + $0x2624] sm:$0xf0] }
 0x5d8   :  { %v17341_v48 = vld [vmem:[#allocation2 + $0xe8c] sm:$0xf]  ;;  %v12404_v60 = vor.u32 %v17149_v2, %v12401_v21 }
 0x5d9   :  { %10072 = vmatpush.bf16.msrb.mxu0 %v16432_v31  ;;  %10100 = vmatpush.bf16.msrb.mxu2 %v12596_v40  ;;  %v13169_v36 = vld [vmem:[#allocation2 + $0xee8] sm:$0xf0]  ;;  %v16240_v31 = vor.u32 %v18121_v18, %v16239_v53  ;;  %v16143_v40 = vld [vmem:[#allocation2 + $0x25c8] sm:$0xf]  ;;  %v9827_v50 = vpop.f32.mrf.mxu2 }
 0x5da   :  { %v16933_v9 = vld [vmem:[#allocation2 + $0x1cc] sm:$0xf]  ;;  %v13172_v38 = vor.u32 %v17341_v48, %v13169_v36  ;;  %v9828_v62 = vadd.f32 %v9827_v50, %v9814_v39  ;;  %v16144_v1 = vor.u32 %v18097_v59, %v16143_v40  ;;  %v16047_v53 = vld [vmem:[#allocation2 + $0x2508] sm:$0xf] }
 0x5db   :  { %10114 = vmatpush.bf16.msrb.mxu3 %v13364_v51  ;;  %10087 = vmatpush.bf16.msrb.mxu1 %v11732_v32  ;;  %v11537_v22 = vld [vmem:[#allocation2 + $0x228] sm:$0xf0]  ;;  %v18073_v18 = vld [vmem:[#allocation2 + $0x2564] sm:$0xf0] }
 0x5dc   :  { %v17125_v17 = vld [vmem:[#allocation2 + $0x7cc] sm:$0xf]  ;;  %v11540_v32 = vor.u32 %v16933_v9, %v11537_v22  ;;  %v16048_v39 = vor.u32 %v18073_v18, %v16047_v53  ;;  %v18049_v40 = vld [vmem:[#allocation2 + $0x24a4] sm:$0xf0] }
 0x5dd   :  { %10073 = vmatpush.bf16.msrb.mxu0 %v16336_v6  ;;  %10101 = vmatpush.bf16.msrb.mxu2 %v12500_v27  ;;  %v12305_v51 = vld [vmem:[#allocation2 + $0x828] sm:$0xf0]  ;;  %v9841_v6 = vpop.f32.mrf.mxu3 }
 0x5de   :  { %v17317_v34 = vld [vmem:[#allocation2 + $0xdcc] sm:$0xf]  ;;  %v12308_v27 = vor.u32 %v17125_v17, %v12305_v51  ;;  %v19044_v5 = vadd.f32 %v9841_v6, %v9828_v62 }
 0x5df   :  { %10115 = vmatpush.bf16.msrb.mxu3 %v13268_v3  ;;  %v13073_v63 = vld [vmem:[#allocation2 + $0xe28] sm:$0xf0]  ;;  %10088 = vmatpush.bf16.msrb.mxu1 %v11636_v24 }
 0x5e0   :  { %v16909_v56 = vld [vmem:[#allocation2 + $0x10c] sm:$0xf]  ;;  %v13076_v3 = vor.u32 %v17317_v34, %v13073_v63 }
 0x5e1   :  { %10074 = vmatpush.bf16.msrb.mxu0 %v16240_v31  ;;  %10102 = vmatpush.bf16.msrb.mxu2 %v12404_v60  ;;  %v11441_v2 = vld [vmem:[#allocation2 + $0x168] sm:$0xf0]  ;;  %v15951_v31 = vld [vmem:[#allocation2 + $0x2448] sm:$0xf] }
 0x5e2   :  { %v17101_v21 = vld [vmem:[#allocation2 + $0x70c] sm:$0xf]  ;;  %v11444_v24 = vor.u32 %v16909_v56, %v11441_v2 }
 0x5e3   :  { %10116 = vmatpush.bf16.msrb.mxu3 %v13172_v38  ;;  %v12209_v48 = vld [vmem:[#allocation2 + $0x768] sm:$0xf0]  ;;  %10089 = vmatpush.bf16.msrb.mxu1 %v11540_v32 }
 0x5e4   :  { %v17293_v36 = vld [vmem:[#allocation2 + $0xd0c] sm:$0xf]  ;;  %v12212_v60 = vor.u32 %v17101_v21, %v12209_v48 }
 0x5e5   :  { %v12977_v30 = vld [vmem:[#allocation2 + $0xd68] sm:$0xf0]  ;;  %10075 = vmatpush.bf16.msrb.mxu0 %v16144_v1  ;;  %10103 = vmatpush.bf16.msrb.mxu2 %v12308_v27  ;;  %v15952_v1 = vor.u32 %v18049_v40, %v15951_v31 }
 0x5e6   :  { %v16885_v59 = vld [vmem:[#allocation2 + $0x4c] sm:$0xf]  ;;  %v12980_v17 = vor.u32 %v17293_v36, %v12977_v30  ;;  %v19046_v36 = vpop.f32.mrf.mxu0 }
 0x5e7   :  { %v11345_v9 = vld [vmem:[#allocation2 + $0xa8] sm:$0xf0]  ;;  %10117 = vmatpush.bf16.msrb.mxu3 %v13076_v3  ;;  %10090 = vmatpush.bf16.msrb.mxu1 %v11444_v24  ;;  %19493 = vst [vmem:[#allocation116_spill] sm:$0xff] %v19046_v36  ;;  %v17223_v36 = vld [vmem:[#allocation2 + $0xadc] sm:$0xf] }
 0x5e8   :  { %v17077_v22 = vld [vmem:[#allocation2 + $0x64c] sm:$0xf]  ;;  %v11348_v32 = vor.u32 %v16885_v59, %v11345_v9  ;;  %v19048_v9 = vpop.f32.mrf.mxu1 }
 0x5e9   :  { %v12113_v38 = vld [vmem:[#allocation2 + $0x6a8] sm:$0xf0]  ;;  %10076 = vmatpush.bf16.msrb.mxu0 %v16048_v39  ;;  %10104 = vmatpush.bf16.msrb.mxu2 %v12212_v60  ;;  %19494 = vst [vmem:[#allocation117_spill] sm:$0xff] %v19048_v9 }
 0x5ea   :  { %v17269_v51 = vld [vmem:[#allocation2 + $0xc4c] sm:$0xf]  ;;  %v12116_v27 = vor.u32 %v17077_v22, %v12113_v38 }
 0x5eb   :  { %v12881_v50 = vld [vmem:[#allocation2 + $0xca8] sm:$0xf0]  ;;  %10118 = vmatpush.bf16.msrb.mxu3 %v12980_v17  ;;  %10091 = vmatpush.bf16.msrb.mxu1 %v11348_v32 }
 0x5ec   :  { %v17629_v34 = vld [vmem:[#allocation2 + $0x178c] sm:$0xf]  ;;  %v12884_v3 = vor.u32 %v17269_v51, %v12881_v50 }
 0x5ed   :  { %v14321_v63 = vld [vmem:[#allocation2 + $0x17e8] sm:$0xf0]  ;;  %10077 = vmatpush.bf16.msrb.mxu0 %v15952_v1  ;;  %10105 = vmatpush.bf16.msrb.mxu2 %v12116_v27 }
 0x5ee   :  { %v17821_v62 = vld [vmem:[#allocation2 + $0x1d8c] sm:$0xf]  ;;  %v14324_v30 = vor.u32 %v17629_v34, %v14321_v63  ;;  %10092 = vmatmul.bf16.vlgmr.msrb.gmra.mxu1 %v18525_v57 }
 0x5ef   :  { %v15089_v6 = vld [vmem:[#allocation2 + $0x1de8] sm:$0xf0]  ;;  %10119 = vmatpush.bf16.msrb.mxu3 %v12884_v3 }
 0x5f0   :  { %v18013_v53 = vld [vmem:[#allocation2 + $0x238c] sm:$0xf]  ;;  %v15092_v21 = vor.u32 %v17821_v62, %v15089_v6  ;;  %10078 = vmatmul.bf16.vlgmr.msrb.gmra.mxu0 %v18572_v41  ;;  %10106 = vmatmul.bf16.vlgmr.msrb.gmra.mxu2 %v18540_v11 }
 0x5f1   :  { %v15857_v18 = vld [vmem:[#allocation2 + $0x23e8] sm:$0xf0]  ;;  %10126 = vmatpush.bf16.msra.mxu0 %v14324_v30 }
 0x5f2   :  { %v18205_v56 = vld [vmem:[#allocation2 + $0x298c] sm:$0xf]  ;;  %v15860_v48 = vor.u32 %v18013_v53, %v15857_v18  ;;  %10140 = vmatpush.bf16.msra.mxu1 %v15092_v21  ;;  %10120 = vmatmul.bf16.vlgmr.msrb.gmra.mxu3 %v18530_v0 }
 0x5f3   :  { %v16625_v2 = vld [vmem:[#allocation2 + $0x29e8] sm:$0xf0] }
 0x5f4   :  { %v17605_v54 = vld [vmem:[#allocation2 + $0x16cc] sm:$0xf]  ;;  %v16628_v31 = vor.u32 %v18205_v56, %v16625_v2  ;;  %10154 = vmatpush.bf16.msra.mxu2 %v15860_v48 }
 0x5f5   :  { %v14225_v33 = vld [vmem:[#allocation2 + $0x1728] sm:$0xf0] }
 0x5f6   :  { %v17797_v39 = vld [vmem:[#allocation2 + $0x1ccc] sm:$0xf]  ;;  %v14228_v22 = vor.u32 %v17605_v54, %v14225_v33  ;;  %10168 = vmatpush.bf16.msra.mxu3 %v16628_v31  ;;  %v19053_v54 = vpop.f32.mrf.mxu2 }
 0x5f7   :  { %v14993_v40 = vld [vmem:[#allocation2 + $0x1d28] sm:$0xf0]  ;;  %19495 = vst [vmem:[#allocation118_spill] sm:$0xff] %v19053_v54  ;;  %v17426_v54 = vld [vmem:[#allocation2 + $0x112c] sm:$0xf0] }
 0x5f8   :  { %v15761_v24 = vld [vmem:[#allocation2 + $0x2328] sm:$0xf0]  ;;  %v14996_v17 = vor.u32 %v17797_v39, %v14993_v40  ;;  %10127 = vmatpush.bf16.msra.mxu0 %v14228_v22  ;;  %v9855_v39 = vpop.f32.mrf.mxu0 }
 0x5f9   :  { %v18181_v60 = vld [vmem:[#allocation2 + $0x28cc] sm:$0xf]  ;;  %v15764_v38 = vor.u32 %v17989_v10, %v15761_v24  ;;  %v9856_v24 = vadd.f32 %v9855_v39, %v19044_v5 }
 0x5fa   :  { %v16529_v59 = vld [vmem:[#allocation2 + $0x2928] sm:$0xf0]  ;;  %10141 = vmatpush.bf16.msra.mxu1 %v14996_v17  ;;  %v9869_v17 = vpop.f32.mrf.mxu1 }
 0x5fb   :  { %v17581_v51 = vld [vmem:[#allocation2 + $0x160c] sm:$0xf]  ;;  %v16532_v63 = vor.u32 %v18181_v60, %v16529_v59  ;;  %10155 = vmatpush.bf16.msra.mxu2 %v15764_v38 }
 0x5fc   :  { %v14129_v50 = vld [vmem:[#allocation2 + $0x1668] sm:$0xf0] }
 0x5fd   :  { %v17773_v34 = vld [vmem:[#allocation2 + $0x1c0c] sm:$0xf]  ;;  %v14132_v33 = vor.u32 %v17581_v51, %v14129_v50  ;;  %10169 = vmatpush.bf16.msra.mxu3 %v16532_v63  ;;  %v9870_v63 = vadd.f32 %v9869_v17, %v9856_v24 }
 0x5fe   :  { %v14897_v62 = vld [vmem:[#allocation2 + $0x1c68] sm:$0xf0] }
 0x5ff   :  { %v17965_v1 = vld [vmem:[#allocation2 + $0x220c] sm:$0xf]  ;;  %v14900_v10 = vor.u32 %v17773_v34, %v14897_v62  ;;  %10128 = vmatpush.bf16.msra.mxu0 %v14132_v33 }
 0x600   :  { %v15665_v6 = vld [vmem:[#allocation2 + $0x2268] sm:$0xf0] }
 0x601   :  { %v18157_v53 = vld [vmem:[#allocation2 + $0x280c] sm:$0xf]  ;;  %v15668_v32 = vor.u32 %v17965_v1, %v15665_v6  ;;  %10142 = vmatpush.bf16.msra.mxu1 %v14900_v10 }
 0x602   :  { %v16433_v18 = vld [vmem:[#allocation2 + $0x2868] sm:$0xf0] }
 0x603   :  { %v17557_v27 = vld [vmem:[#allocation2 + $0x154c] sm:$0xf]  ;;  %v16436_v3 = vor.u32 %v18157_v53, %v16433_v18  ;;  %10156 = vmatpush.bf16.msra.mxu2 %v15668_v32 }
 0x604   :  { %v14033_v56 = vld [vmem:[#allocation2 + $0x15a8] sm:$0xf0] }
 0x605   :  { %v17749_v2 = vld [vmem:[#allocation2 + $0x1b4c] sm:$0xf]  ;;  %v14036_v60 = vor.u32 %v17557_v27, %v14033_v56  ;;  %10170 = vmatpush.bf16.msra.mxu3 %v16436_v3 }
 0x606   :  { %v14801_v30 = vld [vmem:[#allocation2 + $0x1ba8] sm:$0xf0] }
 0x607   :  { %v17941_v21 = vld [vmem:[#allocation2 + $0x214c] sm:$0xf]  ;;  %v14804_v59 = vor.u32 %v17749_v2, %v14801_v30  ;;  %10129 = vmatpush.bf16.msra.mxu0 %v14036_v60  ;;  %v9883_v30 = vpop.f32.mrf.mxu2  ;;  %v19496_v60 = vmax.f32 %v18712_v46, %v18890_v14 }
 0x608   :  { %v15569_v48 = vld [vmem:[#allocation2 + $0x21a8] sm:$0xf0]  ;;  %v9884_v39 = vadd.f32 %v9883_v30, %v9870_v63 }
 0x609   :  { %v18133_v31 = vld [vmem:[#allocation2 + $0x274c] sm:$0xf]  ;;  %v15572_v22 = vor.u32 %v17941_v21, %v15569_v48  ;;  %10143 = vmatpush.bf16.msra.mxu1 %v14804_v59 }
 0x60a   :  { %v16337_v40 = vld [vmem:[#allocation2 + $0x27a8] sm:$0xf0]  ;;  %v19060_v59 = vmax.f32 %v19496_v60, %v9884_v39  ;;  %v17066_v39 = vld [vmem:[#allocation2 + $0x5ec] sm:$0xf0] }
 0x60b   :  { %v17533_v38 = vld [vmem:[#allocation2 + $0x148c] sm:$0xf]  ;;  %v16340_v34 = vor.u32 %v18133_v31, %v16337_v40  ;;  %10157 = vmatpush.bf16.msra.mxu2 %v15572_v22  ;;  %v13559_v60 = vld [vmem:[#allocation2 + $0x1190] sm:$0xf] }
 0x60c   :  { %v13937_v51 = vld [vmem:[#allocation2 + $0x14e8] sm:$0xf0]  ;;  %19497 = vst [vmem:[#allocation119_spill] sm:$0xff] %v19060_v59  ;;  %v17042_v59 = vld [vmem:[#allocation2 + $0x52c] sm:$0xf0] }
 0x60d   :  { %v17725_v50 = vld [vmem:[#allocation2 + $0x1a8c] sm:$0xf]  ;;  %v13940_v33 = vor.u32 %v17533_v38, %v13937_v51  ;;  %10171 = vmatpush.bf16.msra.mxu3 %v16340_v34  ;;  %v19062_v34 = vpop.f32.mrf.mxu3 }
 0x60e   :  { %v14705_v62 = vld [vmem:[#allocation2 + $0x1ae8] sm:$0xf0]  ;;  %19498 = vst [vmem:[#allocation120_spill] sm:$0xff] %v19062_v34  ;;  %v12695_v34 = vld [vmem:[#allocation2 + $0xad0] sm:$0xf] }
 0x60f   :  { %v17917_v1 = vld [vmem:[#allocation2 + $0x208c] sm:$0xf]  ;;  %v14708_v5 = vor.u32 %v17725_v50, %v14705_v62  ;;  %10130 = vmatpush.bf16.msra.mxu0 %v13940_v33 }
 0x610   :  { %v15473_v6 = vld [vmem:[#allocation2 + $0x20e8] sm:$0xf0] }
 0x611   :  { %v18109_v53 = vld [vmem:[#allocation2 + $0x268c] sm:$0xf]  ;;  %v15476_v10 = vor.u32 %v17917_v1, %v15473_v6  ;;  %10144 = vmatpush.bf16.msra.mxu1 %v14708_v5 }
 0x612   :  { %v16241_v18 = vld [vmem:[#allocation2 + $0x26e8] sm:$0xf0] }
 0x613   :  { %v17509_v32 = vld [vmem:[#allocation2 + $0x13cc] sm:$0xf]  ;;  %v16244_v2 = vor.u32 %v18109_v53, %v16241_v18  ;;  %10158 = vmatpush.bf16.msra.mxu2 %v15476_v10 }
 0x614   :  { %v13841_v27 = vld [vmem:[#allocation2 + $0x1428] sm:$0xf0] }
 0x615   :  { %v17701_v56 = vld [vmem:[#allocation2 + $0x19cc] sm:$0xf]  ;;  %v13844_v24 = vor.u32 %v17509_v32, %v13841_v27  ;;  %10172 = vmatpush.bf16.msra.mxu3 %v16244_v2 }
 0x616   :  { %v14609_v3 = vld [vmem:[#allocation2 + $0x1a28] sm:$0xf0] }
 0x617   :  { %v17893_v21 = vld [vmem:[#allocation2 + $0x1fcc] sm:$0xf]  ;;  %v14612_v22 = vor.u32 %v17701_v56, %v14609_v3  ;;  %10131 = vmatpush.bf16.msra.mxu0 %v13844_v24  ;;  %v17258_v24 = vld [vmem:[#allocation2 + $0xbec] sm:$0xf0] }
 0x618   :  { %v15377_v48 = vld [vmem:[#allocation2 + $0x2028] sm:$0xf0] }
 0x619   :  { %v18085_v31 = vld [vmem:[#allocation2 + $0x25cc] sm:$0xf]  ;;  %v15380_v17 = vor.u32 %v17893_v21, %v15377_v48  ;;  %10145 = vmatpush.bf16.msra.mxu1 %v14612_v22  ;;  %v12023_v48 = vld [vmem:[#allocation2 + $0x590] sm:$0xf] }
 0x61a   :  { %v16145_v40 = vld [vmem:[#allocation2 + $0x2628] sm:$0xf0] }
 0x61b   :  { %v17485_v38 = vld [vmem:[#allocation2 + $0x130c] sm:$0xf]  ;;  %v16148_v63 = vor.u32 %v18085_v31, %v16145_v40  ;;  %10159 = vmatpush.bf16.msra.mxu2 %v15380_v17  ;;  %v12791_v31 = vld [vmem:[#allocation2 + $0xb90] sm:$0xf] }
 0x61c   :  { %v13745_v51 = vld [vmem:[#allocation2 + $0x1368] sm:$0xf0] }
 0x61d   :  { %v17677_v50 = vld [vmem:[#allocation2 + $0x190c] sm:$0xf]  ;;  %v13748_v33 = vor.u32 %v17485_v38, %v13745_v51  ;;  %10173 = vmatpush.bf16.msra.mxu3 %v16148_v63  ;;  %v17450_v38 = vld [vmem:[#allocation2 + $0x11ec] sm:$0xf0] }
 0x61e   :  { %v14513_v62 = vld [vmem:[#allocation2 + $0x1968] sm:$0xf0]  ;;  %v14327_v51 = vld [vmem:[#allocation2 + $0x1790] sm:$0xf] }
 0x61f   :  { %v17869_v1 = vld [vmem:[#allocation2 + $0x1f0c] sm:$0xf]  ;;  %v14516_v14 = vor.u32 %v17677_v50, %v14513_v62  ;;  %10132 = vmatpush.bf16.msra.mxu0 %v13748_v33  ;;  %v17642_v50 = vld [vmem:[#allocation2 + $0x17ec] sm:$0xf0]  ;;  %v12024_v62 = vor.u32 %v17066_v39, %v12023_v48 }
 0x620   :  { %v15281_v6 = vld [vmem:[#allocation2 + $0x1f68] sm:$0xf0]  ;;  %v14328_v33 = vor.u32 %v17642_v50, %v14327_v51  ;;  %v12599_v48 = vld [vmem:[#allocation2 + $0xa10] sm:$0xf]  ;;  %v19072_v50 = vpop.f32.mrf.mxu2 }
 0x621   :  { %v18061_v53 = vld [vmem:[#allocation2 + $0x250c] sm:$0xf]  ;;  %v15284_v10 = vor.u32 %v17869_v1, %v15281_v6  ;;  %10146 = vmatpush.bf16.msra.mxu1 %v14516_v14  ;;  %v9897_v1 = vpop.f32.mrf.mxu3  ;;  %v12792_v6 = vor.u32 %v17258_v24, %v12791_v31  ;;  %v19064_v14 = vpop.f32.mrf.mxu0  ;;  %v17210_v31 = vld [vmem:[#allocation2 + $0xa6c] sm:$0xf0]  ;;  %19501 = vst [vmem:[#allocation123_spill] sm:$0xff] %v19072_v50 }
 0x622   :  { %v16049_v18 = vld [vmem:[#allocation2 + $0x2568] sm:$0xf0]  ;;  %19499 = vst [vmem:[#allocation121_spill] sm:$0xff] %v19064_v14  ;;  %v17402_v24 = vld [vmem:[#allocation2 + $0x106c] sm:$0xf0] }
 0x623   :  { %v17461_v5 = vld [vmem:[#allocation2 + $0x124c] sm:$0xf]  ;;  %v16052_v30 = vor.u32 %v18061_v53, %v16049_v18  ;;  %10160 = vmatpush.bf16.msra.mxu2 %v15284_v10  ;;  %v13560_v53 = vor.u32 %v17450_v38, %v13559_v60  ;;  %v11927_v18 = vld [vmem:[#allocation2 + $0x4d0] sm:$0xf] }
 0x624   :  { %v13649_v46 = vld [vmem:[#allocation2 + $0x12a8] sm:$0xf0]  ;;  %v14231_v10 = vld [vmem:[#allocation2 + $0x16d0] sm:$0xf] }
 0x625   :  { %v17653_v32 = vld [vmem:[#allocation2 + $0x184c] sm:$0xf]  ;;  %v13652_v40 = vor.u32 %v17461_v5, %v13649_v46  ;;  %10174 = vmatpush.bf16.msra.mxu3 %v16052_v30  ;;  %v17234_v5 = vld [vmem:[#allocation2 + $0xb2c] sm:$0xf0] }
 0x626   :  { %v14417_v27 = vld [vmem:[#allocation2 + $0x18a8] sm:$0xf0]  ;;  %v13463_v46 = vld [vmem:[#allocation2 + $0x10d0] sm:$0xf]  ;;  %v12696_v30 = vor.u32 %v17234_v5, %v12695_v34  ;;  %v12600_v34 = vor.u32 %v17210_v31, %v12599_v48 }
 0x627   :  { %v17845_v56 = vld [vmem:[#allocation2 + $0x1e4c] sm:$0xf]  ;;  %v14420_v22 = vor.u32 %v17653_v32, %v14417_v27  ;;  %10133 = vmatpush.bf16.msra.mxu0 %v13652_v40  ;;  %v17618_v32 = vld [vmem:[#allocation2 + $0x172c] sm:$0xf0]  ;;  %v11928_v27 = vor.u32 %v17042_v59, %v11927_v18 }
 0x628   :  { %v15185_v2 = vld [vmem:[#allocation2 + $0x1ea8] sm:$0xf0]  ;;  %v14232_v39 = vor.u32 %v17618_v32, %v14231_v10  ;;  %v13367_v40 = vld [vmem:[#allocation2 + $0x1010] sm:$0xf] }
 0x629   :  { %v18037_v3 = vld [vmem:[#allocation2 + $0x244c] sm:$0xf]  ;;  %v15188_v17 = vor.u32 %v17845_v56, %v15185_v2  ;;  %10147 = vmatpush.bf16.msra.mxu1 %v14420_v22  ;;  %v19066_v56 = vpop.f32.mrf.mxu1  ;;  %v13464_v2 = vor.u32 %v17426_v54, %v13463_v46  ;;  %v14135_v59 = vld [vmem:[#allocation2 + $0x1610] sm:$0xf]  ;;  %v13368_v38 = vor.u32 %v17402_v24, %v13367_v40 }
 0x62a   :  { %v15953_v21 = vld [vmem:[#allocation2 + $0x24a8] sm:$0xf0]  ;;  %19500 = vst [vmem:[#allocation122_spill] sm:$0xff] %v19066_v56  ;;  %10134 = vmatmul.bf16.vlgmr.msra.gmra.mxu0 %v18549_v23  ;;  %v17594_v60 = vld [vmem:[#allocation2 + $0x166c] sm:$0xf0] }
 0x62b   :  { %v15956_v63 = vor.u32 %v18037_v3, %v15953_v21  ;;  %10161 = vmatpush.bf16.msra.mxu2 %v15188_v17  ;;  %10182 = vmatpush.bf16.msrb.mxu0 %v12024_v62  ;;  %v11831_v3 = vld [vmem:[#allocation2 + $0x410] sm:$0xf]  ;;  %v19074_v62 = vpop.f32.mrf.mxu3 }
 0x62c   :  { %v17018_v21 = vld [vmem:[#allocation2 + $0x46c] sm:$0xf0]  ;;  %10148 = vmatmul.bf16.vlgmr.msra.gmra.mxu1 %v18570_v37  ;;  %19502 = vst [vmem:[#allocation124_spill] sm:$0xff] %v19074_v62 }
 0x62d   :  { %10175 = vmatpush.bf16.msra.mxu3 %v15956_v63  ;;  %10196 = vmatpush.bf16.msrb.mxu1 %v12792_v6  ;;  %v11832_v54 = vor.u32 %v17018_v21, %v11831_v3  ;;  %v11735_v22 = vld [vmem:[#allocation2 + $0x350] sm:$0xf]  ;;  %v14136_v63 = vor.u32 %v17594_v60, %v14135_v59 }
 0x62e   :  { %10162 = vmatmul.bf16.vlgmr.msra.gmra.mxu2 %v18574_v42  ;;  %v16994_v17 = vld [vmem:[#allocation2 + $0x3ac] sm:$0xf0] }
 0x62f   :  { %10210 = vmatpush.bf16.msrb.mxu2 %v13560_v53  ;;  %10183 = vmatpush.bf16.msrb.mxu0 %v11928_v27  ;;  %v12503_v51 = vld [vmem:[#allocation2 + $0x950] sm:$0xf]  ;;  %v11736_v32 = vor.u32 %v16994_v17, %v11735_v22 }
 0x630   :  { %10176 = vmatmul.bf16.vlgmr.msra.gmra.mxu3 %v18572_v41  ;;  %v17186_v6 = vld [vmem:[#allocation2 + $0x9ac] sm:$0xf0] }
 0x631   :  { %10224 = vmatpush.bf16.msrb.mxu3 %v14328_v33  ;;  %10197 = vmatpush.bf16.msrb.mxu1 %v12696_v30  ;;  %v13271_v53 = vld [vmem:[#allocation2 + $0xf50] sm:$0xf]  ;;  %v9911_v33 = vpop.f32.mrf.mxu0  ;;  %v12504_v27 = vor.u32 %v17186_v6, %v12503_v51  ;;  %v9939_v6 = vpop.f32.mrf.mxu2 }
 0x632   :  { %v17378_v18 = vld [vmem:[#allocation2 + $0xfac] sm:$0xf0]  ;;  %v9912_v10 = vadd.f32 %v9911_v33, %v9897_v1 }
 0x633   :  { %10211 = vmatpush.bf16.msrb.mxu2 %v13464_v2  ;;  %v14039_v5 = vld [vmem:[#allocation2 + $0x1550] sm:$0xf]  ;;  %10184 = vmatpush.bf16.msrb.mxu0 %v11832_v54  ;;  %v13272_v30 = vor.u32 %v17378_v18, %v13271_v53  ;;  %v9925_v2 = vpop.f32.mrf.mxu1 }
 0x634   :  { %v17570_v46 = vld [vmem:[#allocation2 + $0x15ac] sm:$0xf0]  ;;  %v9926_v31 = vadd.f32 %v9925_v2, %v9912_v10  ;;  %v9953_v10 = vpop.f32.mrf.mxu3 }
 0x635   :  { %10225 = vmatpush.bf16.msrb.mxu3 %v14232_v39  ;;  %10198 = vmatpush.bf16.msrb.mxu1 %v12600_v34  ;;  %v11639_v3 = vld [vmem:[#allocation2 + $0x290] sm:$0xf]  ;;  %v14040_v39 = vor.u32 %v17570_v46, %v14039_v5 }
 0x636   :  { %v16970_v21 = vld [vmem:[#allocation2 + $0x2ec] sm:$0xf0]  ;;  %v9940_v33 = vadd.f32 %v9939_v6, %v9926_v31 }
 0x637   :  { %10212 = vmatpush.bf16.msrb.mxu2 %v13368_v38  ;;  %v12407_v48 = vld [vmem:[#allocation2 + $0x890] sm:$0xf]  ;;  %10185 = vmatpush.bf16.msrb.mxu0 %v11736_v32  ;;  %v11640_v54 = vor.u32 %v16970_v21, %v11639_v3 }
 0x638   :  { %v17162_v40 = vld [vmem:[#allocation2 + $0x8ec] sm:$0xf0] }
 0x639   :  { %10226 = vmatpush.bf16.msrb.mxu3 %v14136_v63  ;;  %v13175_v24 = vld [vmem:[#allocation2 + $0xe90] sm:$0xf]  ;;  %10199 = vmatpush.bf16.msrb.mxu1 %v12504_v27  ;;  %v12408_v1 = vor.u32 %v17162_v40, %v12407_v48  ;;  %v19076_v27 = vadd.f32 %v9953_v10, %v9940_v33  ;;  %v19078_v9 = vpop.f32.mrf.mxu0 }
 0x63a   :  { %v17354_v59 = vld [vmem:[#allocation2 + $0xeec] sm:$0xf0]  ;;  %19503 = vst [vmem:[#allocation125_spill] sm:$0xff] %v19078_v9 }
 0x63b   :  { %v13943_v60 = vld [vmem:[#allocation2 + $0x1490] sm:$0xf]  ;;  %10213 = vmatpush.bf16.msrb.mxu2 %v13272_v30  ;;  %v13176_v34 = vor.u32 %v17354_v59, %v13175_v24  ;;  %10186 = vmatpush.bf16.msrb.mxu0 %v11640_v54 }
 0x63c   :  { %v17546_v62 = vld [vmem:[#allocation2 + $0x14ec] sm:$0xf0] }
 0x63d   :  { %v11543_v38 = vld [vmem:[#allocation2 + $0x1d0] sm:$0xf]  ;;  %10227 = vmatpush.bf16.msrb.mxu3 %v14040_v39  ;;  %v13944_v51 = vor.u32 %v17546_v62, %v13943_v60  ;;  %10200 = vmatpush.bf16.msrb.mxu1 %v12408_v1 }
 0x63e   :  { %v16946_v22 = vld [vmem:[#allocation2 + $0x22c] sm:$0xf0] }
 0x63f   :  { %v12311_v17 = vld [vmem:[#allocation2 + $0x7d0] sm:$0xf]  ;;  %v11544_v32 = vor.u32 %v16946_v22, %v11543_v38  ;;  %10214 = vmatpush.bf16.msrb.mxu2 %v13176_v34 }
 0x640   :  { %v17138_v63 = vld [vmem:[#allocation2 + $0x82c] sm:$0xf0] }
 0x641   :  { %v13079_v53 = vld [vmem:[#allocation2 + $0xdd0] sm:$0xf]  ;;  %v12312_v30 = vor.u32 %v17138_v63, %v12311_v17  ;;  %10228 = vmatpush.bf16.msrb.mxu3 %v13944_v51  ;;  %10187 = vmatpush.bf16.msrb.mxu0 %v11544_v32 }
 0x642   :  { %v17330_v18 = vld [vmem:[#allocation2 + $0xe2c] sm:$0xf0] }
 0x643   :  { %v13847_v5 = vld [vmem:[#allocation2 + $0x13d0] sm:$0xf]  ;;  %v13080_v2 = vor.u32 %v17330_v18, %v13079_v53  ;;  %10201 = vmatpush.bf16.msrb.mxu1 %v12312_v30 }
 0x644   :  { %v17522_v46 = vld [vmem:[#allocation2 + $0x142c] sm:$0xf0] }
 0x645   :  { %v11447_v3 = vld [vmem:[#allocation2 + $0x110] sm:$0xf]  ;;  %v13848_v62 = vor.u32 %v17522_v46, %v13847_v5  ;;  %10215 = vmatpush.bf16.msrb.mxu2 %v13080_v2 }
 0x646   :  { %v16922_v21 = vld [vmem:[#allocation2 + $0x16c] sm:$0xf0] }
 0x647   :  { %v12215_v48 = vld [vmem:[#allocation2 + $0x710] sm:$0xf]  ;;  %v11448_v60 = vor.u32 %v16922_v21, %v11447_v3  ;;  %10229 = vmatpush.bf16.msrb.mxu3 %v13848_v62 }
 0x648   :  { %v17114_v39 = vld [vmem:[#allocation2 + $0x76c] sm:$0xf0] }
 0x649   :  { %v12983_v40 = vld [vmem:[#allocation2 + $0xd10] sm:$0xf]  ;;  %v12216_v1 = vor.u32 %v17114_v39, %v12215_v48  ;;  %10188 = vmatpush.bf16.msrb.mxu0 %v11448_v60  ;;  %v17054_v48 = vld [vmem:[#allocation2 + $0x594] sm:$0xf] }
 0x64a   :  { %v17306_v24 = vld [vmem:[#allocation2 + $0xd6c] sm:$0xf0]  ;;  %v12025_v39 = vld [vmem:[#allocation2 + $0x5f0] sm:$0xf0] }
 0x64b   :  { %v13751_v31 = vld [vmem:[#allocation2 + $0x1310] sm:$0xf]  ;;  %v12984_v34 = vor.u32 %v17306_v24, %v12983_v40  ;;  %10202 = vmatpush.bf16.msrb.mxu1 %v12216_v1  ;;  %v12028_v60 = vor.u32 %v17054_v48, %v12025_v39  ;;  %v17030_v1 = vld [vmem:[#allocation2 + $0x4d4] sm:$0xf]  ;;  %v19086_v48 = vpop.f32.mrf.mxu2 }
 0x64c   :  { %v17498_v59 = vld [vmem:[#allocation2 + $0x136c] sm:$0xf0]  ;;  %19505 = vst [vmem:[#allocation127_spill] sm:$0xff] %v19086_v48 }
 0x64d   :  { %v11351_v54 = vld [vmem:[#allocation2 + $0x50] sm:$0xf]  ;;  %v13752_v63 = vor.u32 %v17498_v59, %v13751_v31  ;;  %10216 = vmatpush.bf16.msrb.mxu2 %v12984_v34  ;;  %v11929_v34 = vld [vmem:[#allocation2 + $0x530] sm:$0xf0] }
 0x64e   :  { %v16898_v38 = vld [vmem:[#allocation2 + $0xac] sm:$0xf0] }
 0x64f   :  { %v12119_v22 = vld [vmem:[#allocation2 + $0x650] sm:$0xf]  ;;  %v11352_v10 = vor.u32 %v16898_v38, %v11351_v54  ;;  %10230 = vmatpush.bf16.msrb.mxu3 %v13752_v63 }
 0x650   :  { %v17090_v17 = vld [vmem:[#allocation2 + $0x6ac] sm:$0xf0] }
 0x651   :  { %v12887_v6 = vld [vmem:[#allocation2 + $0xc50] sm:$0xf]  ;;  %v12120_v30 = vor.u32 %v17090_v17, %v12119_v22  ;;  %10189 = vmatpush.bf16.msrb.mxu0 %v11352_v10  ;;  %v19080_v22 = vpop.f32.mrf.mxu1 }
 0x652   :  { %v17282_v51 = vld [vmem:[#allocation2 + $0xcac] sm:$0xf0]  ;;  %19504 = vst [vmem:[#allocation126_spill] sm:$0xff] %v19080_v22  ;;  %v17043_v22 = vld [vmem:[#allocation2 + $0x534] sm:$0xf0] }
 0x653   :  { %v13655_v53 = vld [vmem:[#allocation2 + $0x1250] sm:$0xf]  ;;  %v12888_v2 = vor.u32 %v17282_v51, %v12887_v6  ;;  %10203 = vmatpush.bf16.msrb.mxu1 %v12120_v30 }
 0x654   :  { %v17474_v18 = vld [vmem:[#allocation2 + $0x12ac] sm:$0xf0]  ;;  %10190 = vmatmul.bf16.vlgmr.msrb.gmra.mxu0 %v18525_v57 }
 0x655   :  { %v15095_v33 = vld [vmem:[#allocation2 + $0x1d90] sm:$0xf]  ;;  %v13656_v62 = vor.u32 %v17474_v18, %v13655_v53  ;;  %10217 = vmatpush.bf16.msrb.mxu2 %v12888_v2 }
 0x656   :  { %v17834_v5 = vld [vmem:[#allocation2 + $0x1dec] sm:$0xf0]  ;;  %10204 = vmatmul.bf16.vlgmr.msrb.gmra.mxu1 %v18540_v11 }
 0x657   :  { %v15863_v46 = vld [vmem:[#allocation2 + $0x2390] sm:$0xf]  ;;  %v15096_v40 = vor.u32 %v17834_v5, %v15095_v33  ;;  %10231 = vmatpush.bf16.msrb.mxu3 %v13656_v62  ;;  %v11932_v33 = vor.u32 %v17030_v1, %v11929_v34 }
 0x658   :  { %v18026_v32 = vld [vmem:[#allocation2 + $0x23ec] sm:$0xf0]  ;;  %10218 = vmatmul.bf16.vlgmr.msrb.gmra.mxu2 %v18530_v0 }
 0x659   :  { %v16631_v3 = vld [vmem:[#allocation2 + $0x2990] sm:$0xf]  ;;  %v15864_v24 = vor.u32 %v18026_v32, %v15863_v46  ;;  %10238 = vmatpush.bf16.msra.mxu0 %v15096_v40  ;;  %v17006_v32 = vld [vmem:[#allocation2 + $0x414] sm:$0xf]  ;;  %v9981_v34 = vpop.f32.mrf.mxu1 }
 0x65a   :  { %v18218_v21 = vld [vmem:[#allocation2 + $0x29ec] sm:$0xf0]  ;;  %10232 = vmatmul.bf16.vlgmr.msrb.gmra.mxu3 %v18549_v23 }
 0x65b   :  { %v16632_v31 = vor.u32 %v18218_v21, %v16631_v3  ;;  %v14999_v59 = vld [vmem:[#allocation2 + $0x1cd0] sm:$0xf]  ;;  %10252 = vmatpush.bf16.msra.mxu1 %v15864_v24  ;;  %10280 = vmatpush.bf16.msra.mxu3 %v12028_v60  ;;  %v11833_v3 = vld [vmem:[#allocation2 + $0x470] sm:$0xf0] }
 0x65c   :  { %v17810_v50 = vld [vmem:[#allocation2 + $0x1d2c] sm:$0xf0]  ;;  %v11836_v39 = vor.u32 %v17006_v32, %v11833_v3  ;;  %v16982_v60 = vld [vmem:[#allocation2 + $0x354] sm:$0xf] }
 0x65d   :  { %v15767_v56 = vld [vmem:[#allocation2 + $0x22d0] sm:$0xf]  ;;  %v15000_v17 = vor.u32 %v17810_v50, %v14999_v59  ;;  %10266 = vmatpush.bf16.msra.mxu2 %v16632_v31  ;;  %v19088_v31 = vpop.f32.mrf.mxu3  ;;  %v9967_v59 = vpop.f32.mrf.mxu0  ;;  %v16958_v32 = vld [vmem:[#allocation2 + $0x294] sm:$0xf] }
 0x65e   :  { %v18002_v54 = vld [vmem:[#allocation2 + $0x232c] sm:$0xf0]  ;;  %19506 = vst [vmem:[#allocation128_spill] sm:$0xff] %v19088_v31  ;;  %v11641_v3 = vld [vmem:[#allocation2 + $0x2f0] sm:$0xf0] }
 0x65f   :  { %v16535_v38 = vld [vmem:[#allocation2 + $0x28d0] sm:$0xf]  ;;  %v15768_v6 = vor.u32 %v18002_v54, %v15767_v56  ;;  %10239 = vmatpush.bf16.msra.mxu0 %v15000_v17  ;;  %10281 = vmatpush.bf16.msra.mxu3 %v11932_v33  ;;  %v11737_v54 = vld [vmem:[#allocation2 + $0x3b0] sm:$0xf0] }
 0x660   :  { %v18194_v14 = vld [vmem:[#allocation2 + $0x292c] sm:$0xf0]  ;;  %v14233_v31 = vld [vmem:[#allocation2 + $0x1730] sm:$0xf0] }
 0x661   :  { %v16536_v63 = vor.u32 %v18194_v14, %v16535_v38  ;;  %v14903_v51 = vld [vmem:[#allocation2 + $0x1c10] sm:$0xf]  ;;  %10253 = vmatpush.bf16.msra.mxu1 %v15768_v6  ;;  %v9968_v38 = vadd.f32 %v9967_v59, %v19076_v27  ;;  %v19507_v27 = vmax.f32 %v18743_v26, %v18909_v4 }
 0x662   :  { %v17786_v53 = vld [vmem:[#allocation2 + $0x1c6c] sm:$0xf0] }
 0x663   :  { %v15671_v18 = vld [vmem:[#allocation2 + $0x2210] sm:$0xf]  ;;  %v14904_v50 = vor.u32 %v17786_v53, %v14903_v51  ;;  %10267 = vmatpush.bf16.msra.mxu2 %v16536_v63  ;;  %10282 = vmatpush.bf16.msra.mxu3 %v11836_v39  ;;  %v9982_v33 = vadd.f32 %v9981_v34, %v9968_v38  ;;  %v9995_v38 = vpop.f32.mrf.mxu2 }
 0x664   :  { %v17978_v5 = vld [vmem:[#allocation2 + $0x226c] sm:$0xf0] }
 0x665   :  { %v16439_v46 = vld [vmem:[#allocation2 + $0x2810] sm:$0xf]  ;;  %v15672_v14 = vor.u32 %v17978_v5, %v15671_v18  ;;  %10240 = vmatpush.bf16.msra.mxu0 %v14904_v50  ;;  %v11740_v18 = vor.u32 %v16982_v60, %v11737_v54  ;;  %v19094_v50 = vmax.f32 %v19507_v27, %v9982_v33  ;;  %v16934_v60 = vld [vmem:[#allocation2 + $0x1d4] sm:$0xf]  ;;  %v19098_v48 = vpop.f32.mrf.mxu0 }
 0x666   :  { %v18170_v10 = vld [vmem:[#allocation2 + $0x286c] sm:$0xf0]  ;;  %v11545_v54 = vld [vmem:[#allocation2 + $0x230] sm:$0xf0]  ;;  %19509 = vst [vmem:[#allocation130_spill] sm:$0xff] %v19098_v48 }
 0x667   :  { %v16440_v56 = vor.u32 %v18170_v10, %v16439_v46  ;;  %v14807_v21 = vld [vmem:[#allocation2 + $0x1b50] sm:$0xf]  ;;  %10254 = vmatpush.bf16.msra.mxu1 %v15672_v14  ;;  %19508 = vst [vmem:[#allocation129_spill] sm:$0xff] %v19094_v50  ;;  %10283 = vmatpush.bf16.msra.mxu3 %v11740_v18  ;;  %v17414_v50 = vld [vmem:[#allocation2 + $0x10d4] sm:$0xf] }
 0x668   :  { %v17762_v30 = vld [vmem:[#allocation2 + $0x1bac] sm:$0xf0]  ;;  %v11935_v48 = vld [vmem:[#allocation2 + $0x4d8] sm:$0xf] }
 0x669   :  { %v15575_v2 = vld [vmem:[#allocation2 + $0x2150] sm:$0xf]  ;;  %v14808_v1 = vor.u32 %v17762_v30, %v14807_v21  ;;  %10268 = vmatpush.bf16.msra.mxu2 %v16440_v56 }
 0x66a   :  { %v17954_v62 = vld [vmem:[#allocation2 + $0x21ac] sm:$0xf0] }
 0x66b   :  { %v16343_v40 = vld [vmem:[#allocation2 + $0x2750] sm:$0xf]  ;;  %v15576_v17 = vor.u32 %v17954_v62, %v15575_v2  ;;  %10241 = vmatpush.bf16.msra.mxu0 %v14808_v1  ;;  %v11644_v62 = vor.u32 %v16958_v32, %v11641_v3  ;;  %v10009_v1 = vpop.f32.mrf.mxu3 }
 0x66c   :  { %v18146_v24 = vld [vmem:[#allocation2 + $0x27ac] sm:$0xf0]  ;;  %v19096_v4 = vadd.f32 %v10009_v1, %v9995_v38  ;;  %v13561_v1 = vld [vmem:[#allocation2 + $0x11f0] sm:$0xf0] }
 0x66d   :  { %v16344_v6 = vor.u32 %v18146_v24, %v16343_v40  ;;  %v14711_v63 = vld [vmem:[#allocation2 + $0x1a90] sm:$0xf]  ;;  %10255 = vmatpush.bf16.msra.mxu1 %v15576_v17  ;;  %10284 = vmatpush.bf16.msra.mxu3 %v11644_v62 }
 0x66e   :  { %v17738_v51 = vld [vmem:[#allocation2 + $0x1aec] sm:$0xf0] }
 0x66f   :  { %v15479_v53 = vld [vmem:[#allocation2 + $0x2090] sm:$0xf]  ;;  %v14712_v14 = vor.u32 %v17738_v51, %v14711_v63  ;;  %10269 = vmatpush.bf16.msra.mxu2 %v16344_v6 }
 0x670   :  { %v17930_v5 = vld [vmem:[#allocation2 + $0x20ec] sm:$0xf0] }
 0x671   :  { %v16247_v46 = vld [vmem:[#allocation2 + $0x2690] sm:$0xf]  ;;  %v15480_v56 = vor.u32 %v17930_v5, %v15479_v53  ;;  %10242 = vmatpush.bf16.msra.mxu0 %v14712_v14  ;;  %v11548_v53 = vor.u32 %v16934_v60, %v11545_v54  ;;  %v12793_v60 = vld [vmem:[#allocation2 + $0xbf0] sm:$0xf0] }
 0x672   :  { %v18122_v10 = vld [vmem:[#allocation2 + $0x26ec] sm:$0xf0]  ;;  %v17438_v54 = vld [vmem:[#allocation2 + $0x1194] sm:$0xf] }
 0x673   :  { %v16248_v21 = vor.u32 %v18122_v10, %v16247_v46  ;;  %v14615_v30 = vld [vmem:[#allocation2 + $0x19d0] sm:$0xf]  ;;  %10256 = vmatpush.bf16.msra.mxu1 %v15480_v56  ;;  %v16910_v46 = vld [vmem:[#allocation2 + $0x114] sm:$0xf]  ;;  %10285 = vmatpush.bf16.msra.mxu3 %v11548_v53 }
 0x674   :  { %v17714_v2 = vld [vmem:[#allocation2 + $0x1a2c] sm:$0xf0]  ;;  %v11449_v10 = vld [vmem:[#allocation2 + $0x170] sm:$0xf0] }
 0x675   :  { %v15383_v39 = vld [vmem:[#allocation2 + $0x1fd0] sm:$0xf]  ;;  %v14616_v26 = vor.u32 %v17714_v2, %v14615_v30  ;;  %10270 = vmatpush.bf16.msra.mxu2 %v16248_v21 }
 0x676   :  { %v17906_v40 = vld [vmem:[#allocation2 + $0x202c] sm:$0xf0] }
 0x677   :  { %v16151_v24 = vld [vmem:[#allocation2 + $0x25d0] sm:$0xf]  ;;  %v15384_v34 = vor.u32 %v17906_v40, %v15383_v39  ;;  %10243 = vmatpush.bf16.msra.mxu0 %v14616_v26  ;;  %v11452_v39 = vor.u32 %v16910_v46, %v11449_v10  ;;  %v16886_v40 = vld [vmem:[#allocation2 + $0x54] sm:$0xf] }
 0x678   :  { %v18098_v59 = vld [vmem:[#allocation2 + $0x262c] sm:$0xf0]  ;;  %v17630_v26 = vld [vmem:[#allocation2 + $0x1794] sm:$0xf] }
 0x679   :  { %v16152_v17 = vor.u32 %v18098_v59, %v16151_v24  ;;  %v14519_v6 = vld [vmem:[#allocation2 + $0x1910] sm:$0xf]  ;;  %10257 = vmatpush.bf16.msra.mxu1 %v15384_v34  ;;  %v11353_v24 = vld [vmem:[#allocation2 + $0xb0] sm:$0xf0]  ;;  %10286 = vmatpush.bf16.msra.mxu3 %v11452_v39 }
 0x67a   :  { %v17690_v63 = vld [vmem:[#allocation2 + $0x196c] sm:$0xf0]  ;;  %v17246_v59 = vld [vmem:[#allocation2 + $0xb94] sm:$0xf]  ;;  %v11356_v53 = vor.u32 %v16886_v40, %v11353_v24 }
 0x67b   :  { %v15287_v51 = vld [vmem:[#allocation2 + $0x1f10] sm:$0xf]  ;;  %v14520_v32 = vor.u32 %v17690_v63, %v14519_v6  ;;  %10271 = vmatpush.bf16.msra.mxu2 %v16152_v17  ;;  %v14329_v6 = vld [vmem:[#allocation2 + $0x17f0] sm:$0xf0] }
 0x67c   :  { %v17882_v18 = vld [vmem:[#allocation2 + $0x1f6c] sm:$0xf0]  ;;  %v17822_v63 = vld [vmem:[#allocation2 + $0x1d94] sm:$0xf] }
 0x67d   :  { %v16055_v33 = vld [vmem:[#allocation2 + $0x2510] sm:$0xf]  ;;  %v15288_v14 = vor.u32 %v17882_v18, %v15287_v51  ;;  %10244 = vmatpush.bf16.msra.mxu0 %v14520_v32  ;;  %v15097_v51 = vld [vmem:[#allocation2 + $0x1df0] sm:$0xf0]  ;;  %v12796_v18 = vor.u32 %v17246_v59, %v12793_v60  ;;  %10287 = vmatpush.bf16.msra.mxu3 %v11356_v53 }
 0x67e   :  { %v18074_v5 = vld [vmem:[#allocation2 + $0x256c] sm:$0xf0]  ;;  %v17222_v46 = vld [vmem:[#allocation2 + $0xad4] sm:$0xf]  ;;  %v15100_v32 = vor.u32 %v17822_v63, %v15097_v51 }
 0x67f   :  { %v14423_v3 = vld [vmem:[#allocation2 + $0x1850] sm:$0xf]  ;;  %v16056_v56 = vor.u32 %v18074_v5, %v16055_v33  ;;  %10258 = vmatpush.bf16.msra.mxu1 %v15288_v14  ;;  %v13564_v33 = vor.u32 %v17438_v54, %v13561_v1  ;;  %v14332_v5 = vor.u32 %v17630_v26, %v14329_v6  ;;  %v12697_v10 = vld [vmem:[#allocation2 + $0xb30] sm:$0xf0] }
 0x680   :  { %v17666_v27 = vld [vmem:[#allocation2 + $0x18ac] sm:$0xf0]  ;;  %v17798_v14 = vld [vmem:[#allocation2 + $0x1cd4] sm:$0xf]  ;;  %10288 = vmatmul.bf16.vlgmr.msra.gmra.mxu3 %v18525_v57 }
 0x681   :  { %v15191_v21 = vld [vmem:[#allocation2 + $0x1e50] sm:$0xf]  ;;  %v14424_v38 = vor.u32 %v17666_v27, %v14423_v3  ;;  %10272 = vmatpush.bf16.msra.mxu2 %v16056_v56  ;;  %v13465_v3 = vld [vmem:[#allocation2 + $0x1130] sm:$0xf0]  ;;  %10336 = vmatpush.bf16.msrb.mxu3 %v15100_v32 }
 0x682   :  { %v17858_v30 = vld [vmem:[#allocation2 + $0x1eac] sm:$0xf0]  ;;  %v17606_v27 = vld [vmem:[#allocation2 + $0x16d4] sm:$0xf] }
 0x683   :  { %v15959_v2 = vld [vmem:[#allocation2 + $0x2450] sm:$0xf]  ;;  %v15192_v34 = vor.u32 %v17858_v30, %v15191_v21  ;;  %10245 = vmatpush.bf16.msra.mxu0 %v14424_v38  ;;  %v15001_v56 = vld [vmem:[#allocation2 + $0x1d30] sm:$0xf0]  ;;  %v12700_v21 = vor.u32 %v17222_v46, %v12697_v10  ;;  %v19100_v30 = vpop.f32.mrf.mxu1  ;;  %v14236_v39 = vor.u32 %v17606_v27, %v14233_v31  ;;  %v10023_v46 = vpop.f32.mrf.mxu0 }
 0x684   :  { %v18050_v62 = vld [vmem:[#allocation2 + $0x24ac] sm:$0xf0]  ;;  %19510 = vst [vmem:[#allocation131_spill] sm:$0xff] %v19100_v30  ;;  %v12601_v40 = vld [vmem:[#allocation2 + $0xa70] sm:$0xf0]  ;;  %v15004_v59 = vor.u32 %v17798_v14, %v15001_v56 }
 0x685   :  { %v15960_v17 = vor.u32 %v18050_v62, %v15959_v2  ;;  %10259 = vmatpush.bf16.msra.mxu1 %v15192_v34  ;;  %v13468_v2 = vor.u32 %v17414_v50, %v13465_v3  ;;  %v17198_v62 = vld [vmem:[#allocation2 + $0xa14] sm:$0xf]  ;;  %v19105_v50 = vpop.f32.mrf.mxu2  ;;  %v10024_v3 = vadd.f32 %v10023_v46, %v19096_v4 }
 0x686   :  { %v17390_v24 = vld [vmem:[#allocation2 + $0x1014] sm:$0xf]  ;;  %10246 = vmatmul.bf16.vlgmr.msra.gmra.mxu0 %v18570_v37  ;;  %v12604_v6 = vor.u32 %v17198_v62, %v12601_v40  ;;  %10337 = vmatpush.bf16.msrb.mxu3 %v15004_v59 }
 0x687   :  { %10273 = vmatpush.bf16.msra.mxu2 %v15960_v17  ;;  %10294 = vmatpush.bf16.msrb.mxu0 %v12796_v18  ;;  %v13369_v60 = vld [vmem:[#allocation2 + $0x1070] sm:$0xf0] }
 0x688   :  { %v17582_v54 = vld [vmem:[#allocation2 + $0x1614] sm:$0xf]  ;;  %10260 = vmatmul.bf16.vlgmr.msra.gmra.mxu1 %v18574_v42  ;;  %v13372_v31 = vor.u32 %v17390_v24, %v13369_v60 }
 0x689   :  { %10308 = vmatpush.bf16.msrb.mxu1 %v13564_v33  ;;  %v14137_v38 = vld [vmem:[#allocation2 + $0x1670] sm:$0xf0] }
 0x68a   :  { %10274 = vmatmul.bf16.vlgmr.msra.gmra.mxu2 %v18572_v41  ;;  %v17774_v1 = vld [vmem:[#allocation2 + $0x1c14] sm:$0xf]  ;;  %v14140_v34 = vor.u32 %v17582_v54, %v14137_v38 }
 0x68b   :  { %10322 = vmatpush.bf16.msrb.mxu2 %v14332_v5  ;;  %v14905_v26 = vld [vmem:[#allocation2 + $0x1c70] sm:$0xf0]  ;;  %10295 = vmatpush.bf16.msrb.mxu0 %v12700_v21  ;;  %v10037_v21 = vpop.f32.mrf.mxu1  ;;  %v19113_v9 = vpop.f32.mrf.mxu0 }
 0x68c   :  { %v17174_v17 = vld [vmem:[#allocation2 + $0x954] sm:$0xf]  ;;  %v14908_v53 = vor.u32 %v17774_v1, %v14905_v26  ;;  %v10038_v24 = vadd.f32 %v10037_v21, %v10024_v3 }
 0x68d   :  { %10309 = vmatpush.bf16.msrb.mxu1 %v13468_v2  ;;  %v12505_v63 = vld [vmem:[#allocation2 + $0x9b0] sm:$0xf0] }
 0x68e   :  { %v17366_v51 = vld [vmem:[#allocation2 + $0xf54] sm:$0xf]  ;;  %v12508_v27 = vor.u32 %v17174_v17, %v12505_v63  ;;  %10338 = vmatpush.bf16.msrb.mxu3 %v14908_v53 }
 0x68f   :  { %10323 = vmatpush.bf16.msrb.mxu2 %v14236_v39  ;;  %v13273_v18 = vld [vmem:[#allocation2 + $0xfb0] sm:$0xf0]  ;;  %10296 = vmatpush.bf16.msrb.mxu0 %v12604_v6 }
 0x690   :  { %v17558_v33 = vld [vmem:[#allocation2 + $0x1554] sm:$0xf]  ;;  %v13276_v14 = vor.u32 %v17366_v51, %v13273_v18  ;;  %v10051_v51 = vpop.f32.mrf.mxu2 }
 0x691   :  { %v14041_v5 = vld [vmem:[#allocation2 + $0x15b0] sm:$0xf0]  ;;  %10310 = vmatpush.bf16.msrb.mxu1 %v13372_v31 }
 0x692   :  { %v17750_v10 = vld [vmem:[#allocation2 + $0x1b54] sm:$0xf]  ;;  %v14044_v56 = vor.u32 %v17558_v33, %v14041_v5  ;;  %v19109_v5 = vadd.f32 %v10051_v51, %v10038_v24 }
 0x693   :  { %v14809_v32 = vld [vmem:[#allocation2 + $0x1bb0] sm:$0xf0]  ;;  %10324 = vmatpush.bf16.msrb.mxu2 %v14140_v34  ;;  %10297 = vmatpush.bf16.msrb.mxu0 %v12508_v27 }
 0x694   :  { %v17150_v2 = vld [vmem:[#allocation2 + $0x894] sm:$0xf]  ;;  %v14812_v40 = vor.u32 %v17750_v10, %v14809_v32 }
 0x695   :  { %v12409_v39 = vld [vmem:[#allocation2 + $0x8f0] sm:$0xf0]  ;;  %10311 = vmatpush.bf16.msrb.mxu1 %v13276_v14 }
 0x696   :  { %v17342_v62 = vld [vmem:[#allocation2 + $0xe94] sm:$0xf]  ;;  %v12412_v26 = vor.u32 %v17150_v2, %v12409_v39  ;;  %10339 = vmatpush.bf16.msrb.mxu3 %v14812_v40 }
 0x697   :  { %v13177_v59 = vld [vmem:[#allocation2 + $0xef0] sm:$0xf0]  ;;  %10325 = vmatpush.bf16.msrb.mxu2 %v14044_v56 }
 0x698   :  { %v17534_v60 = vld [vmem:[#allocation2 + $0x1494] sm:$0xf]  ;;  %v13180_v4 = vor.u32 %v17342_v62, %v13177_v59  ;;  %10298 = vmatpush.bf16.msrb.mxu0 %v12412_v26 }
 0x699   :  { %v13945_v54 = vld [vmem:[#allocation2 + $0x14f0] sm:$0xf0] }
 0x69a   :  { %v17726_v38 = vld [vmem:[#allocation2 + $0x1a94] sm:$0xf]  ;;  %v13948_v6 = vor.u32 %v17534_v60, %v13945_v54  ;;  %10312 = vmatpush.bf16.msrb.mxu1 %v13180_v4 }
 0x69b   :  { %v14713_v1 = vld [vmem:[#allocation2 + $0x1af0] sm:$0xf0] }
 0x69c   :  { %v17126_v31 = vld [vmem:[#allocation2 + $0x7d4] sm:$0xf]  ;;  %v14716_v63 = vor.u32 %v17726_v38, %v14713_v1  ;;  %10326 = vmatpush.bf16.msrb.mxu2 %v13948_v6 }
 0x69d   :  { %v12313_v34 = vld [vmem:[#allocation2 + $0x830] sm:$0xf0] }
 0x69e   :  { %v17318_v17 = vld [vmem:[#allocation2 + $0xdd4] sm:$0xf]  ;;  %v12316_v32 = vor.u32 %v17126_v31, %v12313_v34  ;;  %10340 = vmatpush.bf16.msrb.mxu3 %v14716_v63 }
 0x69f   :  { %v13081_v53 = vld [vmem:[#allocation2 + $0xe30] sm:$0xf0] }
 0x6a0   :  { %v17510_v18 = vld [vmem:[#allocation2 + $0x13d4] sm:$0xf]  ;;  %v13084_v3 = vor.u32 %v17318_v17, %v13081_v53  ;;  %10299 = vmatpush.bf16.msrb.mxu0 %v12316_v32  ;;  %v12031_v32 = vld [vmem:[#allocation2 + $0x598] sm:$0xf] }
 0x6a1   :  { %v13849_v33 = vld [vmem:[#allocation2 + $0x1430] sm:$0xf0] }
 0x6a2   :  { %v17702_v46 = vld [vmem:[#allocation2 + $0x19d4] sm:$0xf]  ;;  %v13852_v27 = vor.u32 %v17510_v18, %v13849_v33  ;;  %10313 = vmatpush.bf16.msrb.mxu1 %v13084_v3  ;;  %v19111_v3 = vpop.f32.mrf.mxu3 }
 0x6a3   :  { %v14617_v10 = vld [vmem:[#allocation2 + $0x1a30] sm:$0xf0] }
 0x6a4   :  { %v17102_v14 = vld [vmem:[#allocation2 + $0x714] sm:$0xf]  ;;  %v14620_v2 = vor.u32 %v17702_v46, %v14617_v10  ;;  %10327 = vmatpush.bf16.msrb.mxu2 %v13852_v27 }
 0x6a5   :  { %v12217_v56 = vld [vmem:[#allocation2 + $0x770] sm:$0xf0] }
 0x6a6   :  { %v17294_v21 = vld [vmem:[#allocation2 + $0xd14] sm:$0xf]  ;;  %v12220_v24 = vor.u32 %v17102_v14, %v12217_v56  ;;  %10341 = vmatpush.bf16.msrb.mxu3 %v14620_v2  ;;  %v17067_v14 = vld [vmem:[#allocation2 + $0x5f4] sm:$0xf0] }
 0x6a7   :  { %v12985_v39 = vld [vmem:[#allocation2 + $0xd70] sm:$0xf0]  ;;  %v17259_v2 = vld [vmem:[#allocation2 + $0xbf4] sm:$0xf0] }
 0x6a8   :  { %v17486_v62 = vld [vmem:[#allocation2 + $0x1314] sm:$0xf]  ;;  %v12988_v1 = vor.u32 %v17294_v21, %v12985_v39  ;;  %10300 = vmatpush.bf16.msrb.mxu0 %v12220_v24  ;;  %v12799_v21 = vld [vmem:[#allocation2 + $0xb98] sm:$0xf] }
 0x6a9   :  { %v13753_v40 = vld [vmem:[#allocation2 + $0x1370] sm:$0xf0] }
 0x6aa   :  { %v17678_v59 = vld [vmem:[#allocation2 + $0x1914] sm:$0xf]  ;;  %v13756_v26 = vor.u32 %v17486_v62, %v13753_v40  ;;  %10314 = vmatpush.bf16.msrb.mxu1 %v12988_v1  ;;  %v12703_v1 = vld [vmem:[#allocation2 + $0xad8] sm:$0xf] }
 0x6ab   :  { %v14521_v60 = vld [vmem:[#allocation2 + $0x1970] sm:$0xf0] }
 0x6ac   :  { %v17078_v54 = vld [vmem:[#allocation2 + $0x654] sm:$0xf]  ;;  %v14524_v34 = vor.u32 %v17678_v59, %v14521_v60  ;;  %10328 = vmatpush.bf16.msrb.mxu2 %v13756_v26  ;;  %v12032_v59 = vor.u32 %v17067_v14, %v12031_v32  ;;  %v17235_v26 = vld [vmem:[#allocation2 + $0xb34] sm:$0xf0] }
 0x6ad   :  { %v12121_v38 = vld [vmem:[#allocation2 + $0x6b0] sm:$0xf0] }
 0x6ae   :  { %v17270_v4 = vld [vmem:[#allocation2 + $0xc54] sm:$0xf]  ;;  %v12124_v46 = vor.u32 %v17078_v54, %v12121_v38  ;;  %10342 = vmatpush.bf16.msrb.mxu3 %v14524_v34  ;;  %v12800_v54 = vor.u32 %v17259_v2, %v12799_v21 }
 0x6af   :  { %v12889_v6 = vld [vmem:[#allocation2 + $0xcb0] sm:$0xf0] }
 0x6b0   :  { %v17462_v31 = vld [vmem:[#allocation2 + $0x1254] sm:$0xf]  ;;  %v12892_v27 = vor.u32 %v17270_v4, %v12889_v6  ;;  %10301 = vmatpush.bf16.msrb.mxu0 %v12124_v46  ;;  %v12607_v46 = vld [vmem:[#allocation2 + $0xa18] sm:$0xf] }
 0x6b1   :  { %v13657_v17 = vld [vmem:[#allocation2 + $0x12b0] sm:$0xf0] }
 0x6b2   :  { %v17654_v63 = vld [vmem:[#allocation2 + $0x1854] sm:$0xf]  ;;  %v13660_v56 = vor.u32 %v17462_v31, %v13657_v17  ;;  %10315 = vmatpush.bf16.msrb.mxu1 %v12892_v27  ;;  %v11936_v31 = vor.u32 %v17043_v22, %v11935_v48  ;;  %v10065_v48 = vpop.f32.mrf.mxu3 }
 0x6b3   :  { %v14425_v51 = vld [vmem:[#allocation2 + $0x18b0] sm:$0xf0]  ;;  %10302 = vmatmul.bf16.vlgmr.msrb.gmra.mxu0 %v18540_v11  ;;  %v10066_v21 = vadd.f32 %v10065_v48, %v19109_v5  ;;  %v17811_v5 = vld [vmem:[#allocation2 + $0x1d34] sm:$0xf0] }
 0x6b4   :  { %v18014_v53 = vld [vmem:[#allocation2 + $0x2394] sm:$0xf]  ;;  %v14428_v39 = vor.u32 %v17654_v63, %v14425_v51  ;;  %10329 = vmatpush.bf16.msrb.mxu2 %v13660_v56  ;;  %v12704_v51 = vor.u32 %v17235_v26, %v12703_v1 }
 0x6b5   :  { %v15865_v18 = vld [vmem:[#allocation2 + $0x23f0] sm:$0xf0]  ;;  %10316 = vmatmul.bf16.vlgmr.msrb.gmra.mxu1 %v18530_v0 }
 0x6b6   :  { %v18206_v33 = vld [vmem:[#allocation2 + $0x2994] sm:$0xf]  ;;  %v15868_v62 = vor.u32 %v18014_v53, %v15865_v18  ;;  %10343 = vmatpush.bf16.msrb.mxu3 %v14428_v39  ;;  %v11839_v18 = vld [vmem:[#allocation2 + $0x418] sm:$0xf] }
 0x6b7   :  { %v16633_v10 = vld [vmem:[#allocation2 + $0x29f0] sm:$0xf0]  ;;  %10330 = vmatmul.bf16.vlgmr.msrb.gmra.mxu2 %v18549_v23 }
 0x6b8   :  { %v16636_v40 = vor.u32 %v18206_v33, %v16633_v10  ;;  %v17990_v60 = vld [vmem:[#allocation2 + $0x22d4] sm:$0xf]  ;;  %10350 = vmatpush.bf16.msra.mxu0 %v15868_v62  ;;  %10378 = vmatpush.bf16.msra.mxu2 %v12032_v59  ;;  %v17019_v33 = vld [vmem:[#allocation2 + $0x474] sm:$0xf0]  ;;  %v10079_v59 = vpop.f32.mrf.mxu0 }
 0x6b9   :  { %v15769_v30 = vld [vmem:[#allocation2 + $0x2330] sm:$0xf0]  ;;  %10344 = vmatmul.bf16.vlgmr.msrb.gmra.mxu3 %v18570_v37  ;;  %v11840_v32 = vor.u32 %v17019_v33, %v11839_v18  ;;  %v11743_v62 = vld [vmem:[#allocation2 + $0x358] sm:$0xf] }
 0x6ba   :  { %v18182_v24 = vld [vmem:[#allocation2 + $0x28d4] sm:$0xf]  ;;  %v15772_v4 = vor.u32 %v17990_v60, %v15769_v30  ;;  %10364 = vmatpush.bf16.msra.mxu1 %v16636_v40  ;;  %10392 = vmatpush.bf16.msra.mxu3 %v12800_v54  ;;  %v17211_v30 = vld [vmem:[#allocation2 + $0xa74] sm:$0xf0]  ;;  %v19120_v54 = vadd.f32 %v10079_v59, %v10066_v21 }
 0x6bb   :  { %v16537_v38 = vld [vmem:[#allocation2 + $0x2930] sm:$0xf0]  ;;  %v12608_v2 = vor.u32 %v17211_v30, %v12607_v46  ;;  %v16995_v40 = vld [vmem:[#allocation2 + $0x3b4] sm:$0xf0] }
 0x6bc   :  { %v16540_v6 = vor.u32 %v18182_v24, %v16537_v38  ;;  %v17966_v34 = vld [vmem:[#allocation2 + $0x2214] sm:$0xf]  ;;  %10351 = vmatpush.bf16.msra.mxu0 %v15772_v4  ;;  %10379 = vmatpush.bf16.msra.mxu2 %v11936_v31  ;;  %v12511_v60 = vld [vmem:[#allocation2 + $0x958] sm:$0xf]  ;;  %19511 = vst [vmem:[#allocation132_spill] sm:$0xff] %v19120_v54  ;;  %v11744_v26 = vor.u32 %v16995_v40, %v11743_v62 }
 0x6bd   :  { %v15673_v17 = vld [vmem:[#allocation2 + $0x2270] sm:$0xf0]  ;;  %v17187_v24 = vld [vmem:[#allocation2 + $0x9b4] sm:$0xf0] }
 0x6be   :  { %v18158_v63 = vld [vmem:[#allocation2 + $0x2814] sm:$0xf]  ;;  %v15676_v22 = vor.u32 %v17966_v34, %v15673_v17  ;;  %10365 = vmatpush.bf16.msra.mxu1 %v16540_v6  ;;  %10393 = vmatpush.bf16.msra.mxu3 %v12704_v51  ;;  %v12512_v34 = vor.u32 %v17187_v24, %v12511_v60  ;;  %v16971_v51 = vld [vmem:[#allocation2 + $0x2f4] sm:$0xf0] }
 0x6bf   :  { %v16441_v53 = vld [vmem:[#allocation2 + $0x2870] sm:$0xf0]  ;;  %v17163_v18 = vld [vmem:[#allocation2 + $0x8f4] sm:$0xf0] }
 0x6c0   :  { %v16444_v10 = vor.u32 %v18158_v63, %v16441_v53  ;;  %v17942_v14 = vld [vmem:[#allocation2 + $0x2154] sm:$0xf]  ;;  %10352 = vmatpush.bf16.msra.mxu0 %v15676_v22  ;;  %10380 = vmatpush.bf16.msra.mxu2 %v11840_v32  ;;  %v11647_v63 = vld [vmem:[#allocation2 + $0x298] sm:$0xf] }
 0x6c1   :  { %v15577_v27 = vld [vmem:[#allocation2 + $0x21b0] sm:$0xf0]  ;;  %v12415_v53 = vld [vmem:[#allocation2 + $0x898] sm:$0xf]  ;;  %v11648_v30 = vor.u32 %v16971_v51, %v11647_v63 }
 0x6c2   :  { %v18134_v56 = vld [vmem:[#allocation2 + $0x2754] sm:$0xf]  ;;  %v15580_v38 = vor.u32 %v17942_v14, %v15577_v27  ;;  %10366 = vmatpush.bf16.msra.mxu1 %v16444_v10  ;;  %10394 = vmatpush.bf16.msra.mxu3 %v12608_v2  ;;  %v12416_v32 = vor.u32 %v17163_v18, %v12415_v53  ;;  %v11551_v27 = vld [vmem:[#allocation2 + $0x1d8] sm:$0xf] }
 0x6c3   :  { %v16345_v39 = vld [vmem:[#allocation2 + $0x27b0] sm:$0xf0]  ;;  %v12319_v21 = vld [vmem:[#allocation2 + $0x7d8] sm:$0xf] }
 0x6c4   :  { %v16348_v1 = vor.u32 %v18134_v56, %v16345_v39  ;;  %v17918_v4 = vld [vmem:[#allocation2 + $0x2094] sm:$0xf]  ;;  %10353 = vmatpush.bf16.msra.mxu0 %v15580_v38  ;;  %10381 = vmatpush.bf16.msra.mxu2 %v11744_v26  ;;  %v16947_v56 = vld [vmem:[#allocation2 + $0x234] sm:$0xf0] }
 0x6c5   :  { %v15481_v6 = vld [vmem:[#allocation2 + $0x20f0] sm:$0xf0]  ;;  %v17139_v2 = vld [vmem:[#allocation2 + $0x834] sm:$0xf0]  ;;  %v11552_v40 = vor.u32 %v16947_v56, %v11551_v27 }
 0x6c6   :  { %v18110_v31 = vld [vmem:[#allocation2 + $0x2694] sm:$0xf]  ;;  %v15484_v33 = vor.u32 %v17918_v4, %v15481_v6  ;;  %10367 = vmatpush.bf16.msra.mxu1 %v16348_v1  ;;  %10395 = vmatpush.bf16.msra.mxu3 %v12512_v34  ;;  %v12320_v38 = vor.u32 %v17139_v2, %v12319_v21  ;;  %v11455_v26 = vld [vmem:[#allocation2 + $0x118] sm:$0xf] }
 0x6c7   :  { %v16249_v17 = vld [vmem:[#allocation2 + $0x26f0] sm:$0xf0]  ;;  %v16923_v4 = vld [vmem:[#allocation2 + $0x174] sm:$0xf0] }
 0x6c8   :  { %v16252_v46 = vor.u32 %v18110_v31, %v16249_v17  ;;  %v17894_v22 = vld [vmem:[#allocation2 + $0x1fd4] sm:$0xf]  ;;  %10354 = vmatpush.bf16.msra.mxu0 %v15484_v33  ;;  %10382 = vmatpush.bf16.msra.mxu2 %v11648_v30  ;;  %v12223_v6 = vld [vmem:[#allocation2 + $0x718] sm:$0xf]  ;;  %v11456_v53 = vor.u32 %v16923_v4, %v11455_v26 }
 0x6c9   :  { %v15385_v48 = vld [vmem:[#allocation2 + $0x2030] sm:$0xf0]  ;;  %v17115_v31 = vld [vmem:[#allocation2 + $0x774] sm:$0xf0] }
 0x6ca   :  { %v18086_v10 = vld [vmem:[#allocation2 + $0x25d4] sm:$0xf]  ;;  %v15388_v39 = vor.u32 %v17894_v22, %v15385_v48  ;;  %10368 = vmatpush.bf16.msra.mxu1 %v16252_v46  ;;  %10396 = vmatpush.bf16.msra.mxu3 %v12416_v32  ;;  %v11359_v46 = vld [vmem:[#allocation2 + $0x58] sm:$0xf]  ;;  %v12224_v30 = vor.u32 %v17115_v31, %v12223_v6 }
 0x6cb   :  { %v16153_v14 = vld [vmem:[#allocation2 + $0x2630] sm:$0xf0]  ;;  %v16899_v22 = vld [vmem:[#allocation2 + $0xb4] sm:$0xf0] }
 0x6cc   :  { %v16156_v62 = vor.u32 %v18086_v10, %v16153_v14  ;;  %v17870_v59 = vld [vmem:[#allocation2 + $0x1f14] sm:$0xf]  ;;  %10355 = vmatpush.bf16.msra.mxu0 %v15388_v39  ;;  %10383 = vmatpush.bf16.msra.mxu2 %v11552_v40  ;;  %v12127_v48 = vld [vmem:[#allocation2 + $0x658] sm:$0xf]  ;;  %v11360_v40 = vor.u32 %v16899_v22, %v11359_v46 }
 0x6cd   :  { %v15289_v60 = vld [vmem:[#allocation2 + $0x1f70] sm:$0xf0]  ;;  %v17091_v10 = vld [vmem:[#allocation2 + $0x6b4] sm:$0xf0] }
 0x6ce   :  { %v18062_v24 = vld [vmem:[#allocation2 + $0x2514] sm:$0xf]  ;;  %v15292_v34 = vor.u32 %v17870_v59, %v15289_v60  ;;  %10369 = vmatpush.bf16.msra.mxu1 %v16156_v62  ;;  %10397 = vmatpush.bf16.msra.mxu3 %v12320_v38  ;;  %v13567_v32 = vld [vmem:[#allocation2 + $0x1198] sm:$0xf] }
 0x6cf   :  { %v16057_v1 = vld [vmem:[#allocation2 + $0x2570] sm:$0xf0]  ;;  %v17451_v14 = vld [vmem:[#allocation2 + $0x11f4] sm:$0xf0] }
 0x6d0   :  { %v17846_v17 = vld [vmem:[#allocation2 + $0x1e54] sm:$0xf]  ;;  %v16060_v51 = vor.u32 %v18062_v24, %v16057_v1  ;;  %v14335_v27 = vld [vmem:[#allocation2 + $0x1798] sm:$0xf]  ;;  %10356 = vmatpush.bf16.msra.mxu0 %v15292_v34  ;;  %10384 = vmatpush.bf16.msra.mxu2 %v11456_v53  ;;  %v12128_v24 = vor.u32 %v17091_v10, %v12127_v48  ;;  %v13568_v38 = vor.u32 %v17451_v14, %v13567_v32 }
 0x6d1   :  { %v15193_v63 = vld [vmem:[#allocation2 + $0x1eb0] sm:$0xf0]  ;;  %v17643_v21 = vld [vmem:[#allocation2 + $0x17f4] sm:$0xf0] }
 0x6d2   :  { %v18038_v18 = vld [vmem:[#allocation2 + $0x2454] sm:$0xf]  ;;  %v15196_v56 = vor.u32 %v17846_v17, %v15193_v63  ;;  %v15103_v2 = vld [vmem:[#allocation2 + $0x1d98] sm:$0xf]  ;;  %10370 = vmatpush.bf16.msra.mxu1 %v16060_v51  ;;  %10398 = vmatpush.bf16.msra.mxu3 %v12224_v30  ;;  %v14336_v1 = vor.u32 %v17643_v21, %v14335_v27 }
 0x6d3   :  { %v15961_v33 = vld [vmem:[#allocation2 + $0x24b0] sm:$0xf0]  ;;  %v17835_v39 = vld [vmem:[#allocation2 + $0x1df4] sm:$0xf0] }
 0x6d4   :  { %v15964_v62 = vor.u32 %v18038_v18, %v15961_v33  ;;  %v15871_v59 = vld [vmem:[#allocation2 + $0x2398] sm:$0xf]  ;;  %v15104_v26 = vor.u32 %v17835_v39, %v15103_v2  ;;  %10357 = vmatpush.bf16.msra.mxu0 %v15196_v56  ;;  %10385 = vmatpush.bf16.msra.mxu2 %v11360_v40 }
 0x6d5   :  { %v18027_v60 = vld [vmem:[#allocation2 + $0x23f4] sm:$0xf0] }
 0x6d6   :  { %v13471_v4 = vld [vmem:[#allocation2 + $0x10d8] sm:$0xf]  ;;  %v15872_v34 = vor.u32 %v18027_v60, %v15871_v59  ;;  %10371 = vmatpush.bf16.msra.mxu1 %v15964_v62  ;;  %10399 = vmatpush.bf16.msra.mxu3 %v12128_v24 }
 0x6d7   :  { %v17427_v6 = vld [vmem:[#allocation2 + $0x1134] sm:$0xf0]  ;;  %10358 = vmatmul.bf16.vlgmr.msra.gmra.mxu0 %v18574_v42  ;;  %10386 = vmatmul.bf16.vlgmr.msra.gmra.mxu2 %v18525_v57 }
 0x6d8   :  { %v14239_v31 = vld [vmem:[#allocation2 + $0x16d8] sm:$0xf]  ;;  %10406 = vmatpush.bf16.msrb.mxu0 %v13568_v38  ;;  %v13472_v18 = vor.u32 %v17427_v6, %v13471_v4  ;;  %10434 = vmatpush.bf16.msrb.mxu2 %v15104_v26 }
 0x6d9   :  { %v17619_v17 = vld [vmem:[#allocation2 + $0x1734] sm:$0xf0]  ;;  %10372 = vmatmul.bf16.vlgmr.msra.gmra.mxu1 %v18572_v41  ;;  %10400 = vmatmul.bf16.vlgmr.msra.gmra.mxu3 %v18540_v11 }
 0x6da   :  { %v15007_v63 = vld [vmem:[#allocation2 + $0x1cd8] sm:$0xf]  ;;  %10420 = vmatpush.bf16.msrb.mxu1 %v14336_v1  ;;  %v14240_v33 = vor.u32 %v17619_v17, %v14239_v31  ;;  %10448 = vmatpush.bf16.msrb.mxu3 %v15872_v34 }
 0x6db   :  { %v15775_v51 = vld [vmem:[#allocation2 + $0x22d8] sm:$0xf]  ;;  %v15008_v46 = vor.u32 %v17811_v5, %v15007_v63 }
 0x6dc   :  { %v18003_v53 = vld [vmem:[#allocation2 + $0x2334] sm:$0xf0]  ;;  %10407 = vmatpush.bf16.msrb.mxu0 %v13472_v18 }
 0x6dd   :  { %v13375_v30 = vld [vmem:[#allocation2 + $0x1018] sm:$0xf]  ;;  %v15776_v10 = vor.u32 %v18003_v53, %v15775_v51  ;;  %10435 = vmatpush.bf16.msrb.mxu2 %v15008_v46 }
 0x6de   :  { %v17403_v22 = vld [vmem:[#allocation2 + $0x1074] sm:$0xf0]  ;;  %10421 = vmatpush.bf16.msrb.mxu1 %v14240_v33 }
 0x6df   :  { %v14143_v48 = vld [vmem:[#allocation2 + $0x1618] sm:$0xf]  ;;  %v13376_v2 = vor.u32 %v17403_v22, %v13375_v30  ;;  %10449 = vmatpush.bf16.msrb.mxu3 %v15776_v10 }
 0x6e0   :  { %v17595_v32 = vld [vmem:[#allocation2 + $0x1674] sm:$0xf0] }
 0x6e1   :  { %v14911_v14 = vld [vmem:[#allocation2 + $0x1c18] sm:$0xf]  ;;  %v14144_v5 = vor.u32 %v17595_v32, %v14143_v48  ;;  %10408 = vmatpush.bf16.msrb.mxu0 %v13376_v2 }
 0x6e2   :  { %v17787_v27 = vld [vmem:[#allocation2 + $0x1c74] sm:$0xf0] }
 0x6e3   :  { %v15679_v56 = vld [vmem:[#allocation2 + $0x2218] sm:$0xf]  ;;  %v14912_v39 = vor.u32 %v17787_v27, %v14911_v14  ;;  %10422 = vmatpush.bf16.msrb.mxu1 %v14144_v5 }
 0x6e4   :  { %v17979_v21 = vld [vmem:[#allocation2 + $0x2274] sm:$0xf0] }
 0x6e5   :  { %v13279_v62 = vld [vmem:[#allocation2 + $0xf58] sm:$0xf]  ;;  %v15680_v60 = vor.u32 %v17979_v21, %v15679_v56  ;;  %10436 = vmatpush.bf16.msrb.mxu2 %v14912_v39 }
 0x6e6   :  { %v17379_v40 = vld [vmem:[#allocation2 + $0xfb4] sm:$0xf0] }
 0x6e7   :  { %v14047_v59 = vld [vmem:[#allocation2 + $0x1558] sm:$0xf]  ;;  %v13280_v6 = vor.u32 %v17379_v40, %v13279_v62  ;;  %10450 = vmatpush.bf16.msrb.mxu3 %v15680_v60 }
 0x6e8   :  { %v17571_v24 = vld [vmem:[#allocation2 + $0x15b4] sm:$0xf0] }
 0x6e9   :  { %v14815_v38 = vld [vmem:[#allocation2 + $0x1b58] sm:$0xf]  ;;  %v14048_v31 = vor.u32 %v17571_v24, %v14047_v59  ;;  %10409 = vmatpush.bf16.msrb.mxu0 %v13280_v6 }
 0x6ea   :  { %v17763_v1 = vld [vmem:[#allocation2 + $0x1bb4] sm:$0xf0] }
 0x6eb   :  { %v15583_v26 = vld [vmem:[#allocation2 + $0x2158] sm:$0xf]  ;;  %v14816_v34 = vor.u32 %v17763_v1, %v14815_v38  ;;  %10423 = vmatpush.bf16.msrb.mxu1 %v14048_v31 }
 0x6ec   :  { %v17955_v4 = vld [vmem:[#allocation2 + $0x21b4] sm:$0xf0] }
 0x6ed   :  { %v13183_v17 = vld [vmem:[#allocation2 + $0xe98] sm:$0xf]  ;;  %v15584_v53 = vor.u32 %v17955_v4, %v15583_v26  ;;  %10437 = vmatpush.bf16.msrb.mxu2 %v14816_v34 }
 0x6ee   :  { %v17355_v63 = vld [vmem:[#allocation2 + $0xef4] sm:$0xf0] }
 0x6ef   :  { %v13951_v51 = vld [vmem:[#allocation2 + $0x1498] sm:$0xf]  ;;  %v13184_v48 = vor.u32 %v17355_v63, %v13183_v17  ;;  %10451 = vmatpush.bf16.msrb.mxu3 %v15584_v53 }
 0x6f0   :  { %v17547_v18 = vld [vmem:[#allocation2 + $0x14f4] sm:$0xf0] }
 0x6f1   :  { %v14719_v33 = vld [vmem:[#allocation2 + $0x1a98] sm:$0xf]  ;;  %v13952_v10 = vor.u32 %v17547_v18, %v13951_v51  ;;  %10410 = vmatpush.bf16.msrb.mxu0 %v13184_v48 }
 0x6f2   :  { %v17739_v46 = vld [vmem:[#allocation2 + $0x1af4] sm:$0xf0] }
 0x6f3   :  { %v15487_v30 = vld [vmem:[#allocation2 + $0x2098] sm:$0xf]  ;;  %v14720_v32 = vor.u32 %v17739_v46, %v14719_v33  ;;  %10424 = vmatpush.bf16.msrb.mxu1 %v13952_v10 }
 0x6f4   :  { %v17931_v22 = vld [vmem:[#allocation2 + $0x20f4] sm:$0xf0] }
 0x6f5   :  { %v13087_v14 = vld [vmem:[#allocation2 + $0xdd8] sm:$0xf]  ;;  %v15488_v21 = vor.u32 %v17931_v22, %v15487_v30  ;;  %10438 = vmatpush.bf16.msrb.mxu2 %v14720_v32 }
 0x6f6   :  { %v17331_v27 = vld [vmem:[#allocation2 + $0xe34] sm:$0xf0] }
 0x6f7   :  { %v13855_v56 = vld [vmem:[#allocation2 + $0x13d8] sm:$0xf]  ;;  %v13088_v59 = vor.u32 %v17331_v27, %v13087_v14  ;;  %10452 = vmatpush.bf16.msrb.mxu3 %v15488_v21 }
 0x6f8   :  { %v17523_v2 = vld [vmem:[#allocation2 + $0x1434] sm:$0xf0] }
 0x6f9   :  { %v14623_v5 = vld [vmem:[#allocation2 + $0x19d8] sm:$0xf]  ;;  %v13856_v60 = vor.u32 %v17523_v2, %v13855_v56  ;;  %10411 = vmatpush.bf16.msrb.mxu0 %v13088_v59  ;;  %v19128_v56 = vpop.f32.mrf.mxu1  ;;  %v12801_v59 = vld [vmem:[#allocation2 + $0xbf8] sm:$0xf0] }
 0x6fa   :  { %v17715_v39 = vld [vmem:[#allocation2 + $0x1a34] sm:$0xf0]  ;;  %19512 = vst [vmem:[#allocation133_spill] sm:$0xff] %v19128_v56  ;;  %v15009_v56 = vld [vmem:[#allocation2 + $0x1d38] sm:$0xf0] }
 0x6fb   :  { %v15391_v62 = vld [vmem:[#allocation2 + $0x1fd8] sm:$0xf]  ;;  %v14624_v24 = vor.u32 %v17715_v39, %v14623_v5  ;;  %10425 = vmatpush.bf16.msrb.mxu1 %v13856_v60  ;;  %v17055_v5 = vld [vmem:[#allocation2 + $0x59c] sm:$0xf]  ;;  %v19130_v60 = vpop.f32.mrf.mxu2 }
 0x6fc   :  { %v17907_v40 = vld [vmem:[#allocation2 + $0x2034] sm:$0xf0]  ;;  %19513 = vst [vmem:[#allocation134_spill] sm:$0xff] %v19130_v60 }
 0x6fd   :  { %v12991_v38 = vld [vmem:[#allocation2 + $0xd18] sm:$0xf]  ;;  %v15392_v4 = vor.u32 %v17907_v40, %v15391_v62  ;;  %10439 = vmatpush.bf16.msrb.mxu2 %v14624_v24  ;;  %v12033_v62 = vld [vmem:[#allocation2 + $0x5f8] sm:$0xf0] }
 0x6fe   :  { %v17307_v1 = vld [vmem:[#allocation2 + $0xd74] sm:$0xf0]  ;;  %v17247_v40 = vld [vmem:[#allocation2 + $0xb9c] sm:$0xf] }
 0x6ff   :  { %v13759_v26 = vld [vmem:[#allocation2 + $0x1318] sm:$0xf]  ;;  %v12992_v51 = vor.u32 %v17307_v1, %v12991_v38  ;;  %10453 = vmatpush.bf16.msrb.mxu3 %v15392_v4  ;;  %v17439_v1 = vld [vmem:[#allocation2 + $0x119c] sm:$0xf] }
 0x700   :  { %v17499_v6 = vld [vmem:[#allocation2 + $0x1374] sm:$0xf0] }
 0x701   :  { %v14527_v31 = vld [vmem:[#allocation2 + $0x1918] sm:$0xf]  ;;  %v13760_v33 = vor.u32 %v17499_v6, %v13759_v26  ;;  %10412 = vmatpush.bf16.msrb.mxu0 %v12992_v51  ;;  %v13569_v26 = vld [vmem:[#allocation2 + $0x11f8] sm:$0xf0] }
 0x702   :  { %v17691_v34 = vld [vmem:[#allocation2 + $0x1974] sm:$0xf0]  ;;  %v17031_v51 = vld [vmem:[#allocation2 + $0x4dc] sm:$0xf] }
 0x703   :  { %v15295_v17 = vld [vmem:[#allocation2 + $0x1f18] sm:$0xf]  ;;  %v14528_v46 = vor.u32 %v17691_v34, %v14527_v31  ;;  %10426 = vmatpush.bf16.msrb.mxu1 %v13760_v33  ;;  %v12036_v31 = vor.u32 %v17055_v5, %v12033_v62  ;;  %v12804_v34 = vor.u32 %v17247_v40, %v12801_v59  ;;  %v17415_v33 = vld [vmem:[#allocation2 + $0x10dc] sm:$0xf]  ;;  %v19135_v62 = vpop.f32.mrf.mxu2 }
 0x704   :  { %v17883_v63 = vld [vmem:[#allocation2 + $0x1f74] sm:$0xf0]  ;;  %v17199_v5 = vld [vmem:[#allocation2 + $0xa1c] sm:$0xf] }
 0x705   :  { %v12895_v53 = vld [vmem:[#allocation2 + $0xc58] sm:$0xf]  ;;  %v15296_v10 = vor.u32 %v17883_v63, %v15295_v17  ;;  %10440 = vmatpush.bf16.msrb.mxu2 %v14528_v46  ;;  %v13473_v46 = vld [vmem:[#allocation2 + $0x1138] sm:$0xf0] }
 0x706   :  { %v17283_v18 = vld [vmem:[#allocation2 + $0xcb4] sm:$0xf0]  ;;  %v17391_v40 = vld [vmem:[#allocation2 + $0x101c] sm:$0xf] }
 0x707   :  { %v13663_v30 = vld [vmem:[#allocation2 + $0x1258] sm:$0xf]  ;;  %v12896_v39 = vor.u32 %v17283_v18, %v12895_v53  ;;  %10454 = vmatpush.bf16.msrb.mxu3 %v15296_v10  ;;  %v13572_v53 = vor.u32 %v17439_v1, %v13569_v26  ;;  %v11937_v18 = vld [vmem:[#allocation2 + $0x538] sm:$0xf0]  ;;  %v12708_v10 = vor.u32 %v17223_v36, %v12705_v12 }
 0x708   :  { %v17475_v22 = vld [vmem:[#allocation2 + $0x12b4] sm:$0xf0]  ;;  %v13377_v59 = vld [vmem:[#allocation2 + $0x1078] sm:$0xf0] }
 0x709   :  { %v14431_v48 = vld [vmem:[#allocation2 + $0x1858] sm:$0xf]  ;;  %v13664_v24 = vor.u32 %v17475_v22, %v13663_v30  ;;  %10413 = vmatpush.bf16.msrb.mxu0 %v12896_v39  ;;  %v19132_v22 = vpop.f32.mrf.mxu1  ;;  %v12609_v39 = vld [vmem:[#allocation2 + $0xa78] sm:$0xf0] }
 0x70a   :  { %v17667_v32 = vld [vmem:[#allocation2 + $0x18b4] sm:$0xf0]  ;;  %v16983_v26 = vld [vmem:[#allocation2 + $0x35c] sm:$0xf] }
 0x70b   :  { %v15199_v14 = vld [vmem:[#allocation2 + $0x1e58] sm:$0xf]  ;;  %v14432_v38 = vor.u32 %v17667_v32, %v14431_v48  ;;  %10427 = vmatpush.bf16.msrb.mxu1 %v13664_v24  ;;  %v11940_v48 = vor.u32 %v17031_v51, %v11937_v18  ;;  %v12612_v24 = vor.u32 %v17199_v5, %v12609_v39  ;;  %v13281_v51 = vld [vmem:[#allocation2 + $0xfb8] sm:$0xf0]  ;;  %v19142_v18 = vpop.f32.mrf.mxu0 }
 0x70c   :  { %v17859_v27 = vld [vmem:[#allocation2 + $0x1eb4] sm:$0xf0]  ;;  %10414 = vmatmul.bf16.vlgmr.msrb.gmra.mxu0 %v18530_v0  ;;  %19515 = vst [vmem:[#allocation136_spill] sm:$0xff] %v19142_v18  ;;  %v17343_v5 = vld [vmem:[#allocation2 + $0xe9c] sm:$0xf] }
 0x70d   :  { %v16639_v21 = vld [vmem:[#allocation2 + $0x2998] sm:$0xf]  ;;  %v15200_v4 = vor.u32 %v17859_v27, %v15199_v14  ;;  %10441 = vmatpush.bf16.msrb.mxu2 %v14432_v38  ;;  %v17007_v27 = vld [vmem:[#allocation2 + $0x41c] sm:$0xf] }
 0x70e   :  { %v18219_v2 = vld [vmem:[#allocation2 + $0x29f4] sm:$0xf0]  ;;  %10428 = vmatmul.bf16.vlgmr.msrb.gmra.mxu1 %v18549_v23  ;;  %v13185_v39 = vld [vmem:[#allocation2 + $0xef8] sm:$0xf0] }
 0x70f   :  { %v16640_v6 = vor.u32 %v18219_v2, %v16639_v21  ;;  %v16543_v17 = vld [vmem:[#allocation2 + $0x28d8] sm:$0xf]  ;;  %10455 = vmatpush.bf16.msrb.mxu3 %v15200_v4  ;;  %10476 = vmatpush.bf16.msra.mxu1 %v12036_v31  ;;  %v13476_v21 = vor.u32 %v17415_v33, %v13473_v46  ;;  %v11841_v2 = vld [vmem:[#allocation2 + $0x478] sm:$0xf0]  ;;  %v13380_v4 = vor.u32 %v17391_v40, %v13377_v59  ;;  %v19146_v59 = vpop.f32.mrf.mxu2 }
 0x710   :  { %v18195_v63 = vld [vmem:[#allocation2 + $0x2934] sm:$0xf0]  ;;  %10442 = vmatmul.bf16.vlgmr.msrb.gmra.mxu2 %v18570_v37  ;;  %v11844_v36 = vor.u32 %v17007_v27, %v11841_v2  ;;  %v17175_v31 = vld [vmem:[#allocation2 + $0x95c] sm:$0xf] }
 0x711   :  { %10462 = vmatpush.bf16.msra.mxu0 %v16640_v6  ;;  %v16544_v30 = vor.u32 %v18195_v63, %v16543_v17  ;;  %10490 = vmatpush.bf16.msra.mxu2 %v12804_v34  ;;  %v16447_v32 = vld [vmem:[#allocation2 + $0x2818] sm:$0xf]  ;;  %v11745_v6 = vld [vmem:[#allocation2 + $0x3b8] sm:$0xf0]  ;;  %v19140_v17 = vpop.f32.mrf.mxu3  ;;  %v19144_v2 = vpop.f32.mrf.mxu1 }
 0x712   :  { %v18171_v14 = vld [vmem:[#allocation2 + $0x2874] sm:$0xf0]  ;;  %10456 = vmatmul.bf16.vlgmr.msrb.gmra.mxu3 %v18574_v42  ;;  %v12513_v34 = vld [vmem:[#allocation2 + $0x9b8] sm:$0xf0]  ;;  %19514 = vst [vmem:[#allocation135_spill] sm:$0xff] %v19140_v17  ;;  %v11748_v33 = vor.u32 %v16983_v26, %v11745_v6  ;;  %v13188_v26 = vor.u32 %v17343_v5, %v13185_v39 }
 0x713   :  { %10504 = vmatpush.bf16.msra.mxu3 %v13572_v53  ;;  %v16448_v12 = vor.u32 %v18171_v14, %v16447_v32  ;;  %10477 = vmatpush.bf16.msra.mxu1 %v11940_v48  ;;  %v16351_v38 = vld [vmem:[#allocation2 + $0x2758] sm:$0xf]  ;;  %v17367_v63 = vld [vmem:[#allocation2 + $0xf5c] sm:$0xf]  ;;  %v12516_v46 = vor.u32 %v17175_v31, %v12513_v34 }
 0x714   :  { %v18147_v1 = vld [vmem:[#allocation2 + $0x27b4] sm:$0xf0]  ;;  %v13284_v32 = vor.u32 %v17367_v63, %v13281_v51  ;;  %v11649_v14 = vld [vmem:[#allocation2 + $0x2f8] sm:$0xf0] }
 0x715   :  { %10463 = vmatpush.bf16.msra.mxu0 %v16544_v30  ;;  %10491 = vmatpush.bf16.msra.mxu2 %v12708_v10  ;;  %v16352_v53 = vor.u32 %v18147_v1, %v16351_v38  ;;  %v16255_v30 = vld [vmem:[#allocation2 + $0x2698] sm:$0xf]  ;;  %v16959_v10 = vld [vmem:[#allocation2 + $0x29c] sm:$0xf] }
 0x716   :  { %v18123_v48 = vld [vmem:[#allocation2 + $0x26f4] sm:$0xf0]  ;;  %v17151_v27 = vld [vmem:[#allocation2 + $0x89c] sm:$0xf] }
 0x717   :  { %10505 = vmatpush.bf16.msra.mxu3 %v13476_v21  ;;  %10478 = vmatpush.bf16.msra.mxu1 %v11844_v36  ;;  %v12417_v21 = vld [vmem:[#allocation2 + $0x8f8] sm:$0xf0]  ;;  %v16256_v40 = vor.u32 %v18123_v48, %v16255_v30  ;;  %v18099_v38 = vld [vmem:[#allocation2 + $0x2634] sm:$0xf0]  ;;  %v19150_v30 = vpop.f32.mrf.mxu0  ;;  %v19154_v19 = vpop.f32.mrf.mxu2 }
 0x718   :  { %v12420_v36 = vor.u32 %v17151_v27, %v12417_v21  ;;  %v16935_v1 = vld [vmem:[#allocation2 + $0x1dc] sm:$0xf]  ;;  %v16063_v48 = vld [vmem:[#allocation2 + $0x2518] sm:$0xf]  ;;  %19517 = vst [vmem:[#allocation138_spill] sm:$0xff] %v19154_v19 }
 0x719   :  { %10464 = vmatpush.bf16.msra.mxu0 %v16448_v12  ;;  %10492 = vmatpush.bf16.msra.mxu2 %v12612_v24  ;;  %v11652_v12 = vor.u32 %v16959_v10, %v11649_v14  ;;  %v16159_v24 = vld [vmem:[#allocation2 + $0x25d8] sm:$0xf]  ;;  %v17127_v6 = vld [vmem:[#allocation2 + $0x7dc] sm:$0xf]  ;;  %v19148_v34 = vpop.f32.mrf.mxu3 }
 0x71a   :  { %v12321_v31 = vld [vmem:[#allocation2 + $0x838] sm:$0xf0]  ;;  %v18075_v10 = vld [vmem:[#allocation2 + $0x2574] sm:$0xf0] }
 0x71b   :  { %10506 = vmatpush.bf16.msra.mxu3 %v13380_v4  ;;  %10479 = vmatpush.bf16.msra.mxu1 %v11748_v33  ;;  %v11553_v4 = vld [vmem:[#allocation2 + $0x238] sm:$0xf0]  ;;  %v16064_v54 = vor.u32 %v18075_v10, %v16063_v48 }
 0x71c   :  { %v17319_v63 = vld [vmem:[#allocation2 + $0xddc] sm:$0xf]  ;;  %v11556_v33 = vor.u32 %v16935_v1, %v11553_v4 }
 0x71d   :  { %10465 = vmatpush.bf16.msra.mxu0 %v16352_v53  ;;  %10493 = vmatpush.bf16.msra.mxu2 %v12516_v46  ;;  %v13089_v51 = vld [vmem:[#allocation2 + $0xe38] sm:$0xf0]  ;;  %v16160_v53 = vor.u32 %v18099_v38, %v16159_v24  ;;  %v12324_v46 = vor.u32 %v17127_v6, %v12321_v31  ;;  %v18051_v24 = vld [vmem:[#allocation2 + $0x24b4] sm:$0xf0]  ;;  %v19152_v38 = vpop.f32.mrf.mxu1 }
 0x71e   :  { %v16911_v14 = vld [vmem:[#allocation2 + $0x11c] sm:$0xf]  ;;  %19516 = vst [vmem:[#allocation137_spill] sm:$0xff] %v19152_v38 }
 0x71f   :  { %10507 = vmatpush.bf16.msra.mxu3 %v13284_v32  ;;  %10480 = vmatpush.bf16.msra.mxu1 %v11652_v12  ;;  %v13092_v32 = vor.u32 %v17319_v63, %v13089_v51  ;;  %v11457_v27 = vld [vmem:[#allocation2 + $0x178] sm:$0xf0]  ;;  %v19158_v19 = vpop.f32.mrf.mxu0 }
 0x720   :  { %v17103_v21 = vld [vmem:[#allocation2 + $0x71c] sm:$0xf]  ;;  %v11460_v12 = vor.u32 %v16911_v14, %v11457_v27 }
 0x721   :  { %10466 = vmatpush.bf16.msra.mxu0 %v16256_v40  ;;  %10494 = vmatpush.bf16.msra.mxu2 %v12420_v36  ;;  %v12225_v5 = vld [vmem:[#allocation2 + $0x778] sm:$0xf0]  ;;  %v15967_v40 = vld [vmem:[#allocation2 + $0x2458] sm:$0xf]  ;;  %v19156_v14 = vpop.f32.mrf.mxu3 }
 0x722   :  { %v17295_v39 = vld [vmem:[#allocation2 + $0xd1c] sm:$0xf]  ;;  %v12228_v36 = vor.u32 %v17103_v21, %v12225_v5  ;;  %v15968_v18 = vor.u32 %v18051_v24, %v15967_v40 }
 0x723   :  { %10508 = vmatpush.bf16.msra.mxu3 %v13188_v26  ;;  %10481 = vmatpush.bf16.msra.mxu1 %v11556_v33  ;;  %v16887_v1 = vld [vmem:[#allocation2 + $0x5c] sm:$0xf]  ;;  %v12996_v26 = vor.u32 %v17295_v39, %v12993_v8 }
 0x724   :  { %v11361_v4 = vld [vmem:[#allocation2 + $0xb8] sm:$0xf0] }
 0x725   :  { %10467 = vmatpush.bf16.msra.mxu0 %v16160_v53  ;;  %10495 = vmatpush.bf16.msra.mxu2 %v12324_v46  ;;  %v17079_v6 = vld [vmem:[#allocation2 + $0x65c] sm:$0xf]  ;;  %v11364_v27 = vor.u32 %v16887_v1, %v11361_v4 }
 0x726   :  { %v12129_v31 = vld [vmem:[#allocation2 + $0x6b8] sm:$0xf0] }
 0x727   :  { %10509 = vmatpush.bf16.msra.mxu3 %v13092_v32  ;;  %v17271_v63 = vld [vmem:[#allocation2 + $0xc5c] sm:$0xf]  ;;  %10482 = vmatpush.bf16.msra.mxu1 %v11460_v12  ;;  %v12132_v32 = vor.u32 %v17079_v6, %v12129_v31  ;;  %v19160_v6 = vpop.f32.mrf.mxu1 }
 0x728   :  { %v12897_v51 = vld [vmem:[#allocation2 + $0xcb8] sm:$0xf0] }
 0x729   :  { %v17631_v53 = vld [vmem:[#allocation2 + $0x179c] sm:$0xf]  ;;  %10468 = vmatpush.bf16.msra.mxu0 %v16064_v54  ;;  %10496 = vmatpush.bf16.msra.mxu2 %v12228_v36  ;;  %v12900_v5 = vor.u32 %v17271_v63, %v12897_v51 }
 0x72a   :  { %v14337_v48 = vld [vmem:[#allocation2 + $0x17f8] sm:$0xf0] }
 0x72b   :  { %v17823_v10 = vld [vmem:[#allocation2 + $0x1d9c] sm:$0xf]  ;;  %10510 = vmatpush.bf16.msra.mxu3 %v12996_v26  ;;  %v14340_v39 = vor.u32 %v17631_v53, %v14337_v48  ;;  %10483 = vmatpush.bf16.msra.mxu1 %v11364_v27 }
 0x72c   :  { %v15105_v17 = vld [vmem:[#allocation2 + $0x1df8] sm:$0xf0] }
 0x72d   :  { %v18015_v33 = vld [vmem:[#allocation2 + $0x239c] sm:$0xf]  ;;  %v15108_v15 = vor.u32 %v17823_v10, %v15105_v17  ;;  %10469 = vmatpush.bf16.msra.mxu0 %v15968_v18  ;;  %10497 = vmatpush.bf16.msra.mxu2 %v12132_v32 }
 0x72e   :  { %v15873_v46 = vld [vmem:[#allocation2 + $0x23f8] sm:$0xf0]  ;;  %10484 = vmatmul.bf16.vlgmr.msra.gmra.mxu1 %v18525_v57 }
 0x72f   :  { %v18207_v8 = vld [vmem:[#allocation2 + $0x299c] sm:$0xf]  ;;  %v15876_v38 = vor.u32 %v18015_v33, %v15873_v46  ;;  %10511 = vmatpush.bf16.msra.mxu3 %v12900_v5  ;;  %10532 = vmatpush.bf16.msrb.mxu1 %v15108_v15  ;;  %v19163_v33 = vpop.f32.mrf.mxu2 }
 0x730   :  { %v16641_v21 = vld [vmem:[#allocation2 + $0x29f8] sm:$0xf0]  ;;  %10470 = vmatmul.bf16.vlgmr.msra.gmra.mxu0 %v18572_v41  ;;  %10498 = vmatmul.bf16.vlgmr.msra.gmra.mxu2 %v18540_v11 }
 0x731   :  { %v17607_v54 = vld [vmem:[#allocation2 + $0x16dc] sm:$0xf]  ;;  %v16644_v60 = vor.u32 %v18207_v8, %v16641_v21  ;;  %10518 = vmatpush.bf16.msrb.mxu0 %v14340_v39  ;;  %10546 = vmatpush.bf16.msrb.mxu2 %v15876_v38 }
 0x732   :  { %v14241_v40 = vld [vmem:[#allocation2 + $0x1738] sm:$0xf0]  ;;  %10512 = vmatmul.bf16.vlgmr.msra.gmra.mxu3 %v18530_v0  ;;  %v8248_v0 = vadd.f32 %v18596_v35, %v18594_v25 }
 0x733   :  { %v17799_v24 = vld [vmem:[#allocation2 + $0x1cdc] sm:$0xf]  ;;  %v14244_v4 = vor.u32 %v17607_v54, %v14241_v40  ;;  %10560 = vmatpush.bf16.msrb.mxu3 %v16644_v60  ;;  %v19170_v60 = vpop.f32.mrf.mxu0 }
 0x734   :  { %v17991_v42 = vld [vmem:[#allocation2 + $0x22dc] sm:$0xf]  ;;  %v15012_v17 = vor.u32 %v17799_v24, %v15009_v56  ;;  %v19168_v56 = vpop.f32.mrf.mxu3  ;;  %v8262_v25 = vadd.f32 %v18601_v52, %v8248_v0 }
 0x735   :  { %v15777_v12 = vld [vmem:[#allocation2 + $0x2338] sm:$0xf0]  ;;  %10519 = vmatpush.bf16.msrb.mxu0 %v14244_v4 }
 0x736   :  { %v18183_v36 = vld [vmem:[#allocation2 + $0x28dc] sm:$0xf]  ;;  %v15780_v26 = vor.u32 %v17991_v42, %v15777_v12  ;;  %10533 = vmatpush.bf16.msrb.mxu1 %v15012_v17  ;;  %v19174_v12 = vpop.f32.mrf.mxu1  ;;  %v8276_v52 = vadd.f32 %v18607_v45, %v8262_v25 }
 0x737   :  { %v16545_v1 = vld [vmem:[#allocation2 + $0x2938] sm:$0xf0] }
 0x738   :  { %v17583_v31 = vld [vmem:[#allocation2 + $0x161c] sm:$0xf]  ;;  %v16548_v51 = vor.u32 %v18183_v36, %v16545_v1  ;;  %10547 = vmatpush.bf16.msrb.mxu2 %v15780_v26 }
 0x739   :  { %v14145_v63 = vld [vmem:[#allocation2 + $0x1678] sm:$0xf0] }
 0x73a   :  { %v17775_v18 = vld [vmem:[#allocation2 + $0x1c1c] sm:$0xf]  ;;  %v14148_v42 = vor.u32 %v17583_v31, %v14145_v63  ;;  %10561 = vmatpush.bf16.msrb.mxu3 %v16548_v51  ;;  %v19177_v51 = vpop.f32.mrf.mxu2 }
 0x73b   :  { %v14913_v53 = vld [vmem:[#allocation2 + $0x1c78] sm:$0xf0] }
 0x73c   :  { %v17967_v48 = vld [vmem:[#allocation2 + $0x221c] sm:$0xf]  ;;  %v14916_v46 = vor.u32 %v17775_v18, %v14913_v53  ;;  %10520 = vmatpush.bf16.msrb.mxu0 %v14148_v42 }
 0x73d   :  { %v15681_v10 = vld [vmem:[#allocation2 + $0x2278] sm:$0xf0] }
 0x73e   :  { %v18159_v15 = vld [vmem:[#allocation2 + $0x281c] sm:$0xf]  ;;  %v15684_v27 = vor.u32 %v17967_v48, %v15681_v10  ;;  %10534 = vmatpush.bf16.msrb.mxu1 %v14916_v46 }
 0x73f   :  { %v16449_v38 = vld [vmem:[#allocation2 + $0x2878] sm:$0xf0] }
 0x740   :  { %v17559_v32 = vld [vmem:[#allocation2 + $0x155c] sm:$0xf]  ;;  %v16452_v11 = vor.u32 %v18159_v15, %v16449_v38  ;;  %10548 = vmatpush.bf16.msrb.mxu2 %v15684_v27 }
 0x741   :  { %v14049_v8 = vld [vmem:[#allocation2 + $0x15b8] sm:$0xf0] }
 0x742   :  { %v17751_v21 = vld [vmem:[#allocation2 + $0x1b5c] sm:$0xf]  ;;  %v14052_v24 = vor.u32 %v17559_v32, %v14049_v8  ;;  %10562 = vmatpush.bf16.msrb.mxu3 %v16452_v11  ;;  %v19180_v11 = vpop.f32.mrf.mxu3 }
 0x743   :  { %v14817_v5 = vld [vmem:[#allocation2 + $0x1bb8] sm:$0xf0] }
 0x744   :  { %v17943_v39 = vld [vmem:[#allocation2 + $0x215c] sm:$0xf]  ;;  %v14820_v36 = vor.u32 %v17751_v21, %v14817_v5  ;;  %10521 = vmatpush.bf16.msrb.mxu0 %v14052_v24  ;;  %v19182_v5 = vpop.f32.mrf.mxu0  ;;  %v8444_v24 = vadd.f32 %v18650_v47, %v18647_v28  ;;  %v19518_v47 = vld [vmem:[#allocation24_spill] sm:$0xff] }
 0x745   :  { %v15585_v54 = vld [vmem:[#allocation2 + $0x21b8] sm:$0xf0] }
 0x746   :  { %v18135_v57 = vld [vmem:[#allocation2 + $0x275c] sm:$0xf]  ;;  %v15588_v1 = vor.u32 %v17943_v39, %v15585_v54  ;;  %10535 = vmatpush.bf16.msrb.mxu1 %v14820_v36  ;;  %v8934_v36 = vadd.f32 %v18788_v16, %v18783_v55  ;;  %v19519_v16 = vld [vmem:[#allocation17_spill] sm:$0xff] }
 0x747   :  { %v16353_v40 = vld [vmem:[#allocation2 + $0x27b8] sm:$0xf0] }
 0x748   :  { %v17535_v4 = vld [vmem:[#allocation2 + $0x149c] sm:$0xf]  ;;  %v16356_v35 = vor.u32 %v18135_v57, %v16353_v40  ;;  %10549 = vmatpush.bf16.msrb.mxu2 %v15588_v1  ;;  %v8290_v57 = vadd.f32 %v18609_v29, %v8276_v52  ;;  %v8346_v40 = vadd.f32 %v18623_v44, %v18619_v61  ;;  %v8836_v29 = vadd.f32 %v18757_v43, %v18754_v7  ;;  %v19198_v43 = vpop.f32.mrf.mxu2 }
 0x749   :  { %v13953_v17 = vld [vmem:[#allocation2 + $0x14f8] sm:$0xf0] }
 0x74a   :  { %v17727_v26 = vld [vmem:[#allocation2 + $0x1a9c] sm:$0xf]  ;;  %v13956_v10 = vor.u32 %v17535_v4, %v13953_v17  ;;  %10563 = vmatpush.bf16.msrb.mxu3 %v16356_v35 }
 0x74b   :  { %v14721_v31 = vld [vmem:[#allocation2 + $0x1af8] sm:$0xf0] }
 0x74c   :  { %v17919_v63 = vld [vmem:[#allocation2 + $0x209c] sm:$0xf]  ;;  %v14724_v15 = vor.u32 %v17727_v26, %v14721_v31  ;;  %10522 = vmatpush.bf16.msrb.mxu0 %v13956_v10  ;;  %v8458_v31 = vadd.f32 %v19518_v47, %v8444_v24 }
 0x74d   :  { %v15489_v18 = vld [vmem:[#allocation2 + $0x20f8] sm:$0xf0] }
 0x74e   :  { %v18111_v53 = vld [vmem:[#allocation2 + $0x269c] sm:$0xf]  ;;  %v15492_v38 = vor.u32 %v17919_v63, %v15489_v18  ;;  %10536 = vmatpush.bf16.msrb.mxu1 %v14724_v15  ;;  %v10207_v63 = vpop.f32.mrf.mxu1 }
 0x74f   :  { %v16257_v48 = vld [vmem:[#allocation2 + $0x26f8] sm:$0xf0] }
 0x750   :  { %v17511_v42 = vld [vmem:[#allocation2 + $0x13dc] sm:$0xf]  ;;  %v16260_v32 = vor.u32 %v18111_v53, %v16257_v48  ;;  %10550 = vmatpush.bf16.msrb.mxu2 %v15492_v38  ;;  %v8304_v53 = vadd.f32 %v19519_v16, %v8290_v57  ;;  %v19520_v48 = vld [vmem:[#allocation19_spill] sm:$0xff] }
 0x751   :  { %v13857_v46 = vld [vmem:[#allocation2 + $0x1438] sm:$0xf0]  ;;  %v8360_v10 = vadd.f32 %v19520_v48, %v8346_v40  ;;  %v19529_v16 = vld [vmem:[#allocation51_spill] sm:$0xff] }
 0x752   :  { %v17703_v27 = vld [vmem:[#allocation2 + $0x19dc] sm:$0xf]  ;;  %v13860_v45 = vor.u32 %v17511_v42, %v13857_v46  ;;  %10564 = vmatpush.bf16.msrb.mxu3 %v16260_v32  ;;  %v19522_v46 = vld [vmem:[#allocation55_spill] sm:$0xff] }
 0x753   :  { %v14625_v8 = vld [vmem:[#allocation2 + $0x1a38] sm:$0xf0]  ;;  %v8948_v7 = vadd.f32 %v19522_v46, %v8934_v36  ;;  %v19525_v36 = vld [vmem:[#allocation25_spill] sm:$0xff]  ;;  %v19217_v46 = vpop.f32.mrf.mxu0 }
 0x754   :  { %v17895_v21 = vld [vmem:[#allocation2 + $0x1fdc] sm:$0xf]  ;;  %v14628_v1 = vor.u32 %v17703_v27, %v14625_v8  ;;  %10523 = vmatpush.bf16.msrb.mxu0 %v13860_v45 }
 0x755   :  { %v15393_v0 = vld [vmem:[#allocation2 + $0x2038] sm:$0xf0] }
 0x756   :  { %v18087_v39 = vld [vmem:[#allocation2 + $0x25dc] sm:$0xf]  ;;  %v15396_v4 = vor.u32 %v17895_v21, %v15393_v0  ;;  %10537 = vmatpush.bf16.msrb.mxu1 %v14628_v1  ;;  %v19523_v0 = vld [vmem:[#allocation20_spill] sm:$0xff] }
 0x757   :  { %v16161_v54 = vld [vmem:[#allocation2 + $0x2638] sm:$0xf0] }
 0x758   :  { %v17487_v17 = vld [vmem:[#allocation2 + $0x131c] sm:$0xf]  ;;  %v16164_v61 = vor.u32 %v18087_v39, %v16161_v54  ;;  %10551 = vmatpush.bf16.msrb.mxu2 %v15396_v4  ;;  %v8374_v39 = vadd.f32 %v19523_v0, %v8360_v10  ;;  %v19527_v4 = vld [vmem:[#allocation60_spill] sm:$0xff] }
 0x759   :  { %v13761_v26 = vld [vmem:[#allocation2 + $0x1378] sm:$0xf0]  ;;  %v19532_v10 = vld [vmem:[#allocation96_spill] sm:$0xff] }
 0x75a   :  { %v17679_v25 = vld [vmem:[#allocation2 + $0x191c] sm:$0xf]  ;;  %v13764_v42 = vor.u32 %v17487_v17, %v13761_v26  ;;  %10565 = vmatpush.bf16.msrb.mxu3 %v16164_v61  ;;  %v8472_v26 = vadd.f32 %v19525_v36, %v8458_v31  ;;  %v10108_v31 = vadd.f32 %v19135_v62, %v19132_v22  ;;  %v19536_v22 = vld [vmem:[#allocation57_spill] sm:$0xff] }
 0x75b   :  { %v14529_v44 = vld [vmem:[#allocation2 + $0x1978] sm:$0xf0] }
 0x75c   :  { %v17871_v35 = vld [vmem:[#allocation2 + $0x1f1c] sm:$0xf]  ;;  %v14532_v27 = vor.u32 %v17679_v25, %v14529_v44  ;;  %v19528_v25 = vld [vmem:[#allocation61_spill] sm:$0xff]  ;;  %10524 = vmatpush.bf16.msrb.mxu0 %v13764_v42 }
 0x75d   :  { %v15297_v28 = vld [vmem:[#allocation2 + $0x1f78] sm:$0xf0]  ;;  %v9032_v44 = vadd.f32 %v19528_v25, %v19527_v4  ;;  %v10206_v4 = vadd.f32 %v19174_v12, %v19170_v60  ;;  %v10110_v60 = vadd.f32 %v19146_v59, %v19144_v2  ;;  %v10208_v12 = vadd.f32 %v10207_v63, %v19182_v5 }
 0x75e   :  { %v18063_v18 = vld [vmem:[#allocation2 + $0x251c] sm:$0xf]  ;;  %v15300_v52 = vor.u32 %v17871_v35, %v15297_v28  ;;  %v19208_v35 = vpop.f32.mrf.mxu3  ;;  %10538 = vmatpush.bf16.msrb.mxu1 %v14532_v27 }
 0x75f   :  { %v16065_v55 = vld [vmem:[#allocation2 + $0x2578] sm:$0xf0]  ;;  %v10220_v2 = vadd.f32 %v19177_v51, %v10206_v4  ;;  %v10124_v51 = vadd.f32 %v19156_v14, %v10110_v60  ;;  %v19548_v4 = vld [vmem:[#allocation93_spill] sm:$0xff] }
 0x760   :  { %v19521_v15 = vld [vmem:[#allocation50_spill] sm:$0xff]  ;;  %v16068_v54 = vor.u32 %v18063_v18, %v16065_v55  ;;  %v19530_v18 = vld [vmem:[#allocation88_spill] sm:$0xff]  ;;  %v19531_v55 = vld [vmem:[#allocation89_spill] sm:$0xff]  ;;  %10552 = vmatpush.bf16.msrb.mxu2 %v15300_v52 }
 0x761   :  { %v8850_v38 = vadd.f32 %v19521_v15, %v8836_v29  ;;  %v17463_v32 = vld [vmem:[#allocation2 + $0x125c] sm:$0xf]  ;;  %v19526_v29 = vld [vmem:[#allocation56_spill] sm:$0xff]  ;;  %v9424_v48 = vadd.f32 %v19531_v55, %v19530_v18  ;;  %v19538_v52 = vld [vmem:[#allocation103_spill] sm:$0xff]  ;;  %v10138_v14 = vadd.f32 %v19158_v19, %v10124_v51 }
 0x762   :  { %v13665_v8 = vld [vmem:[#allocation2 + $0x12b8] sm:$0xf0]  ;;  %v8962_v1 = vadd.f32 %v19526_v29, %v8948_v7  ;;  %10566 = vmatpush.bf16.msrb.mxu3 %v16068_v54 }
 0x763   :  { %v17655_v21 = vld [vmem:[#allocation2 + $0x185c] sm:$0xf]  ;;  %v8864_v61 = vadd.f32 %v19529_v16, %v8850_v38  ;;  %v13668_v15 = vor.u32 %v17463_v32, %v13665_v8  ;;  %v19534_v38 = vld [vmem:[#allocation52_spill] sm:$0xff]  ;;  %v19540_v16 = vld [vmem:[#allocation97_spill] sm:$0xff] }
 0x764   :  { %v14433_v57 = vld [vmem:[#allocation2 + $0x18b8] sm:$0xf0]  ;;  %v8976_v62 = vadd.f32 %v19536_v22, %v8962_v1  ;;  %v10122_v1 = vadd.f32 %v19148_v34, %v10108_v31  ;;  %v19247_v34 = vpop.f32.mrf.mxu2  ;;  %v10222_v31 = vadd.f32 %v19198_v43, %v10208_v12  ;;  %v10234_v43 = vadd.f32 %v19208_v35, %v10220_v2 }
 0x765   :  { %v17847_v40 = vld [vmem:[#allocation2 + $0x1e5c] sm:$0xf]  ;;  %v14436_v7 = vor.u32 %v17655_v21, %v14433_v57  ;;  %v8878_v29 = vadd.f32 %v19534_v38, %v8864_v61  ;;  %v9620_v21 = vadd.f32 %v19538_v52, %v18986_v58  ;;  %10525 = vmatpush.bf16.msrb.mxu0 %v13668_v15  ;;  %v19239_v58 = vpop.f32.mrf.mxu1 }
 0x766   :  { %v15201_v24 = vld [vmem:[#allocation2 + $0x1eb8] sm:$0xf0]  ;;  %v10235_v38 = vpop.f32.mrf.mxu3 }
 0x767   :  { %v19524_v45 = vld [vmem:[#allocation18_spill] sm:$0xff]  ;;  %v15204_v0 = vor.u32 %v17847_v40, %v15201_v24  ;;  %v9634_v54 = vadd.f32 %v18994_v20, %v9620_v21  ;;  %10539 = vmatpush.bf16.msrb.mxu1 %v14436_v7  ;;  %v19543_v20 = vld [vmem:[#allocation63_spill] sm:$0xff]  ;;  %v19546_v7 = vld [vmem:[#allocation64_spill] sm:$0xff] }
 0x768   :  { %v19202_v17 = vadd.f32 %v19524_v45, %v8304_v53  ;;  %v18039_v28 = vld [vmem:[#allocation2 + $0x245c] sm:$0xf]  ;;  %v9522_v53 = vadd.f32 %v18959_v49, %v19532_v10  ;;  %v19533_v45 = vld [vmem:[#allocation21_spill] sm:$0xff]  ;;  %10526 = vmatmul.bf16.vlgmr.msrb.gmra.mxu0 %v18549_v23  ;;  %v19553_v21 = vld [vmem:[#allocation27_spill] sm:$0xff] }
 0x769   :  { %v15969_v47 = vld [vmem:[#allocation2 + $0x24b8] sm:$0xf0]  ;;  %v19220_v36 = vadd.f32 %v19533_v45, %v8374_v39  ;;  %10553 = vmatpush.bf16.msrb.mxu2 %v15204_v0  ;;  %v10136_v45 = vadd.f32 %v19150_v30, %v10122_v1  ;;  %v18225_v23 = vld [vmem:[#allocation6 + $0x28] sm:$0xff] }
 0x76a   :  { %v15972_v49 = vor.u32 %v18039_v28, %v15969_v47  ;;  %v18227_v42 = vld [vmem:[#allocation6 + $0x38] sm:$0xff]  ;;  %v9536_v61 = vadd.f32 %v19540_v16, %v9522_v53  ;;  %v18226_v59 = vld [vmem:[#allocation6 + $0x30] sm:$0xff]  ;;  %v19545_v53 = vld [vmem:[#allocation92_spill] sm:$0xff]  ;;  %10540 = vmatmul.bf16.vlgmr.msrb.gmra.mxu1 %v18570_v37 }
 0x76b   :  { %v19535_v32 = vld [vmem:[#allocation26_spill] sm:$0xff]  ;;  %11042 = vmatpush.bf16.msra.mxu0 %v18227_v42  ;;  %v19549_v42 = vld [vmem:[#allocation99_spill] sm:$0xff]  ;;  %v19551_v30 = vld [vmem:[#allocation133_spill] sm:$0xff] }
 0x76c   :  { %v8486_v8 = vadd.f32 %v19535_v32, %v8472_v26  ;;  %v19537_v25 = vld [vmem:[#allocation62_spill] sm:$0xff]  ;;  %v10012_v26 = vadd.f32 %v19111_v3, %v19105_v50  ;;  %10567 = vmatpush.bf16.msrb.mxu3 %v15972_v49 }
 0x76d   :  { %v9046_v27 = vadd.f32 %v19537_v25, %v9032_v44  ;;  %v18235_v57 = vld [vmem:[#allocation6 + $0x78] sm:$0xff]  ;;  %v19541_v44 = vld [vmem:[#allocation53_spill] sm:$0xff]  ;;  %v10249_v25 = vpop.f32.mrf.mxu0 }
 0x76e   :  { %v18243_v39 = vld [vmem:[#allocation6 + $0xb8] sm:$0xff]  ;;  %v8892_v28 = vadd.f32 %v19541_v44, %v8878_v29  ;;  %v10026_v3 = vadd.f32 %v19113_v9, %v10012_v26  ;;  %11056 = vmatpush.bf16.msra.mxu1 %v18235_v57  ;;  %v18242_v10 = vld [vmem:[#allocation6 + $0xb0] sm:$0xff]  ;;  %v9648_v9 = vadd.f32 %v19000_v13, %v9634_v54  ;;  %v19547_v29 = vld [vmem:[#allocation16_spill] sm:$0xff]  ;;  %v8500_v35 = vadd.f32 %v19553_v21, %v8486_v8 }
 0x76f   :  { %v19539_v40 = vld [vmem:[#allocation90_spill] sm:$0xff]  ;;  %v9060_v63 = vadd.f32 %v19543_v20, %v9046_v27  ;;  %11070 = vmatpush.bf16.msra.mxu2 %v18243_v39  ;;  %10568 = vmatmul.bf16.vlgmr.msrb.gmra.mxu3 %v18572_v41  ;;  %v19550_v13 = vld [vmem:[#allocation104_spill] sm:$0xff]  ;;  %v19558_v26 = vld [vmem:[#allocation137_spill] sm:$0xff]  ;;  %v10152_v44 = vadd.f32 %v19160_v6, %v10138_v14  ;;  %v10289_v14 = vpop.f32.mrf.mxu3 }
 0x770   :  { %v9438_v24 = vadd.f32 %v19539_v40, %v9424_v48  ;;  %v19542_v47 = vld [vmem:[#allocation58_spill] sm:$0xff]  ;;  %10554 = vmatmul.bf16.vlgmr.msrb.gmra.mxu2 %v19547_v29  ;;  %11043 = vmatpush.bf16.msra.mxu0 %v18226_v59  ;;  %v9662_v22 = vadd.f32 %v19550_v13, %v9648_v9  ;;  %v18233_v41 = vld [vmem:[#allocation6 + $0x68] sm:$0xff]  ;;  %v10236_v40 = vadd.f32 %v10235_v38, %v10222_v31  ;;  %v19559_v59 = vld [vmem:[#allocation59_spill] sm:$0xff] }
 0x771   :  { %v8990_v18 = vadd.f32 %v19542_v47, %v8976_v62  ;;  %v18251_v5 = vld [vmem:[#allocation6 + $0xf8] sm:$0xff]  ;;  %v18234_v48 = vld [vmem:[#allocation6 + $0x70] sm:$0xff]  ;;  %v9074_v0 = vadd.f32 %v19546_v7, %v9060_v63  ;;  %v10040_v62 = vadd.f32 %v19551_v30, %v10026_v3  ;;  %v18241_v27 = vld [vmem:[#allocation6 + $0xa8] sm:$0xff]  ;;  %v10150_v1 = vadd.f32 %v19558_v26, %v10136_v45 }
 0x772   :  { %v19544_v55 = vld [vmem:[#allocation98_spill] sm:$0xff]  ;;  %v9452_v15 = vadd.f32 %v19545_v53, %v9438_v24  ;;  %11084 = vmatpush.bf16.msra.mxu3 %v18251_v5  ;;  %11057 = vmatpush.bf16.msra.mxu1 %v18234_v48  ;;  %v19555_v24 = vld [vmem:[#allocation65_spill] sm:$0xff]  ;;  %v10248_v47 = vadd.f32 %v19217_v46, %v10234_v43  ;;  %v10250_v2 = vadd.f32 %v10249_v25, %v10236_v40  ;;  %v18232_v3 = vld [vmem:[#allocation6 + $0x60] sm:$0xff] }
 0x773   :  { %v9550_v50 = vadd.f32 %v19544_v55, %v9536_v61  ;;  %v18250_v37 = vld [vmem:[#allocation6 + $0xf0] sm:$0xff]  ;;  %11071 = vmatpush.bf16.msra.mxu2 %v18242_v10  ;;  %v9088_v16 = vadd.f32 %v19555_v24, %v9074_v0  ;;  %v18249_v8 = vld [vmem:[#allocation6 + $0xe8] sm:$0xff]  ;;  %v18240_v48 = vld [vmem:[#allocation6 + $0xa0] sm:$0xff]  ;;  %v10166_v31 = vadd.f32 %v19163_v33, %v10152_v44 }
 0x774   :  { %v9466_v49 = vadd.f32 %v19548_v4, %v9452_v15  ;;  %v19552_v52 = vld [vmem:[#allocation22_spill] sm:$0xff]  ;;  %v19556_v61 = vld [vmem:[#allocation101_spill] sm:$0xff]  ;;  %11044 = vmatpush.bf16.msra.mxu0 %v18225_v23  ;;  %v19562_v10 = vld [vmem:[#allocation23_spill] sm:$0xff] }
 0x775   :  { %v9564_v32 = vadd.f32 %v19549_v42, %v9550_v50  ;;  %v8402_v19 = vadd.f32 %v19552_v52, %v19220_v36  ;;  %v19554_v57 = vld [vmem:[#allocation54_spill] sm:$0xff]  ;;  %v18224_v36 = vld [vmem:[#allocation6 + $0x20] sm:$0xff]  ;;  %v19561_v63 = vld [vmem:[#allocation105_spill] sm:$0xff]  ;;  %v10263_v50 = vpop.f32.mrf.mxu1  ;;  %v10180_v52 = vadd.f32 %v19180_v11, %v10166_v31  ;;  %v10303_v26 = vpop.f32.mrf.mxu0 }
 0x776   :  { %v8906_v39 = vadd.f32 %v19554_v57, %v8892_v28  ;;  %v19557_v12 = vld [vmem:[#allocation134_spill] sm:$0xff]  ;;  %11085 = vmatpush.bf16.msra.mxu3 %v18250_v37  ;;  %v9004_v28 = vadd.f32 %v19559_v59, %v8990_v18  ;;  %v9676_v55 = vadd.f32 %v19561_v63, %v9662_v22  ;;  %11058 = vmatpush.bf16.msra.mxu1 %v18233_v41  ;;  %v19563_v53 = vld [vmem:[#allocation28_spill] sm:$0xff]  ;;  %v19565_v7 = vld [vmem:[#allocation95_spill] sm:$0xff] }
 0x777   :  { %v9578_v60 = vadd.f32 %v19556_v61, %v9564_v32  ;;  %v10054_v54 = vadd.f32 %v19557_v12, %v10040_v62  ;;  %v19560_v5 = vld [vmem:[#allocation94_spill] sm:$0xff]  ;;  %11072 = vmatpush.bf16.msra.mxu2 %v18241_v27  ;;  %v8416_v6 = vadd.f32 %v19562_v10, %v8402_v19  ;;  %v8514_v46 = vadd.f32 %v19563_v53, %v8500_v35  ;;  %v19567_v45 = vld [vmem:[#allocation107_spill] sm:$0xff]  ;;  %v19570_v30 = vld [vmem:[#allocation136_spill] sm:$0xff] }
 0x778   :  { %v9480_v20 = vadd.f32 %v19560_v5, %v9466_v49  ;;  %v19564_v15 = vld [vmem:[#allocation66_spill] sm:$0xff]  ;;  %v9690_v38 = vadd.f32 %v19567_v45, %v9676_v55  ;;  %v19568_v29 = vld [vmem:[#allocation135_spill] sm:$0xff]  ;;  %v10277_v49 = vpop.f32.mrf.mxu2  ;;  %v10262_v37 = vadd.f32 %v19239_v58, %v10248_v47  ;;  %v10264_v42 = vadd.f32 %v10263_v50, %v10250_v2  ;;  %11045 = vmatpush.bf16.msra.mxu0 %v18224_v36  ;;  %v10291_v5 = vpop.f32.mrf.mxu3  ;;  %v18237_v63 = vld [vmem:[#allocation6 + $0x88] sm:$0xff] }
 0x779   :  { %v9102_v51 = vadd.f32 %v19564_v15, %v9088_v16  ;;  %v19566_v18 = vld [vmem:[#allocation102_spill] sm:$0xff]  ;;  %v10068_v4 = vadd.f32 %v19568_v29, %v10054_v54  ;;  %v18248_v13 = vld [vmem:[#allocation6 + $0xe0] sm:$0xff]  ;;  %v10580_v33 = vmax.f32 %v19202_v17, %v8906_v39  ;;  %v10581_v22 = vmax.f32 %v8416_v6, %v9004_v28  ;;  %v18245_v31 = vld [vmem:[#allocation6 + $0xc8] sm:$0xff] }
 0x77a   :  { %v9494_v0 = vadd.f32 %v19565_v7, %v9480_v20  ;;  %v9592_v9 = vadd.f32 %v19566_v18, %v9578_v60  ;;  %v19569_v43 = vld [vmem:[#allocation138_spill] sm:$0xff]  ;;  %11086 = vmatpush.bf16.msra.mxu3 %v18249_v8  ;;  %11059 = vmatpush.bf16.msra.mxu1 %v18232_v3  ;;  %v10278_v19 = vadd.f32 %v10277_v49, %v10264_v42  ;;  %v18221_v8 = vld [vmem:[#allocation6 + $0x8] sm:$0xff]  ;;  %v19573_v3 = vld [vmem:[#allocation91_spill] sm:$0xff] }
 0x77b   :  { %v10164_v23 = vadd.f32 %v19569_v43, %v10150_v1  ;;  %v18223_v32 = vld [vmem:[#allocation6 + $0x18] sm:$0xff]  ;;  %v10082_v62 = vadd.f32 %v19570_v30, %v10068_v4  ;;  %11073 = vmatpush.bf16.msra.mxu2 %v18240_v48  ;;  %v10582_v27 = vmax.f32 %v8514_v46, %v9102_v51  ;;  %v10276_v17 = vadd.f32 %v19247_v34, %v10262_v37  ;;  %v18222_v39 = vld [vmem:[#allocation6 + $0x10] sm:$0xff]  ;;  %v19571_v1 = vld [vmem:[#allocation100_spill] sm:$0xff] }
 0x77c   :  { %v18231_v25 = vld [vmem:[#allocation6 + $0x58] sm:$0xff]  ;;  %v10592_v21 = vmax.f32 %v10580_v33, %v9494_v0  ;;  %v10593_v58 = vmax.f32 %v10581_v22, %v9592_v9  ;;  %11046 = vmatpush.bf16.msra.mxu0 %v18223_v32  ;;  %v18230_v61 = vld [vmem:[#allocation6 + $0x50] sm:$0xff]  ;;  %v18229_v20 = vld [vmem:[#allocation6 + $0x48] sm:$0xff]  ;;  %v10304_v15 = vadd.f32 %v10303_v26, %v10289_v14 }
 0x77d   :  { %v18239_v41 = vld [vmem:[#allocation6 + $0x98] sm:$0xff]  ;;  %v10594_v35 = vmax.f32 %v10582_v27, %v9690_v38  ;;  %v10178_v40 = vadd.f32 %v19168_v56, %v10164_v23  ;;  %v18238_v60 = vld [vmem:[#allocation6 + $0x90] sm:$0xff]  ;;  %v10317_v36 = vpop.f32.mrf.mxu1  ;;  %v19574_v48 = vld [vmem:[#allocation132_spill] sm:$0xff] }
 0x77e   :  { %v19291_v57 = vld [vmem:[#allocation4] sm:$0x3f]  ;;  %11087 = vmatpush.bf16.msra.mxu3 %v18248_v13  ;;  %v10604_v16 = vmax.f32 %v10592_v21, %v10082_v62  ;;  %11060 = vmatpush.bf16.msra.mxu1 %v18231_v25  ;;  %v10605_v11 = vmax.f32 %v10593_v58, %v10180_v52  ;;  %v18246_v59 = vld [vmem:[#allocation6 + $0xd0] sm:$0xff]  ;;  %v19575_v10 = vmax.f32 %v19573_v3, %v19574_v48  ;;  %v18220_v51 = vld [vmem:[#allocation6] sm:$0xff]  ;;  %v10305_v25 = vpop.f32.mrf.mxu0 }
 0x77f   :  { %v18247_v24 = vld [vmem:[#allocation6 + $0xd8] sm:$0xff]  ;;  %11074 = vmatpush.bf16.msra.mxu2 %v18239_v41  ;;  %v10606_v12 = vmax.f32 %v10594_v35, %v10278_v19  ;;  %v10612_v54 = vperm.slane %v19291_v57, 0  ;;  %v10599_v44 = vmax.f32 %v19571_v1, %v10178_v40  ;;  %v10613_v56 = vperm.slane %v19291_v57, 1  ;;  %v18228_v0 = vld [vmem:[#allocation6 + $0x40] sm:$0xff]  ;;  %v19578_v49 = vld [vmem:[#allocation29_spill] sm:$0xff] }
 0x780   :  { %v19572_v47 = vld [vmem:[#allocation106_spill] sm:$0xff]  ;;  %v10614_v2 = vperm.slane %v19291_v57, 2  ;;  %11047 = vmatpush.bf16.msra.mxu0 %v18222_v39  ;;  %v18236_v18 = vld [vmem:[#allocation6 + $0x80] sm:$0xff]  ;;  %v10331_v42 = vpop.f32.mrf.mxu2  ;;  %v19581_v32 = vld [vmem:[#allocation109_spill] sm:$0xff]  ;;  %v10318_v30 = vadd.f32 %v10317_v36, %v10304_v15  ;;  %v10306_v1 = vadd.f32 %v10305_v25, %v10291_v5 }
 0x781   :  { %v10600_v34 = vmax.f32 %v19572_v47, %v10276_v17  ;;  %v10630_v28 = vadd.f32 %v10612_v54, %v10604_v16  ;;  %v10631_v55 = vadd.f32 %v10613_v56, %v10605_v11  ;;  %v10624_v6 = vadd.f32 %v10612_v54, %v19575_v10  ;;  %v19576_v9 = vld [vmem:[#allocation67_spill] sm:$0xff]  ;;  %v19577_v45 = vld [vmem:[#allocation68_spill] sm:$0xff]  ;;  %v19579_v43 = vld [vmem:[#allocation30_spill] sm:$0xff]  ;;  %v10345_v17 = vpop.f32.mrf.mxu3 }
 0x782   :  { %11088 = vmatpush.bf16.msra.mxu3 %v18247_v24  ;;  %11061 = vmatpush.bf16.msra.mxu1 %v18230_v61  ;;  %v10632_v50 = vadd.f32 %v10614_v2, %v10606_v12  ;;  %v10625_v53 = vadd.f32 %v10613_v56, %v10599_v44  ;;  %v9130_v38 = vadd.f32 %v19577_v45, %v19576_v9  ;;  %v19580_v14 = vld [vmem:[#allocation108_spill] sm:$0xff]  ;;  %v19582_v27 = vld [vmem:[#allocation69_spill] sm:$0xff]  ;;  %v19583_v35 = vld [vmem:[#allocation31_spill] sm:$0xff] }
 0x783   :  { %11075 = vmatpush.bf16.msra.mxu2 %v18238_v60  ;;  %v10626_v46 = vadd.f32 %v10614_v2, %v10600_v34  ;;  %v10642_v7 = vmax.f32 %v10630_v28, 0.0  ;;  %v10643_v29 = vmax.f32 %v10631_v55, 0.0  ;;  %v8542_v23 = vadd.f32 %v19579_v43, %v19578_v49  ;;  %v18244_v41 = vld [vmem:[#allocation6 + $0xc0] sm:$0xff]  ;;  %v19584_v39 = vld [vmem:[#allocation70_spill] sm:$0xff]  ;;  %v19589_v34 = vld [vmem:[#allocation33_spill] sm:$0xff] }
 0x784   :  { %11048 = vmatpush.bf16.msra.mxu0 %v18221_v8  ;;  %v10644_v4 = vmax.f32 %v10632_v50, 0.0  ;;  %v10636_v37 = vmax.f32 %v10624_v6, 0.0  ;;  %v9718_v13 = vadd.f32 %v19581_v32, %v19580_v14  ;;  %v10637_v33 = vmax.f32 %v10625_v53, 0.0  ;;  %v19585_v16 = vld [vmem:[#allocation110_spill] sm:$0xff]  ;;  %v19586_v11 = vld [vmem:[#allocation32_spill] sm:$0xff]  ;;  %v19588_v44 = vld [vmem:[#allocation71_spill] sm:$0xff] }
 0x785   :  { %v10638_v22 = vmax.f32 %v10626_v46, 0.0  ;;  %v9144_v52 = vadd.f32 %v19582_v27, %v9130_v38  ;;  %v10319_v58 = vpop.f32.mrf.mxu1  ;;  %v8556_v40 = vadd.f32 %v19583_v35, %v8542_v23  ;;  %v10332_v60 = vadd.f32 %v10331_v42, %v10318_v30  ;;  %v19587_v54 = vld [vmem:[#allocation112_spill] sm:$0xff]  ;;  %v19592_v48 = vld [vmem:[#allocation34_spill] sm:$0xff]  ;;  %v19594_v15 = vld [vmem:[#allocation73_spill] sm:$0xff] }
 0x786   :  { %11089 = vmatpush.bf16.msra.mxu3 %v18246_v59  ;;  %11062 = vmatpush.bf16.msra.mxu1 %v18229_v20  ;;  %v10648_v62 = vpack.c.bf16 %v10642_v7, %v10636_v37  ;;  %v10649_v19 = vpack.c.bf16 %v10643_v29, %v10637_v33  ;;  %v9732_v61 = vadd.f32 %v19585_v16, %v9718_v13  ;;  %v10359_v8 = vpop.f32.mrf.mxu0  ;;  %v19590_v59 = vld [vmem:[#allocation72_spill] sm:$0xff]  ;;  %v19591_v20 = vld [vmem:[#allocation113_spill] sm:$0xff]  ;;  %v19593_v6 = vld [vmem:[#allocation114_spill] sm:$0xff]  ;;  %v10615_v43 = vperm.slane %v19291_v57, 3 }
 0x787   :  { %11076 = vmatpush.bf16.msra.mxu2 %v18237_v63  ;;  %v10650_v21 = vpack.c.bf16 %v10644_v4, %v10638_v22  ;;  %v9158_v24 = vadd.f32 %v19584_v39, %v9144_v52  ;;  %v8570_v12 = vadd.f32 %v19586_v11, %v8556_v40  ;;  %v10346_v47 = vadd.f32 %v10345_v17, %v10332_v60  ;;  %v19595_v7 = vld [vmem:[#allocation35_spill] sm:$0xff]  ;;  %v18258_v25 = vld [vmem:[#allocation6 + $0x130] sm:$0xff]  ;;  %v18257_v27 = vld [vmem:[#allocation6 + $0x128] sm:$0xff] }
 0x788   :  { %11049 = vmatpush.bf16.msra.mxu0 %v18220_v51  ;;  %v9746_v26 = vadd.f32 %v19587_v54, %v9732_v61  ;;  %v10333_v36 = vpop.f32.mrf.mxu2  ;;  %v10320_v55 = vadd.f32 %v10319_v58, %v10306_v1  ;;  %v19597_v4 = vld [vmem:[#allocation111_spill] sm:$0xff]  ;;  %v18254_v35 = vld [vmem:[#allocation6 + $0x110] sm:$0xff]  ;;  %v18253_v17 = vld [vmem:[#allocation6 + $0x108] sm:$0xff] }
 0x789   :  { %v9172_v56 = vadd.f32 %v19588_v44, %v9158_v24  ;;  %v8584_v2 = vadd.f32 %v19589_v34, %v8570_v12  ;;  %v10360_v50 = vadd.f32 %v10359_v8, %v10346_v47  ;;  %v10347_v5 = vpop.f32.mrf.mxu3  ;;  %v18259_v22 = vld [vmem:[#allocation6 + $0x138] sm:$0xff]  ;;  %v18256_v52 = vld [vmem:[#allocation6 + $0x120] sm:$0xff]  ;;  %v19599_v12 = vld [vmem:[#allocation37_spill] sm:$0xff] }
 0x78a   :  { %11090 = vmatpush.bf16.msra.mxu3 %v18245_v31  ;;  %11063 = vmatpush.bf16.msra.mxu1 %v18228_v0  ;;  %v9760_v63 = vadd.f32 %v19591_v20, %v9746_v26  ;;  %v10334_v46 = vadd.f32 %v10333_v36, %v10320_v55  ;;  %v18252_v16 = vld [vmem:[#allocation6 + $0x100] sm:$0xff]  ;;  %v18267_v60 = vld [vmem:[#allocation6 + $0x178] sm:$0xff]  ;;  %v19603_v34 = vld [vmem:[#allocation117_spill] sm:$0xff] }
 0x78b   :  { %11077 = vmatpush.bf16.msra.mxu2 %v18236_v18  ;;  %11050 = vmatmul.bf16.vlgmr.msra.gmra.mxu0 %v10648_v62  ;;  %v9186_v28 = vadd.f32 %v19590_v59, %v9172_v56  ;;  %v8598_v10 = vadd.f32 %v19592_v48, %v8584_v2  ;;  %v19596_v18 = vld [vmem:[#allocation115_spill] sm:$0xff]  ;;  %v19598_v11 = vld [vmem:[#allocation36_spill] sm:$0xff]  ;;  %v19600_v1 = vld [vmem:[#allocation74_spill] sm:$0xff] }
 0x78c   :  { %v9774_v53 = vadd.f32 %v19593_v6, %v9760_v63  ;;  %v10348_v45 = vadd.f32 %v10347_v5, %v10334_v46  ;;  %11098 = vmatpush.bf16.msrb.mxu0 %v18259_v22  ;;  %v8640_v54 = vadd.f32 %v19599_v12, %v19598_v11  ;;  %v19601_v44 = vld [vmem:[#allocation75_spill] sm:$0xff]  ;;  %v19602_v47 = vld [vmem:[#allocation116_spill] sm:$0xff]  ;;  %v19605_v20 = vld [vmem:[#allocation38_spill] sm:$0xff]  ;;  %v10616_v11 = vperm.slane %v19291_v57, 4 }
 0x78d   :  { %11064 = vmatmul.bf16.vlgmr.msra.gmra.mxu1 %v10649_v19  ;;  %v10373_v3 = vpop.f32.mrf.mxu1  ;;  %v9200_v51 = vadd.f32 %v19594_v15, %v9186_v28  ;;  %v8612_v0 = vadd.f32 %v19595_v7, %v8598_v10  ;;  %v9228_v56 = vadd.f32 %v19601_v44, %v19600_v1  ;;  %v9816_v2 = vadd.f32 %v19603_v34, %v19602_v47  ;;  %v19604_v59 = vld [vmem:[#allocation76_spill] sm:$0xff]  ;;  %v19607_v6 = vld [vmem:[#allocation77_spill] sm:$0xff]  ;;  %v19608_v5 = vld [vmem:[#allocation39_spill] sm:$0xff] }
 0x78e   :  { %11078 = vmatmul.bf16.vlgmr.msra.gmra.mxu2 %v10650_v21  ;;  %11091 = vmatpush.bf16.msra.mxu3 %v18244_v41  ;;  %v10374_v31 = vadd.f32 %v10373_v3, %v10360_v50  ;;  %v9788_v9 = vadd.f32 %v19596_v18, %v9774_v53  ;;  %v10361_v38 = vpop.f32.mrf.mxu0  ;;  %v18255_v21 = vld [vmem:[#allocation6 + $0x118] sm:$0xff]  ;;  %v8654_v63 = vadd.f32 %v19605_v20, %v8640_v54  ;;  %v19610_v7 = vld [vmem:[#allocation120_spill] sm:$0xff]  ;;  %v19614_v22 = vld [vmem:[#allocation41_spill] sm:$0xff] }
 0x78f   :  { %v10583_v29 = vmax.f32 %v8612_v0, %v9200_v51  ;;  %v10362_v23 = vadd.f32 %v10361_v38, %v10348_v45  ;;  %11112 = vmatpush.bf16.msrb.mxu1 %v18267_v60  ;;  %v9242_v28 = vadd.f32 %v19604_v59, %v9228_v56  ;;  %v19606_v50 = vld [vmem:[#allocation118_spill] sm:$0xff]  ;;  %v19611_v38 = vld [vmem:[#allocation40_spill] sm:$0xff] }
 0x790   :  { %v10601_v49 = vmax.f32 %v19597_v4, %v10374_v31  ;;  %11099 = vmatpush.bf16.msrb.mxu0 %v18258_v25  ;;  %v10387_v19 = vpop.f32.mrf.mxu2  ;;  %v9830_v3 = vadd.f32 %v19606_v50, %v9816_v2  ;;  %v8668_v15 = vadd.f32 %v19608_v5, %v8654_v63  ;;  %v19609_v51 = vld [vmem:[#allocation78_spill] sm:$0xff] }
 0x791   :  { %v10595_v42 = vmax.f32 %v10583_v29, %v9788_v9  ;;  %v10401_v58 = vpop.f32.mrf.mxu3  ;;  %v9256_v53 = vadd.f32 %v19607_v6, %v9242_v28  ;;  %v18266_v45 = vld [vmem:[#allocation6 + $0x170] sm:$0xff]  ;;  %v18263_v1 = vld [vmem:[#allocation6 + $0x158] sm:$0xff]  ;;  %v18261_v28 = vld [vmem:[#allocation6 + $0x148] sm:$0xff] }
 0x792   :  { %v10627_v32 = vadd.f32 %v10615_v43, %v10601_v49  ;;  %v10402_v61 = vadd.f32 %v10401_v58, %v10387_v19  ;;  %v9844_v0 = vadd.f32 %v19610_v7, %v9830_v3  ;;  %v8682_v29 = vadd.f32 %v19611_v38, %v8668_v15  ;;  %v19612_v49 = vld [vmem:[#allocation121_spill] sm:$0xff]  ;;  %v19617_v58 = vld [vmem:[#allocation42_spill] sm:$0xff]  ;;  %v19624_v15 = vld [vmem:[#allocation124_spill] sm:$0xff] }
 0x793   :  { %v9270_v31 = vadd.f32 %v19609_v51, %v9256_v53  ;;  %11113 = vmatpush.bf16.msrb.mxu1 %v18266_v45  ;;  %v18262_v34 = vld [vmem:[#allocation6 + $0x150] sm:$0xff]  ;;  %v19622_v53 = vld [vmem:[#allocation43_spill] sm:$0xff] }
 0x794   :  { %v10639_v30 = vmax.f32 %v10627_v32, 0.0  ;;  %11100 = vmatpush.bf16.msrb.mxu0 %v18257_v27  ;;  %v19620_v3 = vld [vmem:[#allocation81_spill] sm:$0xff] }
 0x795   :  { %v10375_v37 = vpop.f32.mrf.mxu1  ;;  %v19625_v51 = vld [vmem:[#allocation125_spill] sm:$0xff] }
 0x796   :  { %v10376_v14 = vadd.f32 %v10375_v37, %v10362_v23  ;;  %v10415_v39 = vpop.f32.mrf.mxu0 }
 0x797   :  { %v10416_v36 = vadd.f32 %v10415_v39, %v10402_v61  ;;  %v18264_v39 = vld [vmem:[#allocation6 + $0x160] sm:$0xff] }
 0x798   :  { %v10607_v13 = vmax.f32 %v10595_v42, %v10376_v14  ;;  %11101 = vmatpush.bf16.msrb.mxu0 %v18256_v52  ;;  %v10389_v40 = vpop.f32.mrf.mxu2  ;;  %v19613_v42 = vld [vmem:[#allocation79_spill] sm:$0xff] }
 0x799   :  { %v10403_v24 = vpop.f32.mrf.mxu3  ;;  %v9284_v14 = vadd.f32 %v19613_v42, %v9270_v31  ;;  %v19619_v61 = vld [vmem:[#allocation119_spill] sm:$0xff]  ;;  %v9914_v31 = vadd.f32 %v19625_v51, %v19624_v15 }
 0x79a   :  { %v10633_v33 = vadd.f32 %v10615_v43, %v10607_v13  ;;  %v10404_v46 = vadd.f32 %v10403_v24, %v10389_v40  ;;  %v9858_v43 = vadd.f32 %v19612_v49, %v9844_v0  ;;  %v19618_v40 = vld [vmem:[#allocation123_spill] sm:$0xff]  ;;  %v19628_v49 = vld [vmem:[#allocation84_spill] sm:$0xff] }
 0x79c   :  { %v10645_v62 = vmax.f32 %v10633_v33, 0.0  ;;  %11102 = vmatpush.bf16.msrb.mxu0 %v18255_v21  ;;  %v18265_v33 = vld [vmem:[#allocation6 + $0x168] sm:$0xff] }
 0x79d   :  { %v10429_v26 = vpop.f32.mrf.mxu1  ;;  %11114 = vmatpush.bf16.msrb.mxu1 %v18265_v33  ;;  %v19631_v33 = vld [vmem:[#allocation127_spill] sm:$0xff] }
 0x79e   :  { %v10651_v41 = vpack.c.bf16 %v10645_v62, %v10639_v30  ;;  %v10417_v55 = vpop.f32.mrf.mxu0  ;;  %v10430_v48 = vadd.f32 %v10429_v26, %v10416_v36  ;;  %v8696_v30 = vadd.f32 %v19614_v22, %v8682_v29  ;;  %v19615_v62 = vld [vmem:[#allocation80_spill] sm:$0xff]  ;;  %v19627_v29 = vld [vmem:[#allocation45_spill] sm:$0xff] }
 0x79f   :  { %v10418_v9 = vadd.f32 %v10417_v55, %v10404_v46  ;;  %v9298_v25 = vadd.f32 %v19615_v62, %v9284_v14  ;;  %v18260_v55 = vld [vmem:[#allocation6 + $0x140] sm:$0xff]  ;;  %v19630_v14 = vld [vmem:[#allocation46_spill] sm:$0xff]  ;;  %v19632_v62 = vld [vmem:[#allocation85_spill] sm:$0xff] }
 0x7a0   :  { %11092 = vmatmul.bf16.vlgmr.msra.gmra.mxu3 %v10651_v41  ;;  %11103 = vmatpush.bf16.msrb.mxu0 %v18254_v35  ;;  %v10443_v8 = vpop.f32.mrf.mxu2  ;;  %v19616_v41 = vld [vmem:[#allocation122_spill] sm:$0xff]  ;;  %v8710_v35 = vadd.f32 %v19617_v58, %v8696_v30  ;;  %v19623_v46 = vld [vmem:[#allocation44_spill] sm:$0xff] }
 0x7a1   :  { %v10457_v10 = vpop.f32.mrf.mxu3  ;;  %v10444_v18 = vadd.f32 %v10443_v8, %v10430_v48  ;;  %v9872_v27 = vadd.f32 %v19616_v41, %v9858_v43  ;;  %11115 = vmatpush.bf16.msrb.mxu1 %v18264_v39  ;;  %v19621_v48 = vld [vmem:[#allocation82_spill] sm:$0xff]  ;;  %v8738_v5 = vadd.f32 %v19623_v46, %v19622_v53 }
 0x7a2   :  { %v10584_v24 = vmax.f32 %v8710_v35, %v9298_v25  ;;  %v19634_v58 = vld [vmem:[#allocation86_spill] sm:$0xff] }
 0x7a3   :  { %v10458_v32 = vadd.f32 %v10457_v10, %v10444_v18  ;;  %v9326_v10 = vadd.f32 %v19621_v48, %v19620_v3  ;;  %v19626_v18 = vld [vmem:[#allocation83_spill] sm:$0xff] }
 0x7a4   :  { %11104 = vmatpush.bf16.msrb.mxu0 %v18253_v17  ;;  %v9886_v17 = vadd.f32 %v19618_v40, %v9872_v27  ;;  %v19633_v27 = vld [vmem:[#allocation47_spill] sm:$0xff]  ;;  %v19635_v40 = vld [vmem:[#allocation128_spill] sm:$0xff] }
 0x7a5   :  { %v10431_v4 = vpop.f32.mrf.mxu1  ;;  %11116 = vmatpush.bf16.msrb.mxu1 %v18263_v1 }
 0x7a6   :  { %v10432_v13 = vadd.f32 %v10431_v4, %v10418_v9  ;;  %v10596_v54 = vmax.f32 %v10584_v24, %v9886_v17  ;;  %v9340_v9 = vadd.f32 %v19626_v18, %v9326_v10  ;;  %v8752_v4 = vadd.f32 %v19627_v29, %v8738_v5  ;;  %v18272_v18 = vld [vmem:[#allocation9 + $0x20] sm:$0xff] }
 0x7a7   :  { %v18268_v29 = vld [vmem:[#allocation9] sm:$0xff] }
 0x7a8   :  { %11105 = vmatpush.bf16.msrb.mxu0 %v18252_v16  ;;  %v10445_v23 = vpop.f32.mrf.mxu2  ;;  %v9354_v43 = vadd.f32 %v19628_v49, %v9340_v9  ;;  %v18270_v9 = vld [vmem:[#allocation9 + $0x10] sm:$0xff] }
 0x7a9   :  { %v10446_v52 = vadd.f32 %v10445_v23, %v10432_v13  ;;  %v10459_v21 = vpop.f32.mrf.mxu3  ;;  %11117 = vmatpush.bf16.msrb.mxu1 %v18262_v34  ;;  %v19629_v23 = vld [vmem:[#allocation126_spill] sm:$0xff] }
 0x7aa   :  { %v9368_v25 = vadd.f32 %v19632_v62, %v9354_v43 }
 0x7ab   :  { %v10460_v16 = vadd.f32 %v10459_v21, %v10446_v52 }
 0x7ac   :  { %v9382_v35 = vadd.f32 %v19634_v58, %v9368_v25 }
 0x7ad   :  { %v10471_v37 = vpop.f32.mrf.mxu0  ;;  %v10485_v8 = vpop.f32.mrf.mxu1  ;;  %11118 = vmatpush.bf16.msrb.mxu1 %v18261_v28 }
 0x7ae   :  { %v10472_v19 = vadd.f32 %v10471_v37, %v10458_v32  ;;  %v9928_v37 = vadd.f32 %v19629_v23, %v9914_v31  ;;  %v8766_v32 = vadd.f32 %v19630_v14, %v8752_v4  ;;  %v18275_v31 = vld [vmem:[#allocation9 + $0x38] sm:$0xff] }
 0x7af   :  { %11197 = vmatpush.bf16.msrb.mxu2 %v18275_v31  ;;  %v18286_v23 = vld [vmem:[#allocation7] ss:$0 sm:$0xff] }
 0x7b0   :  { %v10602_v60 = vmax.f32 %v19619_v61, %v10472_v19  ;;  %v9942_v22 = vadd.f32 %v19631_v33, %v9928_v37  ;;  %v8780_v52 = vadd.f32 %v19633_v27, %v8766_v32  ;;  %v19636_v61 = vld [vmem:[#allocation48_spill] sm:$0xff] }
 0x7b1   :  { %11119 = vmatpush.bf16.msrb.mxu1 %v18260_v55  ;;  %v10617_v55 = vperm.slane %v19291_v57, 5  ;;  %v18271_v57 = vld [vmem:[#allocation9 + $0x18] sm:$0xff] }
 0x7b2   :  { %v10628_v44 = vadd.f32 %v10616_v11, %v10602_v60  ;;  %v9956_v17 = vadd.f32 %v19635_v40, %v9942_v22  ;;  %v8794_v60 = vadd.f32 %v19636_v61, %v8780_v52 }
 0x7b3   :  { %v10499_v20 = vpop.f32.mrf.mxu2 }
 0x7b4   :  { %v10640_v2 = vmax.f32 %v10628_v44, 0.0  ;;  %v10500_v6 = vadd.f32 %v10499_v20, %v10485_v8  ;;  %v19641_v20 = vld [vmem:[#allocation129_spill] sm:$0xff] }
 0x7b5   :  { %v10473_v12 = vpop.f32.mrf.mxu0  ;;  %v10513_v63 = vpop.f32.mrf.mxu3 }
 0x7b6   :  { %v10474_v26 = vadd.f32 %v10473_v12, %v10460_v16  ;;  %v10487_v50 = vpop.f32.mrf.mxu1  ;;  %v10514_v45 = vadd.f32 %v10513_v63, %v10500_v6 }
 0x7b8   :  { %v10608_v56 = vmax.f32 %v10596_v54, %v10474_v26  ;;  %v19638_v26 = vld [vmem:[#allocation87_spill] sm:$0xff] }
 0x7b9   :  { %v9396_v1 = vadd.f32 %v19638_v26, %v9382_v35 }
 0x7ba   :  { %v10634_v47 = vadd.f32 %v10616_v11, %v10608_v56  ;;  %v19637_v11 = vld [vmem:[#allocation130_spill] sm:$0xff] }
 0x7bb   :  { %v10501_v7 = vpop.f32.mrf.mxu2  ;;  %v9970_v12 = vadd.f32 %v19637_v11, %v9956_v17 }
 0x7bc   :  { %v10646_v36 = vmax.f32 %v10634_v47, 0.0  ;;  %v10502_v30 = vadd.f32 %v10501_v7, %v10487_v50  ;;  %v19639_v47 = vld [vmem:[#allocation49_spill] sm:$0xff] }
 0x7bd   :  { %v10515_v0 = vpop.f32.mrf.mxu3  ;;  %v8808_v34 = vadd.f32 %v19639_v47, %v8794_v60  ;;  %v18274_v7 = vld [vmem:[#allocation9 + $0x30] sm:$0xff]  ;;  %v18287_v60 = vld [vmem:[#allocation10] ss:$0 sm:$0xff] }
 0x7be   :  { %v10652_v59 = vpack.c.bf16 %v10646_v36, %v10640_v2  ;;  %v10516_v39 = vadd.f32 %v10515_v0, %v10502_v30  ;;  %v19640_v2 = vld [vmem:[#allocation131_spill] sm:$0xff]  ;;  %11198 = vmatpush.bf16.msrb.mxu2 %v18274_v7  ;;  %v18273_v0 = vld [vmem:[#allocation9 + $0x28] sm:$0xff] }
 0x7bf   :  { %v9984_v36 = vadd.f32 %v19640_v2, %v9970_v12  ;;  %v10585_v28 = vmax.f32 %v8808_v34, %v9396_v1 }
 0x7c0   :  { %11106 = vmatmul.bf16.vlgmr.msrb.gmra.mxu0 %v10652_v59 }
 0x7c1   :  { %v10597_v48 = vmax.f32 %v10585_v28, %v9984_v36 }
 0x7c2   :  { %11199 = vmatpush.bf16.msrb.mxu2 %v18273_v0 }
 0x7c6   :  { %11200 = vmatpush.bf16.msrb.mxu2 %v18272_v18 }
 0x7ca   :  { %11201 = vmatpush.bf16.msrb.mxu2 %v18271_v57 }
 0x7ce   :  { %11202 = vmatpush.bf16.msrb.mxu2 %v18270_v9 }
 0x7e5   :  { %v10527_v38 = vpop.f32.mrf.mxu0 }
 0x7e6   :  { %v10528_v42 = vadd.f32 %v10527_v38, %v10514_v45  ;;  %v18269_v45 = vld [vmem:[#allocation9 + $0x8] sm:$0xff] }
 0x7e7   :  { %v10541_v13 = vpop.f32.mrf.mxu1  ;;  %11203 = vmatpush.bf16.msrb.mxu2 %v18269_v45 }
 0x7e8   :  { %v10542_v41 = vadd.f32 %v10541_v13, %v10528_v42 }
 0x7eb   :  { %11204 = vmatpush.bf16.msrb.mxu2 %v18268_v29 }
 0x7ed   :  { %v10529_v16 = vpop.f32.mrf.mxu0 }
 0x7ee   :  { %v10530_v54 = vadd.f32 %v10529_v16, %v10516_v39 }
 0x7ef   :  { %v10543_v56 = vpop.f32.mrf.mxu1 }
 0x7f0   :  { %v10544_v8 = vadd.f32 %v10543_v56, %v10530_v54 }
 0x7f2   :  { %v10569_v21 = vpop.f32.mrf.mxu3 }
 0x7f3   :  { %v10555_v19 = vpop.f32.mrf.mxu2 }
 0x7f4   :  { %v10556_v24 = vadd.f32 %v10555_v19, %v10542_v41 }
 0x7f6   :  { %v10570_v44 = vadd.f32 %v10569_v21, %v10556_v24 }
 0x7f8   :  { %v10603_v63 = vmax.f32 %v19641_v20, %v10570_v44 }
 0x7fa   :  { %v10571_v3 = vpop.f32.mrf.mxu3  ;;  %v10629_v6 = vadd.f32 %v10617_v55, %v10603_v63 }
 0x7fb   :  { %v10557_v59 = vpop.f32.mrf.mxu2 }
 0x7fc   :  { %v10558_v50 = vadd.f32 %v10557_v59, %v10544_v8  ;;  %v10641_v5 = vmax.f32 %v10629_v6, 0.0 }
 0x7fe   :  { %v10572_v10 = vadd.f32 %v10571_v3, %v10558_v50 }
 0x800   :  { %v10609_v53 = vmax.f32 %v10597_v48, %v10572_v10 }
 0x802   :  { %v10635_v46 = vadd.f32 %v10617_v55, %v10609_v53 }
 0x804   :  { %v10647_v15 = vmax.f32 %v10635_v46, 0.0 }
 0x806   :  { %v10653_v51 = vpack.c.bf16 %v10647_v15, %v10641_v5 }
 0x808   :  { %11120 = vmatmul.bf16.vlgmr.msrb.gmra.mxu1 %v10653_v51  ;;  %v11051_v38 = vpop.f32.mrf.mxu0 }
 0x809   :  { %v11052_v32 = vadd.f32 %v18286_v23, %v11051_v38 }
 0x80a   :  { %v11065_v4 = vpop.f32.mrf.mxu1 }
 0x80b   :  { %v11066_v33 = vadd.f32 %v11065_v4, %v11052_v32 }
 0x810   :  { %v11053_v49 = vpop.f32.mrf.mxu0 }
 0x811   :  { %v11079_v43 = vpop.f32.mrf.mxu2  ;;  %v11054_v13 = vadd.f32 %v18286_v23, %v11053_v49 }
 0x812   :  { %v11067_v37 = vpop.f32.mrf.mxu1  ;;  %v11080_v62 = vadd.f32 %v11079_v43, %v11066_v33 }
 0x813   :  { %v11068_v25 = vadd.f32 %v11067_v37, %v11054_v13 }
 0x819   :  { %v11081_v22 = vpop.f32.mrf.mxu2 }
 0x81a   :  { %v11082_v27 = vadd.f32 %v11081_v22, %v11068_v25 }
 0x823   :  { %v11093_v42 = vpop.f32.mrf.mxu3 }
 0x824   :  { %v11094_v52 = vadd.f32 %v11093_v42, %v11080_v62 }
 0x82b   :  { %v11095_v41 = vpop.f32.mrf.mxu3 }
 0x82c   :  { %v11096_v21 = vadd.f32 %v11095_v41, %v11082_v27 }
 0x83d   :  { %v11107_v14 = vpop.f32.mrf.mxu0 }
 0x83e   :  { %v11108_v58 = vadd.f32 %v11107_v14, %v11094_v52 }
 0x845   :  { %v11109_v19 = vpop.f32.mrf.mxu0 }
 0x846   :  { %v11110_v35 = vadd.f32 %v11109_v19, %v11096_v21 }
 0x885   :  { %v11121_v30 = vpop.f32.mrf.mxu1 }
 0x886   :  { %v11122_v40 = vadd.f32 %v11121_v30, %v11108_v58 }
 0x888   :  { %v11126_v24 = vmax.f32 %v11122_v40, 0.0 }
 0x88d   :  { %v11123_v17 = vpop.f32.mrf.mxu1 }
 0x88e   :  { %v11124_v39 = vadd.f32 %v11123_v17, %v11110_v35 }
 0x890   :  { %v11127_v16 = vmax.f32 %v11124_v39, 0.0 }
 0x892   :  { %v11128_v61 = vpack.c.bf16 %v11127_v16, %v11126_v24 }
 0x894   :  { %11205 = vmatmul.bf16.vlgmr.msrb.gmra.mxu2 %v11128_v61 }
 0x917   :  { %v11206_v11 = vpop.f32.mrf.mxu2 }
 0x918   :  { %v11207_v12 = vadd.f32 %v18287_v60, %v11206_v11 }
 0x91a   :  { %11211 = vmax.xlane.f32.xlu0 %v11207_v12 }
 0x91f   :  { %v11208_v54 = vpop.f32.mrf.mxu2 }
 0x920   :  { %v11209_v26 = vadd.f32 %v18287_v60, %v11208_v54 }
 0x922   :  { %11213 = vmax.xlane.f32.xlu0 %v11209_v26 }
 0x98d   :  { %v11212_v1 = vpop.xlane.xlu0 %11211 }
 0x98e   :  { %v11215_v44 = vsub.f32 %v11207_v12, %v11212_v1 }
 0x990   :  { %v11217_v56 = vmul.f32 1.442695, %v11215_v44 }
 0x992   :  { %18288 = vpow2.f32 %v11217_v56 }
 0x995   :  { %v11214_v47 = vpop.xlane.xlu0 %11213 }
 0x996   :  { %v11216_v34 = vsub.f32 %v11209_v26, %v11214_v47 }
 0x998   :  { %v18289_v2 = vpop.eup %18288  ;;  %v11219_v36 = vmul.f32 1.442695, %v11216_v34 }
 0x999   :  { %11221 = vadd.xlane.f32.xlu1 %v18289_v2 }
 0x99a   :  { %18290 = vpow2.f32 %v11219_v36 }
 0x9a0   :  { %v18291_v8 = vpop.eup %18290 }
 0x9a1   :  { %11223 = vadd.xlane.f32.xlu1 %v18291_v8 }
 0xa0c   :  { %v11222_v59 = vpop.xlane.xlu1 %11221 }
 0xa0d   :  { %18292 = vlog2.f32 %v11222_v59 }
 0xa13   :  { %v18293_v28 = vpop.eup %18292 }
 0xa14   :  { %v11226_v20 = vmul.f32 0.6931472, %v18293_v28  ;;  %v11224_v63 = vpop.xlane.xlu1 %11223 }
 0xa15   :  { %18294 = vlog2.f32 %v11224_v63 }
 0xa16   :  { %v11229_v55 = vsub.f32 %v11215_v44, %v11226_v20 }
 0xa18   :  { %11231 = vst [vmem:[%s19385_s7] sm:$0xff] %v11229_v55 }
 0xa1b   :  { %v18295_v50 = vpop.eup %18294 }
 0xa1c   :  { %v11228_v3 = vmul.f32 0.6931472, %v18295_v50 }
 0xa1e   :  { %v11230_v48 = vsub.f32 %v11216_v34, %v11228_v3 }
 0xa20   :  { %11232 = vst [vmem:[%s19385_s7 + $0x8] sm:$0xff] %v11230_v48 }
 0xa21   :  { %11237 = vsyncpa [#allocation3], 1 }
 0xa22   :  { %11238 = vsyncpa [#allocation5], 1 }
 0xa23   :  { %11239 = vsyncpa [#allocation8], 1 }
 0xa24   :  { %11240 = vsyncpa [#allocation11], 1 }

</bundles_post_ra>
